<compile_context>
chip_gen: v6e
topology: v6e:2x2x1
jax: 0.10.0
libtpu: 0.0.40
codegen_flags: <defaults>
</compile_context>

<pallas_src>
import functools

import jax
import jax.numpy as jnp
from jax.experimental import pallas as pl
from jax.experimental.pallas import tpu as pltpu

DIM = 2                              # `dimension` in the PyTorch source
INNER = 10                           # inner_dimension default
IN_FEATS = 2 * DIM                   # 4
OUT_FEATS = DIM * (DIM + 1) // 2     # 3

_LANE = 128                          # lane width
_R_SUB = 8                           # sublane sub-chunk (one f32 vreg / channel)


def _round_up(x, m):
    return ((x + m - 1) // m) * m


def _hamiltonian_kernel(p1_ref, p2_ref,
                        ws_ref, wa_ref, b1_ref,
                        w2_ref, b2_ref, w3_ref, b3_ref,
                        o_ref):
    """One grid step.

    p1_ref, p2_ref : (DIM, r_blk, 128) VMEM  -- channel-major batch tile
    ws_ref, wa_ref : (DIM, INNER) SMEM       -- 0.5*(w1[:2]+w1[2:]) / 0.5*(w1[:2]-w1[2:])
    b1_ref         : (INNER,) SMEM
    w2_ref, b2_ref : (INNER, INNER), (INNER,) SMEM
    w3_ref, b3_ref : (INNER, OUT_FEATS), (OUT_FEATS,) SMEM
    o_ref          : (OUT_FEATS, r_blk, 128) VMEM -- planes [d00, off, d11]
    """
    r_blk = p1_ref.shape[1]
    n_sub = r_blk // _R_SUB

    def dense_pair(rows_a, rows_b, w_ref, b_ref, fan_in, fan_out, act):
        # Merged pass over both argument orderings: each SMEM weight/bias
        # scalar is read ONCE and feeds two vector ops (halves sld counts).
        outs_a, outs_b = [], []
        for j in range(fan_out):
            w0 = w_ref[0, j]
            acc_a = rows_a[0] * w0
            acc_b = rows_b[0] * w0
            for i in range(1, fan_in):
                wij = w_ref[i, j]
                acc_a = acc_a + rows_a[i] * wij
                acc_b = acc_b + rows_b[i] * wij
            bj = b_ref[j]
            acc_a = acc_a + bj
            acc_b = acc_b + bj
            if act is not None:
                acc_a = act(acc_a)      # tanh -> EUP (free slot vs VALU)
                acc_b = act(acc_b)
            outs_a.append(acc_a)
            outs_b.append(acc_b)
        return outs_a, outs_b

    def process(s, carry):
        r0 = pl.multiple_of(s * _R_SUB, _R_SUB)
        sl = pl.ds(r0, _R_SUB)

        p1x = p1_ref[0, sl, :]
        p1y = p1_ref[1, sl, :]
        p2x = p2_ref[0, sl, :]
        p2y = p2_ref[1, sl, :]

        # ---- layer 1: symmetric / antisymmetric factorisation -----------
        #   h12[j] = tanh(sym_j + asym_j),  h21[j] = tanh(sym_j - asym_j)
        sx = p1x + p2x
        sy = p1y + p2y
        dx = p1x - p2x
        dy = p1y - p2y
        h12, h21 = [], []
        for j in range(INNER):
            sym = sx * ws_ref[0, j] + sy * ws_ref[1, j] + b1_ref[j]
            asym = dx * wa_ref[0, j] + dy * wa_ref[1, j]
            h12.append(jnp.tanh(sym + asym))
            h21.append(jnp.tanh(sym - asym))

        # ---- layers 2 & 3: both orderings share every scalar load -------
        h12, h21 = dense_pair(h12, h21, w2_ref, b2_ref, INNER, INNER, jnp.tanh)
        z12, z21 = dense_pair(h12, h21, w3_ref, b3_ref, INNER, OUT_FEATS, None)

        off = 0.5 * (z12[0] + z21[0])
        d00 = 0.5 * (jnp.exp(z12[1]) + jnp.exp(z21[1]))   # exp -> EUP, f32
        d11 = 0.5 * (jnp.exp(z12[2]) + jnp.exp(z21[2]))

        # Lane-dense direct row stores; only 3 planes (off-diagonal is
        # duplicated by the consumer) -> 25% less output HBM traffic.
        o_ref[0, sl, :] = d00
        o_ref[1, sl, :] = off
        o_ref[2, sl, :] = d11
        return carry

    # unroll=2: amortises loop-control scalar ops and lets the scheduler
    # overlap one sub-chunk's EUP tanh/exp latency with the next sub-chunk's
    # VALU work; live set ~50-60 vregs, still under 64 (no spills expected).
    # TODO(synk): verify via a bundle dump that tanh/exp lower to single EUP
    # transcendentals and that sld is no longer the binding slot.
    jax.lax.fori_loop(0, n_sub, process, None, unroll=2)


@functools.partial(jax.jit, static_argnames=("block_rows",))
def hamiltonian_elementary_interaction(p_1, p_2, params, *, block_rows=1024):
    """p_1, p_2: (N, 2) float32.  Returns (N, 2, 2) float32.

    block_rows * 128 batch elements are processed per grid step.
    """
    w1, b1, w2, b2, w3, b3 = params
    n = p_1.shape[0]

    # Layer-1 symmetric/antisymmetric weight combination (pre-scaled by 0.5).
    ws = 0.5 * (w1[:DIM, :] + w1[DIM:, :])   # (2, INNER)
    wa = 0.5 * (w1[:DIM, :] - w1[DIM:, :])   # (2, INNER)

    # Batch tiling: batch folded onto (sublane, lane) -> rows of 128 lanes.
    rows = _round_up(max(1, -(-n // _LANE)), _R_SUB)
    r_blk = _round_up(max(1, block_rows), _R_SUB)
    if rows >= 2 * _R_SUB:
        # Keep at least 2 grid steps so the ("parallel",) grid axis can be
        # split across both v7x TensorCores (no effect on v5e/v6e).
        r_blk = min(r_blk, _round_up(rows // 2, _R_SUB))
    else:
        r_blk = min(r_blk, rows)
    rows = _round_up(rows, r_blk)
    n_pad = rows * _LANE
    grid = (rows // r_blk,)

    def to_channel_major(p):
        # (N, 2) -> pad -> (2, rows, 128); batch index = r*128 + lane.
        # TODO(synk): for repeated calls, keep data channel-major end-to-end
        # upstream to avoid this wrapper-side HBM relayout entirely.
        p = jnp.pad(p, ((0, n_pad - n), (0, 0)))
        return p.T.reshape(DIM, rows, _LANE)

    p1c = to_channel_major(p_1)
    p2c = to_channel_major(p_2)

    vmem_spec = lambda nchan: pl.BlockSpec((nchan, r_blk, _LANE),
                                           lambda i: (0, i, 0))
    smem_spec = lambda: pl.BlockSpec(memory_space=pltpu.MemorySpace.SMEM)

    out = pl.pallas_call(
        _hamiltonian_kernel,
        out_shape=jax.ShapeDtypeStruct((OUT_FEATS, rows, _LANE), jnp.float32),
        grid=grid,
        in_specs=[
            vmem_spec(DIM),     # p1 (channel-major tile)
            vmem_spec(DIM),     # p2
            smem_spec(),        # ws (2, 10)
            smem_spec(),        # wa (2, 10)
            smem_spec(),        # b1 (10,)
            smem_spec(),        # w2 (10, 10)
            smem_spec(),        # b2 (10,)
            smem_spec(),        # w3 (10, 3)
            smem_spec(),        # b3 (3,)
        ],
        out_specs=vmem_spec(OUT_FEATS),
        compiler_params=pltpu.CompilerParams(
            dimension_semantics=("parallel",)),
    )(p1c, p2c, ws, wa, b1, w2, b2, w3, b3)

    # (3, rows, 128) -> (3, n); planes = [d00, off, d11].  The symmetric
    # off-diagonal is duplicated here (consumer side) instead of in HBM.
    out = out.reshape(OUT_FEATS, n_pad)[:, :n]
    d00, off, d11 = out[0], out[1], out[2]
    return jnp.stack([d00, off, off, d11], axis=-1).reshape(n, DIM, DIM)


def init_params(key):
    """Mirrors PyTorch nn.Linear default init: U[-1/sqrt(fan_in), +1/sqrt(fan_in)]."""
    ks = jax.random.split(key, 6)

    def lin(kw, kb, fan_in, fan_out):
        bound = 1.0 / jnp.sqrt(fan_in)
        w = jax.random.uniform(kw, (fan_in, fan_out), jnp.float32, -bound, bound)
        b = jax.random.uniform(kb, (fan_out,), jnp.float32, -bound, bound)
        return w, b

    w1, b1 = lin(ks[0], ks[1], IN_FEATS, INNER)
    w2, b2 = lin(ks[2], ks[3], INNER, INNER)
    w3, b3 = lin(ks[4], ks[5], INNER, OUT_FEATS)
    return w1, b1, w2, b2, w3, b3


def reference_jax(p_1, p_2, params):
    """Pure-JAX reference of the PyTorch forward (exact f32 element-wise math)."""
    w1, b1, w2, b2, w3, b3 = params

    def dense(x, w, b):
        return jnp.sum(x[:, :, None] * w[None, :, :], axis=1) + b

    def forward_(x):
        h = jnp.tanh(dense(x, w1, b1))
        h = jnp.tanh(dense(h, w2, b2))
        z = dense(h, w3, b3)
        m = z.shape[0]
        y = jnp.zeros((m, DIM, DIM), jnp.float32)
        y = y.at[:, 0, 1].set(z[:, 0]).at[:, 1, 0].set(z[:, 0])
        y = y.at[:, 0, 0].set(jnp.exp(z[:, 1])).at[:, 1, 1].set(jnp.exp(z[:, 2]))
        return y

    x12 = jnp.concatenate([p_1, p_2], axis=1)
    x21 = jnp.concatenate([p_2, p_1], axis=1)
    return 0.5 * (forward_(x12) + forward_(x21))


if __name__ == "__main__":
    key = jax.random.PRNGKey(0)
    params = init_params(jax.random.fold_in(key, 0))

    # Case 1: default big block (grid auto-capped to >= 2 steps for megacore).
    # Case 2: batch not a multiple of 128 -> exercises padding + tiny block.
    # Case 3: smaller block -> multi-step grid + in-kernel sub-chunk loop.
    for n, blk in ((4096, 1024), (2000, 1024), (33000, 64)):
        kd = jax.random.fold_in(key, n)
        k1, k2 = jax.random.split(kd)
        p_1 = jax.random.normal(k1, (n, DIM), jnp.float32)
        p_2 = jax.random.normal(k2, (n, DIM), jnp.float32)

        out = hamiltonian_elementary_interaction(p_1, p_2, params,
                                                 block_rows=blk)
        out = jax.block_until_ready(out)

        ref = reference_jax(p_1, p_2, params)
        assert out.shape == (n, DIM, DIM), f"bad shape {out.shape}"
        assert jnp.allclose(out, ref, atol=1e-4, rtol=1e-4), \
            f"mismatch vs reference for n={n}"

    print("KERNEL_OK")
</pallas_src>

<mosaic_0001>
module attributes {stable_mosaic.version = 11 : i64} {
  func.func @_hamiltonian_kernel(%arg0: i32, %arg1: memref<2x16x128xf32, #tpu.memory_space<vmem>>, %arg2: memref<2x16x128xf32, #tpu.memory_space<vmem>>, %arg3: memref<2x10xf32, #tpu.memory_space<smem>>, %arg4: memref<2x10xf32, #tpu.memory_space<smem>>, %arg5: memref<10xf32, #tpu.memory_space<smem>>, %arg6: memref<10x10xf32, #tpu.memory_space<smem>>, %arg7: memref<10xf32, #tpu.memory_space<smem>>, %arg8: memref<10x3xf32, #tpu.memory_space<smem>>, %arg9: memref<3xf32, #tpu.memory_space<smem>>, %arg10: memref<3x16x128xf32, #tpu.memory_space<vmem>>) attributes {dimension_semantics = [#tpu.dimension_semantics<parallel>], iteration_bounds = array<i64: 2>, scalar_prefetch = 0 : i64, scratch_operands = 0 : i64, tpu.core_type = #tpu.core_type<tc>, window_params = [{transform_indices = @transform_0, window_bounds = array<i64: 2, 16, 128>}, {transform_indices = @transform_1, window_bounds = array<i64: 2, 16, 128>}, {transform_indices = @transform_2, window_bounds = array<i64: 2, 10>}, {transform_indices = @transform_3, window_bounds = array<i64: 2, 10>}, {transform_indices = @transform_4, window_bounds = array<i64: 10>}, {transform_indices = @transform_5, window_bounds = array<i64: 10, 10>}, {transform_indices = @transform_6, window_bounds = array<i64: 10>}, {transform_indices = @transform_7, window_bounds = array<i64: 10, 3>}, {transform_indices = @transform_8, window_bounds = array<i64: 3>}, {transform_indices = @transform_9, window_bounds = array<i64: 3, 16, 128>}]} {
    %c0_i32 = arith.constant 0 : i32
    %c8_i32 = arith.constant 8 : i32
    %0 = arith.muli %c0_i32, %c8_i32 : i32
    %1 = tpu.assume_multiple %0, 8 : i32
    %c0 = arith.constant 0 : index
    %2 = arith.index_cast %1 : i32 to index
    %c0_0 = arith.constant 0 : index
    %3 = vector.load %arg1[%c0, %2, %c0_0] : memref<2x16x128xf32, #tpu.memory_space<vmem>>, vector<1x8x128xf32>
    %4 = vector.shape_cast %3 : vector<1x8x128xf32> to vector<8x128xf32>
    %c1 = arith.constant 1 : index
    %5 = arith.index_cast %1 : i32 to index
    %c0_1 = arith.constant 0 : index
    %6 = vector.load %arg1[%c1, %5, %c0_1] : memref<2x16x128xf32, #tpu.memory_space<vmem>>, vector<1x8x128xf32>
    %7 = vector.shape_cast %6 : vector<1x8x128xf32> to vector<8x128xf32>
    %c0_2 = arith.constant 0 : index
    %8 = arith.index_cast %1 : i32 to index
    %c0_3 = arith.constant 0 : index
    %9 = vector.load %arg2[%c0_2, %8, %c0_3] : memref<2x16x128xf32, #tpu.memory_space<vmem>>, vector<1x8x128xf32>
    %10 = vector.shape_cast %9 : vector<1x8x128xf32> to vector<8x128xf32>
    %c1_4 = arith.constant 1 : index
    %11 = arith.index_cast %1 : i32 to index
    %c0_5 = arith.constant 0 : index
    %12 = vector.load %arg2[%c1_4, %11, %c0_5] : memref<2x16x128xf32, #tpu.memory_space<vmem>>, vector<1x8x128xf32>
    %13 = vector.shape_cast %12 : vector<1x8x128xf32> to vector<8x128xf32>
    %14 = arith.addf %4, %10 : vector<8x128xf32>
    %15 = arith.addf %7, %13 : vector<8x128xf32>
    %16 = arith.subf %4, %10 : vector<8x128xf32>
    %17 = arith.subf %7, %13 : vector<8x128xf32>
    %c0_6 = arith.constant 0 : index
    %c0_7 = arith.constant 0 : index
    %18 = memref.load %arg3[%c0_6, %c0_7] : memref<2x10xf32, #tpu.memory_space<smem>>
    %19 = vector.broadcast %18 : f32 to vector<8x128xf32>
    %20 = arith.mulf %14, %19 : vector<8x128xf32>
    %c1_8 = arith.constant 1 : index
    %c0_9 = arith.constant 0 : index
    %21 = memref.load %arg3[%c1_8, %c0_9] : memref<2x10xf32, #tpu.memory_space<smem>>
    %22 = vector.broadcast %21 : f32 to vector<8x128xf32>
    %23 = arith.mulf %15, %22 : vector<8x128xf32>
    %24 = arith.addf %20, %23 : vector<8x128xf32>
    %c0_10 = arith.constant 0 : index
    %25 = memref.load %arg5[%c0_10] : memref<10xf32, #tpu.memory_space<smem>>
    %26 = vector.broadcast %25 : f32 to vector<8x128xf32>
    %27 = arith.addf %24, %26 : vector<8x128xf32>
    %c0_11 = arith.constant 0 : index
    %c0_12 = arith.constant 0 : index
    %28 = memref.load %arg4[%c0_11, %c0_12] : memref<2x10xf32, #tpu.memory_space<smem>>
    %29 = vector.broadcast %28 : f32 to vector<8x128xf32>
    %30 = arith.mulf %16, %29 : vector<8x128xf32>
    %c1_13 = arith.constant 1 : index
    %c0_14 = arith.constant 0 : index
    %31 = memref.load %arg4[%c1_13, %c0_14] : memref<2x10xf32, #tpu.memory_space<smem>>
    %32 = vector.broadcast %31 : f32 to vector<8x128xf32>
    %33 = arith.mulf %17, %32 : vector<8x128xf32>
    %34 = arith.addf %30, %33 : vector<8x128xf32>
    %35 = arith.addf %27, %34 : vector<8x128xf32>
    %36 = math.tanh %35 : vector<8x128xf32>
    %37 = arith.subf %27, %34 : vector<8x128xf32>
    %38 = math.tanh %37 : vector<8x128xf32>
    %c0_15 = arith.constant 0 : index
    %c1_16 = arith.constant 1 : index
    %39 = memref.load %arg3[%c0_15, %c1_16] : memref<2x10xf32, #tpu.memory_space<smem>>
    %40 = vector.broadcast %39 : f32 to vector<8x128xf32>
    %41 = arith.mulf %14, %40 : vector<8x128xf32>
    %c1_17 = arith.constant 1 : index
    %c1_18 = arith.constant 1 : index
    %42 = memref.load %arg3[%c1_17, %c1_18] : memref<2x10xf32, #tpu.memory_space<smem>>
    %43 = vector.broadcast %42 : f32 to vector<8x128xf32>
    %44 = arith.mulf %15, %43 : vector<8x128xf32>
    %45 = arith.addf %41, %44 : vector<8x128xf32>
    %c1_19 = arith.constant 1 : index
    %46 = memref.load %arg5[%c1_19] : memref<10xf32, #tpu.memory_space<smem>>
    %47 = vector.broadcast %46 : f32 to vector<8x128xf32>
    %48 = arith.addf %45, %47 : vector<8x128xf32>
    %c0_20 = arith.constant 0 : index
    %c1_21 = arith.constant 1 : index
    %49 = memref.load %arg4[%c0_20, %c1_21] : memref<2x10xf32, #tpu.memory_space<smem>>
    %50 = vector.broadcast %49 : f32 to vector<8x128xf32>
    %51 = arith.mulf %16, %50 : vector<8x128xf32>
    %c1_22 = arith.constant 1 : index
    %c1_23 = arith.constant 1 : index
    %52 = memref.load %arg4[%c1_22, %c1_23] : memref<2x10xf32, #tpu.memory_space<smem>>
    %53 = vector.broadcast %52 : f32 to vector<8x128xf32>
    %54 = arith.mulf %17, %53 : vector<8x128xf32>
    %55 = arith.addf %51, %54 : vector<8x128xf32>
    %56 = arith.addf %48, %55 : vector<8x128xf32>
    %57 = math.tanh %56 : vector<8x128xf32>
    %58 = arith.subf %48, %55 : vector<8x128xf32>
    %59 = math.tanh %58 : vector<8x128xf32>
    %c0_24 = arith.constant 0 : index
    %c2 = arith.constant 2 : index
    %60 = memref.load %arg3[%c0_24, %c2] : memref<2x10xf32, #tpu.memory_space<smem>>
    %61 = vector.broadcast %60 : f32 to vector<8x128xf32>
    %62 = arith.mulf %14, %61 : vector<8x128xf32>
    %c1_25 = arith.constant 1 : index
    %c2_26 = arith.constant 2 : index
    %63 = memref.load %arg3[%c1_25, %c2_26] : memref<2x10xf32, #tpu.memory_space<smem>>
    %64 = vector.broadcast %63 : f32 to vector<8x128xf32>
    %65 = arith.mulf %15, %64 : vector<8x128xf32>
    %66 = arith.addf %62, %65 : vector<8x128xf32>
    %c2_27 = arith.constant 2 : index
    %67 = memref.load %arg5[%c2_27] : memref<10xf32, #tpu.memory_space<smem>>
    %68 = vector.broadcast %67 : f32 to vector<8x128xf32>
    %69 = arith.addf %66, %68 : vector<8x128xf32>
    %c0_28 = arith.constant 0 : index
    %c2_29 = arith.constant 2 : index
    %70 = memref.load %arg4[%c0_28, %c2_29] : memref<2x10xf32, #tpu.memory_space<smem>>
    %71 = vector.broadcast %70 : f32 to vector<8x128xf32>
    %72 = arith.mulf %16, %71 : vector<8x128xf32>
    %c1_30 = arith.constant 1 : index
    %c2_31 = arith.constant 2 : index
    %73 = memref.load %arg4[%c1_30, %c2_31] : memref<2x10xf32, #tpu.memory_space<smem>>
    %74 = vector.broadcast %73 : f32 to vector<8x128xf32>
    %75 = arith.mulf %17, %74 : vector<8x128xf32>
    %76 = arith.addf %72, %75 : vector<8x128xf32>
    %77 = arith.addf %69, %76 : vector<8x128xf32>
    %78 = math.tanh %77 : vector<8x128xf32>
    %79 = arith.subf %69, %76 : vector<8x128xf32>
    %80 = math.tanh %79 : vector<8x128xf32>
    %c0_32 = arith.constant 0 : index
    %c3 = arith.constant 3 : index
    %81 = memref.load %arg3[%c0_32, %c3] : memref<2x10xf32, #tpu.memory_space<smem>>
    %82 = vector.broadcast %81 : f32 to vector<8x128xf32>
    %83 = arith.mulf %14, %82 : vector<8x128xf32>
    %c1_33 = arith.constant 1 : index
    %c3_34 = arith.constant 3 : index
    %84 = memref.load %arg3[%c1_33, %c3_34] : memref<2x10xf32, #tpu.memory_space<smem>>
    %85 = vector.broadcast %84 : f32 to vector<8x128xf32>
    %86 = arith.mulf %15, %85 : vector<8x128xf32>
    %87 = arith.addf %83, %86 : vector<8x128xf32>
    %c3_35 = arith.constant 3 : index
    %88 = memref.load %arg5[%c3_35] : memref<10xf32, #tpu.memory_space<smem>>
    %89 = vector.broadcast %88 : f32 to vector<8x128xf32>
    %90 = arith.addf %87, %89 : vector<8x128xf32>
    %c0_36 = arith.constant 0 : index
    %c3_37 = arith.constant 3 : index
    %91 = memref.load %arg4[%c0_36, %c3_37] : memref<2x10xf32, #tpu.memory_space<smem>>
    %92 = vector.broadcast %91 : f32 to vector<8x128xf32>
    %93 = arith.mulf %16, %92 : vector<8x128xf32>
    %c1_38 = arith.constant 1 : index
    %c3_39 = arith.constant 3 : index
    %94 = memref.load %arg4[%c1_38, %c3_39] : memref<2x10xf32, #tpu.memory_space<smem>>
    %95 = vector.broadcast %94 : f32 to vector<8x128xf32>
    %96 = arith.mulf %17, %95 : vector<8x128xf32>
    %97 = arith.addf %93, %96 : vector<8x128xf32>
    %98 = arith.addf %90, %97 : vector<8x128xf32>
    %99 = math.tanh %98 : vector<8x128xf32>
    %100 = arith.subf %90, %97 : vector<8x128xf32>
    %101 = math.tanh %100 : vector<8x128xf32>
    %c0_40 = arith.constant 0 : index
    %c4 = arith.constant 4 : index
    %102 = memref.load %arg3[%c0_40, %c4] : memref<2x10xf32, #tpu.memory_space<smem>>
    %103 = vector.broadcast %102 : f32 to vector<8x128xf32>
    %104 = arith.mulf %14, %103 : vector<8x128xf32>
    %c1_41 = arith.constant 1 : index
    %c4_42 = arith.constant 4 : index
    %105 = memref.load %arg3[%c1_41, %c4_42] : memref<2x10xf32, #tpu.memory_space<smem>>
    %106 = vector.broadcast %105 : f32 to vector<8x128xf32>
    %107 = arith.mulf %15, %106 : vector<8x128xf32>
    %108 = arith.addf %104, %107 : vector<8x128xf32>
    %c4_43 = arith.constant 4 : index
    %109 = memref.load %arg5[%c4_43] : memref<10xf32, #tpu.memory_space<smem>>
    %110 = vector.broadcast %109 : f32 to vector<8x128xf32>
    %111 = arith.addf %108, %110 : vector<8x128xf32>
    %c0_44 = arith.constant 0 : index
    %c4_45 = arith.constant 4 : index
    %112 = memref.load %arg4[%c0_44, %c4_45] : memref<2x10xf32, #tpu.memory_space<smem>>
    %113 = vector.broadcast %112 : f32 to vector<8x128xf32>
    %114 = arith.mulf %16, %113 : vector<8x128xf32>
    %c1_46 = arith.constant 1 : index
    %c4_47 = arith.constant 4 : index
    %115 = memref.load %arg4[%c1_46, %c4_47] : memref<2x10xf32, #tpu.memory_space<smem>>
    %116 = vector.broadcast %115 : f32 to vector<8x128xf32>
    %117 = arith.mulf %17, %116 : vector<8x128xf32>
    %118 = arith.addf %114, %117 : vector<8x128xf32>
    %119 = arith.addf %111, %118 : vector<8x128xf32>
    %120 = math.tanh %119 : vector<8x128xf32>
    %121 = arith.subf %111, %118 : vector<8x128xf32>
    %122 = math.tanh %121 : vector<8x128xf32>
    %c0_48 = arith.constant 0 : index
    %c5 = arith.constant 5 : index
    %123 = memref.load %arg3[%c0_48, %c5] : memref<2x10xf32, #tpu.memory_space<smem>>
    %124 = vector.broadcast %123 : f32 to vector<8x128xf32>
    %125 = arith.mulf %14, %124 : vector<8x128xf32>
    %c1_49 = arith.constant 1 : index
    %c5_50 = arith.constant 5 : index
    %126 = memref.load %arg3[%c1_49, %c5_50] : memref<2x10xf32, #tpu.memory_space<smem>>
    %127 = vector.broadcast %126 : f32 to vector<8x128xf32>
    %128 = arith.mulf %15, %127 : vector<8x128xf32>
    %129 = arith.addf %125, %128 : vector<8x128xf32>
    %c5_51 = arith.constant 5 : index
    %130 = memref.load %arg5[%c5_51] : memref<10xf32, #tpu.memory_space<smem>>
    %131 = vector.broadcast %130 : f32 to vector<8x128xf32>
    %132 = arith.addf %129, %131 : vector<8x128xf32>
    %c0_52 = arith.constant 0 : index
    %c5_53 = arith.constant 5 : index
    %133 = memref.load %arg4[%c0_52, %c5_53] : memref<2x10xf32, #tpu.memory_space<smem>>
    %134 = vector.broadcast %133 : f32 to vector<8x128xf32>
    %135 = arith.mulf %16, %134 : vector<8x128xf32>
    %c1_54 = arith.constant 1 : index
    %c5_55 = arith.constant 5 : index
    %136 = memref.load %arg4[%c1_54, %c5_55] : memref<2x10xf32, #tpu.memory_space<smem>>
    %137 = vector.broadcast %136 : f32 to vector<8x128xf32>
    %138 = arith.mulf %17, %137 : vector<8x128xf32>
    %139 = arith.addf %135, %138 : vector<8x128xf32>
    %140 = arith.addf %132, %139 : vector<8x128xf32>
    %141 = math.tanh %140 : vector<8x128xf32>
    %142 = arith.subf %132, %139 : vector<8x128xf32>
    %143 = math.tanh %142 : vector<8x128xf32>
    %c0_56 = arith.constant 0 : index
    %c6 = arith.constant 6 : index
    %144 = memref.load %arg3[%c0_56, %c6] : memref<2x10xf32, #tpu.memory_space<smem>>
    %145 = vector.broadcast %144 : f32 to vector<8x128xf32>
    %146 = arith.mulf %14, %145 : vector<8x128xf32>
    %c1_57 = arith.constant 1 : index
    %c6_58 = arith.constant 6 : index
    %147 = memref.load %arg3[%c1_57, %c6_58] : memref<2x10xf32, #tpu.memory_space<smem>>
    %148 = vector.broadcast %147 : f32 to vector<8x128xf32>
    %149 = arith.mulf %15, %148 : vector<8x128xf32>
    %150 = arith.addf %146, %149 : vector<8x128xf32>
    %c6_59 = arith.constant 6 : index
    %151 = memref.load %arg5[%c6_59] : memref<10xf32, #tpu.memory_space<smem>>
    %152 = vector.broadcast %151 : f32 to vector<8x128xf32>
    %153 = arith.addf %150, %152 : vector<8x128xf32>
    %c0_60 = arith.constant 0 : index
    %c6_61 = arith.constant 6 : index
    %154 = memref.load %arg4[%c0_60, %c6_61] : memref<2x10xf32, #tpu.memory_space<smem>>
    %155 = vector.broadcast %154 : f32 to vector<8x128xf32>
    %156 = arith.mulf %16, %155 : vector<8x128xf32>
    %c1_62 = arith.constant 1 : index
    %c6_63 = arith.constant 6 : index
    %157 = memref.load %arg4[%c1_62, %c6_63] : memref<2x10xf32, #tpu.memory_space<smem>>
    %158 = vector.broadcast %157 : f32 to vector<8x128xf32>
    %159 = arith.mulf %17, %158 : vector<8x128xf32>
    %160 = arith.addf %156, %159 : vector<8x128xf32>
    %161 = arith.addf %153, %160 : vector<8x128xf32>
    %162 = math.tanh %161 : vector<8x128xf32>
    %163 = arith.subf %153, %160 : vector<8x128xf32>
    %164 = math.tanh %163 : vector<8x128xf32>
    %c0_64 = arith.constant 0 : index
    %c7 = arith.constant 7 : index
    %165 = memref.load %arg3[%c0_64, %c7] : memref<2x10xf32, #tpu.memory_space<smem>>
    %166 = vector.broadcast %165 : f32 to vector<8x128xf32>
    %167 = arith.mulf %14, %166 : vector<8x128xf32>
    %c1_65 = arith.constant 1 : index
    %c7_66 = arith.constant 7 : index
    %168 = memref.load %arg3[%c1_65, %c7_66] : memref<2x10xf32, #tpu.memory_space<smem>>
    %169 = vector.broadcast %168 : f32 to vector<8x128xf32>
    %170 = arith.mulf %15, %169 : vector<8x128xf32>
    %171 = arith.addf %167, %170 : vector<8x128xf32>
    %c7_67 = arith.constant 7 : index
    %172 = memref.load %arg5[%c7_67] : memref<10xf32, #tpu.memory_space<smem>>
    %173 = vector.broadcast %172 : f32 to vector<8x128xf32>
    %174 = arith.addf %171, %173 : vector<8x128xf32>
    %c0_68 = arith.constant 0 : index
    %c7_69 = arith.constant 7 : index
    %175 = memref.load %arg4[%c0_68, %c7_69] : memref<2x10xf32, #tpu.memory_space<smem>>
    %176 = vector.broadcast %175 : f32 to vector<8x128xf32>
    %177 = arith.mulf %16, %176 : vector<8x128xf32>
    %c1_70 = arith.constant 1 : index
    %c7_71 = arith.constant 7 : index
    %178 = memref.load %arg4[%c1_70, %c7_71] : memref<2x10xf32, #tpu.memory_space<smem>>
    %179 = vector.broadcast %178 : f32 to vector<8x128xf32>
    %180 = arith.mulf %17, %179 : vector<8x128xf32>
    %181 = arith.addf %177, %180 : vector<8x128xf32>
    %182 = arith.addf %174, %181 : vector<8x128xf32>
    %183 = math.tanh %182 : vector<8x128xf32>
    %184 = arith.subf %174, %181 : vector<8x128xf32>
    %185 = math.tanh %184 : vector<8x128xf32>
    %c0_72 = arith.constant 0 : index
    %c8 = arith.constant 8 : index
    %186 = memref.load %arg3[%c0_72, %c8] : memref<2x10xf32, #tpu.memory_space<smem>>
    %187 = vector.broadcast %186 : f32 to vector<8x128xf32>
    %188 = arith.mulf %14, %187 : vector<8x128xf32>
    %c1_73 = arith.constant 1 : index
    %c8_74 = arith.constant 8 : index
    %189 = memref.load %arg3[%c1_73, %c8_74] : memref<2x10xf32, #tpu.memory_space<smem>>
    %190 = vector.broadcast %189 : f32 to vector<8x128xf32>
    %191 = arith.mulf %15, %190 : vector<8x128xf32>
    %192 = arith.addf %188, %191 : vector<8x128xf32>
    %c8_75 = arith.constant 8 : index
    %193 = memref.load %arg5[%c8_75] : memref<10xf32, #tpu.memory_space<smem>>
    %194 = vector.broadcast %193 : f32 to vector<8x128xf32>
    %195 = arith.addf %192, %194 : vector<8x128xf32>
    %c0_76 = arith.constant 0 : index
    %c8_77 = arith.constant 8 : index
    %196 = memref.load %arg4[%c0_76, %c8_77] : memref<2x10xf32, #tpu.memory_space<smem>>
    %197 = vector.broadcast %196 : f32 to vector<8x128xf32>
    %198 = arith.mulf %16, %197 : vector<8x128xf32>
    %c1_78 = arith.constant 1 : index
    %c8_79 = arith.constant 8 : index
    %199 = memref.load %arg4[%c1_78, %c8_79] : memref<2x10xf32, #tpu.memory_space<smem>>
    %200 = vector.broadcast %199 : f32 to vector<8x128xf32>
    %201 = arith.mulf %17, %200 : vector<8x128xf32>
    %202 = arith.addf %198, %201 : vector<8x128xf32>
    %203 = arith.addf %195, %202 : vector<8x128xf32>
    %204 = math.tanh %203 : vector<8x128xf32>
    %205 = arith.subf %195, %202 : vector<8x128xf32>
    %206 = math.tanh %205 : vector<8x128xf32>
    %c0_80 = arith.constant 0 : index
    %c9 = arith.constant 9 : index
    %207 = memref.load %arg3[%c0_80, %c9] : memref<2x10xf32, #tpu.memory_space<smem>>
    %208 = vector.broadcast %207 : f32 to vector<8x128xf32>
    %209 = arith.mulf %14, %208 : vector<8x128xf32>
    %c1_81 = arith.constant 1 : index
    %c9_82 = arith.constant 9 : index
    %210 = memref.load %arg3[%c1_81, %c9_82] : memref<2x10xf32, #tpu.memory_space<smem>>
    %211 = vector.broadcast %210 : f32 to vector<8x128xf32>
    %212 = arith.mulf %15, %211 : vector<8x128xf32>
    %213 = arith.addf %209, %212 : vector<8x128xf32>
    %c9_83 = arith.constant 9 : index
    %214 = memref.load %arg5[%c9_83] : memref<10xf32, #tpu.memory_space<smem>>
    %215 = vector.broadcast %214 : f32 to vector<8x128xf32>
    %216 = arith.addf %213, %215 : vector<8x128xf32>
    %c0_84 = arith.constant 0 : index
    %c9_85 = arith.constant 9 : index
    %217 = memref.load %arg4[%c0_84, %c9_85] : memref<2x10xf32, #tpu.memory_space<smem>>
    %218 = vector.broadcast %217 : f32 to vector<8x128xf32>
    %219 = arith.mulf %16, %218 : vector<8x128xf32>
    %c1_86 = arith.constant 1 : index
    %c9_87 = arith.constant 9 : index
    %220 = memref.load %arg4[%c1_86, %c9_87] : memref<2x10xf32, #tpu.memory_space<smem>>
    %221 = vector.broadcast %220 : f32 to vector<8x128xf32>
    %222 = arith.mulf %17, %221 : vector<8x128xf32>
    %223 = arith.addf %219, %222 : vector<8x128xf32>
    %224 = arith.addf %216, %223 : vector<8x128xf32>
    %225 = math.tanh %224 : vector<8x128xf32>
    %226 = arith.subf %216, %223 : vector<8x128xf32>
    %227 = math.tanh %226 : vector<8x128xf32>
    %c0_88 = arith.constant 0 : index
    %c0_89 = arith.constant 0 : index
    %228 = memref.load %arg6[%c0_88, %c0_89] : memref<10x10xf32, #tpu.memory_space<smem>>
    %229 = vector.broadcast %228 : f32 to vector<8x128xf32>
    %230 = arith.mulf %36, %229 : vector<8x128xf32>
    %231 = vector.broadcast %228 : f32 to vector<8x128xf32>
    %232 = arith.mulf %38, %231 : vector<8x128xf32>
    %c1_90 = arith.constant 1 : index
    %c0_91 = arith.constant 0 : index
    %233 = memref.load %arg6[%c1_90, %c0_91] : memref<10x10xf32, #tpu.memory_space<smem>>
    %234 = vector.broadcast %233 : f32 to vector<8x128xf32>
    %235 = arith.mulf %57, %234 : vector<8x128xf32>
    %236 = arith.addf %230, %235 : vector<8x128xf32>
    %237 = vector.broadcast %233 : f32 to vector<8x128xf32>
    %238 = arith.mulf %59, %237 : vector<8x128xf32>
    %239 = arith.addf %232, %238 : vector<8x128xf32>
    %c2_92 = arith.constant 2 : index
    %c0_93 = arith.constant 0 : index
    %240 = memref.load %arg6[%c2_92, %c0_93] : memref<10x10xf32, #tpu.memory_space<smem>>
    %241 = vector.broadcast %240 : f32 to vector<8x128xf32>
    %242 = arith.mulf %78, %241 : vector<8x128xf32>
    %243 = arith.addf %236, %242 : vector<8x128xf32>
    %244 = vector.broadcast %240 : f32 to vector<8x128xf32>
    %245 = arith.mulf %80, %244 : vector<8x128xf32>
    %246 = arith.addf %239, %245 : vector<8x128xf32>
    %c3_94 = arith.constant 3 : index
    %c0_95 = arith.constant 0 : index
    %247 = memref.load %arg6[%c3_94, %c0_95] : memref<10x10xf32, #tpu.memory_space<smem>>
    %248 = vector.broadcast %247 : f32 to vector<8x128xf32>
    %249 = arith.mulf %99, %248 : vector<8x128xf32>
    %250 = arith.addf %243, %249 : vector<8x128xf32>
    %251 = vector.broadcast %247 : f32 to vector<8x128xf32>
    %252 = arith.mulf %101, %251 : vector<8x128xf32>
    %253 = arith.addf %246, %252 : vector<8x128xf32>
    %c4_96 = arith.constant 4 : index
    %c0_97 = arith.constant 0 : index
    %254 = memref.load %arg6[%c4_96, %c0_97] : memref<10x10xf32, #tpu.memory_space<smem>>
    %255 = vector.broadcast %254 : f32 to vector<8x128xf32>
    %256 = arith.mulf %120, %255 : vector<8x128xf32>
    %257 = arith.addf %250, %256 : vector<8x128xf32>
    %258 = vector.broadcast %254 : f32 to vector<8x128xf32>
    %259 = arith.mulf %122, %258 : vector<8x128xf32>
    %260 = arith.addf %253, %259 : vector<8x128xf32>
    %c5_98 = arith.constant 5 : index
    %c0_99 = arith.constant 0 : index
    %261 = memref.load %arg6[%c5_98, %c0_99] : memref<10x10xf32, #tpu.memory_space<smem>>
    %262 = vector.broadcast %261 : f32 to vector<8x128xf32>
    %263 = arith.mulf %141, %262 : vector<8x128xf32>
    %264 = arith.addf %257, %263 : vector<8x128xf32>
    %265 = vector.broadcast %261 : f32 to vector<8x128xf32>
    %266 = arith.mulf %143, %265 : vector<8x128xf32>
    %267 = arith.addf %260, %266 : vector<8x128xf32>
    %c6_100 = arith.constant 6 : index
    %c0_101 = arith.constant 0 : index
    %268 = memref.load %arg6[%c6_100, %c0_101] : memref<10x10xf32, #tpu.memory_space<smem>>
    %269 = vector.broadcast %268 : f32 to vector<8x128xf32>
    %270 = arith.mulf %162, %269 : vector<8x128xf32>
    %271 = arith.addf %264, %270 : vector<8x128xf32>
    %272 = vector.broadcast %268 : f32 to vector<8x128xf32>
    %273 = arith.mulf %164, %272 : vector<8x128xf32>
    %274 = arith.addf %267, %273 : vector<8x128xf32>
    %c7_102 = arith.constant 7 : index
    %c0_103 = arith.constant 0 : index
    %275 = memref.load %arg6[%c7_102, %c0_103] : memref<10x10xf32, #tpu.memory_space<smem>>
    %276 = vector.broadcast %275 : f32 to vector<8x128xf32>
    %277 = arith.mulf %183, %276 : vector<8x128xf32>
    %278 = arith.addf %271, %277 : vector<8x128xf32>
    %279 = vector.broadcast %275 : f32 to vector<8x128xf32>
    %280 = arith.mulf %185, %279 : vector<8x128xf32>
    %281 = arith.addf %274, %280 : vector<8x128xf32>
    %c8_104 = arith.constant 8 : index
    %c0_105 = arith.constant 0 : index
    %282 = memref.load %arg6[%c8_104, %c0_105] : memref<10x10xf32, #tpu.memory_space<smem>>
    %283 = vector.broadcast %282 : f32 to vector<8x128xf32>
    %284 = arith.mulf %204, %283 : vector<8x128xf32>
    %285 = arith.addf %278, %284 : vector<8x128xf32>
    %286 = vector.broadcast %282 : f32 to vector<8x128xf32>
    %287 = arith.mulf %206, %286 : vector<8x128xf32>
    %288 = arith.addf %281, %287 : vector<8x128xf32>
    %c9_106 = arith.constant 9 : index
    %c0_107 = arith.constant 0 : index
    %289 = memref.load %arg6[%c9_106, %c0_107] : memref<10x10xf32, #tpu.memory_space<smem>>
    %290 = vector.broadcast %289 : f32 to vector<8x128xf32>
    %291 = arith.mulf %225, %290 : vector<8x128xf32>
    %292 = arith.addf %285, %291 : vector<8x128xf32>
    %293 = vector.broadcast %289 : f32 to vector<8x128xf32>
    %294 = arith.mulf %227, %293 : vector<8x128xf32>
    %295 = arith.addf %288, %294 : vector<8x128xf32>
    %c0_108 = arith.constant 0 : index
    %296 = memref.load %arg7[%c0_108] : memref<10xf32, #tpu.memory_space<smem>>
    %297 = vector.broadcast %296 : f32 to vector<8x128xf32>
    %298 = arith.addf %292, %297 : vector<8x128xf32>
    %299 = vector.broadcast %296 : f32 to vector<8x128xf32>
    %300 = arith.addf %295, %299 : vector<8x128xf32>
    %301 = math.tanh %298 : vector<8x128xf32>
    %302 = math.tanh %300 : vector<8x128xf32>
    %c0_109 = arith.constant 0 : index
    %c1_110 = arith.constant 1 : index
    %303 = memref.load %arg6[%c0_109, %c1_110] : memref<10x10xf32, #tpu.memory_space<smem>>
    %304 = vector.broadcast %303 : f32 to vector<8x128xf32>
    %305 = arith.mulf %36, %304 : vector<8x128xf32>
    %306 = vector.broadcast %303 : f32 to vector<8x128xf32>
    %307 = arith.mulf %38, %306 : vector<8x128xf32>
    %c1_111 = arith.constant 1 : index
    %c1_112 = arith.constant 1 : index
    %308 = memref.load %arg6[%c1_111, %c1_112] : memref<10x10xf32, #tpu.memory_space<smem>>
    %309 = vector.broadcast %308 : f32 to vector<8x128xf32>
    %310 = arith.mulf %57, %309 : vector<8x128xf32>
    %311 = arith.addf %305, %310 : vector<8x128xf32>
    %312 = vector.broadcast %308 : f32 to vector<8x128xf32>
    %313 = arith.mulf %59, %312 : vector<8x128xf32>
    %314 = arith.addf %307, %313 : vector<8x128xf32>
    %c2_113 = arith.constant 2 : index
    %c1_114 = arith.constant 1 : index
    %315 = memref.load %arg6[%c2_113, %c1_114] : memref<10x10xf32, #tpu.memory_space<smem>>
    %316 = vector.broadcast %315 : f32 to vector<8x128xf32>
    %317 = arith.mulf %78, %316 : vector<8x128xf32>
    %318 = arith.addf %311, %317 : vector<8x128xf32>
    %319 = vector.broadcast %315 : f32 to vector<8x128xf32>
    %320 = arith.mulf %80, %319 : vector<8x128xf32>
    %321 = arith.addf %314, %320 : vector<8x128xf32>
    %c3_115 = arith.constant 3 : index
    %c1_116 = arith.constant 1 : index
    %322 = memref.load %arg6[%c3_115, %c1_116] : memref<10x10xf32, #tpu.memory_space<smem>>
    %323 = vector.broadcast %322 : f32 to vector<8x128xf32>
    %324 = arith.mulf %99, %323 : vector<8x128xf32>
    %325 = arith.addf %318, %324 : vector<8x128xf32>
    %326 = vector.broadcast %322 : f32 to vector<8x128xf32>
    %327 = arith.mulf %101, %326 : vector<8x128xf32>
    %328 = arith.addf %321, %327 : vector<8x128xf32>
    %c4_117 = arith.constant 4 : index
    %c1_118 = arith.constant 1 : index
    %329 = memref.load %arg6[%c4_117, %c1_118] : memref<10x10xf32, #tpu.memory_space<smem>>
    %330 = vector.broadcast %329 : f32 to vector<8x128xf32>
    %331 = arith.mulf %120, %330 : vector<8x128xf32>
    %332 = arith.addf %325, %331 : vector<8x128xf32>
    %333 = vector.broadcast %329 : f32 to vector<8x128xf32>
    %334 = arith.mulf %122, %333 : vector<8x128xf32>
    %335 = arith.addf %328, %334 : vector<8x128xf32>
    %c5_119 = arith.constant 5 : index
    %c1_120 = arith.constant 1 : index
    %336 = memref.load %arg6[%c5_119, %c1_120] : memref<10x10xf32, #tpu.memory_space<smem>>
    %337 = vector.broadcast %336 : f32 to vector<8x128xf32>
    %338 = arith.mulf %141, %337 : vector<8x128xf32>
    %339 = arith.addf %332, %338 : vector<8x128xf32>
    %340 = vector.broadcast %336 : f32 to vector<8x128xf32>
    %341 = arith.mulf %143, %340 : vector<8x128xf32>
    %342 = arith.addf %335, %341 : vector<8x128xf32>
    %c6_121 = arith.constant 6 : index
    %c1_122 = arith.constant 1 : index
    %343 = memref.load %arg6[%c6_121, %c1_122] : memref<10x10xf32, #tpu.memory_space<smem>>
    %344 = vector.broadcast %343 : f32 to vector<8x128xf32>
    %345 = arith.mulf %162, %344 : vector<8x128xf32>
    %346 = arith.addf %339, %345 : vector<8x128xf32>
    %347 = vector.broadcast %343 : f32 to vector<8x128xf32>
    %348 = arith.mulf %164, %347 : vector<8x128xf32>
    %349 = arith.addf %342, %348 : vector<8x128xf32>
    %c7_123 = arith.constant 7 : index
    %c1_124 = arith.constant 1 : index
    %350 = memref.load %arg6[%c7_123, %c1_124] : memref<10x10xf32, #tpu.memory_space<smem>>
    %351 = vector.broadcast %350 : f32 to vector<8x128xf32>
    %352 = arith.mulf %183, %351 : vector<8x128xf32>
    %353 = arith.addf %346, %352 : vector<8x128xf32>
    %354 = vector.broadcast %350 : f32 to vector<8x128xf32>
    %355 = arith.mulf %185, %354 : vector<8x128xf32>
    %356 = arith.addf %349, %355 : vector<8x128xf32>
    %c8_125 = arith.constant 8 : index
    %c1_126 = arith.constant 1 : index
    %357 = memref.load %arg6[%c8_125, %c1_126] : memref<10x10xf32, #tpu.memory_space<smem>>
    %358 = vector.broadcast %357 : f32 to vector<8x128xf32>
    %359 = arith.mulf %204, %358 : vector<8x128xf32>
    %360 = arith.addf %353, %359 : vector<8x128xf32>
    %361 = vector.broadcast %357 : f32 to vector<8x128xf32>
    %362 = arith.mulf %206, %361 : vector<8x128xf32>
    %363 = arith.addf %356, %362 : vector<8x128xf32>
    %c9_127 = arith.constant 9 : index
    %c1_128 = arith.constant 1 : index
    %364 = memref.load %arg6[%c9_127, %c1_128] : memref<10x10xf32, #tpu.memory_space<smem>>
    %365 = vector.broadcast %364 : f32 to vector<8x128xf32>
    %366 = arith.mulf %225, %365 : vector<8x128xf32>
    %367 = arith.addf %360, %366 : vector<8x128xf32>
    %368 = vector.broadcast %364 : f32 to vector<8x128xf32>
    %369 = arith.mulf %227, %368 : vector<8x128xf32>
    %370 = arith.addf %363, %369 : vector<8x128xf32>
    %c1_129 = arith.constant 1 : index
    %371 = memref.load %arg7[%c1_129] : memref<10xf32, #tpu.memory_space<smem>>
    %372 = vector.broadcast %371 : f32 to vector<8x128xf32>
    %373 = arith.addf %367, %372 : vector<8x128xf32>
    %374 = vector.broadcast %371 : f32 to vector<8x128xf32>
    %375 = arith.addf %370, %374 : vector<8x128xf32>
    %376 = math.tanh %373 : vector<8x128xf32>
    %377 = math.tanh %375 : vector<8x128xf32>
    %c0_130 = arith.constant 0 : index
    %c2_131 = arith.constant 2 : index
    %378 = memref.load %arg6[%c0_130, %c2_131] : memref<10x10xf32, #tpu.memory_space<smem>>
    %379 = vector.broadcast %378 : f32 to vector<8x128xf32>
    %380 = arith.mulf %36, %379 : vector<8x128xf32>
    %381 = vector.broadcast %378 : f32 to vector<8x128xf32>
    %382 = arith.mulf %38, %381 : vector<8x128xf32>
    %c1_132 = arith.constant 1 : index
    %c2_133 = arith.constant 2 : index
    %383 = memref.load %arg6[%c1_132, %c2_133] : memref<10x10xf32, #tpu.memory_space<smem>>
    %384 = vector.broadcast %383 : f32 to vector<8x128xf32>
    %385 = arith.mulf %57, %384 : vector<8x128xf32>
    %386 = arith.addf %380, %385 : vector<8x128xf32>
    %387 = vector.broadcast %383 : f32 to vector<8x128xf32>
    %388 = arith.mulf %59, %387 : vector<8x128xf32>
    %389 = arith.addf %382, %388 : vector<8x128xf32>
    %c2_134 = arith.constant 2 : index
    %c2_135 = arith.constant 2 : index
    %390 = memref.load %arg6[%c2_134, %c2_135] : memref<10x10xf32, #tpu.memory_space<smem>>
    %391 = vector.broadcast %390 : f32 to vector<8x128xf32>
    %392 = arith.mulf %78, %391 : vector<8x128xf32>
    %393 = arith.addf %386, %392 : vector<8x128xf32>
    %394 = vector.broadcast %390 : f32 to vector<8x128xf32>
    %395 = arith.mulf %80, %394 : vector<8x128xf32>
    %396 = arith.addf %389, %395 : vector<8x128xf32>
    %c3_136 = arith.constant 3 : index
    %c2_137 = arith.constant 2 : index
    %397 = memref.load %arg6[%c3_136, %c2_137] : memref<10x10xf32, #tpu.memory_space<smem>>
    %398 = vector.broadcast %397 : f32 to vector<8x128xf32>
    %399 = arith.mulf %99, %398 : vector<8x128xf32>
    %400 = arith.addf %393, %399 : vector<8x128xf32>
    %401 = vector.broadcast %397 : f32 to vector<8x128xf32>
    %402 = arith.mulf %101, %401 : vector<8x128xf32>
    %403 = arith.addf %396, %402 : vector<8x128xf32>
    %c4_138 = arith.constant 4 : index
    %c2_139 = arith.constant 2 : index
    %404 = memref.load %arg6[%c4_138, %c2_139] : memref<10x10xf32, #tpu.memory_space<smem>>
    %405 = vector.broadcast %404 : f32 to vector<8x128xf32>
    %406 = arith.mulf %120, %405 : vector<8x128xf32>
    %407 = arith.addf %400, %406 : vector<8x128xf32>
    %408 = vector.broadcast %404 : f32 to vector<8x128xf32>
    %409 = arith.mulf %122, %408 : vector<8x128xf32>
    %410 = arith.addf %403, %409 : vector<8x128xf32>
    %c5_140 = arith.constant 5 : index
    %c2_141 = arith.constant 2 : index
    %411 = memref.load %arg6[%c5_140, %c2_141] : memref<10x10xf32, #tpu.memory_space<smem>>
    %412 = vector.broadcast %411 : f32 to vector<8x128xf32>
    %413 = arith.mulf %141, %412 : vector<8x128xf32>
    %414 = arith.addf %407, %413 : vector<8x128xf32>
    %415 = vector.broadcast %411 : f32 to vector<8x128xf32>
    %416 = arith.mulf %143, %415 : vector<8x128xf32>
    %417 = arith.addf %410, %416 : vector<8x128xf32>
    %c6_142 = arith.constant 6 : index
    %c2_143 = arith.constant 2 : index
    %418 = memref.load %arg6[%c6_142, %c2_143] : memref<10x10xf32, #tpu.memory_space<smem>>
    %419 = vector.broadcast %418 : f32 to vector<8x128xf32>
    %420 = arith.mulf %162, %419 : vector<8x128xf32>
    %421 = arith.addf %414, %420 : vector<8x128xf32>
    %422 = vector.broadcast %418 : f32 to vector<8x128xf32>
    %423 = arith.mulf %164, %422 : vector<8x128xf32>
    %424 = arith.addf %417, %423 : vector<8x128xf32>
    %c7_144 = arith.constant 7 : index
    %c2_145 = arith.constant 2 : index
    %425 = memref.load %arg6[%c7_144, %c2_145] : memref<10x10xf32, #tpu.memory_space<smem>>
    %426 = vector.broadcast %425 : f32 to vector<8x128xf32>
    %427 = arith.mulf %183, %426 : vector<8x128xf32>
    %428 = arith.addf %421, %427 : vector<8x128xf32>
    %429 = vector.broadcast %425 : f32 to vector<8x128xf32>
    %430 = arith.mulf %185, %429 : vector<8x128xf32>
    %431 = arith.addf %424, %430 : vector<8x128xf32>
    %c8_146 = arith.constant 8 : index
    %c2_147 = arith.constant 2 : index
    %432 = memref.load %arg6[%c8_146, %c2_147] : memref<10x10xf32, #tpu.memory_space<smem>>
    %433 = vector.broadcast %432 : f32 to vector<8x128xf32>
    %434 = arith.mulf %204, %433 : vector<8x128xf32>
    %435 = arith.addf %428, %434 : vector<8x128xf32>
    %436 = vector.broadcast %432 : f32 to vector<8x128xf32>
    %437 = arith.mulf %206, %436 : vector<8x128xf32>
    %438 = arith.addf %431, %437 : vector<8x128xf32>
    %c9_148 = arith.constant 9 : index
    %c2_149 = arith.constant 2 : index
    %439 = memref.load %arg6[%c9_148, %c2_149] : memref<10x10xf32, #tpu.memory_space<smem>>
    %440 = vector.broadcast %439 : f32 to vector<8x128xf32>
    %441 = arith.mulf %225, %440 : vector<8x128xf32>
    %442 = arith.addf %435, %441 : vector<8x128xf32>
    %443 = vector.broadcast %439 : f32 to vector<8x128xf32>
    %444 = arith.mulf %227, %443 : vector<8x128xf32>
    %445 = arith.addf %438, %444 : vector<8x128xf32>
    %c2_150 = arith.constant 2 : index
    %446 = memref.load %arg7[%c2_150] : memref<10xf32, #tpu.memory_space<smem>>
    %447 = vector.broadcast %446 : f32 to vector<8x128xf32>
    %448 = arith.addf %442, %447 : vector<8x128xf32>
    %449 = vector.broadcast %446 : f32 to vector<8x128xf32>
    %450 = arith.addf %445, %449 : vector<8x128xf32>
    %451 = math.tanh %448 : vector<8x128xf32>
    %452 = math.tanh %450 : vector<8x128xf32>
    %c0_151 = arith.constant 0 : index
    %c3_152 = arith.constant 3 : index
    %453 = memref.load %arg6[%c0_151, %c3_152] : memref<10x10xf32, #tpu.memory_space<smem>>
    %454 = vector.broadcast %453 : f32 to vector<8x128xf32>
    %455 = arith.mulf %36, %454 : vector<8x128xf32>
    %456 = vector.broadcast %453 : f32 to vector<8x128xf32>
    %457 = arith.mulf %38, %456 : vector<8x128xf32>
    %c1_153 = arith.constant 1 : index
    %c3_154 = arith.constant 3 : index
    %458 = memref.load %arg6[%c1_153, %c3_154] : memref<10x10xf32, #tpu.memory_space<smem>>
    %459 = vector.broadcast %458 : f32 to vector<8x128xf32>
    %460 = arith.mulf %57, %459 : vector<8x128xf32>
    %461 = arith.addf %455, %460 : vector<8x128xf32>
    %462 = vector.broadcast %458 : f32 to vector<8x128xf32>
    %463 = arith.mulf %59, %462 : vector<8x128xf32>
    %464 = arith.addf %457, %463 : vector<8x128xf32>
    %c2_155 = arith.constant 2 : index
    %c3_156 = arith.constant 3 : index
    %465 = memref.load %arg6[%c2_155, %c3_156] : memref<10x10xf32, #tpu.memory_space<smem>>
    %466 = vector.broadcast %465 : f32 to vector<8x128xf32>
    %467 = arith.mulf %78, %466 : vector<8x128xf32>
    %468 = arith.addf %461, %467 : vector<8x128xf32>
    %469 = vector.broadcast %465 : f32 to vector<8x128xf32>
    %470 = arith.mulf %80, %469 : vector<8x128xf32>
    %471 = arith.addf %464, %470 : vector<8x128xf32>
    %c3_157 = arith.constant 3 : index
    %c3_158 = arith.constant 3 : index
    %472 = memref.load %arg6[%c3_157, %c3_158] : memref<10x10xf32, #tpu.memory_space<smem>>
    %473 = vector.broadcast %472 : f32 to vector<8x128xf32>
    %474 = arith.mulf %99, %473 : vector<8x128xf32>
    %475 = arith.addf %468, %474 : vector<8x128xf32>
    %476 = vector.broadcast %472 : f32 to vector<8x128xf32>
    %477 = arith.mulf %101, %476 : vector<8x128xf32>
    %478 = arith.addf %471, %477 : vector<8x128xf32>
    %c4_159 = arith.constant 4 : index
    %c3_160 = arith.constant 3 : index
    %479 = memref.load %arg6[%c4_159, %c3_160] : memref<10x10xf32, #tpu.memory_space<smem>>
    %480 = vector.broadcast %479 : f32 to vector<8x128xf32>
    %481 = arith.mulf %120, %480 : vector<8x128xf32>
    %482 = arith.addf %475, %481 : vector<8x128xf32>
    %483 = vector.broadcast %479 : f32 to vector<8x128xf32>
    %484 = arith.mulf %122, %483 : vector<8x128xf32>
    %485 = arith.addf %478, %484 : vector<8x128xf32>
    %c5_161 = arith.constant 5 : index
    %c3_162 = arith.constant 3 : index
    %486 = memref.load %arg6[%c5_161, %c3_162] : memref<10x10xf32, #tpu.memory_space<smem>>
    %487 = vector.broadcast %486 : f32 to vector<8x128xf32>
    %488 = arith.mulf %141, %487 : vector<8x128xf32>
    %489 = arith.addf %482, %488 : vector<8x128xf32>
    %490 = vector.broadcast %486 : f32 to vector<8x128xf32>
    %491 = arith.mulf %143, %490 : vector<8x128xf32>
    %492 = arith.addf %485, %491 : vector<8x128xf32>
    %c6_163 = arith.constant 6 : index
    %c3_164 = arith.constant 3 : index
    %493 = memref.load %arg6[%c6_163, %c3_164] : memref<10x10xf32, #tpu.memory_space<smem>>
    %494 = vector.broadcast %493 : f32 to vector<8x128xf32>
    %495 = arith.mulf %162, %494 : vector<8x128xf32>
    %496 = arith.addf %489, %495 : vector<8x128xf32>
    %497 = vector.broadcast %493 : f32 to vector<8x128xf32>
    %498 = arith.mulf %164, %497 : vector<8x128xf32>
    %499 = arith.addf %492, %498 : vector<8x128xf32>
    %c7_165 = arith.constant 7 : index
    %c3_166 = arith.constant 3 : index
    %500 = memref.load %arg6[%c7_165, %c3_166] : memref<10x10xf32, #tpu.memory_space<smem>>
    %501 = vector.broadcast %500 : f32 to vector<8x128xf32>
    %502 = arith.mulf %183, %501 : vector<8x128xf32>
    %503 = arith.addf %496, %502 : vector<8x128xf32>
    %504 = vector.broadcast %500 : f32 to vector<8x128xf32>
    %505 = arith.mulf %185, %504 : vector<8x128xf32>
    %506 = arith.addf %499, %505 : vector<8x128xf32>
    %c8_167 = arith.constant 8 : index
    %c3_168 = arith.constant 3 : index
    %507 = memref.load %arg6[%c8_167, %c3_168] : memref<10x10xf32, #tpu.memory_space<smem>>
    %508 = vector.broadcast %507 : f32 to vector<8x128xf32>
    %509 = arith.mulf %204, %508 : vector<8x128xf32>
    %510 = arith.addf %503, %509 : vector<8x128xf32>
    %511 = vector.broadcast %507 : f32 to vector<8x128xf32>
    %512 = arith.mulf %206, %511 : vector<8x128xf32>
    %513 = arith.addf %506, %512 : vector<8x128xf32>
    %c9_169 = arith.constant 9 : index
    %c3_170 = arith.constant 3 : index
    %514 = memref.load %arg6[%c9_169, %c3_170] : memref<10x10xf32, #tpu.memory_space<smem>>
    %515 = vector.broadcast %514 : f32 to vector<8x128xf32>
    %516 = arith.mulf %225, %515 : vector<8x128xf32>
    %517 = arith.addf %510, %516 : vector<8x128xf32>
    %518 = vector.broadcast %514 : f32 to vector<8x128xf32>
    %519 = arith.mulf %227, %518 : vector<8x128xf32>
    %520 = arith.addf %513, %519 : vector<8x128xf32>
    %c3_171 = arith.constant 3 : index
    %521 = memref.load %arg7[%c3_171] : memref<10xf32, #tpu.memory_space<smem>>
    %522 = vector.broadcast %521 : f32 to vector<8x128xf32>
    %523 = arith.addf %517, %522 : vector<8x128xf32>
    %524 = vector.broadcast %521 : f32 to vector<8x128xf32>
    %525 = arith.addf %520, %524 : vector<8x128xf32>
    %526 = math.tanh %523 : vector<8x128xf32>
    %527 = math.tanh %525 : vector<8x128xf32>
    %c0_172 = arith.constant 0 : index
    %c4_173 = arith.constant 4 : index
    %528 = memref.load %arg6[%c0_172, %c4_173] : memref<10x10xf32, #tpu.memory_space<smem>>
    %529 = vector.broadcast %528 : f32 to vector<8x128xf32>
    %530 = arith.mulf %36, %529 : vector<8x128xf32>
    %531 = vector.broadcast %528 : f32 to vector<8x128xf32>
    %532 = arith.mulf %38, %531 : vector<8x128xf32>
    %c1_174 = arith.constant 1 : index
    %c4_175 = arith.constant 4 : index
    %533 = memref.load %arg6[%c1_174, %c4_175] : memref<10x10xf32, #tpu.memory_space<smem>>
    %534 = vector.broadcast %533 : f32 to vector<8x128xf32>
    %535 = arith.mulf %57, %534 : vector<8x128xf32>
    %536 = arith.addf %530, %535 : vector<8x128xf32>
    %537 = vector.broadcast %533 : f32 to vector<8x128xf32>
    %538 = arith.mulf %59, %537 : vector<8x128xf32>
    %539 = arith.addf %532, %538 : vector<8x128xf32>
    %c2_176 = arith.constant 2 : index
    %c4_177 = arith.constant 4 : index
    %540 = memref.load %arg6[%c2_176, %c4_177] : memref<10x10xf32, #tpu.memory_space<smem>>
    %541 = vector.broadcast %540 : f32 to vector<8x128xf32>
    %542 = arith.mulf %78, %541 : vector<8x128xf32>
    %543 = arith.addf %536, %542 : vector<8x128xf32>
    %544 = vector.broadcast %540 : f32 to vector<8x128xf32>
    %545 = arith.mulf %80, %544 : vector<8x128xf32>
    %546 = arith.addf %539, %545 : vector<8x128xf32>
    %c3_178 = arith.constant 3 : index
    %c4_179 = arith.constant 4 : index
    %547 = memref.load %arg6[%c3_178, %c4_179] : memref<10x10xf32, #tpu.memory_space<smem>>
    %548 = vector.broadcast %547 : f32 to vector<8x128xf32>
    %549 = arith.mulf %99, %548 : vector<8x128xf32>
    %550 = arith.addf %543, %549 : vector<8x128xf32>
    %551 = vector.broadcast %547 : f32 to vector<8x128xf32>
    %552 = arith.mulf %101, %551 : vector<8x128xf32>
    %553 = arith.addf %546, %552 : vector<8x128xf32>
    %c4_180 = arith.constant 4 : index
    %c4_181 = arith.constant 4 : index
    %554 = memref.load %arg6[%c4_180, %c4_181] : memref<10x10xf32, #tpu.memory_space<smem>>
    %555 = vector.broadcast %554 : f32 to vector<8x128xf32>
    %556 = arith.mulf %120, %555 : vector<8x128xf32>
    %557 = arith.addf %550, %556 : vector<8x128xf32>
    %558 = vector.broadcast %554 : f32 to vector<8x128xf32>
    %559 = arith.mulf %122, %558 : vector<8x128xf32>
    %560 = arith.addf %553, %559 : vector<8x128xf32>
    %c5_182 = arith.constant 5 : index
    %c4_183 = arith.constant 4 : index
    %561 = memref.load %arg6[%c5_182, %c4_183] : memref<10x10xf32, #tpu.memory_space<smem>>
    %562 = vector.broadcast %561 : f32 to vector<8x128xf32>
    %563 = arith.mulf %141, %562 : vector<8x128xf32>
    %564 = arith.addf %557, %563 : vector<8x128xf32>
    %565 = vector.broadcast %561 : f32 to vector<8x128xf32>
    %566 = arith.mulf %143, %565 : vector<8x128xf32>
    %567 = arith.addf %560, %566 : vector<8x128xf32>
    %c6_184 = arith.constant 6 : index
    %c4_185 = arith.constant 4 : index
    %568 = memref.load %arg6[%c6_184, %c4_185] : memref<10x10xf32, #tpu.memory_space<smem>>
    %569 = vector.broadcast %568 : f32 to vector<8x128xf32>
    %570 = arith.mulf %162, %569 : vector<8x128xf32>
    %571 = arith.addf %564, %570 : vector<8x128xf32>
    %572 = vector.broadcast %568 : f32 to vector<8x128xf32>
    %573 = arith.mulf %164, %572 : vector<8x128xf32>
    %574 = arith.addf %567, %573 : vector<8x128xf32>
    %c7_186 = arith.constant 7 : index
    %c4_187 = arith.constant 4 : index
    %575 = memref.load %arg6[%c7_186, %c4_187] : memref<10x10xf32, #tpu.memory_space<smem>>
    %576 = vector.broadcast %575 : f32 to vector<8x128xf32>
    %577 = arith.mulf %183, %576 : vector<8x128xf32>
    %578 = arith.addf %571, %577 : vector<8x128xf32>
    %579 = vector.broadcast %575 : f32 to vector<8x128xf32>
    %580 = arith.mulf %185, %579 : vector<8x128xf32>
    %581 = arith.addf %574, %580 : vector<8x128xf32>
    %c8_188 = arith.constant 8 : index
    %c4_189 = arith.constant 4 : index
    %582 = memref.load %arg6[%c8_188, %c4_189] : memref<10x10xf32, #tpu.memory_space<smem>>
    %583 = vector.broadcast %582 : f32 to vector<8x128xf32>
    %584 = arith.mulf %204, %583 : vector<8x128xf32>
    %585 = arith.addf %578, %584 : vector<8x128xf32>
    %586 = vector.broadcast %582 : f32 to vector<8x128xf32>
    %587 = arith.mulf %206, %586 : vector<8x128xf32>
    %588 = arith.addf %581, %587 : vector<8x128xf32>
    %c9_190 = arith.constant 9 : index
    %c4_191 = arith.constant 4 : index
    %589 = memref.load %arg6[%c9_190, %c4_191] : memref<10x10xf32, #tpu.memory_space<smem>>
    %590 = vector.broadcast %589 : f32 to vector<8x128xf32>
    %591 = arith.mulf %225, %590 : vector<8x128xf32>
    %592 = arith.addf %585, %591 : vector<8x128xf32>
    %593 = vector.broadcast %589 : f32 to vector<8x128xf32>
    %594 = arith.mulf %227, %593 : vector<8x128xf32>
    %595 = arith.addf %588, %594 : vector<8x128xf32>
    %c4_192 = arith.constant 4 : index
    %596 = memref.load %arg7[%c4_192] : memref<10xf32, #tpu.memory_space<smem>>
    %597 = vector.broadcast %596 : f32 to vector<8x128xf32>
    %598 = arith.addf %592, %597 : vector<8x128xf32>
    %599 = vector.broadcast %596 : f32 to vector<8x128xf32>
    %600 = arith.addf %595, %599 : vector<8x128xf32>
    %601 = math.tanh %598 : vector<8x128xf32>
    %602 = math.tanh %600 : vector<8x128xf32>
    %c0_193 = arith.constant 0 : index
    %c5_194 = arith.constant 5 : index
    %603 = memref.load %arg6[%c0_193, %c5_194] : memref<10x10xf32, #tpu.memory_space<smem>>
    %604 = vector.broadcast %603 : f32 to vector<8x128xf32>
    %605 = arith.mulf %36, %604 : vector<8x128xf32>
    %606 = vector.broadcast %603 : f32 to vector<8x128xf32>
    %607 = arith.mulf %38, %606 : vector<8x128xf32>
    %c1_195 = arith.constant 1 : index
    %c5_196 = arith.constant 5 : index
    %608 = memref.load %arg6[%c1_195, %c5_196] : memref<10x10xf32, #tpu.memory_space<smem>>
    %609 = vector.broadcast %608 : f32 to vector<8x128xf32>
    %610 = arith.mulf %57, %609 : vector<8x128xf32>
    %611 = arith.addf %605, %610 : vector<8x128xf32>
    %612 = vector.broadcast %608 : f32 to vector<8x128xf32>
    %613 = arith.mulf %59, %612 : vector<8x128xf32>
    %614 = arith.addf %607, %613 : vector<8x128xf32>
    %c2_197 = arith.constant 2 : index
    %c5_198 = arith.constant 5 : index
    %615 = memref.load %arg6[%c2_197, %c5_198] : memref<10x10xf32, #tpu.memory_space<smem>>
    %616 = vector.broadcast %615 : f32 to vector<8x128xf32>
    %617 = arith.mulf %78, %616 : vector<8x128xf32>
    %618 = arith.addf %611, %617 : vector<8x128xf32>
    %619 = vector.broadcast %615 : f32 to vector<8x128xf32>
    %620 = arith.mulf %80, %619 : vector<8x128xf32>
    %621 = arith.addf %614, %620 : vector<8x128xf32>
    %c3_199 = arith.constant 3 : index
    %c5_200 = arith.constant 5 : index
    %622 = memref.load %arg6[%c3_199, %c5_200] : memref<10x10xf32, #tpu.memory_space<smem>>
    %623 = vector.broadcast %622 : f32 to vector<8x128xf32>
    %624 = arith.mulf %99, %623 : vector<8x128xf32>
    %625 = arith.addf %618, %624 : vector<8x128xf32>
    %626 = vector.broadcast %622 : f32 to vector<8x128xf32>
    %627 = arith.mulf %101, %626 : vector<8x128xf32>
    %628 = arith.addf %621, %627 : vector<8x128xf32>
    %c4_201 = arith.constant 4 : index
    %c5_202 = arith.constant 5 : index
    %629 = memref.load %arg6[%c4_201, %c5_202] : memref<10x10xf32, #tpu.memory_space<smem>>
    %630 = vector.broadcast %629 : f32 to vector<8x128xf32>
    %631 = arith.mulf %120, %630 : vector<8x128xf32>
    %632 = arith.addf %625, %631 : vector<8x128xf32>
    %633 = vector.broadcast %629 : f32 to vector<8x128xf32>
    %634 = arith.mulf %122, %633 : vector<8x128xf32>
    %635 = arith.addf %628, %634 : vector<8x128xf32>
    %c5_203 = arith.constant 5 : index
    %c5_204 = arith.constant 5 : index
    %636 = memref.load %arg6[%c5_203, %c5_204] : memref<10x10xf32, #tpu.memory_space<smem>>
    %637 = vector.broadcast %636 : f32 to vector<8x128xf32>
    %638 = arith.mulf %141, %637 : vector<8x128xf32>
    %639 = arith.addf %632, %638 : vector<8x128xf32>
    %640 = vector.broadcast %636 : f32 to vector<8x128xf32>
    %641 = arith.mulf %143, %640 : vector<8x128xf32>
    %642 = arith.addf %635, %641 : vector<8x128xf32>
    %c6_205 = arith.constant 6 : index
    %c5_206 = arith.constant 5 : index
    %643 = memref.load %arg6[%c6_205, %c5_206] : memref<10x10xf32, #tpu.memory_space<smem>>
    %644 = vector.broadcast %643 : f32 to vector<8x128xf32>
    %645 = arith.mulf %162, %644 : vector<8x128xf32>
    %646 = arith.addf %639, %645 : vector<8x128xf32>
    %647 = vector.broadcast %643 : f32 to vector<8x128xf32>
    %648 = arith.mulf %164, %647 : vector<8x128xf32>
    %649 = arith.addf %642, %648 : vector<8x128xf32>
    %c7_207 = arith.constant 7 : index
    %c5_208 = arith.constant 5 : index
    %650 = memref.load %arg6[%c7_207, %c5_208] : memref<10x10xf32, #tpu.memory_space<smem>>
    %651 = vector.broadcast %650 : f32 to vector<8x128xf32>
    %652 = arith.mulf %183, %651 : vector<8x128xf32>
    %653 = arith.addf %646, %652 : vector<8x128xf32>
    %654 = vector.broadcast %650 : f32 to vector<8x128xf32>
    %655 = arith.mulf %185, %654 : vector<8x128xf32>
    %656 = arith.addf %649, %655 : vector<8x128xf32>
    %c8_209 = arith.constant 8 : index
    %c5_210 = arith.constant 5 : index
    %657 = memref.load %arg6[%c8_209, %c5_210] : memref<10x10xf32, #tpu.memory_space<smem>>
    %658 = vector.broadcast %657 : f32 to vector<8x128xf32>
    %659 = arith.mulf %204, %658 : vector<8x128xf32>
    %660 = arith.addf %653, %659 : vector<8x128xf32>
    %661 = vector.broadcast %657 : f32 to vector<8x128xf32>
    %662 = arith.mulf %206, %661 : vector<8x128xf32>
    %663 = arith.addf %656, %662 : vector<8x128xf32>
    %c9_211 = arith.constant 9 : index
    %c5_212 = arith.constant 5 : index
    %664 = memref.load %arg6[%c9_211, %c5_212] : memref<10x10xf32, #tpu.memory_space<smem>>
    %665 = vector.broadcast %664 : f32 to vector<8x128xf32>
    %666 = arith.mulf %225, %665 : vector<8x128xf32>
    %667 = arith.addf %660, %666 : vector<8x128xf32>
    %668 = vector.broadcast %664 : f32 to vector<8x128xf32>
    %669 = arith.mulf %227, %668 : vector<8x128xf32>
    %670 = arith.addf %663, %669 : vector<8x128xf32>
    %c5_213 = arith.constant 5 : index
    %671 = memref.load %arg7[%c5_213] : memref<10xf32, #tpu.memory_space<smem>>
    %672 = vector.broadcast %671 : f32 to vector<8x128xf32>
    %673 = arith.addf %667, %672 : vector<8x128xf32>
    %674 = vector.broadcast %671 : f32 to vector<8x128xf32>
    %675 = arith.addf %670, %674 : vector<8x128xf32>
    %676 = math.tanh %673 : vector<8x128xf32>
    %677 = math.tanh %675 : vector<8x128xf32>
    %c0_214 = arith.constant 0 : index
    %c6_215 = arith.constant 6 : index
    %678 = memref.load %arg6[%c0_214, %c6_215] : memref<10x10xf32, #tpu.memory_space<smem>>
    %679 = vector.broadcast %678 : f32 to vector<8x128xf32>
    %680 = arith.mulf %36, %679 : vector<8x128xf32>
    %681 = vector.broadcast %678 : f32 to vector<8x128xf32>
    %682 = arith.mulf %38, %681 : vector<8x128xf32>
    %c1_216 = arith.constant 1 : index
    %c6_217 = arith.constant 6 : index
    %683 = memref.load %arg6[%c1_216, %c6_217] : memref<10x10xf32, #tpu.memory_space<smem>>
    %684 = vector.broadcast %683 : f32 to vector<8x128xf32>
    %685 = arith.mulf %57, %684 : vector<8x128xf32>
    %686 = arith.addf %680, %685 : vector<8x128xf32>
    %687 = vector.broadcast %683 : f32 to vector<8x128xf32>
    %688 = arith.mulf %59, %687 : vector<8x128xf32>
    %689 = arith.addf %682, %688 : vector<8x128xf32>
    %c2_218 = arith.constant 2 : index
    %c6_219 = arith.constant 6 : index
    %690 = memref.load %arg6[%c2_218, %c6_219] : memref<10x10xf32, #tpu.memory_space<smem>>
    %691 = vector.broadcast %690 : f32 to vector<8x128xf32>
    %692 = arith.mulf %78, %691 : vector<8x128xf32>
    %693 = arith.addf %686, %692 : vector<8x128xf32>
    %694 = vector.broadcast %690 : f32 to vector<8x128xf32>
    %695 = arith.mulf %80, %694 : vector<8x128xf32>
    %696 = arith.addf %689, %695 : vector<8x128xf32>
    %c3_220 = arith.constant 3 : index
    %c6_221 = arith.constant 6 : index
    %697 = memref.load %arg6[%c3_220, %c6_221] : memref<10x10xf32, #tpu.memory_space<smem>>
    %698 = vector.broadcast %697 : f32 to vector<8x128xf32>
    %699 = arith.mulf %99, %698 : vector<8x128xf32>
    %700 = arith.addf %693, %699 : vector<8x128xf32>
    %701 = vector.broadcast %697 : f32 to vector<8x128xf32>
    %702 = arith.mulf %101, %701 : vector<8x128xf32>
    %703 = arith.addf %696, %702 : vector<8x128xf32>
    %c4_222 = arith.constant 4 : index
    %c6_223 = arith.constant 6 : index
    %704 = memref.load %arg6[%c4_222, %c6_223] : memref<10x10xf32, #tpu.memory_space<smem>>
    %705 = vector.broadcast %704 : f32 to vector<8x128xf32>
    %706 = arith.mulf %120, %705 : vector<8x128xf32>
    %707 = arith.addf %700, %706 : vector<8x128xf32>
    %708 = vector.broadcast %704 : f32 to vector<8x128xf32>
    %709 = arith.mulf %122, %708 : vector<8x128xf32>
    %710 = arith.addf %703, %709 : vector<8x128xf32>
    %c5_224 = arith.constant 5 : index
    %c6_225 = arith.constant 6 : index
    %711 = memref.load %arg6[%c5_224, %c6_225] : memref<10x10xf32, #tpu.memory_space<smem>>
    %712 = vector.broadcast %711 : f32 to vector<8x128xf32>
    %713 = arith.mulf %141, %712 : vector<8x128xf32>
    %714 = arith.addf %707, %713 : vector<8x128xf32>
    %715 = vector.broadcast %711 : f32 to vector<8x128xf32>
    %716 = arith.mulf %143, %715 : vector<8x128xf32>
    %717 = arith.addf %710, %716 : vector<8x128xf32>
    %c6_226 = arith.constant 6 : index
    %c6_227 = arith.constant 6 : index
    %718 = memref.load %arg6[%c6_226, %c6_227] : memref<10x10xf32, #tpu.memory_space<smem>>
    %719 = vector.broadcast %718 : f32 to vector<8x128xf32>
    %720 = arith.mulf %162, %719 : vector<8x128xf32>
    %721 = arith.addf %714, %720 : vector<8x128xf32>
    %722 = vector.broadcast %718 : f32 to vector<8x128xf32>
    %723 = arith.mulf %164, %722 : vector<8x128xf32>
    %724 = arith.addf %717, %723 : vector<8x128xf32>
    %c7_228 = arith.constant 7 : index
    %c6_229 = arith.constant 6 : index
    %725 = memref.load %arg6[%c7_228, %c6_229] : memref<10x10xf32, #tpu.memory_space<smem>>
    %726 = vector.broadcast %725 : f32 to vector<8x128xf32>
    %727 = arith.mulf %183, %726 : vector<8x128xf32>
    %728 = arith.addf %721, %727 : vector<8x128xf32>
    %729 = vector.broadcast %725 : f32 to vector<8x128xf32>
    %730 = arith.mulf %185, %729 : vector<8x128xf32>
    %731 = arith.addf %724, %730 : vector<8x128xf32>
    %c8_230 = arith.constant 8 : index
    %c6_231 = arith.constant 6 : index
    %732 = memref.load %arg6[%c8_230, %c6_231] : memref<10x10xf32, #tpu.memory_space<smem>>
    %733 = vector.broadcast %732 : f32 to vector<8x128xf32>
    %734 = arith.mulf %204, %733 : vector<8x128xf32>
    %735 = arith.addf %728, %734 : vector<8x128xf32>
    %736 = vector.broadcast %732 : f32 to vector<8x128xf32>
    %737 = arith.mulf %206, %736 : vector<8x128xf32>
    %738 = arith.addf %731, %737 : vector<8x128xf32>
    %c9_232 = arith.constant 9 : index
    %c6_233 = arith.constant 6 : index
    %739 = memref.load %arg6[%c9_232, %c6_233] : memref<10x10xf32, #tpu.memory_space<smem>>
    %740 = vector.broadcast %739 : f32 to vector<8x128xf32>
    %741 = arith.mulf %225, %740 : vector<8x128xf32>
    %742 = arith.addf %735, %741 : vector<8x128xf32>
    %743 = vector.broadcast %739 : f32 to vector<8x128xf32>
    %744 = arith.mulf %227, %743 : vector<8x128xf32>
    %745 = arith.addf %738, %744 : vector<8x128xf32>
    %c6_234 = arith.constant 6 : index
    %746 = memref.load %arg7[%c6_234] : memref<10xf32, #tpu.memory_space<smem>>
    %747 = vector.broadcast %746 : f32 to vector<8x128xf32>
    %748 = arith.addf %742, %747 : vector<8x128xf32>
    %749 = vector.broadcast %746 : f32 to vector<8x128xf32>
    %750 = arith.addf %745, %749 : vector<8x128xf32>
    %751 = math.tanh %748 : vector<8x128xf32>
    %752 = math.tanh %750 : vector<8x128xf32>
    %c0_235 = arith.constant 0 : index
    %c7_236 = arith.constant 7 : index
    %753 = memref.load %arg6[%c0_235, %c7_236] : memref<10x10xf32, #tpu.memory_space<smem>>
    %754 = vector.broadcast %753 : f32 to vector<8x128xf32>
    %755 = arith.mulf %36, %754 : vector<8x128xf32>
    %756 = vector.broadcast %753 : f32 to vector<8x128xf32>
    %757 = arith.mulf %38, %756 : vector<8x128xf32>
    %c1_237 = arith.constant 1 : index
    %c7_238 = arith.constant 7 : index
    %758 = memref.load %arg6[%c1_237, %c7_238] : memref<10x10xf32, #tpu.memory_space<smem>>
    %759 = vector.broadcast %758 : f32 to vector<8x128xf32>
    %760 = arith.mulf %57, %759 : vector<8x128xf32>
    %761 = arith.addf %755, %760 : vector<8x128xf32>
    %762 = vector.broadcast %758 : f32 to vector<8x128xf32>
    %763 = arith.mulf %59, %762 : vector<8x128xf32>
    %764 = arith.addf %757, %763 : vector<8x128xf32>
    %c2_239 = arith.constant 2 : index
    %c7_240 = arith.constant 7 : index
    %765 = memref.load %arg6[%c2_239, %c7_240] : memref<10x10xf32, #tpu.memory_space<smem>>
    %766 = vector.broadcast %765 : f32 to vector<8x128xf32>
    %767 = arith.mulf %78, %766 : vector<8x128xf32>
    %768 = arith.addf %761, %767 : vector<8x128xf32>
    %769 = vector.broadcast %765 : f32 to vector<8x128xf32>
    %770 = arith.mulf %80, %769 : vector<8x128xf32>
    %771 = arith.addf %764, %770 : vector<8x128xf32>
    %c3_241 = arith.constant 3 : index
    %c7_242 = arith.constant 7 : index
    %772 = memref.load %arg6[%c3_241, %c7_242] : memref<10x10xf32, #tpu.memory_space<smem>>
    %773 = vector.broadcast %772 : f32 to vector<8x128xf32>
    %774 = arith.mulf %99, %773 : vector<8x128xf32>
    %775 = arith.addf %768, %774 : vector<8x128xf32>
    %776 = vector.broadcast %772 : f32 to vector<8x128xf32>
    %777 = arith.mulf %101, %776 : vector<8x128xf32>
    %778 = arith.addf %771, %777 : vector<8x128xf32>
    %c4_243 = arith.constant 4 : index
    %c7_244 = arith.constant 7 : index
    %779 = memref.load %arg6[%c4_243, %c7_244] : memref<10x10xf32, #tpu.memory_space<smem>>
    %780 = vector.broadcast %779 : f32 to vector<8x128xf32>
    %781 = arith.mulf %120, %780 : vector<8x128xf32>
    %782 = arith.addf %775, %781 : vector<8x128xf32>
    %783 = vector.broadcast %779 : f32 to vector<8x128xf32>
    %784 = arith.mulf %122, %783 : vector<8x128xf32>
    %785 = arith.addf %778, %784 : vector<8x128xf32>
    %c5_245 = arith.constant 5 : index
    %c7_246 = arith.constant 7 : index
    %786 = memref.load %arg6[%c5_245, %c7_246] : memref<10x10xf32, #tpu.memory_space<smem>>
    %787 = vector.broadcast %786 : f32 to vector<8x128xf32>
    %788 = arith.mulf %141, %787 : vector<8x128xf32>
    %789 = arith.addf %782, %788 : vector<8x128xf32>
    %790 = vector.broadcast %786 : f32 to vector<8x128xf32>
    %791 = arith.mulf %143, %790 : vector<8x128xf32>
    %792 = arith.addf %785, %791 : vector<8x128xf32>
    %c6_247 = arith.constant 6 : index
    %c7_248 = arith.constant 7 : index
    %793 = memref.load %arg6[%c6_247, %c7_248] : memref<10x10xf32, #tpu.memory_space<smem>>
    %794 = vector.broadcast %793 : f32 to vector<8x128xf32>
    %795 = arith.mulf %162, %794 : vector<8x128xf32>
    %796 = arith.addf %789, %795 : vector<8x128xf32>
    %797 = vector.broadcast %793 : f32 to vector<8x128xf32>
    %798 = arith.mulf %164, %797 : vector<8x128xf32>
    %799 = arith.addf %792, %798 : vector<8x128xf32>
    %c7_249 = arith.constant 7 : index
    %c7_250 = arith.constant 7 : index
    %800 = memref.load %arg6[%c7_249, %c7_250] : memref<10x10xf32, #tpu.memory_space<smem>>
    %801 = vector.broadcast %800 : f32 to vector<8x128xf32>
    %802 = arith.mulf %183, %801 : vector<8x128xf32>
    %803 = arith.addf %796, %802 : vector<8x128xf32>
    %804 = vector.broadcast %800 : f32 to vector<8x128xf32>
    %805 = arith.mulf %185, %804 : vector<8x128xf32>
    %806 = arith.addf %799, %805 : vector<8x128xf32>
    %c8_251 = arith.constant 8 : index
    %c7_252 = arith.constant 7 : index
    %807 = memref.load %arg6[%c8_251, %c7_252] : memref<10x10xf32, #tpu.memory_space<smem>>
    %808 = vector.broadcast %807 : f32 to vector<8x128xf32>
    %809 = arith.mulf %204, %808 : vector<8x128xf32>
    %810 = arith.addf %803, %809 : vector<8x128xf32>
    %811 = vector.broadcast %807 : f32 to vector<8x128xf32>
    %812 = arith.mulf %206, %811 : vector<8x128xf32>
    %813 = arith.addf %806, %812 : vector<8x128xf32>
    %c9_253 = arith.constant 9 : index
    %c7_254 = arith.constant 7 : index
    %814 = memref.load %arg6[%c9_253, %c7_254] : memref<10x10xf32, #tpu.memory_space<smem>>
    %815 = vector.broadcast %814 : f32 to vector<8x128xf32>
    %816 = arith.mulf %225, %815 : vector<8x128xf32>
    %817 = arith.addf %810, %816 : vector<8x128xf32>
    %818 = vector.broadcast %814 : f32 to vector<8x128xf32>
    %819 = arith.mulf %227, %818 : vector<8x128xf32>
    %820 = arith.addf %813, %819 : vector<8x128xf32>
    %c7_255 = arith.constant 7 : index
    %821 = memref.load %arg7[%c7_255] : memref<10xf32, #tpu.memory_space<smem>>
    %822 = vector.broadcast %821 : f32 to vector<8x128xf32>
    %823 = arith.addf %817, %822 : vector<8x128xf32>
    %824 = vector.broadcast %821 : f32 to vector<8x128xf32>
    %825 = arith.addf %820, %824 : vector<8x128xf32>
    %826 = math.tanh %823 : vector<8x128xf32>
    %827 = math.tanh %825 : vector<8x128xf32>
    %c0_256 = arith.constant 0 : index
    %c8_257 = arith.constant 8 : index
    %828 = memref.load %arg6[%c0_256, %c8_257] : memref<10x10xf32, #tpu.memory_space<smem>>
    %829 = vector.broadcast %828 : f32 to vector<8x128xf32>
    %830 = arith.mulf %36, %829 : vector<8x128xf32>
    %831 = vector.broadcast %828 : f32 to vector<8x128xf32>
    %832 = arith.mulf %38, %831 : vector<8x128xf32>
    %c1_258 = arith.constant 1 : index
    %c8_259 = arith.constant 8 : index
    %833 = memref.load %arg6[%c1_258, %c8_259] : memref<10x10xf32, #tpu.memory_space<smem>>
    %834 = vector.broadcast %833 : f32 to vector<8x128xf32>
    %835 = arith.mulf %57, %834 : vector<8x128xf32>
    %836 = arith.addf %830, %835 : vector<8x128xf32>
    %837 = vector.broadcast %833 : f32 to vector<8x128xf32>
    %838 = arith.mulf %59, %837 : vector<8x128xf32>
    %839 = arith.addf %832, %838 : vector<8x128xf32>
    %c2_260 = arith.constant 2 : index
    %c8_261 = arith.constant 8 : index
    %840 = memref.load %arg6[%c2_260, %c8_261] : memref<10x10xf32, #tpu.memory_space<smem>>
    %841 = vector.broadcast %840 : f32 to vector<8x128xf32>
    %842 = arith.mulf %78, %841 : vector<8x128xf32>
    %843 = arith.addf %836, %842 : vector<8x128xf32>
    %844 = vector.broadcast %840 : f32 to vector<8x128xf32>
    %845 = arith.mulf %80, %844 : vector<8x128xf32>
    %846 = arith.addf %839, %845 : vector<8x128xf32>
    %c3_262 = arith.constant 3 : index
    %c8_263 = arith.constant 8 : index
    %847 = memref.load %arg6[%c3_262, %c8_263] : memref<10x10xf32, #tpu.memory_space<smem>>
    %848 = vector.broadcast %847 : f32 to vector<8x128xf32>
    %849 = arith.mulf %99, %848 : vector<8x128xf32>
    %850 = arith.addf %843, %849 : vector<8x128xf32>
    %851 = vector.broadcast %847 : f32 to vector<8x128xf32>
    %852 = arith.mulf %101, %851 : vector<8x128xf32>
    %853 = arith.addf %846, %852 : vector<8x128xf32>
    %c4_264 = arith.constant 4 : index
    %c8_265 = arith.constant 8 : index
    %854 = memref.load %arg6[%c4_264, %c8_265] : memref<10x10xf32, #tpu.memory_space<smem>>
    %855 = vector.broadcast %854 : f32 to vector<8x128xf32>
    %856 = arith.mulf %120, %855 : vector<8x128xf32>
    %857 = arith.addf %850, %856 : vector<8x128xf32>
    %858 = vector.broadcast %854 : f32 to vector<8x128xf32>
    %859 = arith.mulf %122, %858 : vector<8x128xf32>
    %860 = arith.addf %853, %859 : vector<8x128xf32>
    %c5_266 = arith.constant 5 : index
    %c8_267 = arith.constant 8 : index
    %861 = memref.load %arg6[%c5_266, %c8_267] : memref<10x10xf32, #tpu.memory_space<smem>>
    %862 = vector.broadcast %861 : f32 to vector<8x128xf32>
    %863 = arith.mulf %141, %862 : vector<8x128xf32>
    %864 = arith.addf %857, %863 : vector<8x128xf32>
    %865 = vector.broadcast %861 : f32 to vector<8x128xf32>
    %866 = arith.mulf %143, %865 : vector<8x128xf32>
    %867 = arith.addf %860, %866 : vector<8x128xf32>
    %c6_268 = arith.constant 6 : index
    %c8_269 = arith.constant 8 : index
    %868 = memref.load %arg6[%c6_268, %c8_269] : memref<10x10xf32, #tpu.memory_space<smem>>
    %869 = vector.broadcast %868 : f32 to vector<8x128xf32>
    %870 = arith.mulf %162, %869 : vector<8x128xf32>
    %871 = arith.addf %864, %870 : vector<8x128xf32>
    %872 = vector.broadcast %868 : f32 to vector<8x128xf32>
    %873 = arith.mulf %164, %872 : vector<8x128xf32>
    %874 = arith.addf %867, %873 : vector<8x128xf32>
    %c7_270 = arith.constant 7 : index
    %c8_271 = arith.constant 8 : index
    %875 = memref.load %arg6[%c7_270, %c8_271] : memref<10x10xf32, #tpu.memory_space<smem>>
    %876 = vector.broadcast %875 : f32 to vector<8x128xf32>
    %877 = arith.mulf %183, %876 : vector<8x128xf32>
    %878 = arith.addf %871, %877 : vector<8x128xf32>
    %879 = vector.broadcast %875 : f32 to vector<8x128xf32>
    %880 = arith.mulf %185, %879 : vector<8x128xf32>
    %881 = arith.addf %874, %880 : vector<8x128xf32>
    %c8_272 = arith.constant 8 : index
    %c8_273 = arith.constant 8 : index
    %882 = memref.load %arg6[%c8_272, %c8_273] : memref<10x10xf32, #tpu.memory_space<smem>>
    %883 = vector.broadcast %882 : f32 to vector<8x128xf32>
    %884 = arith.mulf %204, %883 : vector<8x128xf32>
    %885 = arith.addf %878, %884 : vector<8x128xf32>
    %886 = vector.broadcast %882 : f32 to vector<8x128xf32>
    %887 = arith.mulf %206, %886 : vector<8x128xf32>
    %888 = arith.addf %881, %887 : vector<8x128xf32>
    %c9_274 = arith.constant 9 : index
    %c8_275 = arith.constant 8 : index
    %889 = memref.load %arg6[%c9_274, %c8_275] : memref<10x10xf32, #tpu.memory_space<smem>>
    %890 = vector.broadcast %889 : f32 to vector<8x128xf32>
    %891 = arith.mulf %225, %890 : vector<8x128xf32>
    %892 = arith.addf %885, %891 : vector<8x128xf32>
    %893 = vector.broadcast %889 : f32 to vector<8x128xf32>
    %894 = arith.mulf %227, %893 : vector<8x128xf32>
    %895 = arith.addf %888, %894 : vector<8x128xf32>
    %c8_276 = arith.constant 8 : index
    %896 = memref.load %arg7[%c8_276] : memref<10xf32, #tpu.memory_space<smem>>
    %897 = vector.broadcast %896 : f32 to vector<8x128xf32>
    %898 = arith.addf %892, %897 : vector<8x128xf32>
    %899 = vector.broadcast %896 : f32 to vector<8x128xf32>
    %900 = arith.addf %895, %899 : vector<8x128xf32>
    %901 = math.tanh %898 : vector<8x128xf32>
    %902 = math.tanh %900 : vector<8x128xf32>
    %c0_277 = arith.constant 0 : index
    %c9_278 = arith.constant 9 : index
    %903 = memref.load %arg6[%c0_277, %c9_278] : memref<10x10xf32, #tpu.memory_space<smem>>
    %904 = vector.broadcast %903 : f32 to vector<8x128xf32>
    %905 = arith.mulf %36, %904 : vector<8x128xf32>
    %906 = vector.broadcast %903 : f32 to vector<8x128xf32>
    %907 = arith.mulf %38, %906 : vector<8x128xf32>
    %c1_279 = arith.constant 1 : index
    %c9_280 = arith.constant 9 : index
    %908 = memref.load %arg6[%c1_279, %c9_280] : memref<10x10xf32, #tpu.memory_space<smem>>
    %909 = vector.broadcast %908 : f32 to vector<8x128xf32>
    %910 = arith.mulf %57, %909 : vector<8x128xf32>
    %911 = arith.addf %905, %910 : vector<8x128xf32>
    %912 = vector.broadcast %908 : f32 to vector<8x128xf32>
    %913 = arith.mulf %59, %912 : vector<8x128xf32>
    %914 = arith.addf %907, %913 : vector<8x128xf32>
    %c2_281 = arith.constant 2 : index
    %c9_282 = arith.constant 9 : index
    %915 = memref.load %arg6[%c2_281, %c9_282] : memref<10x10xf32, #tpu.memory_space<smem>>
    %916 = vector.broadcast %915 : f32 to vector<8x128xf32>
    %917 = arith.mulf %78, %916 : vector<8x128xf32>
    %918 = arith.addf %911, %917 : vector<8x128xf32>
    %919 = vector.broadcast %915 : f32 to vector<8x128xf32>
    %920 = arith.mulf %80, %919 : vector<8x128xf32>
    %921 = arith.addf %914, %920 : vector<8x128xf32>
    %c3_283 = arith.constant 3 : index
    %c9_284 = arith.constant 9 : index
    %922 = memref.load %arg6[%c3_283, %c9_284] : memref<10x10xf32, #tpu.memory_space<smem>>
    %923 = vector.broadcast %922 : f32 to vector<8x128xf32>
    %924 = arith.mulf %99, %923 : vector<8x128xf32>
    %925 = arith.addf %918, %924 : vector<8x128xf32>
    %926 = vector.broadcast %922 : f32 to vector<8x128xf32>
    %927 = arith.mulf %101, %926 : vector<8x128xf32>
    %928 = arith.addf %921, %927 : vector<8x128xf32>
    %c4_285 = arith.constant 4 : index
    %c9_286 = arith.constant 9 : index
    %929 = memref.load %arg6[%c4_285, %c9_286] : memref<10x10xf32, #tpu.memory_space<smem>>
    %930 = vector.broadcast %929 : f32 to vector<8x128xf32>
    %931 = arith.mulf %120, %930 : vector<8x128xf32>
    %932 = arith.addf %925, %931 : vector<8x128xf32>
    %933 = vector.broadcast %929 : f32 to vector<8x128xf32>
    %934 = arith.mulf %122, %933 : vector<8x128xf32>
    %935 = arith.addf %928, %934 : vector<8x128xf32>
    %c5_287 = arith.constant 5 : index
    %c9_288 = arith.constant 9 : index
    %936 = memref.load %arg6[%c5_287, %c9_288] : memref<10x10xf32, #tpu.memory_space<smem>>
    %937 = vector.broadcast %936 : f32 to vector<8x128xf32>
    %938 = arith.mulf %141, %937 : vector<8x128xf32>
    %939 = arith.addf %932, %938 : vector<8x128xf32>
    %940 = vector.broadcast %936 : f32 to vector<8x128xf32>
    %941 = arith.mulf %143, %940 : vector<8x128xf32>
    %942 = arith.addf %935, %941 : vector<8x128xf32>
    %c6_289 = arith.constant 6 : index
    %c9_290 = arith.constant 9 : index
    %943 = memref.load %arg6[%c6_289, %c9_290] : memref<10x10xf32, #tpu.memory_space<smem>>
    %944 = vector.broadcast %943 : f32 to vector<8x128xf32>
    %945 = arith.mulf %162, %944 : vector<8x128xf32>
    %946 = arith.addf %939, %945 : vector<8x128xf32>
    %947 = vector.broadcast %943 : f32 to vector<8x128xf32>
    %948 = arith.mulf %164, %947 : vector<8x128xf32>
    %949 = arith.addf %942, %948 : vector<8x128xf32>
    %c7_291 = arith.constant 7 : index
    %c9_292 = arith.constant 9 : index
    %950 = memref.load %arg6[%c7_291, %c9_292] : memref<10x10xf32, #tpu.memory_space<smem>>
    %951 = vector.broadcast %950 : f32 to vector<8x128xf32>
    %952 = arith.mulf %183, %951 : vector<8x128xf32>
    %953 = arith.addf %946, %952 : vector<8x128xf32>
    %954 = vector.broadcast %950 : f32 to vector<8x128xf32>
    %955 = arith.mulf %185, %954 : vector<8x128xf32>
    %956 = arith.addf %949, %955 : vector<8x128xf32>
    %c8_293 = arith.constant 8 : index
    %c9_294 = arith.constant 9 : index
    %957 = memref.load %arg6[%c8_293, %c9_294] : memref<10x10xf32, #tpu.memory_space<smem>>
    %958 = vector.broadcast %957 : f32 to vector<8x128xf32>
    %959 = arith.mulf %204, %958 : vector<8x128xf32>
    %960 = arith.addf %953, %959 : vector<8x128xf32>
    %961 = vector.broadcast %957 : f32 to vector<8x128xf32>
    %962 = arith.mulf %206, %961 : vector<8x128xf32>
    %963 = arith.addf %956, %962 : vector<8x128xf32>
    %c9_295 = arith.constant 9 : index
    %c9_296 = arith.constant 9 : index
    %964 = memref.load %arg6[%c9_295, %c9_296] : memref<10x10xf32, #tpu.memory_space<smem>>
    %965 = vector.broadcast %964 : f32 to vector<8x128xf32>
    %966 = arith.mulf %225, %965 : vector<8x128xf32>
    %967 = arith.addf %960, %966 : vector<8x128xf32>
    %968 = vector.broadcast %964 : f32 to vector<8x128xf32>
    %969 = arith.mulf %227, %968 : vector<8x128xf32>
    %970 = arith.addf %963, %969 : vector<8x128xf32>
    %c9_297 = arith.constant 9 : index
    %971 = memref.load %arg7[%c9_297] : memref<10xf32, #tpu.memory_space<smem>>
    %972 = vector.broadcast %971 : f32 to vector<8x128xf32>
    %973 = arith.addf %967, %972 : vector<8x128xf32>
    %974 = vector.broadcast %971 : f32 to vector<8x128xf32>
    %975 = arith.addf %970, %974 : vector<8x128xf32>
    %976 = math.tanh %973 : vector<8x128xf32>
    %977 = math.tanh %975 : vector<8x128xf32>
    %c0_298 = arith.constant 0 : index
    %c0_299 = arith.constant 0 : index
    %978 = memref.load %arg8[%c0_298, %c0_299] : memref<10x3xf32, #tpu.memory_space<smem>>
    %979 = vector.broadcast %978 : f32 to vector<8x128xf32>
    %980 = arith.mulf %301, %979 : vector<8x128xf32>
    %981 = vector.broadcast %978 : f32 to vector<8x128xf32>
    %982 = arith.mulf %302, %981 : vector<8x128xf32>
    %c1_300 = arith.constant 1 : index
    %c0_301 = arith.constant 0 : index
    %983 = memref.load %arg8[%c1_300, %c0_301] : memref<10x3xf32, #tpu.memory_space<smem>>
    %984 = vector.broadcast %983 : f32 to vector<8x128xf32>
    %985 = arith.mulf %376, %984 : vector<8x128xf32>
    %986 = arith.addf %980, %985 : vector<8x128xf32>
    %987 = vector.broadcast %983 : f32 to vector<8x128xf32>
    %988 = arith.mulf %377, %987 : vector<8x128xf32>
    %989 = arith.addf %982, %988 : vector<8x128xf32>
    %c2_302 = arith.constant 2 : index
    %c0_303 = arith.constant 0 : index
    %990 = memref.load %arg8[%c2_302, %c0_303] : memref<10x3xf32, #tpu.memory_space<smem>>
    %991 = vector.broadcast %990 : f32 to vector<8x128xf32>
    %992 = arith.mulf %451, %991 : vector<8x128xf32>
    %993 = arith.addf %986, %992 : vector<8x128xf32>
    %994 = vector.broadcast %990 : f32 to vector<8x128xf32>
    %995 = arith.mulf %452, %994 : vector<8x128xf32>
    %996 = arith.addf %989, %995 : vector<8x128xf32>
    %c3_304 = arith.constant 3 : index
    %c0_305 = arith.constant 0 : index
    %997 = memref.load %arg8[%c3_304, %c0_305] : memref<10x3xf32, #tpu.memory_space<smem>>
    %998 = vector.broadcast %997 : f32 to vector<8x128xf32>
    %999 = arith.mulf %526, %998 : vector<8x128xf32>
    %1000 = arith.addf %993, %999 : vector<8x128xf32>
    %1001 = vector.broadcast %997 : f32 to vector<8x128xf32>
    %1002 = arith.mulf %527, %1001 : vector<8x128xf32>
    %1003 = arith.addf %996, %1002 : vector<8x128xf32>
    %c4_306 = arith.constant 4 : index
    %c0_307 = arith.constant 0 : index
    %1004 = memref.load %arg8[%c4_306, %c0_307] : memref<10x3xf32, #tpu.memory_space<smem>>
    %1005 = vector.broadcast %1004 : f32 to vector<8x128xf32>
    %1006 = arith.mulf %601, %1005 : vector<8x128xf32>
    %1007 = arith.addf %1000, %1006 : vector<8x128xf32>
    %1008 = vector.broadcast %1004 : f32 to vector<8x128xf32>
    %1009 = arith.mulf %602, %1008 : vector<8x128xf32>
    %1010 = arith.addf %1003, %1009 : vector<8x128xf32>
    %c5_308 = arith.constant 5 : index
    %c0_309 = arith.constant 0 : index
    %1011 = memref.load %arg8[%c5_308, %c0_309] : memref<10x3xf32, #tpu.memory_space<smem>>
    %1012 = vector.broadcast %1011 : f32 to vector<8x128xf32>
    %1013 = arith.mulf %676, %1012 : vector<8x128xf32>
    %1014 = arith.addf %1007, %1013 : vector<8x128xf32>
    %1015 = vector.broadcast %1011 : f32 to vector<8x128xf32>
    %1016 = arith.mulf %677, %1015 : vector<8x128xf32>
    %1017 = arith.addf %1010, %1016 : vector<8x128xf32>
    %c6_310 = arith.constant 6 : index
    %c0_311 = arith.constant 0 : index
    %1018 = memref.load %arg8[%c6_310, %c0_311] : memref<10x3xf32, #tpu.memory_space<smem>>
    %1019 = vector.broadcast %1018 : f32 to vector<8x128xf32>
    %1020 = arith.mulf %751, %1019 : vector<8x128xf32>
    %1021 = arith.addf %1014, %1020 : vector<8x128xf32>
    %1022 = vector.broadcast %1018 : f32 to vector<8x128xf32>
    %1023 = arith.mulf %752, %1022 : vector<8x128xf32>
    %1024 = arith.addf %1017, %1023 : vector<8x128xf32>
    %c7_312 = arith.constant 7 : index
    %c0_313 = arith.constant 0 : index
    %1025 = memref.load %arg8[%c7_312, %c0_313] : memref<10x3xf32, #tpu.memory_space<smem>>
    %1026 = vector.broadcast %1025 : f32 to vector<8x128xf32>
    %1027 = arith.mulf %826, %1026 : vector<8x128xf32>
    %1028 = arith.addf %1021, %1027 : vector<8x128xf32>
    %1029 = vector.broadcast %1025 : f32 to vector<8x128xf32>
    %1030 = arith.mulf %827, %1029 : vector<8x128xf32>
    %1031 = arith.addf %1024, %1030 : vector<8x128xf32>
    %c8_314 = arith.constant 8 : index
    %c0_315 = arith.constant 0 : index
    %1032 = memref.load %arg8[%c8_314, %c0_315] : memref<10x3xf32, #tpu.memory_space<smem>>
    %1033 = vector.broadcast %1032 : f32 to vector<8x128xf32>
    %1034 = arith.mulf %901, %1033 : vector<8x128xf32>
    %1035 = arith.addf %1028, %1034 : vector<8x128xf32>
    %1036 = vector.broadcast %1032 : f32 to vector<8x128xf32>
    %1037 = arith.mulf %902, %1036 : vector<8x128xf32>
    %1038 = arith.addf %1031, %1037 : vector<8x128xf32>
    %c9_316 = arith.constant 9 : index
    %c0_317 = arith.constant 0 : index
    %1039 = memref.load %arg8[%c9_316, %c0_317] : memref<10x3xf32, #tpu.memory_space<smem>>
    %1040 = vector.broadcast %1039 : f32 to vector<8x128xf32>
    %1041 = arith.mulf %976, %1040 : vector<8x128xf32>
    %1042 = arith.addf %1035, %1041 : vector<8x128xf32>
    %1043 = vector.broadcast %1039 : f32 to vector<8x128xf32>
    %1044 = arith.mulf %977, %1043 : vector<8x128xf32>
    %1045 = arith.addf %1038, %1044 : vector<8x128xf32>
    %c0_318 = arith.constant 0 : index
    %1046 = memref.load %arg9[%c0_318] : memref<3xf32, #tpu.memory_space<smem>>
    %1047 = vector.broadcast %1046 : f32 to vector<8x128xf32>
    %1048 = arith.addf %1042, %1047 : vector<8x128xf32>
    %1049 = vector.broadcast %1046 : f32 to vector<8x128xf32>
    %1050 = arith.addf %1045, %1049 : vector<8x128xf32>
    %c0_319 = arith.constant 0 : index
    %c1_320 = arith.constant 1 : index
    %1051 = memref.load %arg8[%c0_319, %c1_320] : memref<10x3xf32, #tpu.memory_space<smem>>
    %1052 = vector.broadcast %1051 : f32 to vector<8x128xf32>
    %1053 = arith.mulf %301, %1052 : vector<8x128xf32>
    %1054 = vector.broadcast %1051 : f32 to vector<8x128xf32>
    %1055 = arith.mulf %302, %1054 : vector<8x128xf32>
    %c1_321 = arith.constant 1 : index
    %c1_322 = arith.constant 1 : index
    %1056 = memref.load %arg8[%c1_321, %c1_322] : memref<10x3xf32, #tpu.memory_space<smem>>
    %1057 = vector.broadcast %1056 : f32 to vector<8x128xf32>
    %1058 = arith.mulf %376, %1057 : vector<8x128xf32>
    %1059 = arith.addf %1053, %1058 : vector<8x128xf32>
    %1060 = vector.broadcast %1056 : f32 to vector<8x128xf32>
    %1061 = arith.mulf %377, %1060 : vector<8x128xf32>
    %1062 = arith.addf %1055, %1061 : vector<8x128xf32>
    %c2_323 = arith.constant 2 : index
    %c1_324 = arith.constant 1 : index
    %1063 = memref.load %arg8[%c2_323, %c1_324] : memref<10x3xf32, #tpu.memory_space<smem>>
    %1064 = vector.broadcast %1063 : f32 to vector<8x128xf32>
    %1065 = arith.mulf %451, %1064 : vector<8x128xf32>
    %1066 = arith.addf %1059, %1065 : vector<8x128xf32>
    %1067 = vector.broadcast %1063 : f32 to vector<8x128xf32>
    %1068 = arith.mulf %452, %1067 : vector<8x128xf32>
    %1069 = arith.addf %1062, %1068 : vector<8x128xf32>
    %c3_325 = arith.constant 3 : index
    %c1_326 = arith.constant 1 : index
    %1070 = memref.load %arg8[%c3_325, %c1_326] : memref<10x3xf32, #tpu.memory_space<smem>>
    %1071 = vector.broadcast %1070 : f32 to vector<8x128xf32>
    %1072 = arith.mulf %526, %1071 : vector<8x128xf32>
    %1073 = arith.addf %1066, %1072 : vector<8x128xf32>
    %1074 = vector.broadcast %1070 : f32 to vector<8x128xf32>
    %1075 = arith.mulf %527, %1074 : vector<8x128xf32>
    %1076 = arith.addf %1069, %1075 : vector<8x128xf32>
    %c4_327 = arith.constant 4 : index
    %c1_328 = arith.constant 1 : index
    %1077 = memref.load %arg8[%c4_327, %c1_328] : memref<10x3xf32, #tpu.memory_space<smem>>
    %1078 = vector.broadcast %1077 : f32 to vector<8x128xf32>
    %1079 = arith.mulf %601, %1078 : vector<8x128xf32>
    %1080 = arith.addf %1073, %1079 : vector<8x128xf32>
    %1081 = vector.broadcast %1077 : f32 to vector<8x128xf32>
    %1082 = arith.mulf %602, %1081 : vector<8x128xf32>
    %1083 = arith.addf %1076, %1082 : vector<8x128xf32>
    %c5_329 = arith.constant 5 : index
    %c1_330 = arith.constant 1 : index
    %1084 = memref.load %arg8[%c5_329, %c1_330] : memref<10x3xf32, #tpu.memory_space<smem>>
    %1085 = vector.broadcast %1084 : f32 to vector<8x128xf32>
    %1086 = arith.mulf %676, %1085 : vector<8x128xf32>
    %1087 = arith.addf %1080, %1086 : vector<8x128xf32>
    %1088 = vector.broadcast %1084 : f32 to vector<8x128xf32>
    %1089 = arith.mulf %677, %1088 : vector<8x128xf32>
    %1090 = arith.addf %1083, %1089 : vector<8x128xf32>
    %c6_331 = arith.constant 6 : index
    %c1_332 = arith.constant 1 : index
    %1091 = memref.load %arg8[%c6_331, %c1_332] : memref<10x3xf32, #tpu.memory_space<smem>>
    %1092 = vector.broadcast %1091 : f32 to vector<8x128xf32>
    %1093 = arith.mulf %751, %1092 : vector<8x128xf32>
    %1094 = arith.addf %1087, %1093 : vector<8x128xf32>
    %1095 = vector.broadcast %1091 : f32 to vector<8x128xf32>
    %1096 = arith.mulf %752, %1095 : vector<8x128xf32>
    %1097 = arith.addf %1090, %1096 : vector<8x128xf32>
    %c7_333 = arith.constant 7 : index
    %c1_334 = arith.constant 1 : index
    %1098 = memref.load %arg8[%c7_333, %c1_334] : memref<10x3xf32, #tpu.memory_space<smem>>
    %1099 = vector.broadcast %1098 : f32 to vector<8x128xf32>
    %1100 = arith.mulf %826, %1099 : vector<8x128xf32>
    %1101 = arith.addf %1094, %1100 : vector<8x128xf32>
    %1102 = vector.broadcast %1098 : f32 to vector<8x128xf32>
    %1103 = arith.mulf %827, %1102 : vector<8x128xf32>
    %1104 = arith.addf %1097, %1103 : vector<8x128xf32>
    %c8_335 = arith.constant 8 : index
    %c1_336 = arith.constant 1 : index
    %1105 = memref.load %arg8[%c8_335, %c1_336] : memref<10x3xf32, #tpu.memory_space<smem>>
    %1106 = vector.broadcast %1105 : f32 to vector<8x128xf32>
    %1107 = arith.mulf %901, %1106 : vector<8x128xf32>
    %1108 = arith.addf %1101, %1107 : vector<8x128xf32>
    %1109 = vector.broadcast %1105 : f32 to vector<8x128xf32>
    %1110 = arith.mulf %902, %1109 : vector<8x128xf32>
    %1111 = arith.addf %1104, %1110 : vector<8x128xf32>
    %c9_337 = arith.constant 9 : index
    %c1_338 = arith.constant 1 : index
    %1112 = memref.load %arg8[%c9_337, %c1_338] : memref<10x3xf32, #tpu.memory_space<smem>>
    %1113 = vector.broadcast %1112 : f32 to vector<8x128xf32>
    %1114 = arith.mulf %976, %1113 : vector<8x128xf32>
    %1115 = arith.addf %1108, %1114 : vector<8x128xf32>
    %1116 = vector.broadcast %1112 : f32 to vector<8x128xf32>
    %1117 = arith.mulf %977, %1116 : vector<8x128xf32>
    %1118 = arith.addf %1111, %1117 : vector<8x128xf32>
    %c1_339 = arith.constant 1 : index
    %1119 = memref.load %arg9[%c1_339] : memref<3xf32, #tpu.memory_space<smem>>
    %1120 = vector.broadcast %1119 : f32 to vector<8x128xf32>
    %1121 = arith.addf %1115, %1120 : vector<8x128xf32>
    %1122 = vector.broadcast %1119 : f32 to vector<8x128xf32>
    %1123 = arith.addf %1118, %1122 : vector<8x128xf32>
    %c0_340 = arith.constant 0 : index
    %c2_341 = arith.constant 2 : index
    %1124 = memref.load %arg8[%c0_340, %c2_341] : memref<10x3xf32, #tpu.memory_space<smem>>
    %1125 = vector.broadcast %1124 : f32 to vector<8x128xf32>
    %1126 = arith.mulf %301, %1125 : vector<8x128xf32>
    %1127 = vector.broadcast %1124 : f32 to vector<8x128xf32>
    %1128 = arith.mulf %302, %1127 : vector<8x128xf32>
    %c1_342 = arith.constant 1 : index
    %c2_343 = arith.constant 2 : index
    %1129 = memref.load %arg8[%c1_342, %c2_343] : memref<10x3xf32, #tpu.memory_space<smem>>
    %1130 = vector.broadcast %1129 : f32 to vector<8x128xf32>
    %1131 = arith.mulf %376, %1130 : vector<8x128xf32>
    %1132 = arith.addf %1126, %1131 : vector<8x128xf32>
    %1133 = vector.broadcast %1129 : f32 to vector<8x128xf32>
    %1134 = arith.mulf %377, %1133 : vector<8x128xf32>
    %1135 = arith.addf %1128, %1134 : vector<8x128xf32>
    %c2_344 = arith.constant 2 : index
    %c2_345 = arith.constant 2 : index
    %1136 = memref.load %arg8[%c2_344, %c2_345] : memref<10x3xf32, #tpu.memory_space<smem>>
    %1137 = vector.broadcast %1136 : f32 to vector<8x128xf32>
    %1138 = arith.mulf %451, %1137 : vector<8x128xf32>
    %1139 = arith.addf %1132, %1138 : vector<8x128xf32>
    %1140 = vector.broadcast %1136 : f32 to vector<8x128xf32>
    %1141 = arith.mulf %452, %1140 : vector<8x128xf32>
    %1142 = arith.addf %1135, %1141 : vector<8x128xf32>
    %c3_346 = arith.constant 3 : index
    %c2_347 = arith.constant 2 : index
    %1143 = memref.load %arg8[%c3_346, %c2_347] : memref<10x3xf32, #tpu.memory_space<smem>>
    %1144 = vector.broadcast %1143 : f32 to vector<8x128xf32>
    %1145 = arith.mulf %526, %1144 : vector<8x128xf32>
    %1146 = arith.addf %1139, %1145 : vector<8x128xf32>
    %1147 = vector.broadcast %1143 : f32 to vector<8x128xf32>
    %1148 = arith.mulf %527, %1147 : vector<8x128xf32>
    %1149 = arith.addf %1142, %1148 : vector<8x128xf32>
    %c4_348 = arith.constant 4 : index
    %c2_349 = arith.constant 2 : index
    %1150 = memref.load %arg8[%c4_348, %c2_349] : memref<10x3xf32, #tpu.memory_space<smem>>
    %1151 = vector.broadcast %1150 : f32 to vector<8x128xf32>
    %1152 = arith.mulf %601, %1151 : vector<8x128xf32>
    %1153 = arith.addf %1146, %1152 : vector<8x128xf32>
    %1154 = vector.broadcast %1150 : f32 to vector<8x128xf32>
    %1155 = arith.mulf %602, %1154 : vector<8x128xf32>
    %1156 = arith.addf %1149, %1155 : vector<8x128xf32>
    %c5_350 = arith.constant 5 : index
    %c2_351 = arith.constant 2 : index
    %1157 = memref.load %arg8[%c5_350, %c2_351] : memref<10x3xf32, #tpu.memory_space<smem>>
    %1158 = vector.broadcast %1157 : f32 to vector<8x128xf32>
    %1159 = arith.mulf %676, %1158 : vector<8x128xf32>
    %1160 = arith.addf %1153, %1159 : vector<8x128xf32>
    %1161 = vector.broadcast %1157 : f32 to vector<8x128xf32>
    %1162 = arith.mulf %677, %1161 : vector<8x128xf32>
    %1163 = arith.addf %1156, %1162 : vector<8x128xf32>
    %c6_352 = arith.constant 6 : index
    %c2_353 = arith.constant 2 : index
    %1164 = memref.load %arg8[%c6_352, %c2_353] : memref<10x3xf32, #tpu.memory_space<smem>>
    %1165 = vector.broadcast %1164 : f32 to vector<8x128xf32>
    %1166 = arith.mulf %751, %1165 : vector<8x128xf32>
    %1167 = arith.addf %1160, %1166 : vector<8x128xf32>
    %1168 = vector.broadcast %1164 : f32 to vector<8x128xf32>
    %1169 = arith.mulf %752, %1168 : vector<8x128xf32>
    %1170 = arith.addf %1163, %1169 : vector<8x128xf32>
    %c7_354 = arith.constant 7 : index
    %c2_355 = arith.constant 2 : index
    %1171 = memref.load %arg8[%c7_354, %c2_355] : memref<10x3xf32, #tpu.memory_space<smem>>
    %1172 = vector.broadcast %1171 : f32 to vector<8x128xf32>
    %1173 = arith.mulf %826, %1172 : vector<8x128xf32>
    %1174 = arith.addf %1167, %1173 : vector<8x128xf32>
    %1175 = vector.broadcast %1171 : f32 to vector<8x128xf32>
    %1176 = arith.mulf %827, %1175 : vector<8x128xf32>
    %1177 = arith.addf %1170, %1176 : vector<8x128xf32>
    %c8_356 = arith.constant 8 : index
    %c2_357 = arith.constant 2 : index
    %1178 = memref.load %arg8[%c8_356, %c2_357] : memref<10x3xf32, #tpu.memory_space<smem>>
    %1179 = vector.broadcast %1178 : f32 to vector<8x128xf32>
    %1180 = arith.mulf %901, %1179 : vector<8x128xf32>
    %1181 = arith.addf %1174, %1180 : vector<8x128xf32>
    %1182 = vector.broadcast %1178 : f32 to vector<8x128xf32>
    %1183 = arith.mulf %902, %1182 : vector<8x128xf32>
    %1184 = arith.addf %1177, %1183 : vector<8x128xf32>
    %c9_358 = arith.constant 9 : index
    %c2_359 = arith.constant 2 : index
    %1185 = memref.load %arg8[%c9_358, %c2_359] : memref<10x3xf32, #tpu.memory_space<smem>>
    %1186 = vector.broadcast %1185 : f32 to vector<8x128xf32>
    %1187 = arith.mulf %976, %1186 : vector<8x128xf32>
    %1188 = arith.addf %1181, %1187 : vector<8x128xf32>
    %1189 = vector.broadcast %1185 : f32 to vector<8x128xf32>
    %1190 = arith.mulf %977, %1189 : vector<8x128xf32>
    %1191 = arith.addf %1184, %1190 : vector<8x128xf32>
    %c2_360 = arith.constant 2 : index
    %1192 = memref.load %arg9[%c2_360] : memref<3xf32, #tpu.memory_space<smem>>
    %1193 = vector.broadcast %1192 : f32 to vector<8x128xf32>
    %1194 = arith.addf %1188, %1193 : vector<8x128xf32>
    %1195 = vector.broadcast %1192 : f32 to vector<8x128xf32>
    %1196 = arith.addf %1191, %1195 : vector<8x128xf32>
    %1197 = arith.addf %1048, %1050 : vector<8x128xf32>
    %cst = arith.constant 5.000000e-01 : f32
    %1198 = vector.broadcast %cst : f32 to vector<8x128xf32>
    %1199 = arith.mulf %1198, %1197 : vector<8x128xf32>
    %1200 = math.exp %1121 : vector<8x128xf32>
    %1201 = math.exp %1123 : vector<8x128xf32>
    %1202 = arith.addf %1200, %1201 : vector<8x128xf32>
    %cst_361 = arith.constant 5.000000e-01 : f32
    %1203 = vector.broadcast %cst_361 : f32 to vector<8x128xf32>
    %1204 = arith.mulf %1203, %1202 : vector<8x128xf32>
    %1205 = math.exp %1194 : vector<8x128xf32>
    %1206 = math.exp %1196 : vector<8x128xf32>
    %1207 = arith.addf %1205, %1206 : vector<8x128xf32>
    %cst_362 = arith.constant 5.000000e-01 : f32
    %1208 = vector.broadcast %cst_362 : f32 to vector<8x128xf32>
    %1209 = arith.mulf %1208, %1207 : vector<8x128xf32>
    %c0_363 = arith.constant 0 : index
    %1210 = arith.index_cast %1 : i32 to index
    %c0_364 = arith.constant 0 : index
    %1211 = vector.load %arg10[%c0_363, %1210, %c0_364] : memref<3x16x128xf32, #tpu.memory_space<vmem>>, vector<1x8x128xf32>
    %1212 = vector.shape_cast %1211 : vector<1x8x128xf32> to vector<8x128xf32>
    %1213 = vector.shape_cast %1204 : vector<8x128xf32> to vector<1x8x128xf32>
    tpu.vector_store %arg10[%c0_363, %1210, %c0_364], %1213 {strides = array<i32>} : memref<3x16x128xf32, #tpu.memory_space<vmem>>, vector<1x8x128xf32>,
    %c1_365 = arith.constant 1 : index
    %1214 = arith.index_cast %1 : i32 to index
    %c0_366 = arith.constant 0 : index
    %1215 = vector.load %arg10[%c1_365, %1214, %c0_366] : memref<3x16x128xf32, #tpu.memory_space<vmem>>, vector<1x8x128xf32>
    %1216 = vector.shape_cast %1215 : vector<1x8x128xf32> to vector<8x128xf32>
    %1217 = vector.shape_cast %1199 : vector<8x128xf32> to vector<1x8x128xf32>
    tpu.vector_store %arg10[%c1_365, %1214, %c0_366], %1217 {strides = array<i32>} : memref<3x16x128xf32, #tpu.memory_space<vmem>>, vector<1x8x128xf32>,
    %c2_367 = arith.constant 2 : index
    %1218 = arith.index_cast %1 : i32 to index
    %c0_368 = arith.constant 0 : index
    %1219 = vector.load %arg10[%c2_367, %1218, %c0_368] : memref<3x16x128xf32, #tpu.memory_space<vmem>>, vector<1x8x128xf32>
    %1220 = vector.shape_cast %1219 : vector<1x8x128xf32> to vector<8x128xf32>
    %1221 = vector.shape_cast %1209 : vector<8x128xf32> to vector<1x8x128xf32>
    tpu.vector_store %arg10[%c2_367, %1218, %c0_368], %1221 {strides = array<i32>} : memref<3x16x128xf32, #tpu.memory_space<vmem>>, vector<1x8x128xf32>,
    %c1_i32 = arith.constant 1 : i32
    %c8_i32_369 = arith.constant 8 : i32
    %1222 = arith.muli %c1_i32, %c8_i32_369 : i32
    %1223 = tpu.assume_multiple %1222, 8 : i32
    %c0_370 = arith.constant 0 : index
    %1224 = arith.index_cast %1223 : i32 to index
    %c0_371 = arith.constant 0 : index
    %1225 = vector.load %arg1[%c0_370, %1224, %c0_371] : memref<2x16x128xf32, #tpu.memory_space<vmem>>, vector<1x8x128xf32>
    %1226 = vector.shape_cast %1225 : vector<1x8x128xf32> to vector<8x128xf32>
    %c1_372 = arith.constant 1 : index
    %1227 = arith.index_cast %1223 : i32 to index
    %c0_373 = arith.constant 0 : index
    %1228 = vector.load %arg1[%c1_372, %1227, %c0_373] : memref<2x16x128xf32, #tpu.memory_space<vmem>>, vector<1x8x128xf32>
    %1229 = vector.shape_cast %1228 : vector<1x8x128xf32> to vector<8x128xf32>
    %c0_374 = arith.constant 0 : index
    %1230 = arith.index_cast %1223 : i32 to index
    %c0_375 = arith.constant 0 : index
    %1231 = vector.load %arg2[%c0_374, %1230, %c0_375] : memref<2x16x128xf32, #tpu.memory_space<vmem>>, vector<1x8x128xf32>
    %1232 = vector.shape_cast %1231 : vector<1x8x128xf32> to vector<8x128xf32>
    %c1_376 = arith.constant 1 : index
    %1233 = arith.index_cast %1223 : i32 to index
    %c0_377 = arith.constant 0 : index
    %1234 = vector.load %arg2[%c1_376, %1233, %c0_377] : memref<2x16x128xf32, #tpu.memory_space<vmem>>, vector<1x8x128xf32>
    %1235 = vector.shape_cast %1234 : vector<1x8x128xf32> to vector<8x128xf32>
    %1236 = arith.addf %1226, %1232 : vector<8x128xf32>
    %1237 = arith.addf %1229, %1235 : vector<8x128xf32>
    %1238 = arith.subf %1226, %1232 : vector<8x128xf32>
    %1239 = arith.subf %1229, %1235 : vector<8x128xf32>
    %c0_378 = arith.constant 0 : index
    %c0_379 = arith.constant 0 : index
    %1240 = memref.load %arg3[%c0_378, %c0_379] : memref<2x10xf32, #tpu.memory_space<smem>>
    %1241 = vector.broadcast %1240 : f32 to vector<8x128xf32>
    %1242 = arith.mulf %1236, %1241 : vector<8x128xf32>
    %c1_380 = arith.constant 1 : index
    %c0_381 = arith.constant 0 : index
    %1243 = memref.load %arg3[%c1_380, %c0_381] : memref<2x10xf32, #tpu.memory_space<smem>>
    %1244 = vector.broadcast %1243 : f32 to vector<8x128xf32>
    %1245 = arith.mulf %1237, %1244 : vector<8x128xf32>
    %1246 = arith.addf %1242, %1245 : vector<8x128xf32>
    %c0_382 = arith.constant 0 : index
    %1247 = memref.load %arg5[%c0_382] : memref<10xf32, #tpu.memory_space<smem>>
    %1248 = vector.broadcast %1247 : f32 to vector<8x128xf32>
    %1249 = arith.addf %1246, %1248 : vector<8x128xf32>
    %c0_383 = arith.constant 0 : index
    %c0_384 = arith.constant 0 : index
    %1250 = memref.load %arg4[%c0_383, %c0_384] : memref<2x10xf32, #tpu.memory_space<smem>>
    %1251 = vector.broadcast %1250 : f32 to vector<8x128xf32>
    %1252 = arith.mulf %1238, %1251 : vector<8x128xf32>
    %c1_385 = arith.constant 1 : index
    %c0_386 = arith.constant 0 : index
    %1253 = memref.load %arg4[%c1_385, %c0_386] : memref<2x10xf32, #tpu.memory_space<smem>>
    %1254 = vector.broadcast %1253 : f32 to vector<8x128xf32>
    %1255 = arith.mulf %1239, %1254 : vector<8x128xf32>
    %1256 = arith.addf %1252, %1255 : vector<8x128xf32>
    %1257 = arith.addf %1249, %1256 : vector<8x128xf32>
    %1258 = math.tanh %1257 : vector<8x128xf32>
    %1259 = arith.subf %1249, %1256 : vector<8x128xf32>
    %1260 = math.tanh %1259 : vector<8x128xf32>
    %c0_387 = arith.constant 0 : index
    %c1_388 = arith.constant 1 : index
    %1261 = memref.load %arg3[%c0_387, %c1_388] : memref<2x10xf32, #tpu.memory_space<smem>>
    %1262 = vector.broadcast %1261 : f32 to vector<8x128xf32>
    %1263 = arith.mulf %1236, %1262 : vector<8x128xf32>
    %c1_389 = arith.constant 1 : index
    %c1_390 = arith.constant 1 : index
    %1264 = memref.load %arg3[%c1_389, %c1_390] : memref<2x10xf32, #tpu.memory_space<smem>>
    %1265 = vector.broadcast %1264 : f32 to vector<8x128xf32>
    %1266 = arith.mulf %1237, %1265 : vector<8x128xf32>
    %1267 = arith.addf %1263, %1266 : vector<8x128xf32>
    %c1_391 = arith.constant 1 : index
    %1268 = memref.load %arg5[%c1_391] : memref<10xf32, #tpu.memory_space<smem>>
    %1269 = vector.broadcast %1268 : f32 to vector<8x128xf32>
    %1270 = arith.addf %1267, %1269 : vector<8x128xf32>
    %c0_392 = arith.constant 0 : index
    %c1_393 = arith.constant 1 : index
    %1271 = memref.load %arg4[%c0_392, %c1_393] : memref<2x10xf32, #tpu.memory_space<smem>>
    %1272 = vector.broadcast %1271 : f32 to vector<8x128xf32>
    %1273 = arith.mulf %1238, %1272 : vector<8x128xf32>
    %c1_394 = arith.constant 1 : index
    %c1_395 = arith.constant 1 : index
    %1274 = memref.load %arg4[%c1_394, %c1_395] : memref<2x10xf32, #tpu.memory_space<smem>>
    %1275 = vector.broadcast %1274 : f32 to vector<8x128xf32>
    %1276 = arith.mulf %1239, %1275 : vector<8x128xf32>
    %1277 = arith.addf %1273, %1276 : vector<8x128xf32>
    %1278 = arith.addf %1270, %1277 : vector<8x128xf32>
    %1279 = math.tanh %1278 : vector<8x128xf32>
    %1280 = arith.subf %1270, %1277 : vector<8x128xf32>
    %1281 = math.tanh %1280 : vector<8x128xf32>
    %c0_396 = arith.constant 0 : index
    %c2_397 = arith.constant 2 : index
    %1282 = memref.load %arg3[%c0_396, %c2_397] : memref<2x10xf32, #tpu.memory_space<smem>>
    %1283 = vector.broadcast %1282 : f32 to vector<8x128xf32>
    %1284 = arith.mulf %1236, %1283 : vector<8x128xf32>
    %c1_398 = arith.constant 1 : index
    %c2_399 = arith.constant 2 : index
    %1285 = memref.load %arg3[%c1_398, %c2_399] : memref<2x10xf32, #tpu.memory_space<smem>>
    %1286 = vector.broadcast %1285 : f32 to vector<8x128xf32>
    %1287 = arith.mulf %1237, %1286 : vector<8x128xf32>
    %1288 = arith.addf %1284, %1287 : vector<8x128xf32>
    %c2_400 = arith.constant 2 : index
    %1289 = memref.load %arg5[%c2_400] : memref<10xf32, #tpu.memory_space<smem>>
    %1290 = vector.broadcast %1289 : f32 to vector<8x128xf32>
    %1291 = arith.addf %1288, %1290 : vector<8x128xf32>
    %c0_401 = arith.constant 0 : index
    %c2_402 = arith.constant 2 : index
    %1292 = memref.load %arg4[%c0_401, %c2_402] : memref<2x10xf32, #tpu.memory_space<smem>>
    %1293 = vector.broadcast %1292 : f32 to vector<8x128xf32>
    %1294 = arith.mulf %1238, %1293 : vector<8x128xf32>
    %c1_403 = arith.constant 1 : index
    %c2_404 = arith.constant 2 : index
    %1295 = memref.load %arg4[%c1_403, %c2_404] : memref<2x10xf32, #tpu.memory_space<smem>>
    %1296 = vector.broadcast %1295 : f32 to vector<8x128xf32>
    %1297 = arith.mulf %1239, %1296 : vector<8x128xf32>
    %1298 = arith.addf %1294, %1297 : vector<8x128xf32>
    %1299 = arith.addf %1291, %1298 : vector<8x128xf32>
    %1300 = math.tanh %1299 : vector<8x128xf32>
    %1301 = arith.subf %1291, %1298 : vector<8x128xf32>
    %1302 = math.tanh %1301 : vector<8x128xf32>
    %c0_405 = arith.constant 0 : index
    %c3_406 = arith.constant 3 : index
    %1303 = memref.load %arg3[%c0_405, %c3_406] : memref<2x10xf32, #tpu.memory_space<smem>>
    %1304 = vector.broadcast %1303 : f32 to vector<8x128xf32>
    %1305 = arith.mulf %1236, %1304 : vector<8x128xf32>
    %c1_407 = arith.constant 1 : index
    %c3_408 = arith.constant 3 : index
    %1306 = memref.load %arg3[%c1_407, %c3_408] : memref<2x10xf32, #tpu.memory_space<smem>>
    %1307 = vector.broadcast %1306 : f32 to vector<8x128xf32>
    %1308 = arith.mulf %1237, %1307 : vector<8x128xf32>
    %1309 = arith.addf %1305, %1308 : vector<8x128xf32>
    %c3_409 = arith.constant 3 : index
    %1310 = memref.load %arg5[%c3_409] : memref<10xf32, #tpu.memory_space<smem>>
    %1311 = vector.broadcast %1310 : f32 to vector<8x128xf32>
    %1312 = arith.addf %1309, %1311 : vector<8x128xf32>
    %c0_410 = arith.constant 0 : index
    %c3_411 = arith.constant 3 : index
    %1313 = memref.load %arg4[%c0_410, %c3_411] : memref<2x10xf32, #tpu.memory_space<smem>>
    %1314 = vector.broadcast %1313 : f32 to vector<8x128xf32>
    %1315 = arith.mulf %1238, %1314 : vector<8x128xf32>
    %c1_412 = arith.constant 1 : index
    %c3_413 = arith.constant 3 : index
    %1316 = memref.load %arg4[%c1_412, %c3_413] : memref<2x10xf32, #tpu.memory_space<smem>>
    %1317 = vector.broadcast %1316 : f32 to vector<8x128xf32>
    %1318 = arith.mulf %1239, %1317 : vector<8x128xf32>
    %1319 = arith.addf %1315, %1318 : vector<8x128xf32>
    %1320 = arith.addf %1312, %1319 : vector<8x128xf32>
    %1321 = math.tanh %1320 : vector<8x128xf32>
    %1322 = arith.subf %1312, %1319 : vector<8x128xf32>
    %1323 = math.tanh %1322 : vector<8x128xf32>
    %c0_414 = arith.constant 0 : index
    %c4_415 = arith.constant 4 : index
    %1324 = memref.load %arg3[%c0_414, %c4_415] : memref<2x10xf32, #tpu.memory_space<smem>>
    %1325 = vector.broadcast %1324 : f32 to vector<8x128xf32>
    %1326 = arith.mulf %1236, %1325 : vector<8x128xf32>
    %c1_416 = arith.constant 1 : index
    %c4_417 = arith.constant 4 : index
    %1327 = memref.load %arg3[%c1_416, %c4_417] : memref<2x10xf32, #tpu.memory_space<smem>>
    %1328 = vector.broadcast %1327 : f32 to vector<8x128xf32>
    %1329 = arith.mulf %1237, %1328 : vector<8x128xf32>
    %1330 = arith.addf %1326, %1329 : vector<8x128xf32>
    %c4_418 = arith.constant 4 : index
    %1331 = memref.load %arg5[%c4_418] : memref<10xf32, #tpu.memory_space<smem>>
    %1332 = vector.broadcast %1331 : f32 to vector<8x128xf32>
    %1333 = arith.addf %1330, %1332 : vector<8x128xf32>
    %c0_419 = arith.constant 0 : index
    %c4_420 = arith.constant 4 : index
    %1334 = memref.load %arg4[%c0_419, %c4_420] : memref<2x10xf32, #tpu.memory_space<smem>>
    %1335 = vector.broadcast %1334 : f32 to vector<8x128xf32>
    %1336 = arith.mulf %1238, %1335 : vector<8x128xf32>
    %c1_421 = arith.constant 1 : index
    %c4_422 = arith.constant 4 : index
    %1337 = memref.load %arg4[%c1_421, %c4_422] : memref<2x10xf32, #tpu.memory_space<smem>>
    %1338 = vector.broadcast %1337 : f32 to vector<8x128xf32>
    %1339 = arith.mulf %1239, %1338 : vector<8x128xf32>
    %1340 = arith.addf %1336, %1339 : vector<8x128xf32>
    %1341 = arith.addf %1333, %1340 : vector<8x128xf32>
    %1342 = math.tanh %1341 : vector<8x128xf32>
    %1343 = arith.subf %1333, %1340 : vector<8x128xf32>
    %1344 = math.tanh %1343 : vector<8x128xf32>
    %c0_423 = arith.constant 0 : index
    %c5_424 = arith.constant 5 : index
    %1345 = memref.load %arg3[%c0_423, %c5_424] : memref<2x10xf32, #tpu.memory_space<smem>>
    %1346 = vector.broadcast %1345 : f32 to vector<8x128xf32>
    %1347 = arith.mulf %1236, %1346 : vector<8x128xf32>
    %c1_425 = arith.constant 1 : index
    %c5_426 = arith.constant 5 : index
    %1348 = memref.load %arg3[%c1_425, %c5_426] : memref<2x10xf32, #tpu.memory_space<smem>>
    %1349 = vector.broadcast %1348 : f32 to vector<8x128xf32>
    %1350 = arith.mulf %1237, %1349 : vector<8x128xf32>
    %1351 = arith.addf %1347, %1350 : vector<8x128xf32>
    %c5_427 = arith.constant 5 : index
    %1352 = memref.load %arg5[%c5_427] : memref<10xf32, #tpu.memory_space<smem>>
    %1353 = vector.broadcast %1352 : f32 to vector<8x128xf32>
    %1354 = arith.addf %1351, %1353 : vector<8x128xf32>
    %c0_428 = arith.constant 0 : index
    %c5_429 = arith.constant 5 : index
    %1355 = memref.load %arg4[%c0_428, %c5_429] : memref<2x10xf32, #tpu.memory_space<smem>>
    %1356 = vector.broadcast %1355 : f32 to vector<8x128xf32>
    %1357 = arith.mulf %1238, %1356 : vector<8x128xf32>
    %c1_430 = arith.constant 1 : index
    %c5_431 = arith.constant 5 : index
    %1358 = memref.load %arg4[%c1_430, %c5_431] : memref<2x10xf32, #tpu.memory_space<smem>>
    %1359 = vector.broadcast %1358 : f32 to vector<8x128xf32>
    %1360 = arith.mulf %1239, %1359 : vector<8x128xf32>
    %1361 = arith.addf %1357, %1360 : vector<8x128xf32>
    %1362 = arith.addf %1354, %1361 : vector<8x128xf32>
    %1363 = math.tanh %1362 : vector<8x128xf32>
    %1364 = arith.subf %1354, %1361 : vector<8x128xf32>
    %1365 = math.tanh %1364 : vector<8x128xf32>
    %c0_432 = arith.constant 0 : index
    %c6_433 = arith.constant 6 : index
    %1366 = memref.load %arg3[%c0_432, %c6_433] : memref<2x10xf32, #tpu.memory_space<smem>>
    %1367 = vector.broadcast %1366 : f32 to vector<8x128xf32>
    %1368 = arith.mulf %1236, %1367 : vector<8x128xf32>
    %c1_434 = arith.constant 1 : index
    %c6_435 = arith.constant 6 : index
    %1369 = memref.load %arg3[%c1_434, %c6_435] : memref<2x10xf32, #tpu.memory_space<smem>>
    %1370 = vector.broadcast %1369 : f32 to vector<8x128xf32>
    %1371 = arith.mulf %1237, %1370 : vector<8x128xf32>
    %1372 = arith.addf %1368, %1371 : vector<8x128xf32>
    %c6_436 = arith.constant 6 : index
    %1373 = memref.load %arg5[%c6_436] : memref<10xf32, #tpu.memory_space<smem>>
    %1374 = vector.broadcast %1373 : f32 to vector<8x128xf32>
    %1375 = arith.addf %1372, %1374 : vector<8x128xf32>
    %c0_437 = arith.constant 0 : index
    %c6_438 = arith.constant 6 : index
    %1376 = memref.load %arg4[%c0_437, %c6_438] : memref<2x10xf32, #tpu.memory_space<smem>>
    %1377 = vector.broadcast %1376 : f32 to vector<8x128xf32>
    %1378 = arith.mulf %1238, %1377 : vector<8x128xf32>
    %c1_439 = arith.constant 1 : index
    %c6_440 = arith.constant 6 : index
    %1379 = memref.load %arg4[%c1_439, %c6_440] : memref<2x10xf32, #tpu.memory_space<smem>>
    %1380 = vector.broadcast %1379 : f32 to vector<8x128xf32>
    %1381 = arith.mulf %1239, %1380 : vector<8x128xf32>
    %1382 = arith.addf %1378, %1381 : vector<8x128xf32>
    %1383 = arith.addf %1375, %1382 : vector<8x128xf32>
    %1384 = math.tanh %1383 : vector<8x128xf32>
    %1385 = arith.subf %1375, %1382 : vector<8x128xf32>
    %1386 = math.tanh %1385 : vector<8x128xf32>
    %c0_441 = arith.constant 0 : index
    %c7_442 = arith.constant 7 : index
    %1387 = memref.load %arg3[%c0_441, %c7_442] : memref<2x10xf32, #tpu.memory_space<smem>>
    %1388 = vector.broadcast %1387 : f32 to vector<8x128xf32>
    %1389 = arith.mulf %1236, %1388 : vector<8x128xf32>
    %c1_443 = arith.constant 1 : index
    %c7_444 = arith.constant 7 : index
    %1390 = memref.load %arg3[%c1_443, %c7_444] : memref<2x10xf32, #tpu.memory_space<smem>>
    %1391 = vector.broadcast %1390 : f32 to vector<8x128xf32>
    %1392 = arith.mulf %1237, %1391 : vector<8x128xf32>
    %1393 = arith.addf %1389, %1392 : vector<8x128xf32>
    %c7_445 = arith.constant 7 : index
    %1394 = memref.load %arg5[%c7_445] : memref<10xf32, #tpu.memory_space<smem>>
    %1395 = vector.broadcast %1394 : f32 to vector<8x128xf32>
    %1396 = arith.addf %1393, %1395 : vector<8x128xf32>
    %c0_446 = arith.constant 0 : index
    %c7_447 = arith.constant 7 : index
    %1397 = memref.load %arg4[%c0_446, %c7_447] : memref<2x10xf32, #tpu.memory_space<smem>>
    %1398 = vector.broadcast %1397 : f32 to vector<8x128xf32>
    %1399 = arith.mulf %1238, %1398 : vector<8x128xf32>
    %c1_448 = arith.constant 1 : index
    %c7_449 = arith.constant 7 : index
    %1400 = memref.load %arg4[%c1_448, %c7_449] : memref<2x10xf32, #tpu.memory_space<smem>>
    %1401 = vector.broadcast %1400 : f32 to vector<8x128xf32>
    %1402 = arith.mulf %1239, %1401 : vector<8x128xf32>
    %1403 = arith.addf %1399, %1402 : vector<8x128xf32>
    %1404 = arith.addf %1396, %1403 : vector<8x128xf32>
    %1405 = math.tanh %1404 : vector<8x128xf32>
    %1406 = arith.subf %1396, %1403 : vector<8x128xf32>
    %1407 = math.tanh %1406 : vector<8x128xf32>
    %c0_450 = arith.constant 0 : index
    %c8_451 = arith.constant 8 : index
    %1408 = memref.load %arg3[%c0_450, %c8_451] : memref<2x10xf32, #tpu.memory_space<smem>>
    %1409 = vector.broadcast %1408 : f32 to vector<8x128xf32>
    %1410 = arith.mulf %1236, %1409 : vector<8x128xf32>
    %c1_452 = arith.constant 1 : index
    %c8_453 = arith.constant 8 : index
    %1411 = memref.load %arg3[%c1_452, %c8_453] : memref<2x10xf32, #tpu.memory_space<smem>>
    %1412 = vector.broadcast %1411 : f32 to vector<8x128xf32>
    %1413 = arith.mulf %1237, %1412 : vector<8x128xf32>
    %1414 = arith.addf %1410, %1413 : vector<8x128xf32>
    %c8_454 = arith.constant 8 : index
    %1415 = memref.load %arg5[%c8_454] : memref<10xf32, #tpu.memory_space<smem>>
    %1416 = vector.broadcast %1415 : f32 to vector<8x128xf32>
    %1417 = arith.addf %1414, %1416 : vector<8x128xf32>
    %c0_455 = arith.constant 0 : index
    %c8_456 = arith.constant 8 : index
    %1418 = memref.load %arg4[%c0_455, %c8_456] : memref<2x10xf32, #tpu.memory_space<smem>>
    %1419 = vector.broadcast %1418 : f32 to vector<8x128xf32>
    %1420 = arith.mulf %1238, %1419 : vector<8x128xf32>
    %c1_457 = arith.constant 1 : index
    %c8_458 = arith.constant 8 : index
    %1421 = memref.load %arg4[%c1_457, %c8_458] : memref<2x10xf32, #tpu.memory_space<smem>>
    %1422 = vector.broadcast %1421 : f32 to vector<8x128xf32>
    %1423 = arith.mulf %1239, %1422 : vector<8x128xf32>
    %1424 = arith.addf %1420, %1423 : vector<8x128xf32>
    %1425 = arith.addf %1417, %1424 : vector<8x128xf32>
    %1426 = math.tanh %1425 : vector<8x128xf32>
    %1427 = arith.subf %1417, %1424 : vector<8x128xf32>
    %1428 = math.tanh %1427 : vector<8x128xf32>
    %c0_459 = arith.constant 0 : index
    %c9_460 = arith.constant 9 : index
    %1429 = memref.load %arg3[%c0_459, %c9_460] : memref<2x10xf32, #tpu.memory_space<smem>>
    %1430 = vector.broadcast %1429 : f32 to vector<8x128xf32>
    %1431 = arith.mulf %1236, %1430 : vector<8x128xf32>
    %c1_461 = arith.constant 1 : index
    %c9_462 = arith.constant 9 : index
    %1432 = memref.load %arg3[%c1_461, %c9_462] : memref<2x10xf32, #tpu.memory_space<smem>>
    %1433 = vector.broadcast %1432 : f32 to vector<8x128xf32>
    %1434 = arith.mulf %1237, %1433 : vector<8x128xf32>
    %1435 = arith.addf %1431, %1434 : vector<8x128xf32>
    %c9_463 = arith.constant 9 : index
    %1436 = memref.load %arg5[%c9_463] : memref<10xf32, #tpu.memory_space<smem>>
    %1437 = vector.broadcast %1436 : f32 to vector<8x128xf32>
    %1438 = arith.addf %1435, %1437 : vector<8x128xf32>
    %c0_464 = arith.constant 0 : index
    %c9_465 = arith.constant 9 : index
    %1439 = memref.load %arg4[%c0_464, %c9_465] : memref<2x10xf32, #tpu.memory_space<smem>>
    %1440 = vector.broadcast %1439 : f32 to vector<8x128xf32>
    %1441 = arith.mulf %1238, %1440 : vector<8x128xf32>
    %c1_466 = arith.constant 1 : index
    %c9_467 = arith.constant 9 : index
    %1442 = memref.load %arg4[%c1_466, %c9_467] : memref<2x10xf32, #tpu.memory_space<smem>>
    %1443 = vector.broadcast %1442 : f32 to vector<8x128xf32>
    %1444 = arith.mulf %1239, %1443 : vector<8x128xf32>
    %1445 = arith.addf %1441, %1444 : vector<8x128xf32>
    %1446 = arith.addf %1438, %1445 : vector<8x128xf32>
    %1447 = math.tanh %1446 : vector<8x128xf32>
    %1448 = arith.subf %1438, %1445 : vector<8x128xf32>
    %1449 = math.tanh %1448 : vector<8x128xf32>
    %c0_468 = arith.constant 0 : index
    %c0_469 = arith.constant 0 : index
    %1450 = memref.load %arg6[%c0_468, %c0_469] : memref<10x10xf32, #tpu.memory_space<smem>>
    %1451 = vector.broadcast %1450 : f32 to vector<8x128xf32>
    %1452 = arith.mulf %1258, %1451 : vector<8x128xf32>
    %1453 = vector.broadcast %1450 : f32 to vector<8x128xf32>
    %1454 = arith.mulf %1260, %1453 : vector<8x128xf32>
    %c1_470 = arith.constant 1 : index
    %c0_471 = arith.constant 0 : index
    %1455 = memref.load %arg6[%c1_470, %c0_471] : memref<10x10xf32, #tpu.memory_space<smem>>
    %1456 = vector.broadcast %1455 : f32 to vector<8x128xf32>
    %1457 = arith.mulf %1279, %1456 : vector<8x128xf32>
    %1458 = arith.addf %1452, %1457 : vector<8x128xf32>
    %1459 = vector.broadcast %1455 : f32 to vector<8x128xf32>
    %1460 = arith.mulf %1281, %1459 : vector<8x128xf32>
    %1461 = arith.addf %1454, %1460 : vector<8x128xf32>
    %c2_472 = arith.constant 2 : index
    %c0_473 = arith.constant 0 : index
    %1462 = memref.load %arg6[%c2_472, %c0_473] : memref<10x10xf32, #tpu.memory_space<smem>>
    %1463 = vector.broadcast %1462 : f32 to vector<8x128xf32>
    %1464 = arith.mulf %1300, %1463 : vector<8x128xf32>
    %1465 = arith.addf %1458, %1464 : vector<8x128xf32>
    %1466 = vector.broadcast %1462 : f32 to vector<8x128xf32>
    %1467 = arith.mulf %1302, %1466 : vector<8x128xf32>
    %1468 = arith.addf %1461, %1467 : vector<8x128xf32>
    %c3_474 = arith.constant 3 : index
    %c0_475 = arith.constant 0 : index
    %1469 = memref.load %arg6[%c3_474, %c0_475] : memref<10x10xf32, #tpu.memory_space<smem>>
    %1470 = vector.broadcast %1469 : f32 to vector<8x128xf32>
    %1471 = arith.mulf %1321, %1470 : vector<8x128xf32>
    %1472 = arith.addf %1465, %1471 : vector<8x128xf32>
    %1473 = vector.broadcast %1469 : f32 to vector<8x128xf32>
    %1474 = arith.mulf %1323, %1473 : vector<8x128xf32>
    %1475 = arith.addf %1468, %1474 : vector<8x128xf32>
    %c4_476 = arith.constant 4 : index
    %c0_477 = arith.constant 0 : index
    %1476 = memref.load %arg6[%c4_476, %c0_477] : memref<10x10xf32, #tpu.memory_space<smem>>
    %1477 = vector.broadcast %1476 : f32 to vector<8x128xf32>
    %1478 = arith.mulf %1342, %1477 : vector<8x128xf32>
    %1479 = arith.addf %1472, %1478 : vector<8x128xf32>
    %1480 = vector.broadcast %1476 : f32 to vector<8x128xf32>
    %1481 = arith.mulf %1344, %1480 : vector<8x128xf32>
    %1482 = arith.addf %1475, %1481 : vector<8x128xf32>
    %c5_478 = arith.constant 5 : index
    %c0_479 = arith.constant 0 : index
    %1483 = memref.load %arg6[%c5_478, %c0_479] : memref<10x10xf32, #tpu.memory_space<smem>>
    %1484 = vector.broadcast %1483 : f32 to vector<8x128xf32>
    %1485 = arith.mulf %1363, %1484 : vector<8x128xf32>
    %1486 = arith.addf %1479, %1485 : vector<8x128xf32>
    %1487 = vector.broadcast %1483 : f32 to vector<8x128xf32>
    %1488 = arith.mulf %1365, %1487 : vector<8x128xf32>
    %1489 = arith.addf %1482, %1488 : vector<8x128xf32>
    %c6_480 = arith.constant 6 : index
    %c0_481 = arith.constant 0 : index
    %1490 = memref.load %arg6[%c6_480, %c0_481] : memref<10x10xf32, #tpu.memory_space<smem>>
    %1491 = vector.broadcast %1490 : f32 to vector<8x128xf32>
    %1492 = arith.mulf %1384, %1491 : vector<8x128xf32>
    %1493 = arith.addf %1486, %1492 : vector<8x128xf32>
    %1494 = vector.broadcast %1490 : f32 to vector<8x128xf32>
    %1495 = arith.mulf %1386, %1494 : vector<8x128xf32>
    %1496 = arith.addf %1489, %1495 : vector<8x128xf32>
    %c7_482 = arith.constant 7 : index
    %c0_483 = arith.constant 0 : index
    %1497 = memref.load %arg6[%c7_482, %c0_483] : memref<10x10xf32, #tpu.memory_space<smem>>
    %1498 = vector.broadcast %1497 : f32 to vector<8x128xf32>
    %1499 = arith.mulf %1405, %1498 : vector<8x128xf32>
    %1500 = arith.addf %1493, %1499 : vector<8x128xf32>
    %1501 = vector.broadcast %1497 : f32 to vector<8x128xf32>
    %1502 = arith.mulf %1407, %1501 : vector<8x128xf32>
    %1503 = arith.addf %1496, %1502 : vector<8x128xf32>
    %c8_484 = arith.constant 8 : index
    %c0_485 = arith.constant 0 : index
    %1504 = memref.load %arg6[%c8_484, %c0_485] : memref<10x10xf32, #tpu.memory_space<smem>>
    %1505 = vector.broadcast %1504 : f32 to vector<8x128xf32>
    %1506 = arith.mulf %1426, %1505 : vector<8x128xf32>
    %1507 = arith.addf %1500, %1506 : vector<8x128xf32>
    %1508 = vector.broadcast %1504 : f32 to vector<8x128xf32>
    %1509 = arith.mulf %1428, %1508 : vector<8x128xf32>
    %1510 = arith.addf %1503, %1509 : vector<8x128xf32>
    %c9_486 = arith.constant 9 : index
    %c0_487 = arith.constant 0 : index
    %1511 = memref.load %arg6[%c9_486, %c0_487] : memref<10x10xf32, #tpu.memory_space<smem>>
    %1512 = vector.broadcast %1511 : f32 to vector<8x128xf32>
    %1513 = arith.mulf %1447, %1512 : vector<8x128xf32>
    %1514 = arith.addf %1507, %1513 : vector<8x128xf32>
    %1515 = vector.broadcast %1511 : f32 to vector<8x128xf32>
    %1516 = arith.mulf %1449, %1515 : vector<8x128xf32>
    %1517 = arith.addf %1510, %1516 : vector<8x128xf32>
    %c0_488 = arith.constant 0 : index
    %1518 = memref.load %arg7[%c0_488] : memref<10xf32, #tpu.memory_space<smem>>
    %1519 = vector.broadcast %1518 : f32 to vector<8x128xf32>
    %1520 = arith.addf %1514, %1519 : vector<8x128xf32>
    %1521 = vector.broadcast %1518 : f32 to vector<8x128xf32>
    %1522 = arith.addf %1517, %1521 : vector<8x128xf32>
    %1523 = math.tanh %1520 : vector<8x128xf32>
    %1524 = math.tanh %1522 : vector<8x128xf32>
    %c0_489 = arith.constant 0 : index
    %c1_490 = arith.constant 1 : index
    %1525 = memref.load %arg6[%c0_489, %c1_490] : memref<10x10xf32, #tpu.memory_space<smem>>
    %1526 = vector.broadcast %1525 : f32 to vector<8x128xf32>
    %1527 = arith.mulf %1258, %1526 : vector<8x128xf32>
    %1528 = vector.broadcast %1525 : f32 to vector<8x128xf32>
    %1529 = arith.mulf %1260, %1528 : vector<8x128xf32>
    %c1_491 = arith.constant 1 : index
    %c1_492 = arith.constant 1 : index
    %1530 = memref.load %arg6[%c1_491, %c1_492] : memref<10x10xf32, #tpu.memory_space<smem>>
    %1531 = vector.broadcast %1530 : f32 to vector<8x128xf32>
    %1532 = arith.mulf %1279, %1531 : vector<8x128xf32>
    %1533 = arith.addf %1527, %1532 : vector<8x128xf32>
    %1534 = vector.broadcast %1530 : f32 to vector<8x128xf32>
    %1535 = arith.mulf %1281, %1534 : vector<8x128xf32>
    %1536 = arith.addf %1529, %1535 : vector<8x128xf32>
    %c2_493 = arith.constant 2 : index
    %c1_494 = arith.constant 1 : index
    %1537 = memref.load %arg6[%c2_493, %c1_494] : memref<10x10xf32, #tpu.memory_space<smem>>
    %1538 = vector.broadcast %1537 : f32 to vector<8x128xf32>
    %1539 = arith.mulf %1300, %1538 : vector<8x128xf32>
    %1540 = arith.addf %1533, %1539 : vector<8x128xf32>
    %1541 = vector.broadcast %1537 : f32 to vector<8x128xf32>
    %1542 = arith.mulf %1302, %1541 : vector<8x128xf32>
    %1543 = arith.addf %1536, %1542 : vector<8x128xf32>
    %c3_495 = arith.constant 3 : index
    %c1_496 = arith.constant 1 : index
    %1544 = memref.load %arg6[%c3_495, %c1_496] : memref<10x10xf32, #tpu.memory_space<smem>>
    %1545 = vector.broadcast %1544 : f32 to vector<8x128xf32>
    %1546 = arith.mulf %1321, %1545 : vector<8x128xf32>
    %1547 = arith.addf %1540, %1546 : vector<8x128xf32>
    %1548 = vector.broadcast %1544 : f32 to vector<8x128xf32>
    %1549 = arith.mulf %1323, %1548 : vector<8x128xf32>
    %1550 = arith.addf %1543, %1549 : vector<8x128xf32>
    %c4_497 = arith.constant 4 : index
    %c1_498 = arith.constant 1 : index
    %1551 = memref.load %arg6[%c4_497, %c1_498] : memref<10x10xf32, #tpu.memory_space<smem>>
    %1552 = vector.broadcast %1551 : f32 to vector<8x128xf32>
    %1553 = arith.mulf %1342, %1552 : vector<8x128xf32>
    %1554 = arith.addf %1547, %1553 : vector<8x128xf32>
    %1555 = vector.broadcast %1551 : f32 to vector<8x128xf32>
    %1556 = arith.mulf %1344, %1555 : vector<8x128xf32>
    %1557 = arith.addf %1550, %1556 : vector<8x128xf32>
    %c5_499 = arith.constant 5 : index
    %c1_500 = arith.constant 1 : index
    %1558 = memref.load %arg6[%c5_499, %c1_500] : memref<10x10xf32, #tpu.memory_space<smem>>
    %1559 = vector.broadcast %1558 : f32 to vector<8x128xf32>
    %1560 = arith.mulf %1363, %1559 : vector<8x128xf32>
    %1561 = arith.addf %1554, %1560 : vector<8x128xf32>
    %1562 = vector.broadcast %1558 : f32 to vector<8x128xf32>
    %1563 = arith.mulf %1365, %1562 : vector<8x128xf32>
    %1564 = arith.addf %1557, %1563 : vector<8x128xf32>
    %c6_501 = arith.constant 6 : index
    %c1_502 = arith.constant 1 : index
    %1565 = memref.load %arg6[%c6_501, %c1_502] : memref<10x10xf32, #tpu.memory_space<smem>>
    %1566 = vector.broadcast %1565 : f32 to vector<8x128xf32>
    %1567 = arith.mulf %1384, %1566 : vector<8x128xf32>
    %1568 = arith.addf %1561, %1567 : vector<8x128xf32>
    %1569 = vector.broadcast %1565 : f32 to vector<8x128xf32>
    %1570 = arith.mulf %1386, %1569 : vector<8x128xf32>
    %1571 = arith.addf %1564, %1570 : vector<8x128xf32>
    %c7_503 = arith.constant 7 : index
    %c1_504 = arith.constant 1 : index
    %1572 = memref.load %arg6[%c7_503, %c1_504] : memref<10x10xf32, #tpu.memory_space<smem>>
    %1573 = vector.broadcast %1572 : f32 to vector<8x128xf32>
    %1574 = arith.mulf %1405, %1573 : vector<8x128xf32>
    %1575 = arith.addf %1568, %1574 : vector<8x128xf32>
    %1576 = vector.broadcast %1572 : f32 to vector<8x128xf32>
    %1577 = arith.mulf %1407, %1576 : vector<8x128xf32>
    %1578 = arith.addf %1571, %1577 : vector<8x128xf32>
    %c8_505 = arith.constant 8 : index
    %c1_506 = arith.constant 1 : index
    %1579 = memref.load %arg6[%c8_505, %c1_506] : memref<10x10xf32, #tpu.memory_space<smem>>
    %1580 = vector.broadcast %1579 : f32 to vector<8x128xf32>
    %1581 = arith.mulf %1426, %1580 : vector<8x128xf32>
    %1582 = arith.addf %1575, %1581 : vector<8x128xf32>
    %1583 = vector.broadcast %1579 : f32 to vector<8x128xf32>
    %1584 = arith.mulf %1428, %1583 : vector<8x128xf32>
    %1585 = arith.addf %1578, %1584 : vector<8x128xf32>
    %c9_507 = arith.constant 9 : index
    %c1_508 = arith.constant 1 : index
    %1586 = memref.load %arg6[%c9_507, %c1_508] : memref<10x10xf32, #tpu.memory_space<smem>>
    %1587 = vector.broadcast %1586 : f32 to vector<8x128xf32>
    %1588 = arith.mulf %1447, %1587 : vector<8x128xf32>
    %1589 = arith.addf %1582, %1588 : vector<8x128xf32>
    %1590 = vector.broadcast %1586 : f32 to vector<8x128xf32>
    %1591 = arith.mulf %1449, %1590 : vector<8x128xf32>
    %1592 = arith.addf %1585, %1591 : vector<8x128xf32>
    %c1_509 = arith.constant 1 : index
    %1593 = memref.load %arg7[%c1_509] : memref<10xf32, #tpu.memory_space<smem>>
    %1594 = vector.broadcast %1593 : f32 to vector<8x128xf32>
    %1595 = arith.addf %1589, %1594 : vector<8x128xf32>
    %1596 = vector.broadcast %1593 : f32 to vector<8x128xf32>
    %1597 = arith.addf %1592, %1596 : vector<8x128xf32>
    %1598 = math.tanh %1595 : vector<8x128xf32>
    %1599 = math.tanh %1597 : vector<8x128xf32>
    %c0_510 = arith.constant 0 : index
    %c2_511 = arith.constant 2 : index
    %1600 = memref.load %arg6[%c0_510, %c2_511] : memref<10x10xf32, #tpu.memory_space<smem>>
    %1601 = vector.broadcast %1600 : f32 to vector<8x128xf32>
    %1602 = arith.mulf %1258, %1601 : vector<8x128xf32>
    %1603 = vector.broadcast %1600 : f32 to vector<8x128xf32>
    %1604 = arith.mulf %1260, %1603 : vector<8x128xf32>
    %c1_512 = arith.constant 1 : index
    %c2_513 = arith.constant 2 : index
    %1605 = memref.load %arg6[%c1_512, %c2_513] : memref<10x10xf32, #tpu.memory_space<smem>>
    %1606 = vector.broadcast %1605 : f32 to vector<8x128xf32>
    %1607 = arith.mulf %1279, %1606 : vector<8x128xf32>
    %1608 = arith.addf %1602, %1607 : vector<8x128xf32>
    %1609 = vector.broadcast %1605 : f32 to vector<8x128xf32>
    %1610 = arith.mulf %1281, %1609 : vector<8x128xf32>
    %1611 = arith.addf %1604, %1610 : vector<8x128xf32>
    %c2_514 = arith.constant 2 : index
    %c2_515 = arith.constant 2 : index
    %1612 = memref.load %arg6[%c2_514, %c2_515] : memref<10x10xf32, #tpu.memory_space<smem>>
    %1613 = vector.broadcast %1612 : f32 to vector<8x128xf32>
    %1614 = arith.mulf %1300, %1613 : vector<8x128xf32>
    %1615 = arith.addf %1608, %1614 : vector<8x128xf32>
    %1616 = vector.broadcast %1612 : f32 to vector<8x128xf32>
    %1617 = arith.mulf %1302, %1616 : vector<8x128xf32>
    %1618 = arith.addf %1611, %1617 : vector<8x128xf32>
    %c3_516 = arith.constant 3 : index
    %c2_517 = arith.constant 2 : index
    %1619 = memref.load %arg6[%c3_516, %c2_517] : memref<10x10xf32, #tpu.memory_space<smem>>
    %1620 = vector.broadcast %1619 : f32 to vector<8x128xf32>
    %1621 = arith.mulf %1321, %1620 : vector<8x128xf32>
    %1622 = arith.addf %1615, %1621 : vector<8x128xf32>
    %1623 = vector.broadcast %1619 : f32 to vector<8x128xf32>
    %1624 = arith.mulf %1323, %1623 : vector<8x128xf32>
    %1625 = arith.addf %1618, %1624 : vector<8x128xf32>
    %c4_518 = arith.constant 4 : index
    %c2_519 = arith.constant 2 : index
    %1626 = memref.load %arg6[%c4_518, %c2_519] : memref<10x10xf32, #tpu.memory_space<smem>>
    %1627 = vector.broadcast %1626 : f32 to vector<8x128xf32>
    %1628 = arith.mulf %1342, %1627 : vector<8x128xf32>
    %1629 = arith.addf %1622, %1628 : vector<8x128xf32>
    %1630 = vector.broadcast %1626 : f32 to vector<8x128xf32>
    %1631 = arith.mulf %1344, %1630 : vector<8x128xf32>
    %1632 = arith.addf %1625, %1631 : vector<8x128xf32>
    %c5_520 = arith.constant 5 : index
    %c2_521 = arith.constant 2 : index
    %1633 = memref.load %arg6[%c5_520, %c2_521] : memref<10x10xf32, #tpu.memory_space<smem>>
    %1634 = vector.broadcast %1633 : f32 to vector<8x128xf32>
    %1635 = arith.mulf %1363, %1634 : vector<8x128xf32>
    %1636 = arith.addf %1629, %1635 : vector<8x128xf32>
    %1637 = vector.broadcast %1633 : f32 to vector<8x128xf32>
    %1638 = arith.mulf %1365, %1637 : vector<8x128xf32>
    %1639 = arith.addf %1632, %1638 : vector<8x128xf32>
    %c6_522 = arith.constant 6 : index
    %c2_523 = arith.constant 2 : index
    %1640 = memref.load %arg6[%c6_522, %c2_523] : memref<10x10xf32, #tpu.memory_space<smem>>
    %1641 = vector.broadcast %1640 : f32 to vector<8x128xf32>
    %1642 = arith.mulf %1384, %1641 : vector<8x128xf32>
    %1643 = arith.addf %1636, %1642 : vector<8x128xf32>
    %1644 = vector.broadcast %1640 : f32 to vector<8x128xf32>
    %1645 = arith.mulf %1386, %1644 : vector<8x128xf32>
    %1646 = arith.addf %1639, %1645 : vector<8x128xf32>
    %c7_524 = arith.constant 7 : index
    %c2_525 = arith.constant 2 : index
    %1647 = memref.load %arg6[%c7_524, %c2_525] : memref<10x10xf32, #tpu.memory_space<smem>>
    %1648 = vector.broadcast %1647 : f32 to vector<8x128xf32>
    %1649 = arith.mulf %1405, %1648 : vector<8x128xf32>
    %1650 = arith.addf %1643, %1649 : vector<8x128xf32>
    %1651 = vector.broadcast %1647 : f32 to vector<8x128xf32>
    %1652 = arith.mulf %1407, %1651 : vector<8x128xf32>
    %1653 = arith.addf %1646, %1652 : vector<8x128xf32>
    %c8_526 = arith.constant 8 : index
    %c2_527 = arith.constant 2 : index
    %1654 = memref.load %arg6[%c8_526, %c2_527] : memref<10x10xf32, #tpu.memory_space<smem>>
    %1655 = vector.broadcast %1654 : f32 to vector<8x128xf32>
    %1656 = arith.mulf %1426, %1655 : vector<8x128xf32>
    %1657 = arith.addf %1650, %1656 : vector<8x128xf32>
    %1658 = vector.broadcast %1654 : f32 to vector<8x128xf32>
    %1659 = arith.mulf %1428, %1658 : vector<8x128xf32>
    %1660 = arith.addf %1653, %1659 : vector<8x128xf32>
    %c9_528 = arith.constant 9 : index
    %c2_529 = arith.constant 2 : index
    %1661 = memref.load %arg6[%c9_528, %c2_529] : memref<10x10xf32, #tpu.memory_space<smem>>
    %1662 = vector.broadcast %1661 : f32 to vector<8x128xf32>
    %1663 = arith.mulf %1447, %1662 : vector<8x128xf32>
    %1664 = arith.addf %1657, %1663 : vector<8x128xf32>
    %1665 = vector.broadcast %1661 : f32 to vector<8x128xf32>
    %1666 = arith.mulf %1449, %1665 : vector<8x128xf32>
    %1667 = arith.addf %1660, %1666 : vector<8x128xf32>
    %c2_530 = arith.constant 2 : index
    %1668 = memref.load %arg7[%c2_530] : memref<10xf32, #tpu.memory_space<smem>>
    %1669 = vector.broadcast %1668 : f32 to vector<8x128xf32>
    %1670 = arith.addf %1664, %1669 : vector<8x128xf32>
    %1671 = vector.broadcast %1668 : f32 to vector<8x128xf32>
    %1672 = arith.addf %1667, %1671 : vector<8x128xf32>
    %1673 = math.tanh %1670 : vector<8x128xf32>
    %1674 = math.tanh %1672 : vector<8x128xf32>
    %c0_531 = arith.constant 0 : index
    %c3_532 = arith.constant 3 : index
    %1675 = memref.load %arg6[%c0_531, %c3_532] : memref<10x10xf32, #tpu.memory_space<smem>>
    %1676 = vector.broadcast %1675 : f32 to vector<8x128xf32>
    %1677 = arith.mulf %1258, %1676 : vector<8x128xf32>
    %1678 = vector.broadcast %1675 : f32 to vector<8x128xf32>
    %1679 = arith.mulf %1260, %1678 : vector<8x128xf32>
    %c1_533 = arith.constant 1 : index
    %c3_534 = arith.constant 3 : index
    %1680 = memref.load %arg6[%c1_533, %c3_534] : memref<10x10xf32, #tpu.memory_space<smem>>
    %1681 = vector.broadcast %1680 : f32 to vector<8x128xf32>
    %1682 = arith.mulf %1279, %1681 : vector<8x128xf32>
    %1683 = arith.addf %1677, %1682 : vector<8x128xf32>
    %1684 = vector.broadcast %1680 : f32 to vector<8x128xf32>
    %1685 = arith.mulf %1281, %1684 : vector<8x128xf32>
    %1686 = arith.addf %1679, %1685 : vector<8x128xf32>
    %c2_535 = arith.constant 2 : index
    %c3_536 = arith.constant 3 : index
    %1687 = memref.load %arg6[%c2_535, %c3_536] : memref<10x10xf32, #tpu.memory_space<smem>>
    %1688 = vector.broadcast %1687 : f32 to vector<8x128xf32>
    %1689 = arith.mulf %1300, %1688 : vector<8x128xf32>
    %1690 = arith.addf %1683, %1689 : vector<8x128xf32>
    %1691 = vector.broadcast %1687 : f32 to vector<8x128xf32>
    %1692 = arith.mulf %1302, %1691 : vector<8x128xf32>
    %1693 = arith.addf %1686, %1692 : vector<8x128xf32>
    %c3_537 = arith.constant 3 : index
    %c3_538 = arith.constant 3 : index
    %1694 = memref.load %arg6[%c3_537, %c3_538] : memref<10x10xf32, #tpu.memory_space<smem>>
    %1695 = vector.broadcast %1694 : f32 to vector<8x128xf32>
    %1696 = arith.mulf %1321, %1695 : vector<8x128xf32>
    %1697 = arith.addf %1690, %1696 : vector<8x128xf32>
    %1698 = vector.broadcast %1694 : f32 to vector<8x128xf32>
    %1699 = arith.mulf %1323, %1698 : vector<8x128xf32>
    %1700 = arith.addf %1693, %1699 : vector<8x128xf32>
    %c4_539 = arith.constant 4 : index
    %c3_540 = arith.constant 3 : index
    %1701 = memref.load %arg6[%c4_539, %c3_540] : memref<10x10xf32, #tpu.memory_space<smem>>
    %1702 = vector.broadcast %1701 : f32 to vector<8x128xf32>
    %1703 = arith.mulf %1342, %1702 : vector<8x128xf32>
    %1704 = arith.addf %1697, %1703 : vector<8x128xf32>
    %1705 = vector.broadcast %1701 : f32 to vector<8x128xf32>
    %1706 = arith.mulf %1344, %1705 : vector<8x128xf32>
    %1707 = arith.addf %1700, %1706 : vector<8x128xf32>
    %c5_541 = arith.constant 5 : index
    %c3_542 = arith.constant 3 : index
    %1708 = memref.load %arg6[%c5_541, %c3_542] : memref<10x10xf32, #tpu.memory_space<smem>>
    %1709 = vector.broadcast %1708 : f32 to vector<8x128xf32>
    %1710 = arith.mulf %1363, %1709 : vector<8x128xf32>
    %1711 = arith.addf %1704, %1710 : vector<8x128xf32>
    %1712 = vector.broadcast %1708 : f32 to vector<8x128xf32>
    %1713 = arith.mulf %1365, %1712 : vector<8x128xf32>
    %1714 = arith.addf %1707, %1713 : vector<8x128xf32>
    %c6_543 = arith.constant 6 : index
    %c3_544 = arith.constant 3 : index
    %1715 = memref.load %arg6[%c6_543, %c3_544] : memref<10x10xf32, #tpu.memory_space<smem>>
    %1716 = vector.broadcast %1715 : f32 to vector<8x128xf32>
    %1717 = arith.mulf %1384, %1716 : vector<8x128xf32>
    %1718 = arith.addf %1711, %1717 : vector<8x128xf32>
    %1719 = vector.broadcast %1715 : f32 to vector<8x128xf32>
    %1720 = arith.mulf %1386, %1719 : vector<8x128xf32>
    %1721 = arith.addf %1714, %1720 : vector<8x128xf32>
    %c7_545 = arith.constant 7 : index
    %c3_546 = arith.constant 3 : index
    %1722 = memref.load %arg6[%c7_545, %c3_546] : memref<10x10xf32, #tpu.memory_space<smem>>
    %1723 = vector.broadcast %1722 : f32 to vector<8x128xf32>
    %1724 = arith.mulf %1405, %1723 : vector<8x128xf32>
    %1725 = arith.addf %1718, %1724 : vector<8x128xf32>
    %1726 = vector.broadcast %1722 : f32 to vector<8x128xf32>
    %1727 = arith.mulf %1407, %1726 : vector<8x128xf32>
    %1728 = arith.addf %1721, %1727 : vector<8x128xf32>
    %c8_547 = arith.constant 8 : index
    %c3_548 = arith.constant 3 : index
    %1729 = memref.load %arg6[%c8_547, %c3_548] : memref<10x10xf32, #tpu.memory_space<smem>>
    %1730 = vector.broadcast %1729 : f32 to vector<8x128xf32>
    %1731 = arith.mulf %1426, %1730 : vector<8x128xf32>
    %1732 = arith.addf %1725, %1731 : vector<8x128xf32>
    %1733 = vector.broadcast %1729 : f32 to vector<8x128xf32>
    %1734 = arith.mulf %1428, %1733 : vector<8x128xf32>
    %1735 = arith.addf %1728, %1734 : vector<8x128xf32>
    %c9_549 = arith.constant 9 : index
    %c3_550 = arith.constant 3 : index
    %1736 = memref.load %arg6[%c9_549, %c3_550] : memref<10x10xf32, #tpu.memory_space<smem>>
    %1737 = vector.broadcast %1736 : f32 to vector<8x128xf32>
    %1738 = arith.mulf %1447, %1737 : vector<8x128xf32>
    %1739 = arith.addf %1732, %1738 : vector<8x128xf32>
    %1740 = vector.broadcast %1736 : f32 to vector<8x128xf32>
    %1741 = arith.mulf %1449, %1740 : vector<8x128xf32>
    %1742 = arith.addf %1735, %1741 : vector<8x128xf32>
    %c3_551 = arith.constant 3 : index
    %1743 = memref.load %arg7[%c3_551] : memref<10xf32, #tpu.memory_space<smem>>
    %1744 = vector.broadcast %1743 : f32 to vector<8x128xf32>
    %1745 = arith.addf %1739, %1744 : vector<8x128xf32>
    %1746 = vector.broadcast %1743 : f32 to vector<8x128xf32>
    %1747 = arith.addf %1742, %1746 : vector<8x128xf32>
    %1748 = math.tanh %1745 : vector<8x128xf32>
    %1749 = math.tanh %1747 : vector<8x128xf32>
    %c0_552 = arith.constant 0 : index
    %c4_553 = arith.constant 4 : index
    %1750 = memref.load %arg6[%c0_552, %c4_553] : memref<10x10xf32, #tpu.memory_space<smem>>
    %1751 = vector.broadcast %1750 : f32 to vector<8x128xf32>
    %1752 = arith.mulf %1258, %1751 : vector<8x128xf32>
    %1753 = vector.broadcast %1750 : f32 to vector<8x128xf32>
    %1754 = arith.mulf %1260, %1753 : vector<8x128xf32>
    %c1_554 = arith.constant 1 : index
    %c4_555 = arith.constant 4 : index
    %1755 = memref.load %arg6[%c1_554, %c4_555] : memref<10x10xf32, #tpu.memory_space<smem>>
    %1756 = vector.broadcast %1755 : f32 to vector<8x128xf32>
    %1757 = arith.mulf %1279, %1756 : vector<8x128xf32>
    %1758 = arith.addf %1752, %1757 : vector<8x128xf32>
    %1759 = vector.broadcast %1755 : f32 to vector<8x128xf32>
    %1760 = arith.mulf %1281, %1759 : vector<8x128xf32>
    %1761 = arith.addf %1754, %1760 : vector<8x128xf32>
    %c2_556 = arith.constant 2 : index
    %c4_557 = arith.constant 4 : index
    %1762 = memref.load %arg6[%c2_556, %c4_557] : memref<10x10xf32, #tpu.memory_space<smem>>
    %1763 = vector.broadcast %1762 : f32 to vector<8x128xf32>
    %1764 = arith.mulf %1300, %1763 : vector<8x128xf32>
    %1765 = arith.addf %1758, %1764 : vector<8x128xf32>
    %1766 = vector.broadcast %1762 : f32 to vector<8x128xf32>
    %1767 = arith.mulf %1302, %1766 : vector<8x128xf32>
    %1768 = arith.addf %1761, %1767 : vector<8x128xf32>
    %c3_558 = arith.constant 3 : index
    %c4_559 = arith.constant 4 : index
    %1769 = memref.load %arg6[%c3_558, %c4_559] : memref<10x10xf32, #tpu.memory_space<smem>>
    %1770 = vector.broadcast %1769 : f32 to vector<8x128xf32>
    %1771 = arith.mulf %1321, %1770 : vector<8x128xf32>
    %1772 = arith.addf %1765, %1771 : vector<8x128xf32>
    %1773 = vector.broadcast %1769 : f32 to vector<8x128xf32>
    %1774 = arith.mulf %1323, %1773 : vector<8x128xf32>
    %1775 = arith.addf %1768, %1774 : vector<8x128xf32>
    %c4_560 = arith.constant 4 : index
    %c4_561 = arith.constant 4 : index
    %1776 = memref.load %arg6[%c4_560, %c4_561] : memref<10x10xf32, #tpu.memory_space<smem>>
    %1777 = vector.broadcast %1776 : f32 to vector<8x128xf32>
    %1778 = arith.mulf %1342, %1777 : vector<8x128xf32>
    %1779 = arith.addf %1772, %1778 : vector<8x128xf32>
    %1780 = vector.broadcast %1776 : f32 to vector<8x128xf32>
    %1781 = arith.mulf %1344, %1780 : vector<8x128xf32>
    %1782 = arith.addf %1775, %1781 : vector<8x128xf32>
    %c5_562 = arith.constant 5 : index
    %c4_563 = arith.constant 4 : index
    %1783 = memref.load %arg6[%c5_562, %c4_563] : memref<10x10xf32, #tpu.memory_space<smem>>
    %1784 = vector.broadcast %1783 : f32 to vector<8x128xf32>
    %1785 = arith.mulf %1363, %1784 : vector<8x128xf32>
    %1786 = arith.addf %1779, %1785 : vector<8x128xf32>
    %1787 = vector.broadcast %1783 : f32 to vector<8x128xf32>
    %1788 = arith.mulf %1365, %1787 : vector<8x128xf32>
    %1789 = arith.addf %1782, %1788 : vector<8x128xf32>
    %c6_564 = arith.constant 6 : index
    %c4_565 = arith.constant 4 : index
    %1790 = memref.load %arg6[%c6_564, %c4_565] : memref<10x10xf32, #tpu.memory_space<smem>>
    %1791 = vector.broadcast %1790 : f32 to vector<8x128xf32>
    %1792 = arith.mulf %1384, %1791 : vector<8x128xf32>
    %1793 = arith.addf %1786, %1792 : vector<8x128xf32>
    %1794 = vector.broadcast %1790 : f32 to vector<8x128xf32>
    %1795 = arith.mulf %1386, %1794 : vector<8x128xf32>
    %1796 = arith.addf %1789, %1795 : vector<8x128xf32>
    %c7_566 = arith.constant 7 : index
    %c4_567 = arith.constant 4 : index
    %1797 = memref.load %arg6[%c7_566, %c4_567] : memref<10x10xf32, #tpu.memory_space<smem>>
    %1798 = vector.broadcast %1797 : f32 to vector<8x128xf32>
    %1799 = arith.mulf %1405, %1798 : vector<8x128xf32>
    %1800 = arith.addf %1793, %1799 : vector<8x128xf32>
    %1801 = vector.broadcast %1797 : f32 to vector<8x128xf32>
    %1802 = arith.mulf %1407, %1801 : vector<8x128xf32>
    %1803 = arith.addf %1796, %1802 : vector<8x128xf32>
    %c8_568 = arith.constant 8 : index
    %c4_569 = arith.constant 4 : index
    %1804 = memref.load %arg6[%c8_568, %c4_569] : memref<10x10xf32, #tpu.memory_space<smem>>
    %1805 = vector.broadcast %1804 : f32 to vector<8x128xf32>
    %1806 = arith.mulf %1426, %1805 : vector<8x128xf32>
    %1807 = arith.addf %1800, %1806 : vector<8x128xf32>
    %1808 = vector.broadcast %1804 : f32 to vector<8x128xf32>
    %1809 = arith.mulf %1428, %1808 : vector<8x128xf32>
    %1810 = arith.addf %1803, %1809 : vector<8x128xf32>
    %c9_570 = arith.constant 9 : index
    %c4_571 = arith.constant 4 : index
    %1811 = memref.load %arg6[%c9_570, %c4_571] : memref<10x10xf32, #tpu.memory_space<smem>>
    %1812 = vector.broadcast %1811 : f32 to vector<8x128xf32>
    %1813 = arith.mulf %1447, %1812 : vector<8x128xf32>
    %1814 = arith.addf %1807, %1813 : vector<8x128xf32>
    %1815 = vector.broadcast %1811 : f32 to vector<8x128xf32>
    %1816 = arith.mulf %1449, %1815 : vector<8x128xf32>
    %1817 = arith.addf %1810, %1816 : vector<8x128xf32>
    %c4_572 = arith.constant 4 : index
    %1818 = memref.load %arg7[%c4_572] : memref<10xf32, #tpu.memory_space<smem>>
    %1819 = vector.broadcast %1818 : f32 to vector<8x128xf32>
    %1820 = arith.addf %1814, %1819 : vector<8x128xf32>
    %1821 = vector.broadcast %1818 : f32 to vector<8x128xf32>
    %1822 = arith.addf %1817, %1821 : vector<8x128xf32>
    %1823 = math.tanh %1820 : vector<8x128xf32>
    %1824 = math.tanh %1822 : vector<8x128xf32>
    %c0_573 = arith.constant 0 : index
    %c5_574 = arith.constant 5 : index
    %1825 = memref.load %arg6[%c0_573, %c5_574] : memref<10x10xf32, #tpu.memory_space<smem>>
    %1826 = vector.broadcast %1825 : f32 to vector<8x128xf32>
    %1827 = arith.mulf %1258, %1826 : vector<8x128xf32>
    %1828 = vector.broadcast %1825 : f32 to vector<8x128xf32>
    %1829 = arith.mulf %1260, %1828 : vector<8x128xf32>
    %c1_575 = arith.constant 1 : index
    %c5_576 = arith.constant 5 : index
    %1830 = memref.load %arg6[%c1_575, %c5_576] : memref<10x10xf32, #tpu.memory_space<smem>>
    %1831 = vector.broadcast %1830 : f32 to vector<8x128xf32>
    %1832 = arith.mulf %1279, %1831 : vector<8x128xf32>
    %1833 = arith.addf %1827, %1832 : vector<8x128xf32>
    %1834 = vector.broadcast %1830 : f32 to vector<8x128xf32>
    %1835 = arith.mulf %1281, %1834 : vector<8x128xf32>
    %1836 = arith.addf %1829, %1835 : vector<8x128xf32>
    %c2_577 = arith.constant 2 : index
    %c5_578 = arith.constant 5 : index
    %1837 = memref.load %arg6[%c2_577, %c5_578] : memref<10x10xf32, #tpu.memory_space<smem>>
    %1838 = vector.broadcast %1837 : f32 to vector<8x128xf32>
    %1839 = arith.mulf %1300, %1838 : vector<8x128xf32>
    %1840 = arith.addf %1833, %1839 : vector<8x128xf32>
    %1841 = vector.broadcast %1837 : f32 to vector<8x128xf32>
    %1842 = arith.mulf %1302, %1841 : vector<8x128xf32>
    %1843 = arith.addf %1836, %1842 : vector<8x128xf32>
    %c3_579 = arith.constant 3 : index
    %c5_580 = arith.constant 5 : index
    %1844 = memref.load %arg6[%c3_579, %c5_580] : memref<10x10xf32, #tpu.memory_space<smem>>
    %1845 = vector.broadcast %1844 : f32 to vector<8x128xf32>
    %1846 = arith.mulf %1321, %1845 : vector<8x128xf32>
    %1847 = arith.addf %1840, %1846 : vector<8x128xf32>
    %1848 = vector.broadcast %1844 : f32 to vector<8x128xf32>
    %1849 = arith.mulf %1323, %1848 : vector<8x128xf32>
    %1850 = arith.addf %1843, %1849 : vector<8x128xf32>
    %c4_581 = arith.constant 4 : index
    %c5_582 = arith.constant 5 : index
    %1851 = memref.load %arg6[%c4_581, %c5_582] : memref<10x10xf32, #tpu.memory_space<smem>>
    %1852 = vector.broadcast %1851 : f32 to vector<8x128xf32>
    %1853 = arith.mulf %1342, %1852 : vector<8x128xf32>
    %1854 = arith.addf %1847, %1853 : vector<8x128xf32>
    %1855 = vector.broadcast %1851 : f32 to vector<8x128xf32>
    %1856 = arith.mulf %1344, %1855 : vector<8x128xf32>
    %1857 = arith.addf %1850, %1856 : vector<8x128xf32>
    %c5_583 = arith.constant 5 : index
    %c5_584 = arith.constant 5 : index
    %1858 = memref.load %arg6[%c5_583, %c5_584] : memref<10x10xf32, #tpu.memory_space<smem>>
    %1859 = vector.broadcast %1858 : f32 to vector<8x128xf32>
    %1860 = arith.mulf %1363, %1859 : vector<8x128xf32>
    %1861 = arith.addf %1854, %1860 : vector<8x128xf32>
    %1862 = vector.broadcast %1858 : f32 to vector<8x128xf32>
    %1863 = arith.mulf %1365, %1862 : vector<8x128xf32>
    %1864 = arith.addf %1857, %1863 : vector<8x128xf32>
    %c6_585 = arith.constant 6 : index
    %c5_586 = arith.constant 5 : index
    %1865 = memref.load %arg6[%c6_585, %c5_586] : memref<10x10xf32, #tpu.memory_space<smem>>
    %1866 = vector.broadcast %1865 : f32 to vector<8x128xf32>
    %1867 = arith.mulf %1384, %1866 : vector<8x128xf32>
    %1868 = arith.addf %1861, %1867 : vector<8x128xf32>
    %1869 = vector.broadcast %1865 : f32 to vector<8x128xf32>
    %1870 = arith.mulf %1386, %1869 : vector<8x128xf32>
    %1871 = arith.addf %1864, %1870 : vector<8x128xf32>
    %c7_587 = arith.constant 7 : index
    %c5_588 = arith.constant 5 : index
    %1872 = memref.load %arg6[%c7_587, %c5_588] : memref<10x10xf32, #tpu.memory_space<smem>>
    %1873 = vector.broadcast %1872 : f32 to vector<8x128xf32>
    %1874 = arith.mulf %1405, %1873 : vector<8x128xf32>
    %1875 = arith.addf %1868, %1874 : vector<8x128xf32>
    %1876 = vector.broadcast %1872 : f32 to vector<8x128xf32>
    %1877 = arith.mulf %1407, %1876 : vector<8x128xf32>
    %1878 = arith.addf %1871, %1877 : vector<8x128xf32>
    %c8_589 = arith.constant 8 : index
    %c5_590 = arith.constant 5 : index
    %1879 = memref.load %arg6[%c8_589, %c5_590] : memref<10x10xf32, #tpu.memory_space<smem>>
    %1880 = vector.broadcast %1879 : f32 to vector<8x128xf32>
    %1881 = arith.mulf %1426, %1880 : vector<8x128xf32>
    %1882 = arith.addf %1875, %1881 : vector<8x128xf32>
    %1883 = vector.broadcast %1879 : f32 to vector<8x128xf32>
    %1884 = arith.mulf %1428, %1883 : vector<8x128xf32>
    %1885 = arith.addf %1878, %1884 : vector<8x128xf32>
    %c9_591 = arith.constant 9 : index
    %c5_592 = arith.constant 5 : index
    %1886 = memref.load %arg6[%c9_591, %c5_592] : memref<10x10xf32, #tpu.memory_space<smem>>
    %1887 = vector.broadcast %1886 : f32 to vector<8x128xf32>
    %1888 = arith.mulf %1447, %1887 : vector<8x128xf32>
    %1889 = arith.addf %1882, %1888 : vector<8x128xf32>
    %1890 = vector.broadcast %1886 : f32 to vector<8x128xf32>
    %1891 = arith.mulf %1449, %1890 : vector<8x128xf32>
    %1892 = arith.addf %1885, %1891 : vector<8x128xf32>
    %c5_593 = arith.constant 5 : index
    %1893 = memref.load %arg7[%c5_593] : memref<10xf32, #tpu.memory_space<smem>>
    %1894 = vector.broadcast %1893 : f32 to vector<8x128xf32>
    %1895 = arith.addf %1889, %1894 : vector<8x128xf32>
    %1896 = vector.broadcast %1893 : f32 to vector<8x128xf32>
    %1897 = arith.addf %1892, %1896 : vector<8x128xf32>
    %1898 = math.tanh %1895 : vector<8x128xf32>
    %1899 = math.tanh %1897 : vector<8x128xf32>
    %c0_594 = arith.constant 0 : index
    %c6_595 = arith.constant 6 : index
    %1900 = memref.load %arg6[%c0_594, %c6_595] : memref<10x10xf32, #tpu.memory_space<smem>>
    %1901 = vector.broadcast %1900 : f32 to vector<8x128xf32>
    %1902 = arith.mulf %1258, %1901 : vector<8x128xf32>
    %1903 = vector.broadcast %1900 : f32 to vector<8x128xf32>
    %1904 = arith.mulf %1260, %1903 : vector<8x128xf32>
    %c1_596 = arith.constant 1 : index
    %c6_597 = arith.constant 6 : index
    %1905 = memref.load %arg6[%c1_596, %c6_597] : memref<10x10xf32, #tpu.memory_space<smem>>
    %1906 = vector.broadcast %1905 : f32 to vector<8x128xf32>
    %1907 = arith.mulf %1279, %1906 : vector<8x128xf32>
    %1908 = arith.addf %1902, %1907 : vector<8x128xf32>
    %1909 = vector.broadcast %1905 : f32 to vector<8x128xf32>
    %1910 = arith.mulf %1281, %1909 : vector<8x128xf32>
    %1911 = arith.addf %1904, %1910 : vector<8x128xf32>
    %c2_598 = arith.constant 2 : index
    %c6_599 = arith.constant 6 : index
    %1912 = memref.load %arg6[%c2_598, %c6_599] : memref<10x10xf32, #tpu.memory_space<smem>>
    %1913 = vector.broadcast %1912 : f32 to vector<8x128xf32>
    %1914 = arith.mulf %1300, %1913 : vector<8x128xf32>
    %1915 = arith.addf %1908, %1914 : vector<8x128xf32>
    %1916 = vector.broadcast %1912 : f32 to vector<8x128xf32>
    %1917 = arith.mulf %1302, %1916 : vector<8x128xf32>
    %1918 = arith.addf %1911, %1917 : vector<8x128xf32>
    %c3_600 = arith.constant 3 : index
    %c6_601 = arith.constant 6 : index
    %1919 = memref.load %arg6[%c3_600, %c6_601] : memref<10x10xf32, #tpu.memory_space<smem>>
    %1920 = vector.broadcast %1919 : f32 to vector<8x128xf32>
    %1921 = arith.mulf %1321, %1920 : vector<8x128xf32>
    %1922 = arith.addf %1915, %1921 : vector<8x128xf32>
    %1923 = vector.broadcast %1919 : f32 to vector<8x128xf32>
    %1924 = arith.mulf %1323, %1923 : vector<8x128xf32>
    %1925 = arith.addf %1918, %1924 : vector<8x128xf32>
    %c4_602 = arith.constant 4 : index
    %c6_603 = arith.constant 6 : index
    %1926 = memref.load %arg6[%c4_602, %c6_603] : memref<10x10xf32, #tpu.memory_space<smem>>
    %1927 = vector.broadcast %1926 : f32 to vector<8x128xf32>
    %1928 = arith.mulf %1342, %1927 : vector<8x128xf32>
    %1929 = arith.addf %1922, %1928 : vector<8x128xf32>
    %1930 = vector.broadcast %1926 : f32 to vector<8x128xf32>
    %1931 = arith.mulf %1344, %1930 : vector<8x128xf32>
    %1932 = arith.addf %1925, %1931 : vector<8x128xf32>
    %c5_604 = arith.constant 5 : index
    %c6_605 = arith.constant 6 : index
    %1933 = memref.load %arg6[%c5_604, %c6_605] : memref<10x10xf32, #tpu.memory_space<smem>>
    %1934 = vector.broadcast %1933 : f32 to vector<8x128xf32>
    %1935 = arith.mulf %1363, %1934 : vector<8x128xf32>
    %1936 = arith.addf %1929, %1935 : vector<8x128xf32>
    %1937 = vector.broadcast %1933 : f32 to vector<8x128xf32>
    %1938 = arith.mulf %1365, %1937 : vector<8x128xf32>
    %1939 = arith.addf %1932, %1938 : vector<8x128xf32>
    %c6_606 = arith.constant 6 : index
    %c6_607 = arith.constant 6 : index
    %1940 = memref.load %arg6[%c6_606, %c6_607] : memref<10x10xf32, #tpu.memory_space<smem>>
    %1941 = vector.broadcast %1940 : f32 to vector<8x128xf32>
    %1942 = arith.mulf %1384, %1941 : vector<8x128xf32>
    %1943 = arith.addf %1936, %1942 : vector<8x128xf32>
    %1944 = vector.broadcast %1940 : f32 to vector<8x128xf32>
    %1945 = arith.mulf %1386, %1944 : vector<8x128xf32>
    %1946 = arith.addf %1939, %1945 : vector<8x128xf32>
    %c7_608 = arith.constant 7 : index
    %c6_609 = arith.constant 6 : index
    %1947 = memref.load %arg6[%c7_608, %c6_609] : memref<10x10xf32, #tpu.memory_space<smem>>
    %1948 = vector.broadcast %1947 : f32 to vector<8x128xf32>
    %1949 = arith.mulf %1405, %1948 : vector<8x128xf32>
    %1950 = arith.addf %1943, %1949 : vector<8x128xf32>
    %1951 = vector.broadcast %1947 : f32 to vector<8x128xf32>
    %1952 = arith.mulf %1407, %1951 : vector<8x128xf32>
    %1953 = arith.addf %1946, %1952 : vector<8x128xf32>
    %c8_610 = arith.constant 8 : index
    %c6_611 = arith.constant 6 : index
    %1954 = memref.load %arg6[%c8_610, %c6_611] : memref<10x10xf32, #tpu.memory_space<smem>>
    %1955 = vector.broadcast %1954 : f32 to vector<8x128xf32>
    %1956 = arith.mulf %1426, %1955 : vector<8x128xf32>
    %1957 = arith.addf %1950, %1956 : vector<8x128xf32>
    %1958 = vector.broadcast %1954 : f32 to vector<8x128xf32>
    %1959 = arith.mulf %1428, %1958 : vector<8x128xf32>
    %1960 = arith.addf %1953, %1959 : vector<8x128xf32>
    %c9_612 = arith.constant 9 : index
    %c6_613 = arith.constant 6 : index
    %1961 = memref.load %arg6[%c9_612, %c6_613] : memref<10x10xf32, #tpu.memory_space<smem>>
    %1962 = vector.broadcast %1961 : f32 to vector<8x128xf32>
    %1963 = arith.mulf %1447, %1962 : vector<8x128xf32>
    %1964 = arith.addf %1957, %1963 : vector<8x128xf32>
    %1965 = vector.broadcast %1961 : f32 to vector<8x128xf32>
    %1966 = arith.mulf %1449, %1965 : vector<8x128xf32>
    %1967 = arith.addf %1960, %1966 : vector<8x128xf32>
    %c6_614 = arith.constant 6 : index
    %1968 = memref.load %arg7[%c6_614] : memref<10xf32, #tpu.memory_space<smem>>
    %1969 = vector.broadcast %1968 : f32 to vector<8x128xf32>
    %1970 = arith.addf %1964, %1969 : vector<8x128xf32>
    %1971 = vector.broadcast %1968 : f32 to vector<8x128xf32>
    %1972 = arith.addf %1967, %1971 : vector<8x128xf32>
    %1973 = math.tanh %1970 : vector<8x128xf32>
    %1974 = math.tanh %1972 : vector<8x128xf32>
    %c0_615 = arith.constant 0 : index
    %c7_616 = arith.constant 7 : index
    %1975 = memref.load %arg6[%c0_615, %c7_616] : memref<10x10xf32, #tpu.memory_space<smem>>
    %1976 = vector.broadcast %1975 : f32 to vector<8x128xf32>
    %1977 = arith.mulf %1258, %1976 : vector<8x128xf32>
    %1978 = vector.broadcast %1975 : f32 to vector<8x128xf32>
    %1979 = arith.mulf %1260, %1978 : vector<8x128xf32>
    %c1_617 = arith.constant 1 : index
    %c7_618 = arith.constant 7 : index
    %1980 = memref.load %arg6[%c1_617, %c7_618] : memref<10x10xf32, #tpu.memory_space<smem>>
    %1981 = vector.broadcast %1980 : f32 to vector<8x128xf32>
    %1982 = arith.mulf %1279, %1981 : vector<8x128xf32>
    %1983 = arith.addf %1977, %1982 : vector<8x128xf32>
    %1984 = vector.broadcast %1980 : f32 to vector<8x128xf32>
    %1985 = arith.mulf %1281, %1984 : vector<8x128xf32>
    %1986 = arith.addf %1979, %1985 : vector<8x128xf32>
    %c2_619 = arith.constant 2 : index
    %c7_620 = arith.constant 7 : index
    %1987 = memref.load %arg6[%c2_619, %c7_620] : memref<10x10xf32, #tpu.memory_space<smem>>
    %1988 = vector.broadcast %1987 : f32 to vector<8x128xf32>
    %1989 = arith.mulf %1300, %1988 : vector<8x128xf32>
    %1990 = arith.addf %1983, %1989 : vector<8x128xf32>
    %1991 = vector.broadcast %1987 : f32 to vector<8x128xf32>
    %1992 = arith.mulf %1302, %1991 : vector<8x128xf32>
    %1993 = arith.addf %1986, %1992 : vector<8x128xf32>
    %c3_621 = arith.constant 3 : index
    %c7_622 = arith.constant 7 : index
    %1994 = memref.load %arg6[%c3_621, %c7_622] : memref<10x10xf32, #tpu.memory_space<smem>>
    %1995 = vector.broadcast %1994 : f32 to vector<8x128xf32>
    %1996 = arith.mulf %1321, %1995 : vector<8x128xf32>
    %1997 = arith.addf %1990, %1996 : vector<8x128xf32>
    %1998 = vector.broadcast %1994 : f32 to vector<8x128xf32>
    %1999 = arith.mulf %1323, %1998 : vector<8x128xf32>
    %2000 = arith.addf %1993, %1999 : vector<8x128xf32>
    %c4_623 = arith.constant 4 : index
    %c7_624 = arith.constant 7 : index
    %2001 = memref.load %arg6[%c4_623, %c7_624] : memref<10x10xf32, #tpu.memory_space<smem>>
    %2002 = vector.broadcast %2001 : f32 to vector<8x128xf32>
    %2003 = arith.mulf %1342, %2002 : vector<8x128xf32>
    %2004 = arith.addf %1997, %2003 : vector<8x128xf32>
    %2005 = vector.broadcast %2001 : f32 to vector<8x128xf32>
    %2006 = arith.mulf %1344, %2005 : vector<8x128xf32>
    %2007 = arith.addf %2000, %2006 : vector<8x128xf32>
    %c5_625 = arith.constant 5 : index
    %c7_626 = arith.constant 7 : index
    %2008 = memref.load %arg6[%c5_625, %c7_626] : memref<10x10xf32, #tpu.memory_space<smem>>
    %2009 = vector.broadcast %2008 : f32 to vector<8x128xf32>
    %2010 = arith.mulf %1363, %2009 : vector<8x128xf32>
    %2011 = arith.addf %2004, %2010 : vector<8x128xf32>
    %2012 = vector.broadcast %2008 : f32 to vector<8x128xf32>
    %2013 = arith.mulf %1365, %2012 : vector<8x128xf32>
    %2014 = arith.addf %2007, %2013 : vector<8x128xf32>
    %c6_627 = arith.constant 6 : index
    %c7_628 = arith.constant 7 : index
    %2015 = memref.load %arg6[%c6_627, %c7_628] : memref<10x10xf32, #tpu.memory_space<smem>>
    %2016 = vector.broadcast %2015 : f32 to vector<8x128xf32>
    %2017 = arith.mulf %1384, %2016 : vector<8x128xf32>
    %2018 = arith.addf %2011, %2017 : vector<8x128xf32>
    %2019 = vector.broadcast %2015 : f32 to vector<8x128xf32>
    %2020 = arith.mulf %1386, %2019 : vector<8x128xf32>
    %2021 = arith.addf %2014, %2020 : vector<8x128xf32>
    %c7_629 = arith.constant 7 : index
    %c7_630 = arith.constant 7 : index
    %2022 = memref.load %arg6[%c7_629, %c7_630] : memref<10x10xf32, #tpu.memory_space<smem>>
    %2023 = vector.broadcast %2022 : f32 to vector<8x128xf32>
    %2024 = arith.mulf %1405, %2023 : vector<8x128xf32>
    %2025 = arith.addf %2018, %2024 : vector<8x128xf32>
    %2026 = vector.broadcast %2022 : f32 to vector<8x128xf32>
    %2027 = arith.mulf %1407, %2026 : vector<8x128xf32>
    %2028 = arith.addf %2021, %2027 : vector<8x128xf32>
    %c8_631 = arith.constant 8 : index
    %c7_632 = arith.constant 7 : index
    %2029 = memref.load %arg6[%c8_631, %c7_632] : memref<10x10xf32, #tpu.memory_space<smem>>
    %2030 = vector.broadcast %2029 : f32 to vector<8x128xf32>
    %2031 = arith.mulf %1426, %2030 : vector<8x128xf32>
    %2032 = arith.addf %2025, %2031 : vector<8x128xf32>
    %2033 = vector.broadcast %2029 : f32 to vector<8x128xf32>
    %2034 = arith.mulf %1428, %2033 : vector<8x128xf32>
    %2035 = arith.addf %2028, %2034 : vector<8x128xf32>
    %c9_633 = arith.constant 9 : index
    %c7_634 = arith.constant 7 : index
    %2036 = memref.load %arg6[%c9_633, %c7_634] : memref<10x10xf32, #tpu.memory_space<smem>>
    %2037 = vector.broadcast %2036 : f32 to vector<8x128xf32>
    %2038 = arith.mulf %1447, %2037 : vector<8x128xf32>
    %2039 = arith.addf %2032, %2038 : vector<8x128xf32>
    %2040 = vector.broadcast %2036 : f32 to vector<8x128xf32>
    %2041 = arith.mulf %1449, %2040 : vector<8x128xf32>
    %2042 = arith.addf %2035, %2041 : vector<8x128xf32>
    %c7_635 = arith.constant 7 : index
    %2043 = memref.load %arg7[%c7_635] : memref<10xf32, #tpu.memory_space<smem>>
    %2044 = vector.broadcast %2043 : f32 to vector<8x128xf32>
    %2045 = arith.addf %2039, %2044 : vector<8x128xf32>
    %2046 = vector.broadcast %2043 : f32 to vector<8x128xf32>
    %2047 = arith.addf %2042, %2046 : vector<8x128xf32>
    %2048 = math.tanh %2045 : vector<8x128xf32>
    %2049 = math.tanh %2047 : vector<8x128xf32>
    %c0_636 = arith.constant 0 : index
    %c8_637 = arith.constant 8 : index
    %2050 = memref.load %arg6[%c0_636, %c8_637] : memref<10x10xf32, #tpu.memory_space<smem>>
    %2051 = vector.broadcast %2050 : f32 to vector<8x128xf32>
    %2052 = arith.mulf %1258, %2051 : vector<8x128xf32>
    %2053 = vector.broadcast %2050 : f32 to vector<8x128xf32>
    %2054 = arith.mulf %1260, %2053 : vector<8x128xf32>
    %c1_638 = arith.constant 1 : index
    %c8_639 = arith.constant 8 : index
    %2055 = memref.load %arg6[%c1_638, %c8_639] : memref<10x10xf32, #tpu.memory_space<smem>>
    %2056 = vector.broadcast %2055 : f32 to vector<8x128xf32>
    %2057 = arith.mulf %1279, %2056 : vector<8x128xf32>
    %2058 = arith.addf %2052, %2057 : vector<8x128xf32>
    %2059 = vector.broadcast %2055 : f32 to vector<8x128xf32>
    %2060 = arith.mulf %1281, %2059 : vector<8x128xf32>
    %2061 = arith.addf %2054, %2060 : vector<8x128xf32>
    %c2_640 = arith.constant 2 : index
    %c8_641 = arith.constant 8 : index
    %2062 = memref.load %arg6[%c2_640, %c8_641] : memref<10x10xf32, #tpu.memory_space<smem>>
    %2063 = vector.broadcast %2062 : f32 to vector<8x128xf32>
    %2064 = arith.mulf %1300, %2063 : vector<8x128xf32>
    %2065 = arith.addf %2058, %2064 : vector<8x128xf32>
    %2066 = vector.broadcast %2062 : f32 to vector<8x128xf32>
    %2067 = arith.mulf %1302, %2066 : vector<8x128xf32>
    %2068 = arith.addf %2061, %2067 : vector<8x128xf32>
    %c3_642 = arith.constant 3 : index
    %c8_643 = arith.constant 8 : index
    %2069 = memref.load %arg6[%c3_642, %c8_643] : memref<10x10xf32, #tpu.memory_space<smem>>
    %2070 = vector.broadcast %2069 : f32 to vector<8x128xf32>
    %2071 = arith.mulf %1321, %2070 : vector<8x128xf32>
    %2072 = arith.addf %2065, %2071 : vector<8x128xf32>
    %2073 = vector.broadcast %2069 : f32 to vector<8x128xf32>
    %2074 = arith.mulf %1323, %2073 : vector<8x128xf32>
    %2075 = arith.addf %2068, %2074 : vector<8x128xf32>
    %c4_644 = arith.constant 4 : index
    %c8_645 = arith.constant 8 : index
    %2076 = memref.load %arg6[%c4_644, %c8_645] : memref<10x10xf32, #tpu.memory_space<smem>>
    %2077 = vector.broadcast %2076 : f32 to vector<8x128xf32>
    %2078 = arith.mulf %1342, %2077 : vector<8x128xf32>
    %2079 = arith.addf %2072, %2078 : vector<8x128xf32>
    %2080 = vector.broadcast %2076 : f32 to vector<8x128xf32>
    %2081 = arith.mulf %1344, %2080 : vector<8x128xf32>
    %2082 = arith.addf %2075, %2081 : vector<8x128xf32>
    %c5_646 = arith.constant 5 : index
    %c8_647 = arith.constant 8 : index
    %2083 = memref.load %arg6[%c5_646, %c8_647] : memref<10x10xf32, #tpu.memory_space<smem>>
    %2084 = vector.broadcast %2083 : f32 to vector<8x128xf32>
    %2085 = arith.mulf %1363, %2084 : vector<8x128xf32>
    %2086 = arith.addf %2079, %2085 : vector<8x128xf32>
    %2087 = vector.broadcast %2083 : f32 to vector<8x128xf32>
    %2088 = arith.mulf %1365, %2087 : vector<8x128xf32>
    %2089 = arith.addf %2082, %2088 : vector<8x128xf32>
    %c6_648 = arith.constant 6 : index
    %c8_649 = arith.constant 8 : index
    %2090 = memref.load %arg6[%c6_648, %c8_649] : memref<10x10xf32, #tpu.memory_space<smem>>
    %2091 = vector.broadcast %2090 : f32 to vector<8x128xf32>
    %2092 = arith.mulf %1384, %2091 : vector<8x128xf32>
    %2093 = arith.addf %2086, %2092 : vector<8x128xf32>
    %2094 = vector.broadcast %2090 : f32 to vector<8x128xf32>
    %2095 = arith.mulf %1386, %2094 : vector<8x128xf32>
    %2096 = arith.addf %2089, %2095 : vector<8x128xf32>
    %c7_650 = arith.constant 7 : index
    %c8_651 = arith.constant 8 : index
    %2097 = memref.load %arg6[%c7_650, %c8_651] : memref<10x10xf32, #tpu.memory_space<smem>>
    %2098 = vector.broadcast %2097 : f32 to vector<8x128xf32>
    %2099 = arith.mulf %1405, %2098 : vector<8x128xf32>
    %2100 = arith.addf %2093, %2099 : vector<8x128xf32>
    %2101 = vector.broadcast %2097 : f32 to vector<8x128xf32>
    %2102 = arith.mulf %1407, %2101 : vector<8x128xf32>
    %2103 = arith.addf %2096, %2102 : vector<8x128xf32>
    %c8_652 = arith.constant 8 : index
    %c8_653 = arith.constant 8 : index
    %2104 = memref.load %arg6[%c8_652, %c8_653] : memref<10x10xf32, #tpu.memory_space<smem>>
    %2105 = vector.broadcast %2104 : f32 to vector<8x128xf32>
    %2106 = arith.mulf %1426, %2105 : vector<8x128xf32>
    %2107 = arith.addf %2100, %2106 : vector<8x128xf32>
    %2108 = vector.broadcast %2104 : f32 to vector<8x128xf32>
    %2109 = arith.mulf %1428, %2108 : vector<8x128xf32>
    %2110 = arith.addf %2103, %2109 : vector<8x128xf32>
    %c9_654 = arith.constant 9 : index
    %c8_655 = arith.constant 8 : index
    %2111 = memref.load %arg6[%c9_654, %c8_655] : memref<10x10xf32, #tpu.memory_space<smem>>
    %2112 = vector.broadcast %2111 : f32 to vector<8x128xf32>
    %2113 = arith.mulf %1447, %2112 : vector<8x128xf32>
    %2114 = arith.addf %2107, %2113 : vector<8x128xf32>
    %2115 = vector.broadcast %2111 : f32 to vector<8x128xf32>
    %2116 = arith.mulf %1449, %2115 : vector<8x128xf32>
    %2117 = arith.addf %2110, %2116 : vector<8x128xf32>
    %c8_656 = arith.constant 8 : index
    %2118 = memref.load %arg7[%c8_656] : memref<10xf32, #tpu.memory_space<smem>>
    %2119 = vector.broadcast %2118 : f32 to vector<8x128xf32>
    %2120 = arith.addf %2114, %2119 : vector<8x128xf32>
    %2121 = vector.broadcast %2118 : f32 to vector<8x128xf32>
    %2122 = arith.addf %2117, %2121 : vector<8x128xf32>
    %2123 = math.tanh %2120 : vector<8x128xf32>
    %2124 = math.tanh %2122 : vector<8x128xf32>
    %c0_657 = arith.constant 0 : index
    %c9_658 = arith.constant 9 : index
    %2125 = memref.load %arg6[%c0_657, %c9_658] : memref<10x10xf32, #tpu.memory_space<smem>>
    %2126 = vector.broadcast %2125 : f32 to vector<8x128xf32>
    %2127 = arith.mulf %1258, %2126 : vector<8x128xf32>
    %2128 = vector.broadcast %2125 : f32 to vector<8x128xf32>
    %2129 = arith.mulf %1260, %2128 : vector<8x128xf32>
    %c1_659 = arith.constant 1 : index
    %c9_660 = arith.constant 9 : index
    %2130 = memref.load %arg6[%c1_659, %c9_660] : memref<10x10xf32, #tpu.memory_space<smem>>
    %2131 = vector.broadcast %2130 : f32 to vector<8x128xf32>
    %2132 = arith.mulf %1279, %2131 : vector<8x128xf32>
    %2133 = arith.addf %2127, %2132 : vector<8x128xf32>
    %2134 = vector.broadcast %2130 : f32 to vector<8x128xf32>
    %2135 = arith.mulf %1281, %2134 : vector<8x128xf32>
    %2136 = arith.addf %2129, %2135 : vector<8x128xf32>
    %c2_661 = arith.constant 2 : index
    %c9_662 = arith.constant 9 : index
    %2137 = memref.load %arg6[%c2_661, %c9_662] : memref<10x10xf32, #tpu.memory_space<smem>>
    %2138 = vector.broadcast %2137 : f32 to vector<8x128xf32>
    %2139 = arith.mulf %1300, %2138 : vector<8x128xf32>
    %2140 = arith.addf %2133, %2139 : vector<8x128xf32>
    %2141 = vector.broadcast %2137 : f32 to vector<8x128xf32>
    %2142 = arith.mulf %1302, %2141 : vector<8x128xf32>
    %2143 = arith.addf %2136, %2142 : vector<8x128xf32>
    %c3_663 = arith.constant 3 : index
    %c9_664 = arith.constant 9 : index
    %2144 = memref.load %arg6[%c3_663, %c9_664] : memref<10x10xf32, #tpu.memory_space<smem>>
    %2145 = vector.broadcast %2144 : f32 to vector<8x128xf32>
    %2146 = arith.mulf %1321, %2145 : vector<8x128xf32>
    %2147 = arith.addf %2140, %2146 : vector<8x128xf32>
    %2148 = vector.broadcast %2144 : f32 to vector<8x128xf32>
    %2149 = arith.mulf %1323, %2148 : vector<8x128xf32>
    %2150 = arith.addf %2143, %2149 : vector<8x128xf32>
    %c4_665 = arith.constant 4 : index
    %c9_666 = arith.constant 9 : index
    %2151 = memref.load %arg6[%c4_665, %c9_666] : memref<10x10xf32, #tpu.memory_space<smem>>
    %2152 = vector.broadcast %2151 : f32 to vector<8x128xf32>
    %2153 = arith.mulf %1342, %2152 : vector<8x128xf32>
    %2154 = arith.addf %2147, %2153 : vector<8x128xf32>
    %2155 = vector.broadcast %2151 : f32 to vector<8x128xf32>
    %2156 = arith.mulf %1344, %2155 : vector<8x128xf32>
    %2157 = arith.addf %2150, %2156 : vector<8x128xf32>
    %c5_667 = arith.constant 5 : index
    %c9_668 = arith.constant 9 : index
    %2158 = memref.load %arg6[%c5_667, %c9_668] : memref<10x10xf32, #tpu.memory_space<smem>>
    %2159 = vector.broadcast %2158 : f32 to vector<8x128xf32>
    %2160 = arith.mulf %1363, %2159 : vector<8x128xf32>
    %2161 = arith.addf %2154, %2160 : vector<8x128xf32>
    %2162 = vector.broadcast %2158 : f32 to vector<8x128xf32>
    %2163 = arith.mulf %1365, %2162 : vector<8x128xf32>
    %2164 = arith.addf %2157, %2163 : vector<8x128xf32>
    %c6_669 = arith.constant 6 : index
    %c9_670 = arith.constant 9 : index
    %2165 = memref.load %arg6[%c6_669, %c9_670] : memref<10x10xf32, #tpu.memory_space<smem>>
    %2166 = vector.broadcast %2165 : f32 to vector<8x128xf32>
    %2167 = arith.mulf %1384, %2166 : vector<8x128xf32>
    %2168 = arith.addf %2161, %2167 : vector<8x128xf32>
    %2169 = vector.broadcast %2165 : f32 to vector<8x128xf32>
    %2170 = arith.mulf %1386, %2169 : vector<8x128xf32>
    %2171 = arith.addf %2164, %2170 : vector<8x128xf32>
    %c7_671 = arith.constant 7 : index
    %c9_672 = arith.constant 9 : index
    %2172 = memref.load %arg6[%c7_671, %c9_672] : memref<10x10xf32, #tpu.memory_space<smem>>
    %2173 = vector.broadcast %2172 : f32 to vector<8x128xf32>
    %2174 = arith.mulf %1405, %2173 : vector<8x128xf32>
    %2175 = arith.addf %2168, %2174 : vector<8x128xf32>
    %2176 = vector.broadcast %2172 : f32 to vector<8x128xf32>
    %2177 = arith.mulf %1407, %2176 : vector<8x128xf32>
    %2178 = arith.addf %2171, %2177 : vector<8x128xf32>
    %c8_673 = arith.constant 8 : index
    %c9_674 = arith.constant 9 : index
    %2179 = memref.load %arg6[%c8_673, %c9_674] : memref<10x10xf32, #tpu.memory_space<smem>>
    %2180 = vector.broadcast %2179 : f32 to vector<8x128xf32>
    %2181 = arith.mulf %1426, %2180 : vector<8x128xf32>
    %2182 = arith.addf %2175, %2181 : vector<8x128xf32>
    %2183 = vector.broadcast %2179 : f32 to vector<8x128xf32>
    %2184 = arith.mulf %1428, %2183 : vector<8x128xf32>
    %2185 = arith.addf %2178, %2184 : vector<8x128xf32>
    %c9_675 = arith.constant 9 : index
    %c9_676 = arith.constant 9 : index
    %2186 = memref.load %arg6[%c9_675, %c9_676] : memref<10x10xf32, #tpu.memory_space<smem>>
    %2187 = vector.broadcast %2186 : f32 to vector<8x128xf32>
    %2188 = arith.mulf %1447, %2187 : vector<8x128xf32>
    %2189 = arith.addf %2182, %2188 : vector<8x128xf32>
    %2190 = vector.broadcast %2186 : f32 to vector<8x128xf32>
    %2191 = arith.mulf %1449, %2190 : vector<8x128xf32>
    %2192 = arith.addf %2185, %2191 : vector<8x128xf32>
    %c9_677 = arith.constant 9 : index
    %2193 = memref.load %arg7[%c9_677] : memref<10xf32, #tpu.memory_space<smem>>
    %2194 = vector.broadcast %2193 : f32 to vector<8x128xf32>
    %2195 = arith.addf %2189, %2194 : vector<8x128xf32>
    %2196 = vector.broadcast %2193 : f32 to vector<8x128xf32>
    %2197 = arith.addf %2192, %2196 : vector<8x128xf32>
    %2198 = math.tanh %2195 : vector<8x128xf32>
    %2199 = math.tanh %2197 : vector<8x128xf32>
    %c0_678 = arith.constant 0 : index
    %c0_679 = arith.constant 0 : index
    %2200 = memref.load %arg8[%c0_678, %c0_679] : memref<10x3xf32, #tpu.memory_space<smem>>
    %2201 = vector.broadcast %2200 : f32 to vector<8x128xf32>
    %2202 = arith.mulf %1523, %2201 : vector<8x128xf32>
    %2203 = vector.broadcast %2200 : f32 to vector<8x128xf32>
    %2204 = arith.mulf %1524, %2203 : vector<8x128xf32>
    %c1_680 = arith.constant 1 : index
    %c0_681 = arith.constant 0 : index
    %2205 = memref.load %arg8[%c1_680, %c0_681] : memref<10x3xf32, #tpu.memory_space<smem>>
    %2206 = vector.broadcast %2205 : f32 to vector<8x128xf32>
    %2207 = arith.mulf %1598, %2206 : vector<8x128xf32>
    %2208 = arith.addf %2202, %2207 : vector<8x128xf32>
    %2209 = vector.broadcast %2205 : f32 to vector<8x128xf32>
    %2210 = arith.mulf %1599, %2209 : vector<8x128xf32>
    %2211 = arith.addf %2204, %2210 : vector<8x128xf32>
    %c2_682 = arith.constant 2 : index
    %c0_683 = arith.constant 0 : index
    %2212 = memref.load %arg8[%c2_682, %c0_683] : memref<10x3xf32, #tpu.memory_space<smem>>
    %2213 = vector.broadcast %2212 : f32 to vector<8x128xf32>
    %2214 = arith.mulf %1673, %2213 : vector<8x128xf32>
    %2215 = arith.addf %2208, %2214 : vector<8x128xf32>
    %2216 = vector.broadcast %2212 : f32 to vector<8x128xf32>
    %2217 = arith.mulf %1674, %2216 : vector<8x128xf32>
    %2218 = arith.addf %2211, %2217 : vector<8x128xf32>
    %c3_684 = arith.constant 3 : index
    %c0_685 = arith.constant 0 : index
    %2219 = memref.load %arg8[%c3_684, %c0_685] : memref<10x3xf32, #tpu.memory_space<smem>>
    %2220 = vector.broadcast %2219 : f32 to vector<8x128xf32>
    %2221 = arith.mulf %1748, %2220 : vector<8x128xf32>
    %2222 = arith.addf %2215, %2221 : vector<8x128xf32>
    %2223 = vector.broadcast %2219 : f32 to vector<8x128xf32>
    %2224 = arith.mulf %1749, %2223 : vector<8x128xf32>
    %2225 = arith.addf %2218, %2224 : vector<8x128xf32>
    %c4_686 = arith.constant 4 : index
    %c0_687 = arith.constant 0 : index
    %2226 = memref.load %arg8[%c4_686, %c0_687] : memref<10x3xf32, #tpu.memory_space<smem>>
    %2227 = vector.broadcast %2226 : f32 to vector<8x128xf32>
    %2228 = arith.mulf %1823, %2227 : vector<8x128xf32>
    %2229 = arith.addf %2222, %2228 : vector<8x128xf32>
    %2230 = vector.broadcast %2226 : f32 to vector<8x128xf32>
    %2231 = arith.mulf %1824, %2230 : vector<8x128xf32>
    %2232 = arith.addf %2225, %2231 : vector<8x128xf32>
    %c5_688 = arith.constant 5 : index
    %c0_689 = arith.constant 0 : index
    %2233 = memref.load %arg8[%c5_688, %c0_689] : memref<10x3xf32, #tpu.memory_space<smem>>
    %2234 = vector.broadcast %2233 : f32 to vector<8x128xf32>
    %2235 = arith.mulf %1898, %2234 : vector<8x128xf32>
    %2236 = arith.addf %2229, %2235 : vector<8x128xf32>
    %2237 = vector.broadcast %2233 : f32 to vector<8x128xf32>
    %2238 = arith.mulf %1899, %2237 : vector<8x128xf32>
    %2239 = arith.addf %2232, %2238 : vector<8x128xf32>
    %c6_690 = arith.constant 6 : index
    %c0_691 = arith.constant 0 : index
    %2240 = memref.load %arg8[%c6_690, %c0_691] : memref<10x3xf32, #tpu.memory_space<smem>>
    %2241 = vector.broadcast %2240 : f32 to vector<8x128xf32>
    %2242 = arith.mulf %1973, %2241 : vector<8x128xf32>
    %2243 = arith.addf %2236, %2242 : vector<8x128xf32>
    %2244 = vector.broadcast %2240 : f32 to vector<8x128xf32>
    %2245 = arith.mulf %1974, %2244 : vector<8x128xf32>
    %2246 = arith.addf %2239, %2245 : vector<8x128xf32>
    %c7_692 = arith.constant 7 : index
    %c0_693 = arith.constant 0 : index
    %2247 = memref.load %arg8[%c7_692, %c0_693] : memref<10x3xf32, #tpu.memory_space<smem>>
    %2248 = vector.broadcast %2247 : f32 to vector<8x128xf32>
    %2249 = arith.mulf %2048, %2248 : vector<8x128xf32>
    %2250 = arith.addf %2243, %2249 : vector<8x128xf32>
    %2251 = vector.broadcast %2247 : f32 to vector<8x128xf32>
    %2252 = arith.mulf %2049, %2251 : vector<8x128xf32>
    %2253 = arith.addf %2246, %2252 : vector<8x128xf32>
    %c8_694 = arith.constant 8 : index
    %c0_695 = arith.constant 0 : index
    %2254 = memref.load %arg8[%c8_694, %c0_695] : memref<10x3xf32, #tpu.memory_space<smem>>
    %2255 = vector.broadcast %2254 : f32 to vector<8x128xf32>
    %2256 = arith.mulf %2123, %2255 : vector<8x128xf32>
    %2257 = arith.addf %2250, %2256 : vector<8x128xf32>
    %2258 = vector.broadcast %2254 : f32 to vector<8x128xf32>
    %2259 = arith.mulf %2124, %2258 : vector<8x128xf32>
    %2260 = arith.addf %2253, %2259 : vector<8x128xf32>
    %c9_696 = arith.constant 9 : index
    %c0_697 = arith.constant 0 : index
    %2261 = memref.load %arg8[%c9_696, %c0_697] : memref<10x3xf32, #tpu.memory_space<smem>>
    %2262 = vector.broadcast %2261 : f32 to vector<8x128xf32>
    %2263 = arith.mulf %2198, %2262 : vector<8x128xf32>
    %2264 = arith.addf %2257, %2263 : vector<8x128xf32>
    %2265 = vector.broadcast %2261 : f32 to vector<8x128xf32>
    %2266 = arith.mulf %2199, %2265 : vector<8x128xf32>
    %2267 = arith.addf %2260, %2266 : vector<8x128xf32>
    %c0_698 = arith.constant 0 : index
    %2268 = memref.load %arg9[%c0_698] : memref<3xf32, #tpu.memory_space<smem>>
    %2269 = vector.broadcast %2268 : f32 to vector<8x128xf32>
    %2270 = arith.addf %2264, %2269 : vector<8x128xf32>
    %2271 = vector.broadcast %2268 : f32 to vector<8x128xf32>
    %2272 = arith.addf %2267, %2271 : vector<8x128xf32>
    %c0_699 = arith.constant 0 : index
    %c1_700 = arith.constant 1 : index
    %2273 = memref.load %arg8[%c0_699, %c1_700] : memref<10x3xf32, #tpu.memory_space<smem>>
    %2274 = vector.broadcast %2273 : f32 to vector<8x128xf32>
    %2275 = arith.mulf %1523, %2274 : vector<8x128xf32>
    %2276 = vector.broadcast %2273 : f32 to vector<8x128xf32>
    %2277 = arith.mulf %1524, %2276 : vector<8x128xf32>
    %c1_701 = arith.constant 1 : index
    %c1_702 = arith.constant 1 : index
    %2278 = memref.load %arg8[%c1_701, %c1_702] : memref<10x3xf32, #tpu.memory_space<smem>>
    %2279 = vector.broadcast %2278 : f32 to vector<8x128xf32>
    %2280 = arith.mulf %1598, %2279 : vector<8x128xf32>
    %2281 = arith.addf %2275, %2280 : vector<8x128xf32>
    %2282 = vector.broadcast %2278 : f32 to vector<8x128xf32>
    %2283 = arith.mulf %1599, %2282 : vector<8x128xf32>
    %2284 = arith.addf %2277, %2283 : vector<8x128xf32>
    %c2_703 = arith.constant 2 : index
    %c1_704 = arith.constant 1 : index
    %2285 = memref.load %arg8[%c2_703, %c1_704] : memref<10x3xf32, #tpu.memory_space<smem>>
    %2286 = vector.broadcast %2285 : f32 to vector<8x128xf32>
    %2287 = arith.mulf %1673, %2286 : vector<8x128xf32>
    %2288 = arith.addf %2281, %2287 : vector<8x128xf32>
    %2289 = vector.broadcast %2285 : f32 to vector<8x128xf32>
    %2290 = arith.mulf %1674, %2289 : vector<8x128xf32>
    %2291 = arith.addf %2284, %2290 : vector<8x128xf32>
    %c3_705 = arith.constant 3 : index
    %c1_706 = arith.constant 1 : index
    %2292 = memref.load %arg8[%c3_705, %c1_706] : memref<10x3xf32, #tpu.memory_space<smem>>
    %2293 = vector.broadcast %2292 : f32 to vector<8x128xf32>
    %2294 = arith.mulf %1748, %2293 : vector<8x128xf32>
    %2295 = arith.addf %2288, %2294 : vector<8x128xf32>
    %2296 = vector.broadcast %2292 : f32 to vector<8x128xf32>
    %2297 = arith.mulf %1749, %2296 : vector<8x128xf32>
    %2298 = arith.addf %2291, %2297 : vector<8x128xf32>
    %c4_707 = arith.constant 4 : index
    %c1_708 = arith.constant 1 : index
    %2299 = memref.load %arg8[%c4_707, %c1_708] : memref<10x3xf32, #tpu.memory_space<smem>>
    %2300 = vector.broadcast %2299 : f32 to vector<8x128xf32>
    %2301 = arith.mulf %1823, %2300 : vector<8x128xf32>
    %2302 = arith.addf %2295, %2301 : vector<8x128xf32>
    %2303 = vector.broadcast %2299 : f32 to vector<8x128xf32>
    %2304 = arith.mulf %1824, %2303 : vector<8x128xf32>
    %2305 = arith.addf %2298, %2304 : vector<8x128xf32>
    %c5_709 = arith.constant 5 : index
    %c1_710 = arith.constant 1 : index
    %2306 = memref.load %arg8[%c5_709, %c1_710] : memref<10x3xf32, #tpu.memory_space<smem>>
    %2307 = vector.broadcast %2306 : f32 to vector<8x128xf32>
    %2308 = arith.mulf %1898, %2307 : vector<8x128xf32>
    %2309 = arith.addf %2302, %2308 : vector<8x128xf32>
    %2310 = vector.broadcast %2306 : f32 to vector<8x128xf32>
    %2311 = arith.mulf %1899, %2310 : vector<8x128xf32>
    %2312 = arith.addf %2305, %2311 : vector<8x128xf32>
    %c6_711 = arith.constant 6 : index
    %c1_712 = arith.constant 1 : index
    %2313 = memref.load %arg8[%c6_711, %c1_712] : memref<10x3xf32, #tpu.memory_space<smem>>
    %2314 = vector.broadcast %2313 : f32 to vector<8x128xf32>
    %2315 = arith.mulf %1973, %2314 : vector<8x128xf32>
    %2316 = arith.addf %2309, %2315 : vector<8x128xf32>
    %2317 = vector.broadcast %2313 : f32 to vector<8x128xf32>
    %2318 = arith.mulf %1974, %2317 : vector<8x128xf32>
    %2319 = arith.addf %2312, %2318 : vector<8x128xf32>
    %c7_713 = arith.constant 7 : index
    %c1_714 = arith.constant 1 : index
    %2320 = memref.load %arg8[%c7_713, %c1_714] : memref<10x3xf32, #tpu.memory_space<smem>>
    %2321 = vector.broadcast %2320 : f32 to vector<8x128xf32>
    %2322 = arith.mulf %2048, %2321 : vector<8x128xf32>
    %2323 = arith.addf %2316, %2322 : vector<8x128xf32>
    %2324 = vector.broadcast %2320 : f32 to vector<8x128xf32>
    %2325 = arith.mulf %2049, %2324 : vector<8x128xf32>
    %2326 = arith.addf %2319, %2325 : vector<8x128xf32>
    %c8_715 = arith.constant 8 : index
    %c1_716 = arith.constant 1 : index
    %2327 = memref.load %arg8[%c8_715, %c1_716] : memref<10x3xf32, #tpu.memory_space<smem>>
    %2328 = vector.broadcast %2327 : f32 to vector<8x128xf32>
    %2329 = arith.mulf %2123, %2328 : vector<8x128xf32>
    %2330 = arith.addf %2323, %2329 : vector<8x128xf32>
    %2331 = vector.broadcast %2327 : f32 to vector<8x128xf32>
    %2332 = arith.mulf %2124, %2331 : vector<8x128xf32>
    %2333 = arith.addf %2326, %2332 : vector<8x128xf32>
    %c9_717 = arith.constant 9 : index
    %c1_718 = arith.constant 1 : index
    %2334 = memref.load %arg8[%c9_717, %c1_718] : memref<10x3xf32, #tpu.memory_space<smem>>
    %2335 = vector.broadcast %2334 : f32 to vector<8x128xf32>
    %2336 = arith.mulf %2198, %2335 : vector<8x128xf32>
    %2337 = arith.addf %2330, %2336 : vector<8x128xf32>
    %2338 = vector.broadcast %2334 : f32 to vector<8x128xf32>
    %2339 = arith.mulf %2199, %2338 : vector<8x128xf32>
    %2340 = arith.addf %2333, %2339 : vector<8x128xf32>
    %c1_719 = arith.constant 1 : index
    %2341 = memref.load %arg9[%c1_719] : memref<3xf32, #tpu.memory_space<smem>>
    %2342 = vector.broadcast %2341 : f32 to vector<8x128xf32>
    %2343 = arith.addf %2337, %2342 : vector<8x128xf32>
    %2344 = vector.broadcast %2341 : f32 to vector<8x128xf32>
    %2345 = arith.addf %2340, %2344 : vector<8x128xf32>
    %c0_720 = arith.constant 0 : index
    %c2_721 = arith.constant 2 : index
    %2346 = memref.load %arg8[%c0_720, %c2_721] : memref<10x3xf32, #tpu.memory_space<smem>>
    %2347 = vector.broadcast %2346 : f32 to vector<8x128xf32>
    %2348 = arith.mulf %1523, %2347 : vector<8x128xf32>
    %2349 = vector.broadcast %2346 : f32 to vector<8x128xf32>
    %2350 = arith.mulf %1524, %2349 : vector<8x128xf32>
    %c1_722 = arith.constant 1 : index
    %c2_723 = arith.constant 2 : index
    %2351 = memref.load %arg8[%c1_722, %c2_723] : memref<10x3xf32, #tpu.memory_space<smem>>
    %2352 = vector.broadcast %2351 : f32 to vector<8x128xf32>
    %2353 = arith.mulf %1598, %2352 : vector<8x128xf32>
    %2354 = arith.addf %2348, %2353 : vector<8x128xf32>
    %2355 = vector.broadcast %2351 : f32 to vector<8x128xf32>
    %2356 = arith.mulf %1599, %2355 : vector<8x128xf32>
    %2357 = arith.addf %2350, %2356 : vector<8x128xf32>
    %c2_724 = arith.constant 2 : index
    %c2_725 = arith.constant 2 : index
    %2358 = memref.load %arg8[%c2_724, %c2_725] : memref<10x3xf32, #tpu.memory_space<smem>>
    %2359 = vector.broadcast %2358 : f32 to vector<8x128xf32>
    %2360 = arith.mulf %1673, %2359 : vector<8x128xf32>
    %2361 = arith.addf %2354, %2360 : vector<8x128xf32>
    %2362 = vector.broadcast %2358 : f32 to vector<8x128xf32>
    %2363 = arith.mulf %1674, %2362 : vector<8x128xf32>
    %2364 = arith.addf %2357, %2363 : vector<8x128xf32>
    %c3_726 = arith.constant 3 : index
    %c2_727 = arith.constant 2 : index
    %2365 = memref.load %arg8[%c3_726, %c2_727] : memref<10x3xf32, #tpu.memory_space<smem>>
    %2366 = vector.broadcast %2365 : f32 to vector<8x128xf32>
    %2367 = arith.mulf %1748, %2366 : vector<8x128xf32>
    %2368 = arith.addf %2361, %2367 : vector<8x128xf32>
    %2369 = vector.broadcast %2365 : f32 to vector<8x128xf32>
    %2370 = arith.mulf %1749, %2369 : vector<8x128xf32>
    %2371 = arith.addf %2364, %2370 : vector<8x128xf32>
    %c4_728 = arith.constant 4 : index
    %c2_729 = arith.constant 2 : index
    %2372 = memref.load %arg8[%c4_728, %c2_729] : memref<10x3xf32, #tpu.memory_space<smem>>
    %2373 = vector.broadcast %2372 : f32 to vector<8x128xf32>
    %2374 = arith.mulf %1823, %2373 : vector<8x128xf32>
    %2375 = arith.addf %2368, %2374 : vector<8x128xf32>
    %2376 = vector.broadcast %2372 : f32 to vector<8x128xf32>
    %2377 = arith.mulf %1824, %2376 : vector<8x128xf32>
    %2378 = arith.addf %2371, %2377 : vector<8x128xf32>
    %c5_730 = arith.constant 5 : index
    %c2_731 = arith.constant 2 : index
    %2379 = memref.load %arg8[%c5_730, %c2_731] : memref<10x3xf32, #tpu.memory_space<smem>>
    %2380 = vector.broadcast %2379 : f32 to vector<8x128xf32>
    %2381 = arith.mulf %1898, %2380 : vector<8x128xf32>
    %2382 = arith.addf %2375, %2381 : vector<8x128xf32>
    %2383 = vector.broadcast %2379 : f32 to vector<8x128xf32>
    %2384 = arith.mulf %1899, %2383 : vector<8x128xf32>
    %2385 = arith.addf %2378, %2384 : vector<8x128xf32>
    %c6_732 = arith.constant 6 : index
    %c2_733 = arith.constant 2 : index
    %2386 = memref.load %arg8[%c6_732, %c2_733] : memref<10x3xf32, #tpu.memory_space<smem>>
    %2387 = vector.broadcast %2386 : f32 to vector<8x128xf32>
    %2388 = arith.mulf %1973, %2387 : vector<8x128xf32>
    %2389 = arith.addf %2382, %2388 : vector<8x128xf32>
    %2390 = vector.broadcast %2386 : f32 to vector<8x128xf32>
    %2391 = arith.mulf %1974, %2390 : vector<8x128xf32>
    %2392 = arith.addf %2385, %2391 : vector<8x128xf32>
    %c7_734 = arith.constant 7 : index
    %c2_735 = arith.constant 2 : index
    %2393 = memref.load %arg8[%c7_734, %c2_735] : memref<10x3xf32, #tpu.memory_space<smem>>
    %2394 = vector.broadcast %2393 : f32 to vector<8x128xf32>
    %2395 = arith.mulf %2048, %2394 : vector<8x128xf32>
    %2396 = arith.addf %2389, %2395 : vector<8x128xf32>
    %2397 = vector.broadcast %2393 : f32 to vector<8x128xf32>
    %2398 = arith.mulf %2049, %2397 : vector<8x128xf32>
    %2399 = arith.addf %2392, %2398 : vector<8x128xf32>
    %c8_736 = arith.constant 8 : index
    %c2_737 = arith.constant 2 : index
    %2400 = memref.load %arg8[%c8_736, %c2_737] : memref<10x3xf32, #tpu.memory_space<smem>>
    %2401 = vector.broadcast %2400 : f32 to vector<8x128xf32>
    %2402 = arith.mulf %2123, %2401 : vector<8x128xf32>
    %2403 = arith.addf %2396, %2402 : vector<8x128xf32>
    %2404 = vector.broadcast %2400 : f32 to vector<8x128xf32>
    %2405 = arith.mulf %2124, %2404 : vector<8x128xf32>
    %2406 = arith.addf %2399, %2405 : vector<8x128xf32>
    %c9_738 = arith.constant 9 : index
    %c2_739 = arith.constant 2 : index
    %2407 = memref.load %arg8[%c9_738, %c2_739] : memref<10x3xf32, #tpu.memory_space<smem>>
    %2408 = vector.broadcast %2407 : f32 to vector<8x128xf32>
    %2409 = arith.mulf %2198, %2408 : vector<8x128xf32>
    %2410 = arith.addf %2403, %2409 : vector<8x128xf32>
    %2411 = vector.broadcast %2407 : f32 to vector<8x128xf32>
    %2412 = arith.mulf %2199, %2411 : vector<8x128xf32>
    %2413 = arith.addf %2406, %2412 : vector<8x128xf32>
    %c2_740 = arith.constant 2 : index
    %2414 = memref.load %arg9[%c2_740] : memref<3xf32, #tpu.memory_space<smem>>
    %2415 = vector.broadcast %2414 : f32 to vector<8x128xf32>
    %2416 = arith.addf %2410, %2415 : vector<8x128xf32>
    %2417 = vector.broadcast %2414 : f32 to vector<8x128xf32>
    %2418 = arith.addf %2413, %2417 : vector<8x128xf32>
    %2419 = arith.addf %2270, %2272 : vector<8x128xf32>
    %cst_741 = arith.constant 5.000000e-01 : f32
    %2420 = vector.broadcast %cst_741 : f32 to vector<8x128xf32>
    %2421 = arith.mulf %2420, %2419 : vector<8x128xf32>
    %2422 = math.exp %2343 : vector<8x128xf32>
    %2423 = math.exp %2345 : vector<8x128xf32>
    %2424 = arith.addf %2422, %2423 : vector<8x128xf32>
    %cst_742 = arith.constant 5.000000e-01 : f32
    %2425 = vector.broadcast %cst_742 : f32 to vector<8x128xf32>
    %2426 = arith.mulf %2425, %2424 : vector<8x128xf32>
    %2427 = math.exp %2416 : vector<8x128xf32>
    %2428 = math.exp %2418 : vector<8x128xf32>
    %2429 = arith.addf %2427, %2428 : vector<8x128xf32>
    %cst_743 = arith.constant 5.000000e-01 : f32
    %2430 = vector.broadcast %cst_743 : f32 to vector<8x128xf32>
    %2431 = arith.mulf %2430, %2429 : vector<8x128xf32>
    %c0_744 = arith.constant 0 : index
    %2432 = arith.index_cast %1223 : i32 to index
    %c0_745 = arith.constant 0 : index
    %2433 = vector.load %arg10[%c0_744, %2432, %c0_745] : memref<3x16x128xf32, #tpu.memory_space<vmem>>, vector<1x8x128xf32>
    %2434 = vector.shape_cast %2433 : vector<1x8x128xf32> to vector<8x128xf32>
    %2435 = vector.shape_cast %2426 : vector<8x128xf32> to vector<1x8x128xf32>
    tpu.vector_store %arg10[%c0_744, %2432, %c0_745], %2435 {strides = array<i32>} : memref<3x16x128xf32, #tpu.memory_space<vmem>>, vector<1x8x128xf32>,
    %c1_746 = arith.constant 1 : index
    %2436 = arith.index_cast %1223 : i32 to index
    %c0_747 = arith.constant 0 : index
    %2437 = vector.load %arg10[%c1_746, %2436, %c0_747] : memref<3x16x128xf32, #tpu.memory_space<vmem>>, vector<1x8x128xf32>
    %2438 = vector.shape_cast %2437 : vector<1x8x128xf32> to vector<8x128xf32>
    %2439 = vector.shape_cast %2421 : vector<8x128xf32> to vector<1x8x128xf32>
    tpu.vector_store %arg10[%c1_746, %2436, %c0_747], %2439 {strides = array<i32>} : memref<3x16x128xf32, #tpu.memory_space<vmem>>, vector<1x8x128xf32>,
    %c2_748 = arith.constant 2 : index
    %2440 = arith.index_cast %1223 : i32 to index
    %c0_749 = arith.constant 0 : index
    %2441 = vector.load %arg10[%c2_748, %2440, %c0_749] : memref<3x16x128xf32, #tpu.memory_space<vmem>>, vector<1x8x128xf32>
    %2442 = vector.shape_cast %2441 : vector<1x8x128xf32> to vector<8x128xf32>
    %2443 = vector.shape_cast %2431 : vector<8x128xf32> to vector<1x8x128xf32>
    tpu.vector_store %arg10[%c2_748, %2440, %c0_749], %2443 {strides = array<i32>} : memref<3x16x128xf32, #tpu.memory_space<vmem>>, vector<1x8x128xf32>,
    %c2_i32 = arith.constant 2 : i32
    return
  }
  func.func @transform_0(%arg0: i32) -> (i32, i32, i32) {
    %c0_i32 = arith.constant 0 : i32
    %c0_i32_0 = arith.constant 0 : i32
    %c0_i32_1 = arith.constant 0 : i32
    return %c0_i32, %arg0, %c0_i32_0 : i32, i32, i32
  }
  func.func @transform_1(%arg0: i32) -> (i32, i32, i32) {
    %c0_i32 = arith.constant 0 : i32
    %c0_i32_0 = arith.constant 0 : i32
    %c0_i32_1 = arith.constant 0 : i32
    return %c0_i32, %arg0, %c0_i32_0 : i32, i32, i32
  }
  func.func @transform_2(%arg0: i32) -> (i32, i32) {
    %c0_i32 = arith.constant 0 : i32
    %c0_i32_0 = arith.constant 0 : i32
    %c0_i32_1 = arith.constant 0 : i32
    return %c0_i32, %c0_i32_0 : i32, i32
  }
  func.func @transform_3(%arg0: i32) -> (i32, i32) {
    %c0_i32 = arith.constant 0 : i32
    %c0_i32_0 = arith.constant 0 : i32
    %c0_i32_1 = arith.constant 0 : i32
    return %c0_i32, %c0_i32_0 : i32, i32
  }
  func.func @transform_4(%arg0: i32) -> i32 {
    %c0_i32 = arith.constant 0 : i32
    %c0_i32_0 = arith.constant 0 : i32
    return %c0_i32 : i32
  }
  func.func @transform_5(%arg0: i32) -> (i32, i32) {
    %c0_i32 = arith.constant 0 : i32
    %c0_i32_0 = arith.constant 0 : i32
    %c0_i32_1 = arith.constant 0 : i32
    return %c0_i32, %c0_i32_0 : i32, i32
  }
  func.func @transform_6(%arg0: i32) -> i32 {
    %c0_i32 = arith.constant 0 : i32
    %c0_i32_0 = arith.constant 0 : i32
    return %c0_i32 : i32
  }
  func.func @transform_7(%arg0: i32) -> (i32, i32) {
    %c0_i32 = arith.constant 0 : i32
    %c0_i32_0 = arith.constant 0 : i32
    %c0_i32_1 = arith.constant 0 : i32
    return %c0_i32, %c0_i32_0 : i32, i32
  }
  func.func @transform_8(%arg0: i32) -> i32 {
    %c0_i32 = arith.constant 0 : i32
    %c0_i32_0 = arith.constant 0 : i32
    return %c0_i32 : i32
  }
  func.func @transform_9(%arg0: i32) -> (i32, i32, i32) {
    %c0_i32 = arith.constant 0 : i32
    %c0_i32_0 = arith.constant 0 : i32
    %c0_i32_1 = arith.constant 0 : i32
    return %c0_i32, %arg0, %c0_i32_0 : i32, i32, i32
  }
}

</mosaic_0001>

<bundles_post_ra>
// kernel: hamiltonian_elementary_interaction.1
= control target key start
LH: loop header
LB: loop body
LE: loop exit
PB: predicated region body
PF: predicated region fallthrough
CT: control target
= control target key end

     0   :  { %s5954_s0 = inlined_call_operand.vmem [shape: f32[2,32,128], index: 0, kind: input, shape index: {}]   ;;  %s5955_s1 = inlined_call_operand.vmem [shape: f32[2,32,128], index: 1, kind: input, shape index: {}]   ;;  %s5956_s2 = inlined_call_operand.vmem [shape: f32[2,10], index: 2, kind: input, shape index: {}]   ;;  %s5957_s3 = inlined_call_operand.vmem [shape: f32[2,10], index: 3, kind: input, shape index: {}]   ;;  %s5958_s4 = inlined_call_operand.vmem [shape: f32[10], index: 4, kind: input, shape index: {}]   ;;  %s5959_s5 = inlined_call_operand.vmem [shape: f32[10,10], index: 5, kind: input, shape index: {}]   ;;  %s5960_s6 = inlined_call_operand.vmem [shape: f32[10], index: 6, kind: input, shape index: {}]   ;;  %s5961_s7 = inlined_call_operand.vmem [shape: f32[10,3], index: 7, kind: input, shape index: {}]   ;;  %s5962_s8 = inlined_call_operand.vmem [shape: f32[3], index: 8, kind: input, shape index: {}]   ;;  %s5963_s9 = inlined_call_operand.vmem [shape: f32[3,32,128], index: 9, kind: output, shape index: {}]  }
   0x1   :  { %5967 = sst [smem:[#allocation20_spill]] %s5954_s0 }
   0x2   :  { %5968 = sst [smem:[#allocation21_spill]] %s5955_s1 }
   0x3   :  { %5969 = sst [smem:[#allocation22_spill]] %s5956_s2 }
   0x4   :  { %5970 = sst [smem:[#allocation23_spill]] %s5957_s3 }
   0x5   :  { %5971 = sst [smem:[#allocation24_spill]] %s5958_s4 }
   0x6   :  { %14 = vsyncpa [#allocation5], 0 }
   0x7   :  { %15 = vsyncpa [#allocation7], 0 }
   0x8   :  { %16 = vsyncpa [#allocation10], 0 }
   0x9   :  { %17 = vsyncpa [#allocation13], 0  ;;  %s3785_s30 = smov 0   ;;  %s3787_s10 = smov 0  }
   0xa   :  { %s3789_s11 = smov 0  }
   0xb LB: > { %s3801_s12 = sadd.s32 4294967295, %s3724_s11   ;;  %s3804_s13 = sadd.s32 1, %s3724_s11   ;;  %s3724_s11 = sphi %s3789_s11, %s5997_s11   ;;  %s3720_s10 = sphi %s3787_s10, %s5996_s10   ;;  %s3716_s30 = sphi %s3785_s30, %s5995_s30  }
   0xc   : > { %s27_s14 = ssub.s32 %s3724_s11, %s3804_s13  ;;  %s30_s15 = sadd.s32 1, %s3720_s10 }
   0xd   : > { %p28_p0 = scmp.eq.s32.totalorder %s27_s14, 0  ;;  %p37_p1 = scmp.ne.s32.totalorder %s3720_s10, %s3716_s30 }
   0xe   : > { %p38_p2 = scmp.eq.s32.totalorder %s3724_s11, 0  ;;  %p240_p3 = scmp.eq.s32.totalorder %s3801_s12, 1 }
   0xf   : > { %s3814_s16 = scalar_select %p28_p0, %s3720_s10, %s30_s15  }
  0x10   : > { %p3816_p4 = por %p38_p2, %p37_p1  ;;  %p3820_p5 = por %p240_p3, %p37_p1 }
  0x11   : > { %p2892_p6 = scmp.ge.s32.totalorder %s3724_s11, 1  ;;  %p253_p7 = scmp.lt.s32.totalorder %s3724_s11, 3 }
  0x12   : > { %s5972_s17 = scalar_select %p3816_p4, 1, 0 }
  0x13   : > { %s5973_s18 = scalar_select %p3820_p5, 1, 0 }
  0x14   : > { %p5964_p8 = scmp.eq.s32.totalorder %s3801_s12, 0  ;;  %p3827_p9 = pnand %p2892_p6, %p253_p7 }
  0x15   : > { %s5975_s3 = sld [smem:[#allocation23_spill]]  ;;  %s298_s25 = sshll.u32 %s5959_s5, 4  ;;  %s3839_s25 = int_to_ptr.vmem [resolvable:$true] %s298_s25 }
  0x16   : > { %s5974_s19 = scalar_select %p3827_p9, 1, 0 }
  0x17   : > { %p3336_p10 = pneg %p3827_p9  ;;  %s322_s29 = sshll.u32 %s5961_s7, 4  ;;  %s3850_s29 = int_to_ptr.vmem [resolvable:$true] %s322_s29 }
  0x19   : > { %p3843_p11 = pnand %p5964_p8, %p3336_p10 }
  0x1b   : > { %s277_s22 = sshll.u32 %s5975_s3, 4  ;;  %p3854_p13 = pneg %p3843_p11  ;;  %s278_s22 = int_to_ptr.vmem [resolvable:$true] %s277_s22 }
  0x1c   : > { %s3581_s14 = scalar_lea.vmem %s278_s22, 32  ;;  %p3589_p2 = scmp.lt.s32.totalorder %s278_s22, %s278_s22 }
  0x1d   : > { %p3582_p12 = scmp.ne.s32.totalorder %s278_s22, %s3581_s14  ;;  %p3590_p3 = scmp.lt.s32.totalorder %s3581_s14, %s3581_s14 }
  0x1f   : > { %p3584_p0 = pnand %p3854_p13, %p3582_p12  ;;  %p3591_p6 = por %p3590_p3, %p3589_p2 }
  0x21   : > { %p3585_p1 = pneg %p3584_p0 }
  0x23   : > { %p3592_p7 = pnand %p3591_p6, %p3585_p1 }
  0x25   : > { %3595 = shalt.err (!%p3592_p7)
}
  0x26   : > { %s3726_s20 = smov [#allocation6]   ;;  %s3596_s21 = scalar_lea.vmem %s3839_s25, 256 }
  0x27   : > { %3342 = dma.vmem_to_smem (!%p3843_p11), %s278_s22, 32, %s3726_s20, [#allocation7]  }
  0x28   : > { %p3597_p10 = scmp.ne.s32.totalorder %s3839_s25, %s3596_s21  ;;  %p3604_p12 = scmp.lt.s32.totalorder %s3839_s25, %s3839_s25 }
  0x29   : > { %p3605_p0 = scmp.lt.s32.totalorder %s3596_s21, %s3596_s21 }
  0x2a   : > { %p3599_p8 = pnand %p3597_p10, %p3854_p13 }
  0x2b   : > { %p3606_p9 = por %p3605_p0, %p3604_p12 }
  0x2c   : > { %p3600_p5 = pneg %p3599_p8 }
  0x2e   : > { %p3607_p2 = pnand %p3606_p9, %p3600_p5 }
  0x30   : > { %3610 = shalt.err (!%p3607_p2)
}
  0x31   : > { %s3727_s23 = smov [#allocation9]   ;;  %s3728_s24 = smov 128  }
  0x32   : > { %s3729_s22 = smov 8   ;;  %s5978_s2 = sld [smem:[#allocation22_spill]] }
  0x33   : > { %3348 = dma.vmem_to_smem (!%p3843_p11), %s3839_s25, 256, %s3727_s23, [#allocation10], %s3728_s24, %s3728_s24, %s3729_s22  }
  0x34   : > { %s3611_s20 = scalar_lea.vmem %s3850_s29, 256  ;;  %p3619_p1 = scmp.lt.s32.totalorder %s3850_s29, %s3850_s29 }
  0x35   : > { %p3612_p8 = scmp.ne.s32.totalorder %s3850_s29, %s3611_s20  ;;  %p3620_p3 = scmp.lt.s32.totalorder %s3611_s20, %s3611_s20 }
  0x37   : > { %p3614_p5 = pnand %p3612_p8, %p3854_p13  ;;  %p3621_p6 = por %p3620_p3, %p3619_p1 }
  0x38   : > { %s266_s14 = sshll.u32 %s5978_s2, 4  ;;  %s267_s14 = int_to_ptr.vmem [resolvable:$true] %s266_s14 }
  0x39   : > { %p3615_p9 = pneg %p3614_p5 }
  0x3b   : > { %p3622_p7 = pnand %p3621_p6, %p3615_p9 }
  0x3d   : > { %3625 = shalt.err (!%p3622_p7)
}
  0x3e   : > { %s3730_s21 = smov [#allocation12]   ;;  %s3626_s25 = scalar_lea.vmem %s267_s14, 32 }
  0x3f   : > { %3354 = dma.vmem_to_smem (!%p3843_p11), %s3850_s29, 256, %s3730_s21, [#allocation13], %s3728_s24, %s3728_s24, %s3729_s22  }
  0x40   : > { %p3627_p10 = scmp.ne.s32.totalorder %s267_s14, %s3626_s25  ;;  %p3634_p2 = scmp.lt.s32.totalorder %s267_s14, %s267_s14 }
  0x41   : > { %p3635_p8 = scmp.lt.s32.totalorder %s3626_s25, %s3626_s25 }
  0x42   : > { %p3629_p12 = pnand %p3627_p10, %p3854_p13 }
  0x43   : > { %p3636_p5 = por %p3635_p8, %p3634_p2 }
  0x44   : > { %p3630_p0 = pneg %p3629_p12 }
  0x46   : > { %p3637_p4 = pnand %p3636_p5, %p3630_p0 }
  0x48   : > { %3640 = shalt.err (!%p3637_p4)
}
  0x49   : > { %s3731_s23 = smov [#allocation4]   ;;  %s5979_s4 = sld [smem:[#allocation24_spill]] }
  0x4a   : > { %3339 = dma.vmem_to_smem (!%p3843_p11), %s267_s14, 32, %s3731_s23, [#allocation5]  }
  0x4b   : > { %s312_s20 = sshll.u32 %s5960_s6, 4  ;;  %s313_s20 = int_to_ptr.vmem [resolvable:$true] %s312_s20 }
  0x4f   : > { %s288_s29 = sshll.u32 %s5979_s4, 4  ;;  %s289_s29 = int_to_ptr.vmem [resolvable:$true] %s288_s29 }
  0x50   : > { %s3641_s21 = scalar_lea.vmem %s289_s29, 16  ;;  %p3649_p4 = scmp.lt.s32.totalorder %s289_s29, %s289_s29 }
  0x51   : > { %p3642_p9 = scmp.ne.s32.totalorder %s289_s29, %s3641_s21  ;;  %p3650_p6 = scmp.lt.s32.totalorder %s3641_s21, %s3641_s21 }
  0x53   : > { %p3644_p1 = pnand %p3642_p9, %p3854_p13  ;;  %p3651_p7 = por %p3650_p6, %p3649_p4 }
  0x55   : > { %p3645_p3 = pneg %p3644_p1 }
  0x57   : > { %p3652_p10 = pnand %p3651_p7, %p3645_p3 }
  0x59   : > { %3655 = shalt.err (!%p3652_p10)
}
  0x5a   : > { %s3732_s14 = smov [#allocation8]   ;;  %s3656_s25 = scalar_lea.vmem %s313_s20, 16 }
  0x5b   : > { %3345 = dma.vmem_to_smem (!%p3843_p11), %s289_s29, 16, %s3732_s14, [#allocation7]  }
  0x5c   : > { %p3657_p12 = scmp.ne.s32.totalorder %s313_s20, %s3656_s25  ;;  %p3664_p8 = scmp.lt.s32.totalorder %s313_s20, %s313_s20 }
  0x5d   : > { %p3665_p5 = scmp.lt.s32.totalorder %s3656_s25, %s3656_s25 }
  0x5e   : > { %p3659_p0 = pnand %p3657_p12, %p3854_p13 }
  0x5f   : > { %p3666_p9 = por %p3665_p5, %p3664_p8 }
  0x60   : > { %p3660_p2 = pneg %p3659_p0 }
  0x62   : > { %p3667_p1 = pnand %p3666_p9, %p3660_p2 }
  0x64   : > { %3670 = shalt.err (!%p3667_p1)
}
  0x65   : > { %s3733_s23 = smov [#allocation11]   ;;  %s336_s29 = sshll.u32 %s5962_s8, 4  ;;  %s337_s29 = int_to_ptr.vmem [resolvable:$true] %s336_s29 }
  0x66   : > { %3351 = dma.vmem_to_smem (!%p3843_p11), %s313_s20, 16, %s3733_s23, [#allocation10]  }
  0x67   : > { %s3671_s24 = scalar_lea.vmem %s337_s29, 16  ;;  %p3679_p7 = scmp.lt.s32.totalorder %s337_s29, %s337_s29 }
  0x68   : > { %p3672_p3 = scmp.ne.s32.totalorder %s337_s29, %s3671_s24  ;;  %p3680_p10 = scmp.lt.s32.totalorder %s3671_s24, %s3671_s24 }
  0x6a   : > { %p3674_p4 = pnand %p3672_p3, %p3854_p13  ;;  %p3681_p12 = por %p3680_p10, %p3679_p7 }
  0x6c   : > { %p3675_p6 = pneg %p3674_p4 }
  0x6e   : > { %p3682_p0 = pnand %p3681_p12, %p3675_p6 }
  0x70   : > { %3685 = shalt.err (!%p3682_p0)
}
  0x71   : > { %s3734_s22 = smov [#allocation14]   ;;  %p2900_p2 = scmp.ge.s32.totalorder %s3724_s11, 2 }
  0x72   : > { %3357 = dma.vmem_to_smem (!%p3843_p11), %s337_s29, 16, %s3734_s22, [#allocation13]  }
  0x73   : > { %343 = sbr.rel (%p2900_p2) target bundleno = 145 (0x91), region = 44  ;;  %p5980_p8 = scmp.ne.s32.totalorder (!%p2900_p2), %s5972_s17, 0 }
  0x78   : > { %346 = sbr.rel (!%p5980_p8) target bundleno = 132 (0x84), region = 48  ;;  %s348_s15 = sand.u32 (%p5980_p8), 1, %s3720_s10  }
  0x79   : > { %s3304_s20 = sshll.u32 (%p5980_p8), %s3724_s11, 4  ;;  %s2901_s21 = sshll.u32 (%p5980_p8), %s348_s15, 5 }
  0x7a   : > { %s5981_s0 = sld [smem:[#allocation20_spill]] (%p5980_p8)  ;;  %s350_s26 = scalar_lea.vmem (%p5980_p8), [#allocation2], %s2901_s21 }
  0x80   : > { %s353_s23 = scalar_lea.vmem %s5981_s0, %s3304_s20 }
  0x81   : > { %v388_v0 = vld [vmem:[%s353_s23] sm:$0xff]  ;;  %v390_v1 = vld [vmem:[%s353_s23 + $0x8] sm:$0xff] }
  0x82   : > { %v392_v2 = vld [vmem:[%s353_s23 + $0x20] sm:$0xff]  ;;  %389 = vst [vmem:[%s350_s26] sm:$0xff] %v388_v0  ;;  %391 = vst [vmem:[%s350_s26 + $0x8] sm:$0xff] %v390_v1  ;;  %v394_v3 = vld [vmem:[%s353_s23 + $0x28] sm:$0xff] }
  0x83   : > { %393 = vst [vmem:[%s350_s26 + $0x10] sm:$0xff] %v392_v2  ;;  %395 = vst [vmem:[%s350_s26 + $0x18] sm:$0xff] %v394_v3 }
  0x84 PF: > { %p5982_p11 = scmp.ne.s32.totalorder %s5972_s17, 0 }
  0x85   : > { %s403_s27 = sand.u32 (%p5982_p11), 1, %s3720_s10   ;;  %s3305_s28 = sshll.u32 (%p5982_p11), %s3724_s11, 4 }
  0x86   : > { %401 = sbr.rel (!%p5982_p11) target bundleno = 145 (0x91), region = 86  ;;  %s2904_s29 = sshll.u32 (%p5982_p11), %s403_s27, 5 }
  0x87   : > { %s5983_s1 = sld [smem:[#allocation21_spill]] (%p5982_p11)  ;;  %s405_s20 = scalar_lea.vmem (%p5982_p11), [#allocation3], %s2904_s29 }
  0x8d   : > { %s408_s15 = scalar_lea.vmem %s5983_s1, %s3305_s28 }
  0x8e   : > { %v443_v4 = vld [vmem:[%s408_s15] sm:$0xff]  ;;  %v445_v5 = vld [vmem:[%s408_s15 + $0x8] sm:$0xff] }
  0x8f   : > { %v447_v6 = vld [vmem:[%s408_s15 + $0x20] sm:$0xff]  ;;  %444 = vst [vmem:[%s405_s20] sm:$0xff] %v443_v4  ;;  %446 = vst [vmem:[%s405_s20 + $0x8] sm:$0xff] %v445_v5  ;;  %v449_v7 = vld [vmem:[%s408_s15 + $0x28] sm:$0xff] }
  0x90   : > { %448 = vst [vmem:[%s405_s20 + $0x10] sm:$0xff] %v447_v6  ;;  %450 = vst [vmem:[%s405_s20 + $0x18] sm:$0xff] %v449_v7 }
  0x91 PF: > { %p5984_p13 = scmp.ne.s32.totalorder %s5974_s19, 0 }
  0x92   : > { %s5966_s11 = sand.u32 (!%p5984_p13), 1, %s3716_s30   ;;  %p5985_p5 = scmp.eq.s32.totalorder (!%p5984_p13), %s3801_s12, 0 }
  0x93   : > { %459 = sbr.rel (%p5984_p13) target bundleno = 646 (0x286), region = 124  ;;  %s2908_s17 = sshll.u32 (!%p5984_p13), %s5966_s11, 5 }
  0x94   : > { %s3928_s21 = scalar_lea.vmem (!%p5984_p13), [#allocation2], %s2908_s17  ;;  %s3930_s14 = scalar_lea.vmem (!%p5984_p13), [#allocation3], %s2908_s17 }
  0x98   : > { %3699 = dma.done.wait (%p5985_p5), [#allocation5], 32   ;;  %p5986_p9 = pmov %p5985_p5 }
  0x99   : > { %p5987_p1 = pmov %p5985_p5 }
  0x9a   : > { %3701 = vsyncadd (%p5986_p9), [#allocation5], 4294967264 }
  0x9b   : > { %3703 = dma.done.wait (%p5987_p1), [#allocation7], 48   ;;  %p5988_p3 = pmov %p5987_p1 }
  0x9c   : > { %p5989_p4 = pmov %p5987_p1 }
  0x9d   : > { %3705 = vsyncadd (%p5988_p3), [#allocation7], 4294967248 }
  0x9e   : > { %3707 = dma.done.wait (%p5989_p4), [#allocation10], 272   ;;  %p5990_p6 = pmov %p5987_p1 }
  0x9f   : > { %p5991_p7 = pmov %p5987_p1 }
  0xa0   : > { %3709 = vsyncadd (%p5990_p6), [#allocation10], 4294967024 }
  0xa1   : > { %3711 = dma.done.wait (%p5991_p7), [#allocation13], 272   ;;  %p5992_p10 = pmov %p5987_p1 }
  0xa3   : > { %3713 = vsyncadd (%p5992_p10), [#allocation13], 4294967024 }
  0xa4   : > { %503 = sfence }
  0xa5   : > { %s550_s19 = sld [smem:[#allocation4]]  ;;  %v539_v8 = vld [vmem:[%s3928_s21] sm:$0xff]  ;;  %v2917_v9 = vld [vmem:[%s3928_s21 + $0x10] sm:$0xff]  ;;  %s5993_s2 = sand.u32 1, %s3716_s30  }
  0xa6   : > { %s2919_s25 = sld [smem:[#allocation4 + $0x80]]  ;;  %v543_v10 = vld [vmem:[%s3930_s14] sm:$0xff]  ;;  %v2918_v11 = vld [vmem:[%s3930_s14 + $0x10] sm:$0xff]  ;;  %s4958_s3 = smul.u32 48, %s5993_s2 }
  0xa7   : > { %s3948_s23 = sld [smem:[#allocation8]]  ;;  %v3962_v12 = vadd.f32 %v543_v10, %v539_v8  ;;  %v3964_v13 = vadd.f32 %v2918_v11, %v2917_v9  ;;  %v3974_v18 = vsub.f32 %v539_v8, %v543_v10  ;;  %v3976_v19 = vsub.f32 %v2917_v9, %v2918_v11  ;;  %p5994_p12 = scmp.ne.s32.totalorder %s5973_s18, 0 }
  0xa8   : > { %s3950_s26 = sld [smem:[#allocation6]] }
  0xa9   : > { %s3952_s27 = sld [smem:[#allocation6 + $0x80]] }
  0xaa   : > { %s2921_s28 = sld [smem:[#allocation4 + $0x1]] }
  0xab   : > { %s2922_s29 = sld [smem:[#allocation4 + $0x81]]  ;;  %v551_v14 = vstv %s550_s19 }
  0xac   : > { %s3958_s24 = sld [smem:[#allocation8 + $0x1]]  ;;  %v554_v15 = vstv %s2919_s25  ;;  %v552_v20 = vmul.f32 %v551_v14, %v3962_v12 }
  0xad   : > { %s3960_s22 = sld [smem:[#allocation6 + $0x1]]  ;;  %v555_v21 = vmul.f32 %v554_v15, %v3964_v13  ;;  %v558_v32 = vstv %s3948_s23 }
  0xae   : > { %s3966_s15 = sld [smem:[#allocation6 + $0x81]]  ;;  %v561_v22 = vstv %s3950_s26 }
  0xaf   : > { %s3968_s20 = sld [smem:[#allocation4 + $0x2]]  ;;  %v564_v23 = vstv %s3952_s27  ;;  %v556_v28 = vadd.f32 %v555_v21, %v552_v20  ;;  %v562_v29 = vmul.f32 %v561_v22, %v3974_v18 }
  0xb0   : > { %s3970_s17 = sld [smem:[#allocation4 + $0x82]]  ;;  %v572_v16 = vstv %s2921_s28  ;;  %v565_v30 = vmul.f32 %v564_v23, %v3976_v19 }
  0xb1   : > { %v575_v17 = vstv %s2922_s29  ;;  %s3972_s11 = sld [smem:[#allocation8 + $0x2]]  ;;  %v573_v24 = vmul.f32 %v572_v16, %v3962_v12  ;;  %v559_v41 = vadd.f32 %v558_v32, %v556_v28 }
  0xb2   : > { %s3980_s19 = sld [smem:[#allocation6 + $0x2]]  ;;  %v576_v25 = vmul.f32 %v575_v17, %v3964_v13  ;;  %v579_v37 = vstv %s3958_s24  ;;  %v566_v42 = vadd.f32 %v565_v30, %v562_v29 }
  0xb3   : > { %s3984_s25 = sld [smem:[#allocation6 + $0x82]]  ;;  %v582_v26 = vstv %s3960_s22 }
  0xb4   : > { %s3988_s28 = sld [smem:[#allocation4 + $0x3]]  ;;  %v585_v27 = vstv %s3966_s15  ;;  %v577_v34 = vadd.f32 %v576_v25, %v573_v24  ;;  %v583_v35 = vmul.f32 %v582_v26, %v3974_v18  ;;  %v567_v53 = vadd.f32 %v566_v42, %v559_v41 }
  0xb5   : > { %s3992_s29 = sld [smem:[#allocation4 + $0x83]]  ;;  %v593_v31 = vstv %s3968_s20  ;;  %v586_v36 = vmul.f32 %v585_v27, %v3976_v19  ;;  %v569_v55 = vsub.f32 %v559_v41, %v566_v42 }
  0xb6   : > { %s3997_s26 = sld [smem:[#allocation8 + $0x3]]  ;;  %v596_v33 = vstv %s3970_s17  ;;  %v594_v38 = vmul.f32 %v593_v31, %v3962_v12  ;;  %v580_v46 = vadd.f32 %v579_v37, %v577_v34  ;;  %3405 = vtanh.f32 %v567_v53 }
  0xb7   : > { %s4001_s27 = sld [smem:[#allocation6 + $0x3]]  ;;  %v597_v39 = vmul.f32 %v596_v33, %v3964_v13  ;;  %v587_v47 = vadd.f32 %v586_v36, %v583_v35  ;;  %v600_v54 = vstv %s3972_s11  ;;  %3407 = vtanh.f32 %v569_v55 }
  0xb8   : > { %s4005_s22 = sld [smem:[#allocation6 + $0x83]]  ;;  %v603_v40 = vstv %s3980_s19 }
  0xb9   : > { %s4011_s15 = sld [smem:[#allocation4 + $0x4]]  ;;  %v606_v43 = vstv %s3984_s25  ;;  %v604_v48 = vmul.f32 %v603_v40, %v3974_v18  ;;  %v598_v49 = vadd.f32 %v597_v39, %v594_v38  ;;  %v588_v57 = vadd.f32 %v587_v47, %v580_v46 }
  0xba   : > { %s4014_s23 = sld [smem:[#allocation4 + $0x84]]  ;;  %v614_v44 = vstv %s3988_s28  ;;  %v607_v50 = vmul.f32 %v606_v43, %v3976_v19  ;;  %v590_v6 = vsub.f32 %v580_v46, %v587_v47 }
  0xbb   : > { %v617_v45 = vstv %s3992_s29  ;;  %s4018_s20 = sld [smem:[#allocation8 + $0x4]]  ;;  %v615_v51 = vmul.f32 %v614_v44, %v3962_v12  ;;  %v601_v61 = vadd.f32 %v600_v54, %v598_v49  ;;  %3409 = vtanh.f32 %v588_v57 }
  0xbc   : > { %s4021_s24 = sld [smem:[#allocation6 + $0x4]]  ;;  %v618_v52 = vmul.f32 %v617_v45, %v3964_v13  ;;  %v608_v62 = vadd.f32 %v607_v50, %v604_v48  ;;  %v621_v0 = vstv %s3997_s26  ;;  %3411 = vtanh.f32 %v590_v6 }
  0xbd   : > { %s4026_s17 = sld [smem:[#allocation6 + $0x84]]  ;;  %v624_v58 = vstv %s4001_s27 }
  0xbe   : > { %s4029_s19 = sld [smem:[#allocation4 + $0x5]]  ;;  %v627_v59 = vstv %s4005_s22  ;;  %v619_v63 = vadd.f32 %v618_v52, %v615_v51  ;;  %v625_v3 = vmul.f32 %v624_v58, %v3974_v18  ;;  %v609_v9 = vadd.f32 %v608_v62, %v601_v61 }
  0xbf   : > { %v635_v56 = vstv %s4011_s15  ;;  %s4032_s25 = sld [smem:[#allocation4 + $0x85]]  ;;  %v628_v4 = vmul.f32 %v627_v59, %v3976_v19  ;;  %v611_v10 = vsub.f32 %v601_v61, %v608_v62 }
  0xc0   : > { %v638_v60 = vstv %s4014_s23  ;;  %s4037_s28 = sld [smem:[#allocation8 + $0x5]]  ;;  %v636_v1 = vmul.f32 %v635_v56, %v3962_v12  ;;  %v622_v11 = vadd.f32 %v621_v0, %v619_v63  ;;  %3413 = vtanh.f32 %v609_v9 }
  0xc1   : > { %s4039_s29 = sld [smem:[#allocation6 + $0x5]]  ;;  %v639_v2 = vmul.f32 %v638_v60, %v3964_v13  ;;  %v629_v21 = vadd.f32 %v628_v4, %v625_v3  ;;  %v642_v22 = vstv %s4018_s20  ;;  %3415 = vtanh.f32 %v611_v10 }
  0xc2   : > { %s4044_s11 = sld [smem:[#allocation6 + $0x85]]  ;;  %v645_v5 = vstv %s4021_s24 }
  0xc3   : > { %s4049_s27 = sld [smem:[#allocation4 + $0x6]]  ;;  %v648_v7 = vstv %s4026_s17  ;;  %v640_v15 = vadd.f32 %v639_v2, %v636_v1  ;;  %v646_v16 = vmul.f32 %v645_v5, %v3974_v18  ;;  %v630_v34 = vadd.f32 %v629_v21, %v622_v11  ;;  %v4096_v48 = vpop.eup %3405 }
  0xc4   : > { %v656_v8 = vstv %s4029_s19  ;;  %s4053_s26 = sld [smem:[#allocation4 + $0x86]]  ;;  %v649_v17 = vmul.f32 %v648_v7, %v3976_v19  ;;  %v632_v40 = vsub.f32 %v622_v11, %v629_v21  ;;  %v4102_v52 = vpop.eup %3407 }
  0xc5   : > { %v657_v14 = vmul.f32 %v656_v8, %v3962_v12  ;;  %s4056_s22 = sld [smem:[#allocation8 + $0x6]]  ;;  %v659_v20 = vstv %s4032_s25  ;;  %v643_v30 = vadd.f32 %v642_v22, %v640_v15  ;;  %3417 = vtanh.f32 %v630_v34 }
  0xc6   : > { %s4061_s15 = sld [smem:[#allocation6 + $0x6]]  ;;  %v660_v23 = vmul.f32 %v659_v20, %v3964_v13  ;;  %v663_v28 = vstv %s4037_s28  ;;  %v650_v31 = vadd.f32 %v649_v17, %v646_v16  ;;  %3419 = vtanh.f32 %v632_v40 }
  0xc7   : > { %v666_v24 = vstv %s4039_s29  ;;  %s4066_s23 = sld [smem:[#allocation6 + $0x86]] }
  0xc8   : > { %v667_v25 = vmul.f32 %v666_v24, %v3974_v18  ;;  %v669_v26 = vstv %s4044_s11  ;;  %s4070_s24 = sld [smem:[#allocation4 + $0x7]]  ;;  %v661_v27 = vadd.f32 %v660_v23, %v657_v14  ;;  %v651_v44 = vadd.f32 %v650_v31, %v643_v30  ;;  %v4107_v57 = vpop.eup %3409 }
  0xc9   : > { %v670_v29 = vmul.f32 %v669_v26, %v3976_v19  ;;  %s4074_s17 = sld [smem:[#allocation4 + $0x87]]  ;;  %v677_v32 = vstv %s4049_s27  ;;  %v653_v49 = vsub.f32 %v643_v30, %v650_v31  ;;  %v4124_v6 = vpop.eup %3411  ;;  %v4156_v30 = vld [vmem:[%s3930_s14 + $0x8] sm:$0xff] }
  0xca   : > { %v680_v33 = vstv %s4053_s26  ;;  %s4078_s20 = sld [smem:[#allocation8 + $0x7]]  ;;  %v678_v35 = vmul.f32 %v677_v32, %v3962_v12  ;;  %v664_v36 = vadd.f32 %v663_v28, %v661_v27  ;;  %3421 = vtanh.f32 %v651_v44 }
  0xcb   : > { %s4081_s19 = sld [smem:[#allocation6 + $0x7]]  ;;  %v671_v37 = vadd.f32 %v670_v29, %v667_v25  ;;  %v681_v38 = vmul.f32 %v680_v33, %v3964_v13  ;;  %v684_v41 = vstv %s4056_s22  ;;  %3423 = vtanh.f32 %v653_v49  ;;  %v4153_v29 = vld [vmem:[%s3928_s21 + $0x8] sm:$0xff] }
  0xcc   : > { %v687_v39 = vstv %s4061_s15  ;;  %s4085_s25 = sld [smem:[#allocation6 + $0x87]] }
  0xcd   : > { %v688_v42 = vmul.f32 %v687_v39, %v3974_v18  ;;  %v690_v43 = vstv %s4066_s23  ;;  %s4090_s28 = sld [smem:[#allocation4 + $0x8]]  ;;  %v682_v45 = vadd.f32 %v681_v38, %v678_v35  ;;  %v672_v53 = vadd.f32 %v671_v37, %v664_v36  ;;  %v4129_v8 = vpop.eup %3413 }
  0xce   : > { %v691_v46 = vmul.f32 %v690_v43, %v3976_v19  ;;  %v698_v47 = vstv %s4070_s24  ;;  %s4094_s29 = sld [smem:[#allocation4 + $0x88]]  ;;  %v674_v58 = vsub.f32 %v664_v36, %v671_v37  ;;  %v4140_v17 = vpop.eup %3415 }
  0xcf   : > { %v699_v50 = vmul.f32 %v698_v47, %v3962_v12  ;;  %v701_v51 = vstv %s4074_s17  ;;  %s4100_s11 = sld [smem:[#allocation8 + $0x8]]  ;;  %v685_v54 = vadd.f32 %v684_v41, %v682_v45  ;;  %3425 = vtanh.f32 %v672_v53  ;;  %v3110_v41 = vld [vmem:[%s3930_s14 + $0x18] sm:$0xff] }
  0xd0   : > { %v692_v55 = vadd.f32 %v691_v46, %v688_v42  ;;  %v702_v56 = vmul.f32 %v701_v51, %v3964_v13  ;;  %s4105_s27 = sld [smem:[#allocation6 + $0x8]]  ;;  %v705_v59 = vstv %s4078_s20  ;;  %3427 = vtanh.f32 %v674_v58 }
  0xd1   : > { %v708_v60 = vstv %s4081_s19  ;;  %s4111_s26 = sld [smem:[#allocation6 + $0x88]]  ;;  %v4177_v42 = vadd.f32 %v4156_v30, %v4153_v29 }
  0xd2   : > { %v693_v61 = vadd.f32 %v692_v55, %v685_v54  ;;  %v703_v62 = vadd.f32 %v702_v56, %v699_v50  ;;  %v709_v63 = vmul.f32 %v708_v60, %v3974_v18  ;;  %s4114_s22 = sld [smem:[#allocation4 + $0x9]]  ;;  %v695_v0 = vsub.f32 %v685_v54, %v692_v55  ;;  %v4163_v34 = vpop.eup %3417 }
  0xd3   : > { %v711_v1 = vstv %s4085_s25  ;;  %v719_v2 = vstv %s4090_s28  ;;  %s4118_s15 = sld [smem:[#allocation4 + $0x89]]  ;;  %v4179_v43 = vpop.eup %3419 }
  0xd4   : > { %v706_v3 = vadd.f32 %v705_v59, %v703_v62  ;;  %v712_v4 = vmul.f32 %v711_v1, %v3976_v19  ;;  %v720_v5 = vmul.f32 %v719_v2, %v3962_v12  ;;  %s4122_s23 = sld [smem:[#allocation8 + $0x9]]  ;;  %v722_v7 = vstv %s4094_s29 }
  0xd5   : > { %s4127_s24 = sld [smem:[#allocation6 + $0x9]]  ;;  %3429 = vtanh.f32 %v693_v61  ;;  %v723_v10 = vmul.f32 %v722_v7, %v3964_v13  ;;  %v726_v14 = vstv %s4100_s11 }
  0xd6   : > { %v713_v9 = vadd.f32 %v712_v4, %v709_v63  ;;  %v729_v11 = vstv %s4105_s27  ;;  %s4133_s17 = sld [smem:[#allocation6 + $0x89]]  ;;  %3431 = vtanh.f32 %v695_v0 }
  0xd7   : > { %v730_v15 = vmul.f32 %v729_v11, %v3974_v18  ;;  %v732_v16 = vstv %s4111_s26  ;;  %s4138_s20 = sld [smem:[#allocation9]]  ;;  %v724_v22 = vadd.f32 %v723_v10, %v720_v5 }
  0xd8   : > { %v714_v20 = vadd.f32 %v713_v9, %v706_v3  ;;  %v716_v21 = vsub.f32 %v706_v3, %v713_v9  ;;  %v733_v23 = vmul.f32 %v732_v16, %v3976_v19  ;;  %s4143_s19 = sld [smem:[#allocation9 + $0x80]]  ;;  %v740_v24 = vstv %s4114_s22 }
  0xd9   : > { %v743_v25 = vstv %s4118_s15  ;;  %s4147_s25 = sld [smem:[#allocation9 + $0x100]]  ;;  %v727_v26 = vadd.f32 %v726_v14, %v724_v22  ;;  %v741_v28 = vmul.f32 %v740_v24, %v3962_v12 }
  0xda   : > { %3433 = vtanh.f32 %v714_v20  ;;  %v734_v27 = vadd.f32 %v733_v23, %v730_v15  ;;  %s4150_s28 = sld [smem:[#allocation9 + $0x180]]  ;;  %v744_v31 = vmul.f32 %v743_v25, %v3964_v13  ;;  %v747_v32 = vstv %s4122_s23  ;;  %v3108_v13 = vld [vmem:[%s3928_s21 + $0x18] sm:$0xff] }
  0xdb   : > { %3435 = vtanh.f32 %v716_v21  ;;  %v750_v33 = vstv %s4127_s24  ;;  %s4161_s29 = sld [smem:[#allocation9 + $0x200]]  ;;  %v4198_v55 = vadd.f32 %v3110_v41, %v3108_v13  ;;  %v4230_v21 = vsub.f32 %v4153_v29, %v4156_v30 }
  0xdc   : > { %v735_v35 = vadd.f32 %v734_v27, %v727_v26  ;;  %v737_v12 = vsub.f32 %v727_v26, %v734_v27  ;;  %v751_v36 = vmul.f32 %v750_v33, %v3974_v18  ;;  %v753_v37 = vstv %s4133_s17  ;;  %s4167_s11 = sld [smem:[#allocation9 + $0x280]] }
  0xdd   : > { %v745_v38 = vadd.f32 %v744_v31, %v741_v28  ;;  %v754_v39 = vmul.f32 %v753_v37, %v3976_v19  ;;  %v761_v40 = vstv %s4138_s20  ;;  %s4171_s27 = sld [smem:[#allocation9 + $0x300]]  ;;  %v4186_v19 = vpop.eup %3421  ;;  %v4236_v25 = vsub.f32 %v3108_v13, %v3110_v41 }
  0xde   : > { %3437 = vtanh.f32 %v735_v35  ;;  %v762_v18 = vmul.f32 %v4096_v48, %v761_v40  ;;  %v763_v44 = vmul.f32 %v4102_v52, %v761_v40  ;;  %v765_v45 = vstv %s4143_s19  ;;  %s4184_s26 = sld [smem:[#allocation9 + $0x380]]  ;;  %v4191_v50 = vpop.eup %3423 }
  0xdf   : > { %3439 = vtanh.f32 %v737_v12  ;;  %v748_v46 = vadd.f32 %v747_v32, %v745_v38  ;;  %v755_v47 = vadd.f32 %v754_v39, %v751_v36  ;;  %v766_v49 = vmul.f32 %v4107_v57, %v765_v45  ;;  %s4189_s21 = sld [smem:[#allocation9 + $0x400]]  ;;  %v4200_v56 = vpop.eup %3425 }
  0xe0   : > { %v768_v51 = vmul.f32 %v4124_v6, %v765_v45  ;;  %v771_v53 = vstv %s4147_s25  ;;  %v777_v54 = vstv %s4150_s28  ;;  %s4196_s14 = sld [smem:[#allocation9 + $0x480]]  ;;  %v4205_v62 = vpop.eup %3427 }
  0xe1   : > { %v756_v58 = vadd.f32 %v755_v47, %v748_v46  ;;  %v758_v59 = vsub.f32 %v748_v46, %v755_v47  ;;  %v767_v60 = vadd.f32 %v766_v49, %v762_v18  ;;  %v772_v61 = vmul.f32 %v4129_v8, %v771_v53  ;;  %s4203_s22 = sld [smem:[#allocation11]] }
  0xe2   : > { %v769_v63 = vadd.f32 %v768_v51, %v763_v44  ;;  %v774_v0 = vmul.f32 %v4140_v17, %v771_v53  ;;  %v778_v1 = vmul.f32 %v4163_v34, %v777_v54  ;;  %v780_v2 = vmul.f32 %v4179_v43, %v777_v54  ;;  %s4210_s15 = sld [smem:[#allocation9 + $0x1]]  ;;  %v4212_v3 = vpop.eup %3429 }
  0xe3   : > { %3441 = vtanh.f32 %v756_v58  ;;  %v773_v4 = vadd.f32 %v772_v61, %v767_v60  ;;  %v783_v5 = vstv %s4161_s29  ;;  %v789_v7 = vstv %s4167_s11  ;;  %s4216_s23 = sld [smem:[#allocation9 + $0x81]]  ;;  %v4218_v9 = vpop.eup %3431 }
  0xe4   : > { %3443 = vtanh.f32 %v758_v59  ;;  %v775_v10 = vadd.f32 %v774_v0, %v769_v63  ;;  %v784_v11 = vmul.f32 %v4186_v19, %v783_v5  ;;  %v786_v14 = vmul.f32 %v4191_v50, %v783_v5  ;;  %s4222_s24 = sld [smem:[#allocation9 + $0x101]] }
  0xe5   : > { %v779_v15 = vadd.f32 %v778_v1, %v773_v4  ;;  %v790_v16 = vmul.f32 %v4200_v56, %v789_v7  ;;  %v795_v20 = vstv %s4171_s27  ;;  %s4226_s17 = sld [smem:[#allocation9 + $0x181]]  ;;  %v792_v23 = vmul.f32 %v4205_v62, %v789_v7 }
  0xe6   : > { %v781_v22 = vadd.f32 %v780_v2, %v775_v10  ;;  %v801_v24 = vstv %s4184_s26  ;;  %s4234_s20 = sld [smem:[#allocation9 + $0x201]]  ;;  %v796_v28 = vmul.f32 %v4212_v3, %v795_v20  ;;  %v798_v31 = vmul.f32 %v4218_v9, %v795_v20 }
  0xe7   : > { %v4238_v26 = vpop.eup %3433  ;;  %v785_v27 = vadd.f32 %v784_v11, %v779_v15  ;;  %v807_v29 = vstv %s4189_s21  ;;  %s4243_s19 = sld [smem:[#allocation9 + $0x281]]  ;;  %v813_v33 = vstv %s4196_s14  ;;  %v819_v35 = vstv %s4203_s22 }
  0xe8   : > { %v4245_v30 = vpop.eup %3435  ;;  %v787_v32 = vadd.f32 %v786_v14, %v781_v22  ;;  %v825_v12 = vstv %s4210_s15  ;;  %s4250_s25 = sld [smem:[#allocation9 + $0x301]]  ;;  %v802_v37 = vmul.f32 %v4238_v26, %v801_v24 }
  0xe9   : > { %v791_v36 = vadd.f32 %v790_v16, %v785_v27  ;;  %v826_v38 = vmul.f32 %v4096_v48, %v825_v12  ;;  %v827_v39 = vmul.f32 %v4102_v52, %v825_v12  ;;  %v804_v13 = vmul.f32 %v4245_v30, %v801_v24  ;;  %s4263_s28 = sld [smem:[#allocation9 + $0x381]] }
  0xea   : > { %v793_v40 = vadd.f32 %v792_v23, %v787_v32  ;;  %v829_v41 = vstv %s4216_s23  ;;  %v835_v18 = vstv %s4222_s24  ;;  %s4270_s29 = sld [smem:[#allocation9 + $0x401]] }
  0xeb   : > { %v4258_v44 = vpop.eup %3437  ;;  %v797_v45 = vadd.f32 %v796_v28, %v791_v36  ;;  %v830_v46 = vmul.f32 %v4107_v57, %v829_v41  ;;  %v832_v47 = vmul.f32 %v4124_v6, %v829_v41  ;;  %v836_v49 = vmul.f32 %v4129_v8, %v835_v18  ;;  %s4273_s11 = sld [smem:[#allocation9 + $0x481]] }
  0xec   : > { %v4265_v51 = vpop.eup %3439  ;;  %v799_v53 = vadd.f32 %v798_v31, %v793_v40  ;;  %v808_v54 = vmul.f32 %v4258_v44, %v807_v29  ;;  %v838_v58 = vmul.f32 %v4140_v17, %v835_v18  ;;  %v841_v59 = vstv %s4226_s17  ;;  %s4278_s27 = sld [smem:[#allocation11 + $0x1]] }
  0xed   : > { %v803_v60 = vadd.f32 %v802_v37, %v797_v45  ;;  %v810_v61 = vmul.f32 %v4265_v51, %v807_v29  ;;  %v831_v63 = vadd.f32 %v830_v46, %v826_v38  ;;  %v833_v0 = vadd.f32 %v832_v47, %v827_v39  ;;  %s4281_s26 = sld [smem:[#allocation9 + $0x2]] }
  0xee   : > { %v805_v1 = vadd.f32 %v804_v13, %v799_v53  ;;  %v842_v2 = vmul.f32 %v4163_v34, %v841_v59  ;;  %v844_v4 = vmul.f32 %v4179_v43, %v841_v59  ;;  %v847_v5 = vstv %s4234_s20  ;;  %s4288_s21 = sld [smem:[#allocation9 + $0x82]] }
  0xef   : > { %v809_v7 = vadd.f32 %v808_v54, %v803_v60  ;;  %v837_v10 = vadd.f32 %v836_v49, %v831_v63  ;;  %v839_v11 = vadd.f32 %v838_v58, %v833_v0  ;;  %v848_v14 = vmul.f32 %v4186_v19, %v847_v5  ;;  %s4294_s14 = sld [smem:[#allocation9 + $0x102]] }
  0xf0   : > { %v4283_v15 = vpop.eup %3441  ;;  %v811_v16 = vadd.f32 %v810_v61, %v805_v1  ;;  %v850_v20 = vmul.f32 %v4191_v50, %v847_v5  ;;  %v853_v22 = vstv %s4243_s19  ;;  %v859_v23 = vstv %s4250_s25  ;;  %s4300_s15 = sld [smem:[#allocation9 + $0x182]] }
  0xf1   : > { %v4290_v24 = vpop.eup %3443  ;;  %v814_v27 = vmul.f32 %v4283_v15, %v813_v33  ;;  %v843_v28 = vadd.f32 %v842_v2, %v837_v10  ;;  %v845_v31 = vadd.f32 %v844_v4, %v839_v11  ;;  %v854_v29 = vmul.f32 %v4200_v56, %v853_v22  ;;  %s4306_s23 = sld [smem:[#allocation9 + $0x202]] }
  0xf2   : > { %v816_v32 = vmul.f32 %v4290_v24, %v813_v33  ;;  %v856_v12 = vmul.f32 %v4205_v62, %v853_v22  ;;  %v860_v36 = vmul.f32 %v4212_v3, %v859_v23  ;;  %v862_v37 = vmul.f32 %v4218_v9, %v859_v23  ;;  %s4311_s24 = sld [smem:[#allocation9 + $0x282]] }
  0xf3   : > { %v815_v38 = vadd.f32 %v814_v27, %v809_v7  ;;  %v849_v39 = vadd.f32 %v848_v14, %v843_v28  ;;  %v851_v40 = vadd.f32 %v850_v20, %v845_v31  ;;  %v865_v13 = vstv %s4263_s28  ;;  %s4318_s17 = sld [smem:[#allocation9 + $0x302]] }
  0xf4   : > { %v817_v41 = vadd.f32 %v816_v32, %v811_v16  ;;  %v866_v18 = vmul.f32 %v4238_v26, %v865_v13  ;;  %v868_v33 = vmul.f32 %v4245_v30, %v865_v13  ;;  %v871_v45 = vstv %s4270_s29  ;;  %s4321_s20 = sld [smem:[#allocation9 + $0x382]] }
  0xf5   : > { %v820_v46 = vadd.f32 %v819_v35, %v815_v38  ;;  %v855_v47 = vadd.f32 %v854_v29, %v849_v39  ;;  %v857_v49 = vadd.f32 %v856_v12, %v851_v40  ;;  %v872_v53 = vmul.f32 %v4258_v44, %v871_v45  ;;  %s4326_s22 = sld [smem:[#allocation9 + $0x402]] }
  0xf6   : > { %v821_v54 = vadd.f32 %v819_v35, %v817_v41  ;;  %v874_v58 = vmul.f32 %v4265_v51, %v871_v45  ;;  %v877_v59 = vstv %s4273_s11  ;;  %v883_v60 = vstv %s4278_s27  ;;  %s4330_s19 = sld [smem:[#allocation9 + $0x482]] }
  0xf7   : > { %3445 = vtanh.f32 %v820_v46  ;;  %v861_v61 = vadd.f32 %v860_v36, %v855_v47  ;;  %v863_v63 = vadd.f32 %v862_v37, %v857_v49  ;;  %v878_v0 = vmul.f32 %v4283_v15, %v877_v59  ;;  %s4336_s25 = sld [smem:[#allocation11 + $0x2]] }
  0xf8   : > { %3447 = vtanh.f32 %v821_v54  ;;  %v880_v1 = vmul.f32 %v4290_v24, %v877_v59  ;;  %v889_v2 = vstv %s4281_s26  ;;  %v893_v35 = vstv %s4288_s21  ;;  %s4340_s28 = sld [smem:[#allocation9 + $0x3]] }
  0xf9   : > { %v867_v4 = vadd.f32 %v866_v18, %v861_v61  ;;  %v869_v5 = vadd.f32 %v868_v33, %v863_v63  ;;  %v890_v7 = vmul.f32 %v4096_v48, %v889_v2  ;;  %v891_v10 = vmul.f32 %v4102_v52, %v889_v2  ;;  %s4346_s29 = sld [smem:[#allocation9 + $0x83]] }
  0xfa   : > { %v894_v11 = vmul.f32 %v4107_v57, %v893_v35  ;;  %v896_v14 = vmul.f32 %v4124_v6, %v893_v35  ;;  %v899_v16 = vstv %s4294_s14  ;;  %v905_v20 = vstv %s4300_s15  ;;  %s4350_s11 = sld [smem:[#allocation9 + $0x103]] }
  0xfb   : > { %v873_v22 = vadd.f32 %v872_v53, %v867_v4  ;;  %v875_v23 = vadd.f32 %v874_v58, %v869_v5  ;;  %v900_v27 = vmul.f32 %v4129_v8, %v899_v16  ;;  %v902_v28 = vmul.f32 %v4140_v17, %v899_v16  ;;  %s4354_s27 = sld [smem:[#allocation9 + $0x183]] }
  0xfc   : > { %v895_v31 = vadd.f32 %v894_v11, %v890_v7  ;;  %v897_v29 = vadd.f32 %v896_v14, %v891_v10  ;;  %v906_v32 = vmul.f32 %v4163_v34, %v905_v20  ;;  %v908_v12 = vmul.f32 %v4179_v43, %v905_v20  ;;  %s4358_s26 = sld [smem:[#allocation9 + $0x203]] }
  0xfd   : > { %v879_v36 = vadd.f32 %v878_v0, %v873_v22  ;;  %v881_v37 = vadd.f32 %v880_v1, %v875_v23  ;;  %v911_v38 = vstv %s4306_s23  ;;  %v917_v39 = vstv %s4311_s24  ;;  %s4364_s21 = sld [smem:[#allocation9 + $0x283]] }
  0xfe   : > { %v901_v40 = vadd.f32 %v900_v27, %v895_v31  ;;  %v903_v13 = vadd.f32 %v902_v28, %v897_v29  ;;  %v912_v41 = vmul.f32 %v4186_v19, %v911_v38  ;;  %v914_v18 = vmul.f32 %v4191_v50, %v911_v38  ;;  %s4370_s14 = sld [smem:[#allocation9 + $0x303]] }
  0xff   : > { %v884_v33 = vadd.f32 %v883_v60, %v879_v36  ;;  %v885_v45 = vadd.f32 %v883_v60, %v881_v37  ;;  %v918_v46 = vmul.f32 %v4200_v56, %v917_v39  ;;  %v920_v47 = vmul.f32 %v4205_v62, %v917_v39  ;;  %s4382_s15 = sld [smem:[#allocation9 + $0x383]] }
 0x100   : > { %v907_v49 = vadd.f32 %v906_v32, %v901_v40  ;;  %v909_v53 = vadd.f32 %v908_v12, %v903_v13  ;;  %v923_v54 = vstv %s4318_s17  ;;  %v929_v58 = vstv %s4321_s20  ;;  %s4386_s23 = sld [smem:[#allocation9 + $0x403]] }
 0x101   : > { %3449 = vtanh.f32 %v884_v33  ;;  %v924_v59 = vmul.f32 %v4212_v3, %v923_v54  ;;  %v926_v60 = vmul.f32 %v4218_v9, %v923_v54  ;;  %v930_v61 = vmul.f32 %v4238_v26, %v929_v58  ;;  %s4392_s24 = sld [smem:[#allocation9 + $0x483]] }
 0x102   : > { %3451 = vtanh.f32 %v885_v45  ;;  %v913_v63 = vadd.f32 %v912_v41, %v907_v49  ;;  %v915_v0 = vadd.f32 %v914_v18, %v909_v53  ;;  %v932_v1 = vmul.f32 %v4245_v30, %v929_v58  ;;  %s4396_s17 = sld [smem:[#allocation11 + $0x3]] }
 0x103   : > { %v935_v2 = vstv %s4326_s22  ;;  %v941_v35 = vstv %s4330_s19  ;;  %v947_v4 = vstv %s4336_s25  ;;  %v953_v5 = vstv %s4340_s28  ;;  %s4400_s20 = sld [smem:[#allocation9 + $0x4]] }
 0x104   : > { %v4372_v7 = vpop.eup %3445  ;;  %v919_v10 = vadd.f32 %v918_v46, %v913_v63  ;;  %v921_v11 = vadd.f32 %v920_v47, %v915_v0  ;;  %v936_v14 = vmul.f32 %v4258_v44, %v935_v2  ;;  %v938_v16 = vmul.f32 %v4265_v51, %v935_v2  ;;  %s4404_s22 = sld [smem:[#allocation9 + $0x84]] }
 0x105   : > { %v4376_v20 = vpop.eup %3447  ;;  %v942_v22 = vmul.f32 %v4283_v15, %v941_v35  ;;  %v944_v23 = vmul.f32 %v4290_v24, %v941_v35  ;;  %v954_v27 = vmul.f32 %v4096_v48, %v953_v5  ;;  %v955_v28 = vmul.f32 %v4102_v52, %v953_v5  ;;  %s4408_s19 = sld [smem:[#allocation9 + $0x104]] }
 0x106   : > { %v925_v31 = vadd.f32 %v924_v59, %v919_v10  ;;  %v927_v29 = vadd.f32 %v926_v60, %v921_v11  ;;  %v957_v32 = vstv %s4346_s29  ;;  %v963_v12 = vstv %s4350_s11  ;;  %s4412_s25 = sld [smem:[#allocation9 + $0x184]] }
 0x107   : > { %v958_v36 = vmul.f32 %v4107_v57, %v957_v32  ;;  %v960_v37 = vmul.f32 %v4124_v6, %v957_v32  ;;  %v964_v38 = vmul.f32 %v4129_v8, %v963_v12  ;;  %v966_v39 = vmul.f32 %v4140_v17, %v963_v12  ;;  %s4420_s28 = sld [smem:[#allocation9 + $0x204]] }
 0x108   : > { %v931_v40 = vadd.f32 %v930_v61, %v925_v31  ;;  %v933_v13 = vadd.f32 %v932_v1, %v927_v29  ;;  %v969_v41 = vstv %s4354_s27  ;;  %v975_v18 = vstv %s4358_s26  ;;  %s4426_s29 = sld [smem:[#allocation9 + $0x284]] }
 0x109   : > { %v959_v33 = vadd.f32 %v958_v36, %v954_v27  ;;  %v961_v45 = vadd.f32 %v960_v37, %v955_v28  ;;  %v970_v46 = vmul.f32 %v4163_v34, %v969_v41  ;;  %v972_v47 = vmul.f32 %v4179_v43, %v969_v41  ;;  %s4431_s11 = sld [smem:[#allocation9 + $0x304]] }
 0x10a   : > { %v937_v49 = vadd.f32 %v936_v14, %v931_v40  ;;  %v939_v53 = vadd.f32 %v938_v16, %v933_v13  ;;  %v976_v54 = vmul.f32 %v4186_v19, %v975_v18  ;;  %v978_v58 = vmul.f32 %v4191_v50, %v975_v18  ;;  %s4434_s27 = sld [smem:[#allocation9 + $0x384]] }
 0x10b   : > { %v965_v59 = vadd.f32 %v964_v38, %v959_v33  ;;  %v967_v60 = vadd.f32 %v966_v39, %v961_v45  ;;  %v981_v61 = vstv %s4364_s21  ;;  %v987_v63 = vstv %s4370_s14  ;;  %s4440_s26 = sld [smem:[#allocation9 + $0x404]] }
 0x10c   : > { %v943_v0 = vadd.f32 %v942_v22, %v937_v49  ;;  %v945_v1 = vadd.f32 %v944_v23, %v939_v53  ;;  %v982_v2 = vmul.f32 %v4200_v56, %v981_v61  ;;  %v984_v35 = vmul.f32 %v4205_v62, %v981_v61  ;;  %s4444_s21 = sld [smem:[#allocation9 + $0x484]] }
 0x10d   : > { %v971_v5 = vadd.f32 %v970_v46, %v965_v59  ;;  %v973_v10 = vadd.f32 %v972_v47, %v967_v60  ;;  %v988_v11 = vmul.f32 %v4212_v3, %v987_v63  ;;  %v990_v14 = vmul.f32 %v4218_v9, %v987_v63  ;;  %s4450_s14 = sld [smem:[#allocation11 + $0x4]] }
 0x10e   : > { %v4416_v16 = vpop.eup %3449  ;;  %v948_v27 = vadd.f32 %v947_v4, %v943_v0  ;;  %v949_v28 = vadd.f32 %v947_v4, %v945_v1  ;;  %v993_v31 = vstv %s4382_s15  ;;  %v999_v22 = vstv %s4386_s23  ;;  %s4454_s15 = sld [smem:[#allocation9 + $0x5]] }
 0x10f   : > { %v4422_v23 = vpop.eup %3451  ;;  %v977_v29 = vadd.f32 %v976_v54, %v971_v5  ;;  %v979_v32 = vadd.f32 %v978_v58, %v973_v10  ;;  %v994_v12 = vmul.f32 %v4238_v26, %v993_v31  ;;  %v996_v36 = vmul.f32 %v4245_v30, %v993_v31  ;;  %s4458_s23 = sld [smem:[#allocation9 + $0x85]] }
 0x110   : > { %3453 = vtanh.f32 %v948_v27  ;;  %v1000_v4 = vmul.f32 %v4258_v44, %v999_v22  ;;  %v1002_v37 = vmul.f32 %v4265_v51, %v999_v22  ;;  %v1005_v38 = vstv %s4392_s24  ;;  %s4462_s24 = sld [smem:[#allocation9 + $0x105]] }
 0x111   : > { %3455 = vtanh.f32 %v949_v28  ;;  %v983_v39 = vadd.f32 %v982_v2, %v977_v29  ;;  %v985_v40 = vadd.f32 %v984_v35, %v979_v32  ;;  %v1006_v13 = vmul.f32 %v4283_v15, %v1005_v38  ;;  %s4866_s0 = sld [smem:[#allocation12 + $0x182]] }
 0x112   : > { %v1008_v41 = vmul.f32 %v4290_v24, %v1005_v38  ;;  %v1011_v18 = vstv %s4396_s17  ;;  %v1017_v33 = vstv %s4400_s20  ;;  %v1021_v45 = vstv %s4404_s22  ;;  %s4466_s17 = sld [smem:[#allocation9 + $0x185]] }
 0x113   : > { %v989_v46 = vadd.f32 %v988_v11, %v983_v39  ;;  %v991_v47 = vadd.f32 %v990_v14, %v985_v40  ;;  %v1018_v49 = vmul.f32 %v4096_v48, %v1017_v33  ;;  %v1019_v53 = vmul.f32 %v4102_v52, %v1017_v33  ;;  %s4470_s20 = sld [smem:[#allocation9 + $0x205]] }
 0x114   : > { %v1022_v54 = vmul.f32 %v4107_v57, %v1021_v45  ;;  %v1024_v58 = vmul.f32 %v4124_v6, %v1021_v45  ;;  %v1027_v59 = vstv %s4408_s19  ;;  %v1033_v60 = vstv %s4412_s25  ;;  %s4478_s22 = sld [smem:[#allocation9 + $0x285]] }
 0x115   : > { %v995_v61 = vadd.f32 %v994_v12, %v989_v46  ;;  %v997_v63 = vadd.f32 %v996_v36, %v991_v47  ;;  %v1028_v0 = vmul.f32 %v4129_v8, %v1027_v59  ;;  %v1030_v1 = vmul.f32 %v4140_v17, %v1027_v59  ;;  %s4485_s19 = sld [smem:[#allocation9 + $0x305]] }
 0x116   : > { %v1023_v2 = vadd.f32 %v1022_v54, %v1018_v49  ;;  %v1025_v35 = vadd.f32 %v1024_v58, %v1019_v53  ;;  %v1034_v5 = vmul.f32 %v4163_v34, %v1033_v60  ;;  %v1036_v10 = vmul.f32 %v4179_v43, %v1033_v60  ;;  %s4490_s25 = sld [smem:[#allocation9 + $0x385]] }
 0x117   : > { %v1001_v11 = vadd.f32 %v1000_v4, %v995_v61  ;;  %v1003_v14 = vadd.f32 %v1002_v37, %v997_v63  ;;  %v1039_v27 = vstv %s4420_s28  ;;  %v1045_v28 = vstv %s4426_s29  ;;  %s4496_s28 = sld [smem:[#allocation9 + $0x405]] }
 0x118   : > { %v1029_v31 = vadd.f32 %v1028_v0, %v1023_v2  ;;  %v1031_v22 = vadd.f32 %v1030_v1, %v1025_v35  ;;  %v1040_v29 = vmul.f32 %v4186_v19, %v1039_v27  ;;  %v1042_v32 = vmul.f32 %v4191_v50, %v1039_v27  ;;  %s4500_s29 = sld [smem:[#allocation9 + $0x485]] }
 0x119   : > { %v1007_v12 = vadd.f32 %v1006_v13, %v1001_v11  ;;  %v1009_v36 = vadd.f32 %v1008_v41, %v1003_v14  ;;  %v1046_v38 = vmul.f32 %v4200_v56, %v1045_v28  ;;  %v1048_v4 = vmul.f32 %v4205_v62, %v1045_v28  ;;  %s4886_s1 = sld [smem:[#allocation12 + $0x402]] }
 0x11a   : > { %v1035_v37 = vadd.f32 %v1034_v5, %v1029_v31  ;;  %v1037_v39 = vadd.f32 %v1036_v10, %v1031_v22  ;;  %v1051_v40 = vstv %s4431_s11  ;;  %v1057_v33 = vstv %s4434_s27  ;;  %s4506_s11 = sld [smem:[#allocation11 + $0x5]] }
 0x11b   : > { %v1012_v45 = vadd.f32 %v1011_v18, %v1007_v12  ;;  %v1013_v46 = vadd.f32 %v1011_v18, %v1009_v36  ;;  %v1052_v47 = vmul.f32 %v4212_v3, %v1051_v40  ;;  %v1054_v13 = vmul.f32 %v4218_v9, %v1051_v40  ;;  %s4510_s27 = sld [smem:[#allocation9 + $0x6]] }
 0x11c   : > { %v1041_v41 = vadd.f32 %v1040_v29, %v1035_v37  ;;  %v1043_v49 = vadd.f32 %v1042_v32, %v1037_v39  ;;  %v1058_v53 = vmul.f32 %v4238_v26, %v1057_v33  ;;  %v1060_v54 = vmul.f32 %v4245_v30, %v1057_v33  ;;  %s4966_s4 = sld [smem:[#allocation8 + $0x2]] }
 0x11d   : > { %v4480_v58 = vpop.eup %3453  ;;  %3457 = vtanh.f32 %v1012_v45  ;;  %v1063_v59 = vstv %s4440_s26  ;;  %v1069_v60 = vstv %s4444_s21  ;;  %v1075_v61 = vstv %s4450_s14  ;;  %s4516_s26 = sld [smem:[#allocation9 + $0x86]] }
 0x11e   : > { %v4487_v18 = vpop.eup %3455  ;;  %3459 = vtanh.f32 %v1013_v46  ;;  %v1047_v63 = vadd.f32 %v1046_v38, %v1041_v41  ;;  %v1049_v0 = vadd.f32 %v1048_v4, %v1043_v49  ;;  %v1064_v1 = vmul.f32 %v4258_v44, %v1063_v59  ;;  %s4518_s21 = sld [smem:[#allocation9 + $0x106]] }
 0x11f   : > { %v1066_v2 = vmul.f32 %v4265_v51, %v1063_v59  ;;  %v1070_v35 = vmul.f32 %v4283_v15, %v1069_v60  ;;  %v1072_v5 = vmul.f32 %v4290_v24, %v1069_v60  ;;  %v1081_v10 = vstv %s4454_s15  ;;  %s4524_s14 = sld [smem:[#allocation9 + $0x186]] }
 0x120   : > { %v1053_v11 = vadd.f32 %v1052_v47, %v1047_v63  ;;  %v1055_v14 = vadd.f32 %v1054_v13, %v1049_v0  ;;  %v1082_v27 = vmul.f32 %v4096_v48, %v1081_v10  ;;  %v1083_v28 = vmul.f32 %v4102_v52, %v1081_v10  ;;  %s4530_s15 = sld [smem:[#allocation9 + $0x206]] }
 0x121   : > { %v1085_v31 = vstv %s4458_s23  ;;  %v1091_v22 = vstv %s4462_s24  ;;  %v1097_v29 = vstv %s4466_s17  ;;  %v1103_v32 = vstv %s4470_s20  ;;  %s4536_s23 = sld [smem:[#allocation9 + $0x286]] }
 0x122   : > { %v1059_v12 = vadd.f32 %v1058_v53, %v1053_v11  ;;  %v1061_v36 = vadd.f32 %v1060_v54, %v1055_v14  ;;  %v1086_v38 = vmul.f32 %v4107_v57, %v1085_v31  ;;  %v1088_v4 = vmul.f32 %v4124_v6, %v1085_v31  ;;  %s4546_s24 = sld [smem:[#allocation9 + $0x306]] }
 0x123   : > { %v1092_v37 = vmul.f32 %v4129_v8, %v1091_v22  ;;  %v1094_v39 = vmul.f32 %v4140_v17, %v1091_v22  ;;  %v1098_v40 = vmul.f32 %v4163_v34, %v1097_v29  ;;  %v1100_v33 = vmul.f32 %v4179_v43, %v1097_v29  ;;  %s4550_s17 = sld [smem:[#allocation9 + $0x386]] }
 0x124   : > { %v1065_v45 = vadd.f32 %v1064_v1, %v1059_v12  ;;  %v1067_v46 = vadd.f32 %v1066_v2, %v1061_v36  ;;  %v1087_v47 = vadd.f32 %v1086_v38, %v1082_v27  ;;  %v1089_v13 = vadd.f32 %v1088_v4, %v1083_v28  ;;  %s4556_s20 = sld [smem:[#allocation9 + $0x406]] }
 0x125   : > { %v1104_v41 = vmul.f32 %v4186_v19, %v1103_v32  ;;  %v1106_v49 = vmul.f32 %v4191_v50, %v1103_v32  ;;  %v1109_v53 = vstv %s4478_s22  ;;  %v1115_v54 = vstv %s4485_s19  ;;  %s4560_s22 = sld [smem:[#allocation9 + $0x486]] }
 0x126   : > { %v1071_v59 = vadd.f32 %v1070_v35, %v1065_v45  ;;  %v1073_v60 = vadd.f32 %v1072_v5, %v1067_v46  ;;  %v1093_v63 = vadd.f32 %v1092_v37, %v1087_v47  ;;  %v1095_v0 = vadd.f32 %v1094_v39, %v1089_v13  ;;  %s4566_s19 = sld [smem:[#allocation11 + $0x6]] }
 0x127   : > { %v1110_v1 = vmul.f32 %v4200_v56, %v1109_v53  ;;  %v1112_v2 = vmul.f32 %v4205_v62, %v1109_v53  ;;  %v1116_v10 = vmul.f32 %v4212_v3, %v1115_v54  ;;  %v1118_v11 = vmul.f32 %v4218_v9, %v1115_v54  ;;  %s4972_s2 = sld [smem:[#allocation6 + $0x2]] }
 0x128   : > { %v1076_v14 = vadd.f32 %v1075_v61, %v1071_v59  ;;  %v1077_v27 = vadd.f32 %v1075_v61, %v1073_v60  ;;  %v1099_v28 = vadd.f32 %v1098_v40, %v1093_v63  ;;  %v1101_v31 = vadd.f32 %v1100_v33, %v1095_v0  ;;  %s4976_s30 = sld [smem:[#allocation6 + $0x82]] }
 0x129   : > { %v1121_v22 = vstv %s4490_s25  ;;  %v1127_v35 = vstv %s4496_s28  ;;  %v1133_v29 = vstv %s4500_s29  ;;  %v1139_v5 = vstv %s4506_s11  ;;  %s4570_s25 = sld [smem:[#allocation9 + $0x7]] }
 0x12a   : > { %v4538_v32 = vpop.eup %3457  ;;  %3461 = vtanh.f32 %v1076_v14  ;;  %v1105_v12 = vadd.f32 %v1104_v41, %v1099_v28  ;;  %v1107_v36 = vadd.f32 %v1106_v49, %v1101_v31  ;;  %v1122_v61 = vmul.f32 %v4238_v26, %v1121_v22  ;;  %s4574_s28 = sld [smem:[#allocation9 + $0x87]] }
 0x12b   : > { %v4541_v38 = vpop.eup %3459  ;;  %3463 = vtanh.f32 %v1077_v27  ;;  %v1124_v4 = vmul.f32 %v4245_v30, %v1121_v22  ;;  %v1128_v37 = vmul.f32 %v4258_v44, %v1127_v35  ;;  %v1130_v39 = vmul.f32 %v4265_v51, %v1127_v35  ;;  %s4578_s29 = sld [smem:[#allocation9 + $0x107]] }
 0x12c   : > { %v1111_v40 = vadd.f32 %v1110_v1, %v1105_v12  ;;  %v1113_v33 = vadd.f32 %v1112_v2, %v1107_v36  ;;  %v1134_v45 = vmul.f32 %v4283_v15, %v1133_v29  ;;  %v1136_v46 = vmul.f32 %v4290_v24, %v1133_v29  ;;  %s4607_s11 = sld [smem:[#allocation9 + $0x307]] }
 0x12d   : > { %v1145_v47 = vstv %s4510_s27  ;;  %v1149_v13 = vstv %s4516_s26  ;;  %v1155_v41 = vstv %s4518_s21  ;;  %v1161_v49 = vstv %s4524_s14  ;;  %s4584_s27 = sld [smem:[#allocation9 + $0x187]] }
 0x12e   : > { %v1117_v53 = vadd.f32 %v1116_v10, %v1111_v40  ;;  %v1119_v54 = vadd.f32 %v1118_v11, %v1113_v33  ;;  %v1146_v59 = vmul.f32 %v4096_v48, %v1145_v47  ;;  %v1147_v60 = vmul.f32 %v4102_v52, %v1145_v47  ;;  %s4588_s26 = sld [smem:[#allocation9 + $0x207]] }
 0x12f   : > { %v1150_v63 = vmul.f32 %v4107_v57, %v1149_v13  ;;  %v1152_v0 = vmul.f32 %v4124_v6, %v1149_v13  ;;  %v1156_v1 = vmul.f32 %v4129_v8, %v1155_v41  ;;  %v1158_v2 = vmul.f32 %v4140_v17, %v1155_v41  ;;  %s4600_s21 = sld [smem:[#allocation9 + $0x287]] }
 0x130   : > { %v1123_v10 = vadd.f32 %v1122_v61, %v1117_v53  ;;  %v1125_v11 = vadd.f32 %v1124_v4, %v1119_v54  ;;  %v1162_v14 = vmul.f32 %v4163_v34, %v1161_v49  ;;  %v1164_v27 = vmul.f32 %v4179_v43, %v1161_v49  ;;  %s4614_s14 = sld [smem:[#allocation9 + $0x387]] }
 0x131   : > { %v1151_v28 = vadd.f32 %v1150_v63, %v1146_v59  ;;  %v1153_v31 = vadd.f32 %v1152_v0, %v1147_v60  ;;  %v1167_v22 = vstv %s4530_s15  ;;  %v1173_v35 = vstv %s4536_s23  ;;  %s4618_s15 = sld [smem:[#allocation9 + $0x407]] }
 0x132   : > { %v1129_v29 = vadd.f32 %v1128_v37, %v1123_v10  ;;  %v1131_v12 = vadd.f32 %v1130_v39, %v1125_v11  ;;  %v1168_v36 = vmul.f32 %v4186_v19, %v1167_v22  ;;  %v1170_v61 = vmul.f32 %v4191_v50, %v1167_v22  ;;  %s4624_s23 = sld [smem:[#allocation9 + $0x487]] }
 0x133   : > { %v1157_v4 = vadd.f32 %v1156_v1, %v1151_v28  ;;  %v1159_v40 = vadd.f32 %v1158_v2, %v1153_v31  ;;  %v1174_v33 = vmul.f32 %v4200_v56, %v1173_v35  ;;  %v1176_v47 = vmul.f32 %v4205_v62, %v1173_v35 }
 0x134   : > { %v1135_v13 = vadd.f32 %v1134_v45, %v1129_v29  ;;  %v1137_v41 = vadd.f32 %v1136_v46, %v1131_v12  ;;  %v1179_v49 = vstv %s4546_s24  ;;  %v1185_v37 = vstv %s4550_s17  ;;  %s4628_s24 = sld [smem:[#allocation11 + $0x7]] }
 0x135   : > { %v1163_v39 = vadd.f32 %v1162_v14, %v1157_v4  ;;  %v1165_v53 = vadd.f32 %v1164_v27, %v1159_v40  ;;  %v1180_v54 = vmul.f32 %v4212_v3, %v1179_v49  ;;  %v1182_v59 = vmul.f32 %v4218_v9, %v1179_v49  ;;  %s4632_s17 = sld [smem:[#allocation9 + $0x8]] }
 0x136   : > { %v1140_v60 = vadd.f32 %v1139_v5, %v1135_v13  ;;  %v1141_v63 = vadd.f32 %v1139_v5, %v1137_v41  ;;  %v1186_v45 = vmul.f32 %v4238_v26, %v1185_v37  ;;  %v1188_v46 = vmul.f32 %v4245_v30, %v1185_v37 }
 0x137   : > { %v4596_v0 = vpop.eup %3461  ;;  %v1169_v1 = vadd.f32 %v1168_v36, %v1163_v39  ;;  %v1171_v2 = vadd.f32 %v1170_v61, %v1165_v53  ;;  %v1191_v10 = vstv %s4556_s20  ;;  %v1197_v11 = vstv %s4560_s22  ;;  %s4636_s20 = sld [smem:[#allocation9 + $0x88]] }
 0x138   : > { %v4602_v14 = vpop.eup %3463  ;;  %3465 = vtanh.f32 %v1140_v60  ;;  %v1192_v5 = vmul.f32 %v4258_v44, %v1191_v10  ;;  %v1194_v27 = vmul.f32 %v4265_v51, %v1191_v10  ;;  %v1198_v28 = vmul.f32 %v4283_v15, %v1197_v11  ;;  %s4640_s22 = sld [smem:[#allocation9 + $0x108]] }
 0x139   : > { %3467 = vtanh.f32 %v1141_v63  ;;  %v1175_v31 = vadd.f32 %v1174_v33, %v1169_v1  ;;  %v1177_v22 = vadd.f32 %v1176_v47, %v1171_v2  ;;  %v1200_v35 = vmul.f32 %v4290_v24, %v1197_v11 }
 0x13a   : > { %v1203_v29 = vstv %s4566_s19  ;;  %v1209_v12 = vstv %s4570_s25  ;;  %v1213_v36 = vstv %s4574_s28  ;;  %v1219_v61 = vstv %s4578_s29  ;;  %s4644_s19 = sld [smem:[#allocation9 + $0x188]] }
 0x13b   : > { %v1181_v4 = vadd.f32 %v1180_v54, %v1175_v31  ;;  %v1183_v40 = vadd.f32 %v1182_v59, %v1177_v22  ;;  %v1210_v13 = vmul.f32 %v4096_v48, %v1209_v12  ;;  %v1211_v41 = vmul.f32 %v4102_v52, %v1209_v12  ;;  %s4650_s25 = sld [smem:[#allocation9 + $0x208]] }
 0x13c   : > { %v1214_v33 = vmul.f32 %v4107_v57, %v1213_v36  ;;  %v1216_v47 = vmul.f32 %v4124_v6, %v1213_v36  ;;  %v1220_v49 = vmul.f32 %v4129_v8, %v1219_v61  ;;  %v1222_v37 = vmul.f32 %v4140_v17, %v1219_v61  ;;  %s4654_s28 = sld [smem:[#allocation9 + $0x288]] }
 0x13d   : > { %v1187_v39 = vadd.f32 %v1186_v45, %v1181_v4  ;;  %v1189_v53 = vadd.f32 %v1188_v46, %v1183_v40  ;;  %v1225_v54 = vstv %s4584_s27  ;;  %v1231_v59 = vstv %s4588_s26  ;;  %s4661_s29 = sld [smem:[#allocation9 + $0x308]] }
 0x13e   : > { %v1215_v60 = vadd.f32 %v1214_v33, %v1210_v13  ;;  %v1217_v63 = vadd.f32 %v1216_v47, %v1211_v41  ;;  %v1226_v1 = vmul.f32 %v4163_v34, %v1225_v54  ;;  %v1228_v2 = vmul.f32 %v4179_v43, %v1225_v54  ;;  %s4666_s27 = sld [smem:[#allocation9 + $0x388]] }
 0x13f   : > { %v1193_v10 = vadd.f32 %v1192_v5, %v1187_v39  ;;  %v1195_v11 = vadd.f32 %v1194_v27, %v1189_v53  ;;  %v1232_v31 = vmul.f32 %v4186_v19, %v1231_v59  ;;  %v1234_v45 = vmul.f32 %v4191_v50, %v1231_v59  ;;  %s4672_s26 = sld [smem:[#allocation9 + $0x408]] }
 0x140   : > { %v1221_v46 = vadd.f32 %v1220_v49, %v1215_v60  ;;  %v1223_v22 = vadd.f32 %v1222_v37, %v1217_v63  ;;  %v1237_v12 = vstv %s4600_s21  ;;  %v1243_v36 = vstv %s4607_s11  ;;  %s4676_s21 = sld [smem:[#allocation9 + $0x488]] }
 0x141   : > { %v1199_v61 = vadd.f32 %v1198_v28, %v1193_v10  ;;  %v1201_v4 = vadd.f32 %v1200_v35, %v1195_v11  ;;  %v1238_v40 = vmul.f32 %v4200_v56, %v1237_v12  ;;  %v1240_v5 = vmul.f32 %v4205_v62, %v1237_v12  ;;  %s4682_s11 = sld [smem:[#allocation11 + $0x8]] }
 0x142   : > { %v1227_v27 = vadd.f32 %v1226_v1, %v1221_v46  ;;  %v1229_v13 = vadd.f32 %v1228_v2, %v1223_v22  ;;  %v1244_v41 = vmul.f32 %v4212_v3, %v1243_v36  ;;  %v1246_v33 = vmul.f32 %v4218_v9, %v1243_v36 }
 0x143   : > { %v1204_v47 = vadd.f32 %v1203_v29, %v1199_v61  ;;  %v1205_v49 = vadd.f32 %v1203_v29, %v1201_v4  ;;  %v1249_v37 = vstv %s4614_s14  ;;  %v1255_v39 = vstv %s4618_s15  ;;  %s4686_s14 = sld [smem:[#allocation9 + $0x9]] }
 0x144   : > { %v1233_v28 = vadd.f32 %v1232_v31, %v1227_v27  ;;  %v1235_v35 = vadd.f32 %v1234_v45, %v1229_v13  ;;  %v1250_v53 = vmul.f32 %v4238_v26, %v1249_v37  ;;  %v1252_v54 = vmul.f32 %v4245_v30, %v1249_v37  ;;  %s4690_s15 = sld [smem:[#allocation9 + $0x89]] }
 0x145   : > { %v4656_v59 = vpop.eup %3465  ;;  %3469 = vtanh.f32 %v1204_v47  ;;  %v1256_v29 = vmul.f32 %v4258_v44, %v1255_v39  ;;  %v1258_v60 = vmul.f32 %v4265_v51, %v1255_v39  ;;  %v1261_v63 = vstv %s4624_s23  ;;  %s4694_s23 = sld [smem:[#allocation9 + $0x109]] }
 0x146   : > { %v4663_v1 = vpop.eup %3467  ;;  %3471 = vtanh.f32 %v1205_v49  ;;  %v1239_v2 = vadd.f32 %v1238_v40, %v1233_v28  ;;  %v1241_v10 = vadd.f32 %v1240_v5, %v1235_v35  ;;  %v1262_v11 = vmul.f32 %v4283_v15, %v1261_v63 }
 0x147   : > { %v1264_v31 = vmul.f32 %v4290_v24, %v1261_v63  ;;  %v1267_v45 = vstv %s4628_s24  ;;  %v1273_v46 = vstv %s4632_s17  ;;  %v1277_v22 = vstv %s4636_s20  ;;  %s4698_s24 = sld [smem:[#allocation9 + $0x189]] }
 0x148   : > { %v1245_v12 = vadd.f32 %v1244_v41, %v1239_v2  ;;  %v1247_v36 = vadd.f32 %v1246_v33, %v1241_v10  ;;  %v1274_v61 = vmul.f32 %v4096_v48, %v1273_v46  ;;  %v1275_v4 = vmul.f32 %v4102_v52, %v1273_v46  ;;  %s4702_s17 = sld [smem:[#allocation9 + $0x209]] }
 0x149   : > { %v1278_v40 = vmul.f32 %v4107_v57, %v1277_v22  ;;  %v1280_v5 = vmul.f32 %v4124_v6, %v1277_v22  ;;  %v1283_v27 = vstv %s4640_s22  ;;  %v1289_v13 = vstv %s4644_s19  ;;  %s4710_s20 = sld [smem:[#allocation9 + $0x289]] }
 0x14a   : > { %v1251_v47 = vadd.f32 %v1250_v53, %v1245_v12  ;;  %v1253_v49 = vadd.f32 %v1252_v54, %v1247_v36  ;;  %v1284_v41 = vmul.f32 %v4129_v8, %v1283_v27  ;;  %v1286_v33 = vmul.f32 %v4140_v17, %v1283_v27  ;;  %s4717_s22 = sld [smem:[#allocation9 + $0x309]] }
 0x14b   : > { %v1279_v37 = vadd.f32 %v1278_v40, %v1274_v61  ;;  %v1281_v39 = vadd.f32 %v1280_v5, %v1275_v4  ;;  %v1290_v28 = vmul.f32 %v4163_v34, %v1289_v13  ;;  %v1292_v35 = vmul.f32 %v4179_v43, %v1289_v13  ;;  %s4722_s19 = sld [smem:[#allocation9 + $0x389]] }
 0x14c   : > { %v1257_v63 = vadd.f32 %v1256_v29, %v1251_v47  ;;  %v1259_v2 = vadd.f32 %v1258_v60, %v1253_v49  ;;  %v1295_v10 = vstv %s4650_s25  ;;  %v1301_v53 = vstv %s4654_s28  ;;  %s4728_s25 = sld [smem:[#allocation9 + $0x409]] }
 0x14d   : > { %v1285_v54 = vadd.f32 %v1284_v41, %v1279_v37  ;;  %v1287_v46 = vadd.f32 %v1286_v33, %v1281_v39  ;;  %v1296_v22 = vmul.f32 %v4186_v19, %v1295_v10  ;;  %v1298_v12 = vmul.f32 %v4191_v50, %v1295_v10  ;;  %s4732_s28 = sld [smem:[#allocation9 + $0x489]] }
 0x14e   : > { %v1263_v36 = vadd.f32 %v1262_v11, %v1257_v63  ;;  %v1265_v61 = vadd.f32 %v1264_v31, %v1259_v2  ;;  %v1302_v4 = vmul.f32 %v4200_v56, %v1301_v53  ;;  %v1304_v29 = vmul.f32 %v4205_v62, %v1301_v53 }
 0x14f   : > { %v1291_v60 = vadd.f32 %v1290_v28, %v1285_v54  ;;  %v1293_v40 = vadd.f32 %v1292_v35, %v1287_v46  ;;  %v1307_v5 = vstv %s4661_s29  ;;  %v1313_v27 = vstv %s4666_s27  ;;  %s4738_s29 = sld [smem:[#allocation11 + $0x9]] }
 0x150   : > { %v1268_v13 = vadd.f32 %v1267_v45, %v1263_v36  ;;  %v1269_v47 = vadd.f32 %v1267_v45, %v1265_v61  ;;  %v1308_v49 = vmul.f32 %v4212_v3, %v1307_v5  ;;  %v1310_v11 = vmul.f32 %v4218_v9, %v1307_v5  ;;  %s4742_s27 = sld [smem:[#allocation12]] }
 0x151   : > { %v1297_v31 = vadd.f32 %v1296_v22, %v1291_v60  ;;  %v1299_v41 = vadd.f32 %v1298_v12, %v1293_v40  ;;  %v1314_v33 = vmul.f32 %v4238_v26, %v1313_v27  ;;  %v1316_v37 = vmul.f32 %v4245_v30, %v1313_v27 }
 0x152   : > { %v4712_v39 = vpop.eup %3469  ;;  %3473 = vtanh.f32 %v1268_v13  ;;  %v1319_v28 = vstv %s4672_s26  ;;  %v1325_v35 = vstv %s4676_s21  ;;  %v1331_v63 = vstv %s4682_s11  ;;  %s4748_s26 = sld [smem:[#allocation12 + $0x80]] }
 0x153   : > { %v4719_v45 = vpop.eup %3471  ;;  %3475 = vtanh.f32 %v1269_v47  ;;  %v1303_v2 = vadd.f32 %v1302_v4, %v1297_v31  ;;  %v1305_v10 = vadd.f32 %v1304_v29, %v1299_v41  ;;  %v1320_v53 = vmul.f32 %v4258_v44, %v1319_v28  ;;  %s4750_s21 = sld [smem:[#allocation12 + $0x100]] }
 0x154   : > { %v1322_v54 = vmul.f32 %v4265_v51, %v1319_v28  ;;  %v1326_v46 = vmul.f32 %v4283_v15, %v1325_v35  ;;  %v1328_v22 = vmul.f32 %v4290_v24, %v1325_v35  ;;  %v1337_v12 = vstv %s4686_s14  ;;  %s4756_s11 = sld [smem:[#allocation12 + $0x180]] }
 0x155   : > { %v1309_v36 = vadd.f32 %v1308_v49, %v1303_v2  ;;  %v1311_v61 = vadd.f32 %v1310_v11, %v1305_v10  ;;  %v1338_v4 = vmul.f32 %v4096_v48, %v1337_v12  ;;  %v1339_v29 = vmul.f32 %v4102_v52, %v1337_v12  ;;  %s4762_s14 = sld [smem:[#allocation12 + $0x200]] }
 0x156   : > { %v1341_v60 = vstv %s4690_s15  ;;  %v1347_v40 = vstv %s4694_s23  ;;  %v1353_v5 = vstv %s4698_s24  ;;  %v1359_v27 = vstv %s4702_s17  ;;  %s4764_s15 = sld [smem:[#allocation12 + $0x280]] }
 0x157   : > { %v1315_v13 = vadd.f32 %v1314_v33, %v1309_v36  ;;  %v1317_v47 = vadd.f32 %v1316_v37, %v1311_v61  ;;  %v1342_v31 = vmul.f32 %v4107_v57, %v1341_v60  ;;  %v1344_v49 = vmul.f32 %v4124_v6, %v1341_v60  ;;  %s4770_s23 = sld [smem:[#allocation12 + $0x300]] }
 0x158   : > { %v1348_v48 = vmul.f32 %v4129_v8, %v1347_v40  ;;  %v1350_v52 = vmul.f32 %v4140_v17, %v1347_v40  ;;  %v1354_v11 = vmul.f32 %v4163_v34, %v1353_v5  ;;  %v1356_v41 = vmul.f32 %v4179_v43, %v1353_v5  ;;  %s4775_s24 = sld [smem:[#allocation12 + $0x380]] }
 0x159   : > { %v1321_v33 = vadd.f32 %v1320_v53, %v1315_v13  ;;  %v1323_v37 = vadd.f32 %v1322_v54, %v1317_v47  ;;  %v1343_v28 = vadd.f32 %v1342_v31, %v1338_v4  ;;  %v1345_v35 = vadd.f32 %v1344_v49, %v1339_v29  ;;  %s4782_s17 = sld [smem:[#allocation12 + $0x400]] }
 0x15a   : > { %v1360_v57 = vmul.f32 %v4186_v19, %v1359_v27  ;;  %v1362_v6 = vmul.f32 %v4191_v50, %v1359_v27  ;;  %v1365_v2 = vstv %s4710_s20  ;;  %v1371_v8 = vstv %s4717_s22  ;;  %s4786_s20 = sld [smem:[#allocation12 + $0x480]] }
 0x15b   : > { %v1327_v17 = vadd.f32 %v1326_v46, %v1321_v33  ;;  %v1329_v34 = vadd.f32 %v1328_v22, %v1323_v37  ;;  %v1349_v43 = vadd.f32 %v1348_v48, %v1343_v28  ;;  %v1351_v10 = vadd.f32 %v1350_v52, %v1345_v35  ;;  %s4792_s22 = sld [smem:[#allocation14]] }
 0x15c   : > { %v1366_v53 = vmul.f32 %v4200_v56, %v1365_v2  ;;  %v1368_v54 = vmul.f32 %v4205_v62, %v1365_v2  ;;  %v1372_v19 = vmul.f32 %v4212_v3, %v1371_v8  ;;  %v1374_v50 = vmul.f32 %v4218_v9, %v1371_v8 }
 0x15d   : > { %v1332_v12 = vadd.f32 %v1331_v63, %v1327_v17  ;;  %v1333_v36 = vadd.f32 %v1331_v63, %v1329_v34  ;;  %v1355_v61 = vadd.f32 %v1354_v11, %v1349_v43  ;;  %v1357_v4 = vadd.f32 %v1356_v41, %v1351_v10 }
 0x15e   : > { %v1377_v46 = vstv %s4722_s19  ;;  %v1383_v22 = vstv %s4728_s25  ;;  %v1389_v29 = vstv %s4732_s28  ;;  %v1395_v60 = vstv %s4738_s29  ;;  %s4796_s19 = sld [smem:[#allocation12 + $0x1]] }
 0x15f   : > { %v4772_v56 = vpop.eup %3473  ;;  %3477 = vtanh.f32 %v1332_v12  ;;  %v1361_v62 = vadd.f32 %v1360_v57, %v1355_v61  ;;  %v1363_v3 = vadd.f32 %v1362_v6, %v1357_v4  ;;  %v1378_v9 = vmul.f32 %v4238_v26, %v1377_v46  ;;  %s4802_s25 = sld [smem:[#allocation12 + $0x81]] }
 0x160   : > { %v4777_v63 = vpop.eup %3475  ;;  %3479 = vtanh.f32 %v1333_v36  ;;  %v1380_v40 = vmul.f32 %v4245_v30, %v1377_v46  ;;  %v1384_v5 = vmul.f32 %v4258_v44, %v1383_v22  ;;  %v1386_v27 = vmul.f32 %v4265_v51, %v1383_v22  ;;  %s4806_s28 = sld [smem:[#allocation12 + $0x101]] }
 0x161   : > { %v1367_v13 = vadd.f32 %v1366_v53, %v1361_v62  ;;  %v1369_v47 = vadd.f32 %v1368_v54, %v1363_v3  ;;  %v1390_v31 = vmul.f32 %v4283_v15, %v1389_v29  ;;  %v1392_v26 = vmul.f32 %v4290_v24, %v1389_v29  ;;  %s4847_s29 = sld [smem:[#allocation14 + $0x1]] }
 0x162   : > { %v1401_v49 = vstv %s4742_s27  ;;  %v1405_v48 = vstv %s4748_s26  ;;  %v1411_v52 = vstv %s4750_s21  ;;  %v1417_v11 = vstv %s4756_s11  ;;  %s4810_s27 = sld [smem:[#allocation12 + $0x181]] }
 0x163   : > { %v1373_v30 = vadd.f32 %v1372_v19, %v1367_v13  ;;  %v1375_v44 = vadd.f32 %v1374_v50, %v1369_v47  ;;  %v1402_v51 = vmul.f32 %v4372_v7, %v1401_v49  ;;  %v1403_v41 = vmul.f32 %v4376_v20, %v1401_v49  ;;  %s4814_s26 = sld [smem:[#allocation12 + $0x201]] }
 0x164   : > { %v1406_v15 = vmul.f32 %v4416_v16, %v1405_v48  ;;  %v1408_v24 = vmul.f32 %v4422_v23, %v1405_v48  ;;  %v1412_v33 = vmul.f32 %v4480_v58, %v1411_v52  ;;  %v1414_v37 = vmul.f32 %v4487_v18, %v1411_v52  ;;  %s4818_s21 = sld [smem:[#allocation12 + $0x281]] }
 0x165   : > { %v1379_v28 = vadd.f32 %v1378_v9, %v1373_v30  ;;  %v1381_v35 = vadd.f32 %v1380_v40, %v1375_v44  ;;  %v1418_v57 = vmul.f32 %v4538_v32, %v1417_v11  ;;  %v1420_v6 = vmul.f32 %v4541_v38, %v1417_v11  ;;  %s4822_s11 = sld [smem:[#allocation12 + $0x301]] }
 0x166   : > { %v1407_v2 = vadd.f32 %v1406_v15, %v1402_v51  ;;  %v1409_v8 = vadd.f32 %v1408_v24, %v1403_v41  ;;  %v1423_v17 = vstv %s4762_s14  ;;  %v1429_v34 = vstv %s4764_s15  ;;  %s4826_s14 = sld [smem:[#allocation12 + $0x381]] }
 0x167   : > { %v1385_v43 = vadd.f32 %v1384_v5, %v1379_v28  ;;  %v1387_v10 = vadd.f32 %v1386_v27, %v1381_v35  ;;  %v1424_v53 = vmul.f32 %v4596_v0, %v1423_v17  ;;  %v1426_v54 = vmul.f32 %v4602_v14, %v1423_v17  ;;  %s4834_s15 = sld [smem:[#allocation12 + $0x401]] }
 0x168   : > { %v1413_v19 = vadd.f32 %v1412_v33, %v1407_v2  ;;  %v1415_v50 = vadd.f32 %v1414_v37, %v1409_v8  ;;  %v1430_v12 = vmul.f32 %v4656_v59, %v1429_v34  ;;  %v1432_v36 = vmul.f32 %v4663_v1, %v1429_v34 }
 0x169   : > { %v1391_v61 = vadd.f32 %v1390_v31, %v1385_v43  ;;  %v1393_v4 = vadd.f32 %v1392_v26, %v1387_v10  ;;  %v1435_v46 = vstv %s4770_s23  ;;  %v1441_v22 = vstv %s4775_s24  ;;  %s4840_s23 = sld [smem:[#allocation12 + $0x481]] }
 0x16a   : > { %v1419_v29 = vadd.f32 %v1418_v57, %v1413_v19  ;;  %v1421_v62 = vadd.f32 %v1420_v6, %v1415_v50  ;;  %v1436_v3 = vmul.f32 %v4712_v39, %v1435_v46  ;;  %v1438_v9 = vmul.f32 %v4719_v45, %v1435_v46  ;;  %s4850_s24 = sld [smem:[#allocation12 + $0x2]] }
 0x16b   : > { %v1396_v40 = vadd.f32 %v1395_v60, %v1391_v61  ;;  %v1397_v5 = vadd.f32 %v1395_v60, %v1393_v4  ;;  %v1442_v27 = vmul.f32 %v4772_v56, %v1441_v22  ;;  %v1444_v13 = vmul.f32 %v4777_v63, %v1441_v22 }
 0x16c   : > { %v4836_v47 = vpop.eup %3477  ;;  %v1425_v31 = vadd.f32 %v1424_v53, %v1419_v29  ;;  %v1427_v26 = vadd.f32 %v1426_v54, %v1421_v62  ;;  %v1447_v49 = vstv %s4782_s17  ;;  %v1453_v48 = vstv %s4786_s20  ;;  %s4856_s17 = sld [smem:[#allocation12 + $0x82]] }
 0x16d   : > { %v4842_v52 = vpop.eup %3479  ;;  %3481 = vtanh.f32 %v1396_v40  ;;  %v1448_v60 = vmul.f32 %v4836_v47, %v1447_v49  ;;  %v1459_v11 = vstv %s4792_s22  ;;  %v1463_v30 = vstv %s4796_s19  ;;  %s4860_s19 = sld [smem:[#allocation12 + $0x102]] }
 0x16e   : > { %3483 = vtanh.f32 %v1397_v5  ;;  %v1431_v44 = vadd.f32 %v1430_v12, %v1425_v31  ;;  %v1433_v51 = vadd.f32 %v1432_v36, %v1427_v26  ;;  %v1450_v41 = vmul.f32 %v4842_v52, %v1447_v49  ;;  %s4930_s20 = sld [smem:[#allocation4 + $0x1]] }
 0x16f   : > { %v1464_v15 = vmul.f32 %v4372_v7, %v1463_v30  ;;  %v1465_v24 = vmul.f32 %v4376_v20, %v1463_v30  ;;  %v1467_v33 = vstv %s4802_s25  ;;  %v1473_v37 = vstv %s4806_s28  ;;  %s4868_s25 = sld [smem:[#allocation12 + $0x202]] }
 0x170   : > { %v1437_v28 = vadd.f32 %v1436_v3, %v1431_v44  ;;  %v1439_v35 = vadd.f32 %v1438_v9, %v1433_v51  ;;  %v1468_v57 = vmul.f32 %v4416_v16, %v1467_v33  ;;  %v1470_v6 = vmul.f32 %v4422_v23, %v1467_v33  ;;  %s4874_s28 = sld [smem:[#allocation12 + $0x282]] }
 0x171   : > { %v1474_v2 = vmul.f32 %v4480_v58, %v1473_v37  ;;  %v1476_v8 = vmul.f32 %v4487_v18, %v1473_v37  ;;  %v1479_v17 = vstv %s4810_s27  ;;  %v1485_v34 = vstv %s4814_s26  ;;  %s4876_s27 = sld [smem:[#allocation12 + $0x302]] }
 0x172   : > { %v1443_v43 = vadd.f32 %v1442_v27, %v1437_v28  ;;  %v1445_v10 = vadd.f32 %v1444_v13, %v1439_v35  ;;  %v1469_v53 = vadd.f32 %v1468_v57, %v1464_v15  ;;  %v1471_v54 = vadd.f32 %v1470_v6, %v1465_v24  ;;  %s4882_s26 = sld [smem:[#allocation12 + $0x382]] }
 0x173   : > { %v1480_v19 = vmul.f32 %v4538_v32, %v1479_v17  ;;  %v1482_v50 = vmul.f32 %v4541_v38, %v1479_v17  ;;  %v1486_v12 = vmul.f32 %v4596_v0, %v1485_v34  ;;  %v1488_v36 = vmul.f32 %v4602_v14, %v1485_v34  ;;  %s4950_s22 = sld [smem:[#allocation6 + $0x81]] }
 0x174   : > { %v1449_v61 = vadd.f32 %v1448_v60, %v1443_v43  ;;  %v1451_v4 = vadd.f32 %v1450_v41, %v1445_v10  ;;  %v1475_v46 = vadd.f32 %v1474_v2, %v1469_v53  ;;  %v1477_v22 = vadd.f32 %v1476_v8, %v1471_v54 }
 0x175   : > { %v1491_v29 = vstv %s4818_s21  ;;  %v1497_v62 = vstv %s4822_s11  ;;  %v1503_v3 = vstv %s4826_s14  ;;  %v1509_v9 = vstv %s4834_s15  ;;  %s4892_s21 = sld [smem:[#allocation12 + $0x482]] }
 0x176   : > { %v1481_v40 = vadd.f32 %v1480_v19, %v1475_v46  ;;  %v1483_v5 = vadd.f32 %v1482_v50, %v1477_v22  ;;  %v1492_v27 = vmul.f32 %v4656_v59, %v1491_v29  ;;  %v1494_v13 = vmul.f32 %v4663_v1, %v1491_v29  ;;  %s4896_s11 = sld [smem:[#allocation14 + $0x2]] }
 0x177   : > { %v1498_v31 = vmul.f32 %v4712_v39, %v1497_v62  ;;  %v1500_v26 = vmul.f32 %v4719_v45, %v1497_v62  ;;  %v1504_v49 = vmul.f32 %v4772_v56, %v1503_v3  ;;  %v1506_v60 = vmul.f32 %v4777_v63, %v1503_v3  ;;  %s4902_s14 = sld [smem:[#allocation4]] }
 0x178   : > { %v1487_v30 = vadd.f32 %v1486_v12, %v1481_v40  ;;  %v1489_v44 = vadd.f32 %v1488_v36, %v1483_v5  ;;  %v1510_v51 = vmul.f32 %v4836_v47, %v1509_v9  ;;  %v1512_v41 = vmul.f32 %v4842_v52, %v1509_v9  ;;  %s4908_s15 = sld [smem:[#allocation4 + $0x80]] }
 0x179   : > { %v1515_v15 = vstv %s4840_s23  ;;  %v1521_v24 = vstv %s4847_s29  ;;  %v1525_v33 = vstv %s4850_s24  ;;  %v1529_v37 = vstv %s4856_s17  ;;  %s4918_s23 = sld [smem:[#allocation8]] }
 0x17a   : > { %v4904_v28 = vpop.eup %3481  ;;  %v1493_v35 = vadd.f32 %v1492_v27, %v1487_v30  ;;  %v1495_v57 = vadd.f32 %v1494_v13, %v1489_v44  ;;  %v1526_v6 = vmul.f32 %v4372_v7, %v1525_v33  ;;  %v1527_v2 = vmul.f32 %v4376_v20, %v1525_v33  ;;  %s4924_s29 = sld [smem:[#allocation6]] }
 0x17b   : > { %v4910_v8 = vpop.eup %3483  ;;  %v1454_v17 = vmul.f32 %v4904_v28, %v1453_v48  ;;  %v1516_v34 = vmul.f32 %v4904_v28, %v1515_v15  ;;  %v1530_v43 = vmul.f32 %v4416_v16, %v1529_v37  ;;  %v1532_v10 = vmul.f32 %v4422_v23, %v1529_v37  ;;  %s4927_s24 = sld [smem:[#allocation6 + $0x80]] }
 0x17c   : > { %v1456_v7 = vmul.f32 %v4910_v8, %v1453_v48  ;;  %v1499_v20 = vadd.f32 %v1498_v31, %v1493_v35  ;;  %v1501_v53 = vadd.f32 %v1500_v26, %v1495_v57  ;;  %v1518_v54 = vmul.f32 %v4910_v8, %v1515_v15  ;;  %s4937_s17 = sld [smem:[#allocation4 + $0x81]] }
 0x17d   : > { %v1455_v19 = vadd.f32 %v1454_v17, %v1449_v61  ;;  %v1531_v50 = vadd.f32 %v1530_v43, %v1526_v6  ;;  %v1533_v16 = vadd.f32 %v1532_v10, %v1527_v2  ;;  %v1535_v12 = vstv %s4860_s19  ;;  %s4941_s19 = sld [smem:[#allocation8 + $0x1]] }
 0x17e   : > { %v1457_v23 = vadd.f32 %v1456_v7, %v1451_v4  ;;  %v1505_v36 = vadd.f32 %v1504_v49, %v1499_v20  ;;  %v1507_v46 = vadd.f32 %v1506_v60, %v1501_v53  ;;  %v1536_v48 = vmul.f32 %v4480_v58, %v1535_v12 }
 0x17f   : > { %v1460_v22 = vadd.f32 %v1459_v11, %v1455_v19  ;;  %v1538_v29 = vmul.f32 %v4487_v18, %v1535_v12  ;;  %v1541_v62 = vstv %s4866_s0  ;;  %v1547_v3 = vstv %s4868_s25  ;;  %s4946_s0 = sld [smem:[#allocation6 + $0x1]] }
 0x180   : > { %v1461_v61 = vadd.f32 %v1459_v11, %v1457_v23  ;;  %v1511_v9 = vadd.f32 %v1510_v51, %v1505_v36  ;;  %v1513_v40 = vadd.f32 %v1512_v41, %v1507_v46  ;;  %v1537_v4 = vadd.f32 %v1536_v48, %v1531_v50  ;;  %s4954_s25 = sld [smem:[#allocation4 + $0x2]] }
 0x181   : > { %v1539_v58 = vadd.f32 %v1538_v29, %v1533_v16  ;;  %v1542_v5 = vmul.f32 %v4538_v32, %v1541_v62  ;;  %v1544_v27 = vmul.f32 %v4541_v38, %v1541_v62  ;;  %v1548_v18 = vmul.f32 %v4596_v0, %v1547_v3 }
 0x182   : > { %v1517_v13 = vadd.f32 %v1516_v34, %v1511_v9  ;;  %v1519_v31 = vadd.f32 %v1518_v54, %v1513_v40  ;;  %v1550_v11 = vmul.f32 %v4602_v14, %v1547_v3  ;;  %v1553_v26 = vstv %s4874_s28  ;;  %s4962_s28 = sld [smem:[#allocation4 + $0x82]] }
 0x183   : > { %v1543_v49 = vadd.f32 %v1542_v5, %v1537_v4  ;;  %v1545_v60 = vadd.f32 %v1544_v27, %v1539_v58  ;;  %v1554_v30 = vmul.f32 %v4656_v59, %v1553_v26  ;;  %v1556_v32 = vmul.f32 %v4663_v1, %v1553_v26 }
 0x184   : > { %v1522_v38 = vadd.f32 %v1521_v24, %v1517_v13  ;;  %v1523_v0 = vadd.f32 %v1521_v24, %v1519_v31  ;;  %v1559_v44 = vstv %s4876_s27  ;;  %v1565_v14 = vstv %s4882_s26  ;;  %s4983_s27 = sld [smem:[#allocation4 + $0x83]] }
 0x185   : > { %v1549_v51 = vadd.f32 %v1548_v18, %v1543_v49  ;;  %v1551_v41 = vadd.f32 %v1550_v11, %v1545_v60  ;;  %v1560_v59 = vmul.f32 %v4712_v39, %v1559_v44  ;;  %v1562_v15 = vmul.f32 %v4719_v45, %v1559_v44  ;;  %s4988_s26 = sld [smem:[#allocation8 + $0x3]] }
 0x186   : > { %v1566_v1 = vmul.f32 %v4772_v56, %v1565_v14  ;;  %v1568_v33 = vmul.f32 %v4777_v63, %v1565_v14  ;;  %v1571_v37 = vstv %s4886_s1  ;;  %v1577_v35 = vstv %s4892_s21  ;;  %s4981_s1 = sld [smem:[#allocation4 + $0x3]] }
 0x187   : > { %v1555_v24 = vadd.f32 %v1554_v30, %v1549_v51  ;;  %v1557_v57 = vadd.f32 %v1556_v32, %v1551_v41  ;;  %v1572_v6 = vmul.f32 %v4836_v47, %v1571_v37  ;;  %v1574_v39 = vmul.f32 %v4842_v52, %v1571_v37  ;;  %s4991_s21 = sld [smem:[#allocation6 + $0x3]] }
 0x188   : > { %v1578_v45 = vmul.f32 %v4904_v28, %v1577_v35  ;;  %v1580_v56 = vmul.f32 %v4910_v8, %v1577_v35  ;;  %v1583_v63 = vstv %s4896_s11  ;;  %v1586_v2 = vadd.f32 %v1461_v61, %v1460_v22  ;;  %s4994_s11 = scalar_lea.vmem [#allocation15], %s4958_s3  ;;  %s5009_s3 = sld [smem:[#allocation4 + $0x84]] }
 0x189   : > { %v1561_v17 = vadd.f32 %v1560_v59, %v1555_v24  ;;  %v1563_v34 = vadd.f32 %v1562_v15, %v1557_v57  ;;  %v1588_v43 = vmul.f32 1.442695, %v1522_v38  ;;  %v1590_v10 = vmul.f32 1.442695, %v1523_v0 }
 0x18a   : > { %v1587_v47 = vmul.f32 0.5, %v1586_v2  ;;  %v1620_v52 = vstv %s4902_s14  ;;  %v1623_v7 = vstv %s4908_s15  ;;  %v1627_v20 = vstv %s4918_s23  ;;  %s5000_s14 = sld [smem:[#allocation6 + $0x83]] }
 0x18b   : > { %v1567_v28 = vadd.f32 %v1566_v1, %v1561_v17  ;;  %v1569_v8 = vadd.f32 %v1568_v33, %v1563_v34  ;;  %3485 = vpow2.f32 %v1588_v43  ;;  %v1621_v53 = vmul.f32 %v1620_v52, %v4177_v42  ;;  %s5004_s15 = sld [smem:[#allocation4 + $0x4]] }
 0x18c   : > { %3487 = vpow2.f32 %v1590_v10  ;;  %3105 = vst [vmem:[%s4994_s11 + $0x10] sm:$0xff] %v1587_v47  ;;  %v1624_v54 = vmul.f32 %v1623_v7, %v4198_v55  ;;  %v1630_v19 = vstv %s4924_s29  ;;  %v1633_v50 = vstv %s4927_s24  ;;  %s5012_s23 = sld [smem:[#allocation8 + $0x4]] }
 0x18d   : > { %v1573_v16 = vadd.f32 %v1572_v6, %v1567_v28  ;;  %v1575_v12 = vadd.f32 %v1574_v39, %v1569_v8  ;;  %v1631_v23 = vmul.f32 %v1630_v19, %v4230_v21  ;;  %v1634_v36 = vmul.f32 %v1633_v50, %v4236_v25  ;;  %s5017_s29 = sld [smem:[#allocation6 + $0x4]] }
 0x18e   : > { %v1625_v46 = vadd.f32 %v1624_v54, %v1621_v53  ;;  %v1641_v48 = vstv %s4930_s20  ;;  %v1644_v22 = vstv %s4937_s17  ;;  %v1648_v29 = vstv %s4941_s19  ;;  %s5021_s24 = sld [smem:[#allocation6 + $0x84]] }
 0x18f   : > { %v1579_v62 = vadd.f32 %v1578_v45, %v1573_v16  ;;  %v1581_v3 = vadd.f32 %v1580_v56, %v1575_v12  ;;  %v1635_v61 = vadd.f32 %v1634_v36, %v1631_v23  ;;  %v1642_v9 = vmul.f32 %v1641_v48, %v4177_v42  ;;  %s5024_s20 = sld [smem:[#allocation4 + $0x5]] }
 0x190   : > { %v1628_v40 = vadd.f32 %v1627_v20, %v1625_v46  ;;  %v1645_v4 = vmul.f32 %v1644_v22, %v4198_v55  ;;  %v1651_v58 = vstv %s4946_s0  ;;  %v1654_v5 = vstv %s4950_s22  ;;  %s5027_s17 = sld [smem:[#allocation4 + $0x85]] }
 0x191   : > { %v1584_v27 = vadd.f32 %v1583_v63, %v1579_v62  ;;  %v1585_v18 = vadd.f32 %v1583_v63, %v1581_v3  ;;  %v1652_v13 = vmul.f32 %v1651_v58, %v4230_v21  ;;  %v1655_v31 = vmul.f32 %v1654_v5, %v4236_v25  ;;  %s5031_s19 = sld [smem:[#allocation8 + $0x5]] }
 0x192   : > { %v1636_v11 = vadd.f32 %v1635_v61, %v1628_v40  ;;  %v1638_v26 = vsub.f32 %v1628_v40, %v1635_v61  ;;  %v1646_v49 = vadd.f32 %v1645_v4, %v1642_v9  ;;  %v1662_v60 = vstv %s4954_s25  ;;  %s5036_s0 = sld [smem:[#allocation6 + $0x5]] }
 0x193   : > { %v1594_v30 = vmul.f32 1.442695, %v1584_v27  ;;  %v1596_v32 = vmul.f32 1.442695, %v1585_v18  ;;  %v1656_v38 = vadd.f32 %v1655_v31, %v1652_v13  ;;  %v1663_v0 = vmul.f32 %v1662_v60, %v4177_v42  ;;  %s5039_s22 = sld [smem:[#allocation6 + $0x85]] }
 0x194   : > { %3489 = vtanh.f32 %v1636_v11  ;;  %v1649_v44 = vadd.f32 %v1648_v29, %v1646_v49  ;;  %v1665_v14 = vstv %s4962_s28  ;;  %v1669_v51 = vstv %s4966_s4  ;;  %s5043_s4 = sld [smem:[#allocation4 + $0x6]] }
 0x195   : > { %3491 = vpow2.f32 %v1594_v30  ;;  %v1666_v41 = vmul.f32 %v1665_v14, %v4198_v55  ;;  %v1672_v59 = vstv %s4972_s2  ;;  %v1675_v15 = vstv %s4976_s30  ;;  %s5048_s25 = sld [smem:[#allocation4 + $0x86]] }
 0x196   : > { %3493 = vpow2.f32 %v1596_v32  ;;  %v1657_v1 = vadd.f32 %v1656_v38, %v1649_v44  ;;  %v1659_v33 = vsub.f32 %v1649_v44, %v1656_v38  ;;  %v1673_v37 = vmul.f32 %v1672_v59, %v4230_v21  ;;  %s5051_s28 = sld [smem:[#allocation8 + $0x6]] }
 0x197   : > { %3495 = vtanh.f32 %v1638_v26  ;;  %v1667_v35 = vadd.f32 %v1666_v41, %v1663_v0  ;;  %v1676_v24 = vmul.f32 %v1675_v15, %v4236_v25  ;;  %v1683_v57 = vstv %s4981_s1  ;;  %s5056_s2 = sld [smem:[#allocation6 + $0x6]] }
 0x198   : > { %v3486_v6 = vpop.eup %3485  ;;  %3497 = vtanh.f32 %v1657_v1  ;;  %v1684_v39 = vmul.f32 %v1683_v57, %v4177_v42  ;;  %v1686_v45 = vstv %s4983_s27  ;;  %v1690_v56 = vstv %s4988_s26  ;;  %s5059_s30 = sld [smem:[#allocation6 + $0x86]] }
 0x199   : > { %v3488_v63 = vpop.eup %3487  ;;  %3499 = vtanh.f32 %v1659_v33  ;;  %v1670_v2 = vadd.f32 %v1669_v51, %v1667_v35  ;;  %v1677_v17 = vadd.f32 %v1676_v24, %v1673_v37  ;;  %v1687_v34 = vmul.f32 %v1686_v45, %v4198_v55  ;;  %s5064_s1 = sld [smem:[#allocation4 + $0x7]] }
 0x19a   : > { %v1592_v43 = vadd.f32 %v3488_v63, %v3486_v6  ;;  %v1693_v10 = vstv %s4991_s21  ;;  %v1696_v47 = vstv %s5000_s14  ;;  %v1704_v52 = vstv %s5004_s15  ;;  %s5068_s27 = sld [smem:[#allocation4 + $0x87]] }
 0x19b   : > { %v1678_v7 = vadd.f32 %v1677_v17, %v1670_v2  ;;  %v1680_v20 = vsub.f32 %v1670_v2, %v1677_v17  ;;  %v1688_v28 = vadd.f32 %v1687_v34, %v1684_v39  ;;  %v1694_v8 = vmul.f32 %v1693_v10, %v4230_v21  ;;  %s5073_s26 = sld [smem:[#allocation8 + $0x7]] }
 0x19c   : > { %v1593_v53 = vmul.f32 0.5, %v1592_v43  ;;  %v1697_v54 = vmul.f32 %v1696_v47, %v4236_v25  ;;  %v1705_v19 = vmul.f32 %v1704_v52, %v4177_v42  ;;  %v1707_v50 = vstv %s5009_s3  ;;  %s5078_s21 = sld [smem:[#allocation6 + $0x7]] }
 0x19d   : > { %3501 = vtanh.f32 %v1678_v7  ;;  %v1691_v16 = vadd.f32 %v1690_v56, %v1688_v28  ;;  %v1708_v12 = vmul.f32 %v1707_v50, %v4198_v55  ;;  %v1711_v23 = vstv %s5012_s23  ;;  %s5082_s14 = sld [smem:[#allocation6 + $0x87]] }
 0x19e   : > { %1600 = vst [vmem:[%s4994_s11] sm:$0xff] %v1593_v53  ;;  %3503 = vtanh.f32 %v1680_v20  ;;  %v1698_v36 = vadd.f32 %v1697_v54, %v1694_v8  ;;  %v1714_v46 = vstv %s5017_s29  ;;  %v1717_v48 = vstv %s5021_s24  ;;  %s5088_s15 = sld [smem:[#allocation4 + $0x8]] }
 0x19f   : > { %v1709_v22 = vadd.f32 %v1708_v12, %v1705_v19  ;;  %v1715_v29 = vmul.f32 %v1714_v46, %v4230_v21  ;;  %v1718_v62 = vmul.f32 %v1717_v48, %v4236_v25  ;;  %v1725_v3 = vstv %s5024_s20  ;;  %s5093_s3 = sld [smem:[#allocation4 + $0x88]] }
 0x1a0   : > { %v1699_v61 = vadd.f32 %v1698_v36, %v1691_v16  ;;  %v1701_v9 = vsub.f32 %v1691_v16, %v1698_v36  ;;  %v1726_v40 = vmul.f32 %v1725_v3, %v4177_v42  ;;  %v1728_v4 = vstv %s5027_s17  ;;  %s5095_s23 = sld [smem:[#allocation8 + $0x8]] }
 0x1a1   : > { %v5084_v58 = vpop.eup %3489  ;;  %v1712_v5 = vadd.f32 %v1711_v23, %v1709_v22  ;;  %v1719_v27 = vadd.f32 %v1718_v62, %v1715_v29  ;;  %v1729_v18 = vmul.f32 %v1728_v4, %v4198_v55  ;;  %v1732_v13 = vstv %s5031_s19  ;;  %s5102_s29 = sld [smem:[#allocation6 + $0x8]] }
 0x1a2   : > { %v3492_v31 = vpop.eup %3491  ;;  %3505 = vtanh.f32 %v1699_v61  ;;  %v1735_v11 = vstv %s5036_s0  ;;  %v1738_v26 = vstv %s5039_s22  ;;  %v1746_v49 = vstv %s5043_s4  ;;  %s5108_s24 = sld [smem:[#allocation6 + $0x88]] }
 0x1a3   : > { %v3494_v60 = vpop.eup %3493  ;;  %3507 = vtanh.f32 %v1701_v9  ;;  %v1720_v30 = vadd.f32 %v1719_v27, %v1712_v5  ;;  %v1722_v32 = vsub.f32 %v1712_v5, %v1719_v27  ;;  %v1730_v38 = vadd.f32 %v1729_v18, %v1726_v40  ;;  %s5113_s20 = sld [smem:[#allocation4 + $0x9]] }
 0x1a4   : > { %v5097_v0 = vpop.eup %3495  ;;  %v1598_v44 = vadd.f32 %v3494_v60, %v3492_v31  ;;  %v1736_v14 = vmul.f32 %v1735_v11, %v4230_v21  ;;  %v1739_v51 = vmul.f32 %v1738_v26, %v4236_v25  ;;  %v1747_v41 = vmul.f32 %v1746_v49, %v4177_v42  ;;  %s5119_s17 = sld [smem:[#allocation4 + $0x89]] }
 0x1a5   : > { %v5104_v59 = vpop.eup %3497  ;;  %3509 = vtanh.f32 %v1720_v30  ;;  %v1733_v15 = vadd.f32 %v1732_v13, %v1730_v38  ;;  %v1749_v1 = vstv %s5048_s25  ;;  %v1753_v33 = vstv %s5051_s28  ;;  %s5123_s19 = sld [smem:[#allocation8 + $0x9]] }
 0x1a6   : > { %v5110_v37 = vpop.eup %3499  ;;  %v1599_v35 = vmul.f32 0.5, %v1598_v44  ;;  %3511 = vtanh.f32 %v1722_v32  ;;  %v1740_v24 = vadd.f32 %v1739_v51, %v1736_v14  ;;  %v1750_v57 = vmul.f32 %v1749_v1, %v4198_v55  ;;  %s5129_s0 = sld [smem:[#allocation6 + $0x9]] }
 0x1a7   : > { %v1756_v6 = vstv %s5056_s2  ;;  %v1759_v39 = vstv %s5059_s30  ;;  %v1767_v45 = vstv %s5064_s1  ;;  %v1770_v56 = vstv %s5068_s27  ;;  %s5135_s22 = sld [smem:[#allocation6 + $0x89]] }
 0x1a8   : > { %3106 = vst [vmem:[%s4994_s11 + $0x20] sm:$0xff] %v1599_v35  ;;  %v1741_v63 = vadd.f32 %v1740_v24, %v1733_v15  ;;  %v1743_v2 = vsub.f32 %v1733_v15, %v1740_v24  ;;  %v1751_v17 = vadd.f32 %v1750_v57, %v1747_v41  ;;  %v1757_v34 = vmul.f32 %v1756_v6, %v4230_v21  ;;  %s5140_s4 = sld [smem:[#allocation9]] }
 0x1a9   : > { %v1760_v43 = vmul.f32 %v1759_v39, %v4236_v25  ;;  %v1768_v10 = vmul.f32 %v1767_v45, %v4177_v42  ;;  %v1771_v47 = vmul.f32 %v1770_v56, %v4198_v55  ;;  %v1774_v52 = vstv %s5073_s26  ;;  %s5146_s25 = sld [smem:[#allocation9 + $0x80]] }
 0x1aa   : > { %v5131_v7 = vpop.eup %3501  ;;  %3513 = vtanh.f32 %v1741_v63  ;;  %v1754_v20 = vadd.f32 %v1753_v33, %v1751_v17  ;;  %v1777_v28 = vstv %s5078_s21  ;;  %v1780_v8 = vstv %s5082_s14  ;;  %s5149_s28 = sld [smem:[#allocation9 + $0x100]] }
 0x1ab   : > { %v5137_v53 = vpop.eup %3503  ;;  %3515 = vtanh.f32 %v1743_v2  ;;  %v1761_v54 = vadd.f32 %v1760_v43, %v1757_v34  ;;  %v1772_v19 = vadd.f32 %v1771_v47, %v1768_v10  ;;  %v1778_v50 = vmul.f32 %v1777_v28, %v4230_v21  ;;  %s5154_s2 = sld [smem:[#allocation9 + $0x180]] }
 0x1ac   : > { %v1781_v16 = vmul.f32 %v1780_v8, %v4236_v25  ;;  %v1788_v12 = vstv %s5088_s15  ;;  %v1791_v23 = vstv %s5093_s3  ;;  %v1795_v36 = vstv %s5095_s23  ;;  %s5161_s30 = sld [smem:[#allocation9 + $0x200]] }
 0x1ad   : > { %v1762_v46 = vadd.f32 %v1761_v54, %v1754_v20  ;;  %v1764_v48 = vsub.f32 %v1754_v20, %v1761_v54  ;;  %v1775_v22 = vadd.f32 %v1774_v52, %v1772_v19  ;;  %v1789_v29 = vmul.f32 %v1788_v12, %v4177_v42  ;;  %s5165_s1 = sld [smem:[#allocation9 + $0x280]] }
 0x1ae   : > { %v1782_v62 = vadd.f32 %v1781_v16, %v1778_v50  ;;  %v1792_v3 = vmul.f32 %v1791_v23, %v4198_v55  ;;  %v1798_v61 = vstv %s5102_s29  ;;  %v1801_v9 = vstv %s5108_s24  ;;  %s5170_s27 = sld [smem:[#allocation9 + $0x300]] }
 0x1af   : > { %v5156_v40 = vpop.eup %3505  ;;  %3517 = vtanh.f32 %v1762_v46  ;;  %v1799_v4 = vmul.f32 %v1798_v61, %v4230_v21  ;;  %v1802_v5 = vmul.f32 %v1801_v9, %v4236_v25  ;;  %v1809_v27 = vstv %s5113_s20  ;;  %s5176_s26 = sld [smem:[#allocation9 + $0x380]] }
 0x1b0   : > { %v5163_v18 = vpop.eup %3507  ;;  %3519 = vtanh.f32 %v1764_v48  ;;  %v1783_v13 = vadd.f32 %v1782_v62, %v1775_v22  ;;  %v1785_v31 = vsub.f32 %v1775_v22, %v1782_v62  ;;  %v1793_v11 = vadd.f32 %v1792_v3, %v1789_v29  ;;  %s5183_s21 = sld [smem:[#allocation9 + $0x400]] }
 0x1b1   : > { %v1803_v26 = vadd.f32 %v1802_v5, %v1799_v4  ;;  %v1810_v49 = vmul.f32 %v1809_v27, %v4177_v42  ;;  %v1812_v60 = vstv %s5119_s17  ;;  %v1816_v30 = vstv %s5123_s19  ;;  %s5186_s14 = sld [smem:[#allocation9 + $0x480]] }
 0x1b2   : > { %v5172_v32 = vpop.eup %3509  ;;  %3521 = vtanh.f32 %v1783_v13  ;;  %v1796_v38 = vadd.f32 %v1795_v36, %v1793_v11  ;;  %v1813_v44 = vmul.f32 %v1812_v60, %v4198_v55  ;;  %v1819_v14 = vstv %s5129_s0  ;;  %s5192_s15 = sld [smem:[#allocation11]] }
 0x1b3   : > { %v5178_v51 = vpop.eup %3511  ;;  %3523 = vtanh.f32 %v1785_v31  ;;  %v1820_v42 = vmul.f32 %v1819_v14, %v4230_v21  ;;  %v1822_v41 = vstv %s5135_s22  ;;  %v1830_v15 = vstv %s5140_s4  ;;  %s5195_s3 = sld [smem:[#allocation9 + $0x1]] }
 0x1b4   : > { %v1804_v1 = vadd.f32 %v1803_v26, %v1796_v38  ;;  %v1806_v33 = vsub.f32 %v1796_v38, %v1803_v26  ;;  %v1814_v35 = vadd.f32 %v1813_v44, %v1810_v49  ;;  %v1823_v24 = vmul.f32 %v1822_v41, %v4236_v25  ;;  %s5202_s23 = sld [smem:[#allocation9 + $0x81]] }
 0x1b5   : > { %v1831_v55 = vmul.f32 %v5084_v58, %v1830_v15  ;;  %v1832_v57 = vmul.f32 %v5097_v0, %v1830_v15  ;;  %v1834_v6 = vstv %s5146_s25  ;;  %v1840_v39 = vstv %s5149_s28  ;;  %s5207_s29 = sld [smem:[#allocation9 + $0x101]] }
 0x1b6   : > { %3525 = vtanh.f32 %v1804_v1  ;;  %v1817_v21 = vadd.f32 %v1816_v30, %v1814_v35  ;;  %v1824_v45 = vadd.f32 %v1823_v24, %v1820_v42  ;;  %v1835_v56 = vmul.f32 %v5104_v59, %v1834_v6  ;;  %s5212_s24 = sld [smem:[#allocation9 + $0x181]] }
 0x1b7   : > { %v5197_v25 = vpop.eup %3513  ;;  %3527 = vtanh.f32 %v1806_v33  ;;  %v1837_v63 = vmul.f32 %v5110_v37, %v1834_v6  ;;  %v1841_v2 = vmul.f32 %v5131_v7, %v1840_v39  ;;  %v1843_v17 = vmul.f32 %v5137_v53, %v1840_v39  ;;  %s5223_s20 = sld [smem:[#allocation9 + $0x201]] }
 0x1b8   : > { %v5204_v34 = vpop.eup %3515  ;;  %v1825_v43 = vadd.f32 %v1824_v45, %v1817_v21  ;;  %v1827_v10 = vsub.f32 %v1817_v21, %v1824_v45  ;;  %v1836_v47 = vadd.f32 %v1835_v56, %v1831_v55  ;;  %v1846_v52 = vstv %s5154_s2  ;;  %s5233_s17 = sld [smem:[#allocation9 + $0x281]] }
 0x1b9   : > { %v1838_v20 = vadd.f32 %v1837_v63, %v1832_v57  ;;  %v1847_v28 = vmul.f32 %v5156_v40, %v1846_v52  ;;  %v1849_v8 = vmul.f32 %v5163_v18, %v1846_v52  ;;  %v1852_v54 = vstv %s5161_s30  ;;  %s5240_s19 = sld [smem:[#allocation9 + $0x301]] }
 0x1ba   : > { %3529 = vtanh.f32 %v1825_v43  ;;  %v1842_v19 = vadd.f32 %v1841_v2, %v1836_v47  ;;  %v1853_v50 = vmul.f32 %v5172_v32, %v1852_v54  ;;  %v1855_v16 = vmul.f32 %v5178_v51, %v1852_v54  ;;  %s5247_s0 = sld [smem:[#allocation9 + $0x381]] }
 0x1bb   : > { %3531 = vtanh.f32 %v1827_v10  ;;  %v1844_v12 = vadd.f32 %v1843_v17, %v1838_v20  ;;  %v1858_v23 = vstv %s5165_s1  ;;  %v1864_v36 = vstv %s5170_s27  ;;  %s5253_s22 = sld [smem:[#allocation9 + $0x401]] }
 0x1bc   : > { %v5218_v46 = vpop.eup %3517  ;;  %v1848_v48 = vadd.f32 %v1847_v28, %v1842_v19  ;;  %v1859_v22 = vmul.f32 %v5197_v25, %v1858_v23  ;;  %v1861_v29 = vmul.f32 %v5204_v34, %v1858_v23  ;;  %v1870_v62 = vstv %s5176_s26  ;;  %s5260_s4 = sld [smem:[#allocation9 + $0x481]] }
 0x1bd   : > { %v5225_v3 = vpop.eup %3519  ;;  %v1850_v61 = vadd.f32 %v1849_v8, %v1844_v12  ;;  %v1865_v9 = vmul.f32 %v5218_v46, %v1864_v36  ;;  %v1876_v4 = vstv %s5183_s21  ;;  %v1882_v5 = vstv %s5186_s14  ;;  %s5266_s25 = sld [smem:[#allocation11 + $0x1]] }
 0x1be   : > { %v1854_v27 = vadd.f32 %v1853_v50, %v1848_v48  ;;  %v1867_v13 = vmul.f32 %v5225_v3, %v1864_v36  ;;  %v1888_v31 = vstv %s5192_s15  ;;  %v1894_v11 = vstv %s5195_s3  ;;  %s5270_s28 = sld [smem:[#allocation9 + $0x2]] }
 0x1bf   : > { %v5235_v26 = vpop.eup %3521  ;;  %v1856_v49 = vadd.f32 %v1855_v16, %v1850_v61  ;;  %v1895_v60 = vmul.f32 %v5084_v58, %v1894_v11  ;;  %v1896_v30 = vmul.f32 %v5097_v0, %v1894_v11  ;;  %v1898_v38 = vstv %s5202_s23  ;;  %s5274_s2 = sld [smem:[#allocation9 + $0x82]] }
 0x1c0   : > { %v5242_v44 = vpop.eup %3523  ;;  %v1860_v14 = vadd.f32 %v1859_v22, %v1854_v27  ;;  %v1871_v42 = vmul.f32 %v5235_v26, %v1870_v62  ;;  %v1899_v41 = vmul.f32 %v5104_v59, %v1898_v38  ;;  %v1901_v15 = vmul.f32 %v5110_v37, %v1898_v38  ;;  %s5280_s30 = sld [smem:[#allocation9 + $0x102]] }
 0x1c1   : > { %v1862_v1 = vadd.f32 %v1861_v29, %v1856_v49  ;;  %v1873_v33 = vmul.f32 %v5242_v44, %v1870_v62  ;;  %v1904_v35 = vstv %s5207_s29  ;;  %v1910_v24 = vstv %s5212_s24  ;;  %s5287_s1 = sld [smem:[#allocation9 + $0x182]] }
 0x1c2   : > { %v1866_v55 = vadd.f32 %v1865_v9, %v1860_v14  ;;  %v1900_v57 = vadd.f32 %v1899_v41, %v1895_v60  ;;  %v1902_v6 = vadd.f32 %v1901_v15, %v1896_v30  ;;  %v1905_v39 = vmul.f32 %v5131_v7, %v1904_v35  ;;  %s5294_s27 = sld [smem:[#allocation9 + $0x202]] }
 0x1c3   : > { %v5255_v21 = vpop.eup %3525  ;;  %v1868_v45 = vadd.f32 %v1867_v13, %v1862_v1  ;;  %v1907_v56 = vmul.f32 %v5137_v53, %v1904_v35  ;;  %v1911_v63 = vmul.f32 %v5156_v40, %v1910_v24  ;;  %v1913_v2 = vmul.f32 %v5163_v18, %v1910_v24  ;;  %s5298_s26 = sld [smem:[#allocation9 + $0x282]] }
 0x1c4   : > { %v5262_v17 = vpop.eup %3527  ;;  %v1872_v43 = vadd.f32 %v1871_v42, %v1866_v55  ;;  %v1877_v10 = vmul.f32 %v5255_v21, %v1876_v4  ;;  %v1906_v47 = vadd.f32 %v1905_v39, %v1900_v57  ;;  %v1916_v52 = vstv %s5223_s20  ;;  %s5304_s21 = sld [smem:[#allocation9 + $0x302]] }
 0x1c5   : > { %v1874_v20 = vadd.f32 %v1873_v33, %v1868_v45  ;;  %v1879_v28 = vmul.f32 %v5262_v17, %v1876_v4  ;;  %v1908_v8 = vadd.f32 %v1907_v56, %v1902_v6  ;;  %v1917_v54 = vmul.f32 %v5172_v32, %v1916_v52  ;;  %s5310_s14 = sld [smem:[#allocation9 + $0x382]] }
 0x1c6   : > { %v1878_v19 = vadd.f32 %v1877_v10, %v1872_v43  ;;  %v1912_v50 = vadd.f32 %v1911_v63, %v1906_v47  ;;  %v1919_v16 = vmul.f32 %v5178_v51, %v1916_v52  ;;  %v1922_v12 = vstv %s5233_s17  ;;  %s5314_s3 = sld [smem:[#allocation9 + $0x402]] }
 0x1c7   : > { %v5276_v23 = vpop.eup %3529  ;;  %v1880_v36 = vadd.f32 %v1879_v28, %v1874_v20  ;;  %v1914_v48 = vadd.f32 %v1913_v2, %v1908_v8  ;;  %v1923_v22 = vmul.f32 %v5197_v25, %v1922_v12  ;;  %v1925_v29 = vmul.f32 %v5204_v34, %v1922_v12  ;;  %s5318_s15 = sld [smem:[#allocation9 + $0x482]] }
 0x1c8   : > { %v5282_v62 = vpop.eup %3531  ;;  %v1883_v61 = vmul.f32 %v5276_v23, %v1882_v5  ;;  %v1918_v9 = vadd.f32 %v1917_v54, %v1912_v50  ;;  %v1928_v4 = vstv %s5240_s19  ;;  %v1934_v27 = vstv %s5247_s0  ;;  %s5323_s23 = sld [smem:[#allocation11 + $0x2]] }
 0x1c9   : > { %v1885_v13 = vmul.f32 %v5282_v62, %v1882_v5  ;;  %v1920_v11 = vadd.f32 %v1919_v16, %v1914_v48  ;;  %v1929_v49 = vmul.f32 %v5218_v46, %v1928_v4  ;;  %v1931_v60 = vmul.f32 %v5225_v3, %v1928_v4  ;;  %s5328_s29 = sld [smem:[#allocation9 + $0x3]] }
 0x1ca   : > { %v1884_v30 = vadd.f32 %v1883_v61, %v1878_v19  ;;  %v1924_v38 = vadd.f32 %v1923_v22, %v1918_v9  ;;  %v1935_v14 = vmul.f32 %v5235_v26, %v1934_v27  ;;  %v1937_v42 = vmul.f32 %v5242_v44, %v1934_v27  ;;  %s5333_s24 = sld [smem:[#allocation9 + $0x83]] }
 0x1cb   : > { %v1886_v41 = vadd.f32 %v1885_v13, %v1880_v36  ;;  %v1926_v15 = vadd.f32 %v1925_v29, %v1920_v11  ;;  %v1940_v1 = vstv %s5253_s22  ;;  %v1946_v5 = vstv %s5260_s4  ;;  %s5339_s20 = sld [smem:[#allocation9 + $0x103]] }
 0x1cc   : > { %v1889_v33 = vadd.f32 %v1888_v31, %v1884_v30  ;;  %v1930_v35 = vadd.f32 %v1929_v49, %v1924_v38  ;;  %v1941_v24 = vmul.f32 %v5255_v21, %v1940_v1  ;;  %v1943_v55 = vmul.f32 %v5262_v17, %v1940_v1  ;;  %s5342_s17 = sld [smem:[#allocation9 + $0x183]] }
 0x1cd   : > { %v1890_v57 = vadd.f32 %v1888_v31, %v1886_v41  ;;  %v1932_v6 = vadd.f32 %v1931_v60, %v1926_v15  ;;  %v1947_v39 = vmul.f32 %v5276_v23, %v1946_v5  ;;  %v1949_v45 = vmul.f32 %v5282_v62, %v1946_v5  ;;  %s5348_s19 = sld [smem:[#allocation9 + $0x203]] }
 0x1ce   : > { %3533 = vtanh.f32 %v1889_v33  ;;  %v1936_v56 = vadd.f32 %v1935_v14, %v1930_v35  ;;  %v1952_v63 = vstv %s5266_s25  ;;  %v1958_v2 = vstv %s5270_s28  ;;  %s5354_s0 = sld [smem:[#allocation9 + $0x283]] }
 0x1cf   : > { %3535 = vtanh.f32 %v1890_v57  ;;  %v1938_v43 = vadd.f32 %v1937_v42, %v1932_v6  ;;  %v1959_v31 = vmul.f32 %v5084_v58, %v1958_v2  ;;  %v1960_v10 = vmul.f32 %v5097_v0, %v1958_v2  ;;  %s5362_s22 = sld [smem:[#allocation9 + $0x303]] }
 0x1d0   : > { %v1942_v47 = vadd.f32 %v1941_v24, %v1936_v56  ;;  %v1962_v52 = vstv %s5274_s2  ;;  %v1968_v20 = vstv %s5280_s30  ;;  %v1974_v28 = vstv %s5287_s1  ;;  %s5368_s4 = sld [smem:[#allocation9 + $0x383]] }
 0x1d1   : > { %v1944_v8 = vadd.f32 %v1943_v55, %v1938_v43  ;;  %v1963_v54 = vmul.f32 %v5104_v59, %v1962_v52  ;;  %v1965_v19 = vmul.f32 %v5110_v37, %v1962_v52  ;;  %v1969_v50 = vmul.f32 %v5131_v7, %v1968_v20  ;;  %s5376_s25 = sld [smem:[#allocation9 + $0x403]] }
 0x1d2   : > { %v1948_v16 = vadd.f32 %v1947_v39, %v1942_v47  ;;  %v1971_v12 = vmul.f32 %v5137_v53, %v1968_v20  ;;  %v1975_v36 = vmul.f32 %v5156_v40, %v1974_v28  ;;  %v1977_v48 = vmul.f32 %v5163_v18, %v1974_v28  ;;  %s5380_s28 = sld [smem:[#allocation9 + $0x483]] }
 0x1d3   : > { %v1950_v22 = vadd.f32 %v1949_v45, %v1944_v8  ;;  %v1964_v29 = vadd.f32 %v1963_v54, %v1959_v31  ;;  %v1966_v61 = vadd.f32 %v1965_v19, %v1960_v10  ;;  %v1980_v9 = vstv %s5294_s27  ;;  %s5384_s2 = sld [smem:[#allocation11 + $0x3]] }
 0x1d4   : > { %v1953_v4 = vadd.f32 %v1952_v63, %v1948_v16  ;;  %v1981_v27 = vmul.f32 %v5172_v32, %v1980_v9  ;;  %v1983_v13 = vmul.f32 %v5178_v51, %v1980_v9  ;;  %v1986_v11 = vstv %s5298_s26  ;;  %s5388_s30 = sld [smem:[#allocation9 + $0x4]] }
 0x1d5   : > { %v1954_v49 = vadd.f32 %v1952_v63, %v1950_v22  ;;  %v1970_v60 = vadd.f32 %v1969_v50, %v1964_v29  ;;  %v1972_v30 = vadd.f32 %v1971_v12, %v1966_v61  ;;  %v1987_v38 = vmul.f32 %v5197_v25, %v1986_v11  ;;  %s5392_s1 = sld [smem:[#allocation9 + $0x84]] }
 0x1d6   : > { %3537 = vtanh.f32 %v1953_v4  ;;  %v1989_v14 = vmul.f32 %v5204_v34, %v1986_v11  ;;  %v1992_v42 = vstv %s5304_s21  ;;  %v1998_v41 = vstv %s5310_s14  ;;  %s5396_s27 = sld [smem:[#allocation9 + $0x104]] }
 0x1d7   : > { %3539 = vtanh.f32 %v1954_v49  ;;  %v1976_v15 = vadd.f32 %v1975_v36, %v1970_v60  ;;  %v1978_v1 = vadd.f32 %v1977_v48, %v1972_v30  ;;  %v1993_v5 = vmul.f32 %v5218_v46, %v1992_v42  ;;  %s5404_s26 = sld [smem:[#allocation9 + $0x184]] }
 0x1d8   : > { %v1995_v33 = vmul.f32 %v5225_v3, %v1992_v42  ;;  %v1999_v35 = vmul.f32 %v5235_v26, %v1998_v41  ;;  %v2001_v24 = vmul.f32 %v5242_v44, %v1998_v41  ;;  %v2004_v55 = vstv %s5314_s3  ;;  %s5410_s21 = sld [smem:[#allocation9 + $0x204]] }
 0x1d9   : > { %v1982_v57 = vadd.f32 %v1981_v27, %v1976_v15  ;;  %v1984_v6 = vadd.f32 %v1983_v13, %v1978_v1  ;;  %v2005_v39 = vmul.f32 %v5255_v21, %v2004_v55  ;;  %v2007_v45 = vmul.f32 %v5262_v17, %v2004_v55  ;;  %s5414_s14 = sld [smem:[#allocation9 + $0x284]] }
 0x1da   : > { %v2010_v56 = vstv %s5318_s15  ;;  %v2016_v63 = vstv %s5323_s23  ;;  %v2022_v2 = vstv %s5328_s29  ;;  %v2026_v43 = vstv %s5333_s24  ;;  %s5418_s3 = sld [smem:[#allocation9 + $0x304]] }
 0x1db   : > { %v5364_v31 = vpop.eup %3533  ;;  %v1988_v10 = vadd.f32 %v1987_v38, %v1982_v57  ;;  %v1990_v47 = vadd.f32 %v1989_v14, %v1984_v6  ;;  %v2011_v52 = vmul.f32 %v5276_v23, %v2010_v56  ;;  %v2013_v20 = vmul.f32 %v5282_v62, %v2010_v56  ;;  %s5423_s15 = sld [smem:[#allocation9 + $0x384]] }
 0x1dc   : > { %v5370_v28 = vpop.eup %3535  ;;  %v2023_v8 = vmul.f32 %v5084_v58, %v2022_v2  ;;  %v2024_v54 = vmul.f32 %v5097_v0, %v2022_v2  ;;  %v2027_v19 = vmul.f32 %v5104_v59, %v2026_v43  ;;  %v2029_v50 = vmul.f32 %v5110_v37, %v2026_v43  ;;  %s5426_s23 = sld [smem:[#allocation9 + $0x404]] }
 0x1dd   : > { %v1994_v16 = vadd.f32 %v1993_v5, %v1988_v10  ;;  %v1996_v12 = vadd.f32 %v1995_v33, %v1990_v47  ;;  %v2032_v36 = vstv %s5339_s20  ;;  %v2038_v48 = vstv %s5342_s17  ;;  %s5432_s29 = sld [smem:[#allocation9 + $0x484]] }
 0x1de   : > { %v2028_v22 = vadd.f32 %v2027_v19, %v2023_v8  ;;  %v2030_v29 = vadd.f32 %v2029_v50, %v2024_v54  ;;  %v2033_v61 = vmul.f32 %v5131_v7, %v2032_v36  ;;  %v2035_v9 = vmul.f32 %v5137_v53, %v2032_v36  ;;  %s5436_s24 = sld [smem:[#allocation11 + $0x4]] }
 0x1df   : > { %v2000_v4 = vadd.f32 %v1999_v35, %v1994_v16  ;;  %v2002_v27 = vadd.f32 %v2001_v24, %v1996_v12  ;;  %v2039_v13 = vmul.f32 %v5156_v40, %v2038_v48  ;;  %v2041_v11 = vmul.f32 %v5163_v18, %v2038_v48  ;;  %s5442_s20 = sld [smem:[#allocation9 + $0x5]] }
 0x1e0   : > { %v2034_v49 = vadd.f32 %v2033_v61, %v2028_v22  ;;  %v2036_v60 = vadd.f32 %v2035_v9, %v2030_v29  ;;  %v2044_v30 = vstv %s5348_s19  ;;  %v2050_v38 = vstv %s5354_s0  ;;  %s5446_s17 = sld [smem:[#allocation9 + $0x85]] }
 0x1e1   : > { %v2006_v14 = vadd.f32 %v2005_v39, %v2000_v4  ;;  %v2008_v42 = vadd.f32 %v2007_v45, %v2002_v27  ;;  %v2045_v41 = vmul.f32 %v5172_v32, %v2044_v30  ;;  %v2047_v15 = vmul.f32 %v5178_v51, %v2044_v30  ;;  %s5450_s19 = sld [smem:[#allocation9 + $0x105]] }
 0x1e2   : > { %v2040_v1 = vadd.f32 %v2039_v13, %v2034_v49  ;;  %v2042_v5 = vadd.f32 %v2041_v11, %v2036_v60  ;;  %v2051_v33 = vmul.f32 %v5197_v25, %v2050_v38  ;;  %v2053_v35 = vmul.f32 %v5204_v34, %v2050_v38  ;;  %s5454_s0 = sld [smem:[#allocation9 + $0x185]] }
 0x1e3   : > { %v5400_v24 = vpop.eup %3537  ;;  %v2012_v55 = vadd.f32 %v2011_v52, %v2006_v14  ;;  %v2014_v57 = vadd.f32 %v2013_v20, %v2008_v42  ;;  %v2056_v6 = vstv %s5362_s22  ;;  %v2062_v39 = vstv %s5368_s4  ;;  %s5462_s22 = sld [smem:[#allocation9 + $0x205]] }
 0x1e4   : > { %v5406_v45 = vpop.eup %3539  ;;  %v2046_v56 = vadd.f32 %v2045_v41, %v2040_v1  ;;  %v2048_v2 = vadd.f32 %v2047_v15, %v2042_v5  ;;  %v2057_v43 = vmul.f32 %v5218_v46, %v2056_v6  ;;  %v2059_v10 = vmul.f32 %v5225_v3, %v2056_v6  ;;  %s5467_s4 = sld [smem:[#allocation9 + $0x285]] }
 0x1e5   : > { %v2017_v47 = vadd.f32 %v2016_v63, %v2012_v55  ;;  %v2018_v8 = vadd.f32 %v2016_v63, %v2014_v57  ;;  %v2063_v52 = vmul.f32 %v5235_v26, %v2062_v39  ;;  %v2065_v20 = vmul.f32 %v5242_v44, %v2062_v39 }
 0x1e6   : > { %v2052_v54 = vadd.f32 %v2051_v33, %v2046_v56  ;;  %v2054_v19 = vadd.f32 %v2053_v35, %v2048_v2  ;;  %v2068_v50 = vstv %s5376_s25  ;;  %v2074_v16 = vstv %s5380_s28  ;;  %s5476_s25 = sld [smem:[#allocation9 + $0x305]] }
 0x1e7   : > { %3541 = vtanh.f32 %v2017_v47  ;;  %v2069_v12 = vmul.f32 %v5255_v21, %v2068_v50  ;;  %v2071_v63 = vmul.f32 %v5262_v17, %v2068_v50  ;;  %v2075_v36 = vmul.f32 %v5276_v23, %v2074_v16  ;;  %s5482_s28 = sld [smem:[#allocation9 + $0x385]] }
 0x1e8   : > { %3543 = vtanh.f32 %v2018_v8  ;;  %v2058_v48 = vadd.f32 %v2057_v43, %v2052_v54  ;;  %v2060_v22 = vadd.f32 %v2059_v10, %v2054_v19  ;;  %v2077_v29 = vmul.f32 %v5282_v62, %v2074_v16 }
 0x1e9   : > { %v2080_v61 = vstv %s5384_s2  ;;  %v2086_v9 = vstv %s5388_s30  ;;  %v2090_v4 = vstv %s5392_s1  ;;  %v2096_v27 = vstv %s5396_s27  ;;  %s5488_s2 = sld [smem:[#allocation9 + $0x405]] }
 0x1ea   : > { %v2064_v13 = vadd.f32 %v2063_v52, %v2058_v48  ;;  %v2066_v11 = vadd.f32 %v2065_v20, %v2060_v22  ;;  %v2087_v49 = vmul.f32 %v5084_v58, %v2086_v9  ;;  %v2088_v60 = vmul.f32 %v5097_v0, %v2086_v9  ;;  %s5492_s30 = sld [smem:[#allocation9 + $0x485]] }
 0x1eb   : > { %v2091_v30 = vmul.f32 %v5104_v59, %v2090_v4  ;;  %v2093_v38 = vmul.f32 %v5110_v37, %v2090_v4  ;;  %v2097_v14 = vmul.f32 %v5131_v7, %v2096_v27  ;;  %v2099_v42 = vmul.f32 %v5137_v53, %v2096_v27  ;;  %s5498_s1 = sld [smem:[#allocation11 + $0x5]] }
 0x1ec   : > { %v2070_v41 = vadd.f32 %v2069_v12, %v2064_v13  ;;  %v2072_v15 = vadd.f32 %v2071_v63, %v2066_v11  ;;  %v2102_v1 = vstv %s5404_s26  ;;  %v2108_v5 = vstv %s5410_s21  ;;  %s5502_s27 = sld [smem:[#allocation9 + $0x6]] }
 0x1ed   : > { %v2092_v33 = vadd.f32 %v2091_v30, %v2087_v49  ;;  %v2094_v35 = vadd.f32 %v2093_v38, %v2088_v60  ;;  %v2103_v55 = vmul.f32 %v5156_v40, %v2102_v1  ;;  %v2105_v57 = vmul.f32 %v5163_v18, %v2102_v1  ;;  %s5506_s26 = sld [smem:[#allocation9 + $0x86]] }
 0x1ee   : > { %v2076_v6 = vadd.f32 %v2075_v36, %v2070_v41  ;;  %v2078_v39 = vadd.f32 %v2077_v29, %v2072_v15  ;;  %v2109_v56 = vmul.f32 %v5172_v32, %v2108_v5  ;;  %v2111_v2 = vmul.f32 %v5178_v51, %v2108_v5  ;;  %s5510_s21 = sld [smem:[#allocation9 + $0x106]] }
 0x1ef   : > { %v2098_v43 = vadd.f32 %v2097_v14, %v2092_v33  ;;  %v2100_v10 = vadd.f32 %v2099_v42, %v2094_v35  ;;  %v2114_v47 = vstv %s5414_s14  ;;  %v2120_v8 = vstv %s5418_s3  ;;  %s5516_s14 = sld [smem:[#allocation9 + $0x186]] }
 0x1f0   : > { %v2081_v52 = vadd.f32 %v2080_v61, %v2076_v6  ;;  %v2082_v20 = vadd.f32 %v2080_v61, %v2078_v39  ;;  %v2115_v54 = vmul.f32 %v5197_v25, %v2114_v47  ;;  %v2117_v19 = vmul.f32 %v5204_v34, %v2114_v47  ;;  %s5520_s3 = sld [smem:[#allocation9 + $0x206]] }
 0x1f1   : > { %v2104_v50 = vadd.f32 %v2103_v55, %v2098_v43  ;;  %v2106_v16 = vadd.f32 %v2105_v57, %v2100_v10  ;;  %v2121_v12 = vmul.f32 %v5218_v46, %v2120_v8  ;;  %v2123_v63 = vmul.f32 %v5225_v3, %v2120_v8 }
 0x1f2   : > { %3545 = vtanh.f32 %v2081_v52  ;;  %v2126_v36 = vstv %s5423_s15  ;;  %v2132_v48 = vstv %s5426_s23  ;;  %v2138_v22 = vstv %s5432_s29  ;;  %s5530_s15 = sld [smem:[#allocation9 + $0x286]] }
 0x1f3   : > { %3547 = vtanh.f32 %v2082_v20  ;;  %v2110_v29 = vadd.f32 %v2109_v56, %v2104_v50  ;;  %v2112_v61 = vadd.f32 %v2111_v2, %v2106_v16  ;;  %v2127_v9 = vmul.f32 %v5235_v26, %v2126_v36  ;;  %s5535_s23 = sld [smem:[#allocation9 + $0x306]] }
 0x1f4   : > { %v5470_v4 = vpop.eup %3541  ;;  %v2129_v27 = vmul.f32 %v5242_v44, %v2126_v36  ;;  %v2133_v13 = vmul.f32 %v5255_v21, %v2132_v48  ;;  %v2135_v11 = vmul.f32 %v5262_v17, %v2132_v48  ;;  %v2139_v49 = vmul.f32 %v5276_v23, %v2138_v22  ;;  %s5542_s29 = sld [smem:[#allocation9 + $0x386]] }
 0x1f5   : > { %v5478_v60 = vpop.eup %3543  ;;  %v2116_v30 = vadd.f32 %v2115_v54, %v2110_v29  ;;  %v2118_v38 = vadd.f32 %v2117_v19, %v2112_v61  ;;  %v2141_v14 = vmul.f32 %v5282_v62, %v2138_v22  ;;  %v2144_v42 = vstv %s5436_s24  ;;  %s5546_s24 = sld [smem:[#allocation9 + $0x406]] }
 0x1f6   : > { %v2150_v41 = vstv %s5442_s20  ;;  %v2154_v15 = vstv %s5446_s17  ;;  %v2160_v1 = vstv %s5450_s19  ;;  %v2166_v5 = vstv %s5454_s0  ;;  %s5552_s20 = sld [smem:[#allocation9 + $0x486]] }
 0x1f7   : > { %v2122_v33 = vadd.f32 %v2121_v12, %v2116_v30  ;;  %v2124_v35 = vadd.f32 %v2123_v63, %v2118_v38  ;;  %v2151_v55 = vmul.f32 %v5084_v58, %v2150_v41  ;;  %v2152_v57 = vmul.f32 %v5097_v0, %v2150_v41  ;;  %s5556_s17 = sld [smem:[#allocation11 + $0x6]] }
 0x1f8   : > { %v2155_v6 = vmul.f32 %v5104_v59, %v2154_v15  ;;  %v2157_v39 = vmul.f32 %v5110_v37, %v2154_v15  ;;  %v2161_v56 = vmul.f32 %v5131_v7, %v2160_v1  ;;  %v2163_v2 = vmul.f32 %v5137_v53, %v2160_v1  ;;  %s5560_s19 = sld [smem:[#allocation9 + $0x7]] }
 0x1f9   : > { %v2128_v43 = vadd.f32 %v2127_v9, %v2122_v33  ;;  %v2130_v10 = vadd.f32 %v2129_v27, %v2124_v35  ;;  %v2167_v47 = vmul.f32 %v5156_v40, %v2166_v5  ;;  %v2169_v8 = vmul.f32 %v5163_v18, %v2166_v5  ;;  %s5564_s0 = sld [smem:[#allocation9 + $0x87]] }
 0x1fa   : > { %v2156_v52 = vadd.f32 %v2155_v6, %v2151_v55  ;;  %v2158_v20 = vadd.f32 %v2157_v39, %v2152_v57  ;;  %v2172_v54 = vstv %s5462_s22  ;;  %v2178_v19 = vstv %s5467_s4  ;;  %s5568_s22 = sld [smem:[#allocation9 + $0x107]] }
 0x1fb   : > { %v2134_v50 = vadd.f32 %v2133_v13, %v2128_v43  ;;  %v2136_v16 = vadd.f32 %v2135_v11, %v2130_v10  ;;  %v2173_v12 = vmul.f32 %v5172_v32, %v2172_v54  ;;  %v2175_v63 = vmul.f32 %v5178_v51, %v2172_v54  ;;  %s5572_s4 = sld [smem:[#allocation9 + $0x187]] }
 0x1fc   : > { %v2162_v36 = vadd.f32 %v2161_v56, %v2156_v52  ;;  %v2164_v48 = vadd.f32 %v2163_v2, %v2158_v20  ;;  %v2179_v22 = vmul.f32 %v5197_v25, %v2178_v19  ;;  %v2181_v29 = vmul.f32 %v5204_v34, %v2178_v19 }
 0x1fd   : > { %v2140_v61 = vadd.f32 %v2139_v49, %v2134_v50  ;;  %v2142_v9 = vadd.f32 %v2141_v14, %v2136_v16  ;;  %v2184_v27 = vstv %s5476_s25  ;;  %v2190_v30 = vstv %s5482_s28  ;;  %s5578_s25 = sld [smem:[#allocation9 + $0x207]] }
 0x1fe   : > { %v2168_v13 = vadd.f32 %v2167_v47, %v2162_v36  ;;  %v2170_v11 = vadd.f32 %v2169_v8, %v2164_v48  ;;  %v2185_v38 = vmul.f32 %v5218_v46, %v2184_v27  ;;  %v2187_v41 = vmul.f32 %v5225_v3, %v2184_v27  ;;  %s5582_s28 = sld [smem:[#allocation9 + $0x287]] }
 0x1ff   : > { %v5522_v15 = vpop.eup %3545  ;;  %v2145_v1 = vadd.f32 %v2144_v42, %v2140_v61  ;;  %v2146_v5 = vadd.f32 %v2144_v42, %v2142_v9  ;;  %v2191_v49 = vmul.f32 %v5235_v26, %v2190_v30  ;;  %v2193_v14 = vmul.f32 %v5242_v44, %v2190_v30 }
 0x200   : > { %v5526_v33 = vpop.eup %3547  ;;  %v2174_v35 = vadd.f32 %v2173_v12, %v2168_v13  ;;  %v2176_v55 = vadd.f32 %v2175_v63, %v2170_v11  ;;  %v2196_v57 = vstv %s5488_s2  ;;  %v2202_v6 = vstv %s5492_s30  ;;  %s5589_s2 = sld [smem:[#allocation9 + $0x307]] }
 0x201   : > { %3549 = vtanh.f32 %v2145_v1  ;;  %v2197_v39 = vmul.f32 %v5255_v21, %v2196_v57  ;;  %v2199_v42 = vmul.f32 %v5262_v17, %v2196_v57  ;;  %v2203_v56 = vmul.f32 %v5276_v23, %v2202_v6  ;;  %s5594_s30 = sld [smem:[#allocation9 + $0x387]] }
 0x202   : > { %3551 = vtanh.f32 %v2146_v5  ;;  %v2180_v2 = vadd.f32 %v2179_v22, %v2174_v35  ;;  %v2182_v43 = vadd.f32 %v2181_v29, %v2176_v55  ;;  %v2205_v10 = vmul.f32 %v5282_v62, %v2202_v6 }
 0x203   : > { %v2208_v47 = vstv %s5498_s1  ;;  %v2214_v8 = vstv %s5502_s27  ;;  %v2218_v52 = vstv %s5506_s26  ;;  %v2224_v20 = vstv %s5510_s21  ;;  %s5600_s1 = sld [smem:[#allocation9 + $0x407]] }
 0x204   : > { %v2186_v54 = vadd.f32 %v2185_v38, %v2180_v2  ;;  %v2188_v19 = vadd.f32 %v2187_v41, %v2182_v43  ;;  %v2215_v50 = vmul.f32 %v5084_v58, %v2214_v8  ;;  %v2216_v16 = vmul.f32 %v5097_v0, %v2214_v8  ;;  %s5604_s27 = sld [smem:[#allocation9 + $0x487]] }
 0x205   : > { %v2219_v12 = vmul.f32 %v5104_v59, %v2218_v52  ;;  %v2221_v63 = vmul.f32 %v5110_v37, %v2218_v52  ;;  %v2225_v36 = vmul.f32 %v5131_v7, %v2224_v20  ;;  %v2227_v48 = vmul.f32 %v5137_v53, %v2224_v20  ;;  %s5610_s26 = sld [smem:[#allocation11 + $0x7]] }
 0x206   : > { %v2192_v22 = vadd.f32 %v2191_v49, %v2186_v54  ;;  %v2194_v29 = vadd.f32 %v2193_v14, %v2188_v19  ;;  %v2230_v61 = vstv %s5516_s14  ;;  %v2236_v9 = vstv %s5520_s3  ;;  %s5614_s21 = sld [smem:[#allocation9 + $0x8]] }
 0x207   : > { %v2220_v27 = vadd.f32 %v2219_v12, %v2215_v50  ;;  %v2222_v30 = vadd.f32 %v2221_v63, %v2216_v16  ;;  %v2231_v13 = vmul.f32 %v5156_v40, %v2230_v61  ;;  %v2233_v11 = vmul.f32 %v5163_v18, %v2230_v61  ;;  %s5618_s14 = sld [smem:[#allocation9 + $0x88]] }
 0x208   : > { %v2198_v38 = vadd.f32 %v2197_v39, %v2192_v22  ;;  %v2200_v41 = vadd.f32 %v2199_v42, %v2194_v29  ;;  %v2237_v1 = vmul.f32 %v5172_v32, %v2236_v9  ;;  %v2239_v5 = vmul.f32 %v5178_v51, %v2236_v9  ;;  %s5622_s3 = sld [smem:[#allocation9 + $0x108]] }
 0x209   : > { %v2226_v49 = vadd.f32 %v2225_v36, %v2220_v27  ;;  %v2228_v14 = vadd.f32 %v2227_v48, %v2222_v30  ;;  %v2242_v35 = vstv %s5530_s15  ;;  %v2248_v55 = vstv %s5535_s23  ;;  %s5626_s15 = sld [smem:[#allocation9 + $0x188]] }
 0x20a   : > { %v2204_v57 = vadd.f32 %v2203_v56, %v2198_v38  ;;  %v2206_v6 = vadd.f32 %v2205_v10, %v2200_v41  ;;  %v2243_v2 = vmul.f32 %v5197_v25, %v2242_v35  ;;  %v2245_v39 = vmul.f32 %v5204_v34, %v2242_v35  ;;  %s5630_s23 = sld [smem:[#allocation9 + $0x208]] }
 0x20b   : > { %v2232_v42 = vadd.f32 %v2231_v13, %v2226_v49  ;;  %v2234_v43 = vadd.f32 %v2233_v11, %v2228_v14  ;;  %v2249_v8 = vmul.f32 %v5218_v46, %v2248_v55  ;;  %v2251_v52 = vmul.f32 %v5225_v3, %v2248_v55 }
 0x20c   : > { %v2209_v20 = vadd.f32 %v2208_v47, %v2204_v57  ;;  %v2210_v54 = vadd.f32 %v2208_v47, %v2206_v6  ;;  %v2254_v19 = vstv %s5542_s29  ;;  %v2260_v50 = vstv %s5546_s24  ;;  %s5638_s29 = sld [smem:[#allocation9 + $0x288]] }
 0x20d   : > { %v2238_v56 = vadd.f32 %v2237_v1, %v2232_v42  ;;  %v2240_v10 = vadd.f32 %v2239_v5, %v2234_v43  ;;  %v2255_v16 = vmul.f32 %v5235_v26, %v2254_v19  ;;  %v2257_v12 = vmul.f32 %v5242_v44, %v2254_v19  ;;  %s5645_s24 = sld [smem:[#allocation9 + $0x308]] }
 0x20e   : > { %v5584_v63 = vpop.eup %3549  ;;  %3553 = vtanh.f32 %v2209_v20  ;;  %v2261_v47 = vmul.f32 %v5255_v21, %v2260_v50  ;;  %v2263_v36 = vmul.f32 %v5262_v17, %v2260_v50  ;;  %v2266_v48 = vstv %s5552_s20  ;;  %s5650_s20 = sld [smem:[#allocation9 + $0x388]] }
 0x20f   : > { %v5591_v22 = vpop.eup %3551  ;;  %3555 = vtanh.f32 %v2210_v54  ;;  %v2244_v29 = vadd.f32 %v2243_v2, %v2238_v56  ;;  %v2246_v61 = vadd.f32 %v2245_v39, %v2240_v10  ;;  %v2267_v9 = vmul.f32 %v5276_v23, %v2266_v48 }
 0x210   : > { %v2269_v27 = vmul.f32 %v5282_v62, %v2266_v48  ;;  %v2272_v30 = vstv %s5556_s17  ;;  %v2278_v13 = vstv %s5560_s19  ;;  %v2282_v11 = vstv %s5564_s0  ;;  %s5656_s17 = sld [smem:[#allocation9 + $0x408]] }
 0x211   : > { %v2250_v38 = vadd.f32 %v2249_v8, %v2244_v29  ;;  %v2252_v41 = vadd.f32 %v2251_v52, %v2246_v61  ;;  %v2279_v1 = vmul.f32 %v5084_v58, %v2278_v13  ;;  %v2280_v5 = vmul.f32 %v5097_v0, %v2278_v13  ;;  %s5660_s19 = sld [smem:[#allocation9 + $0x488]] }
 0x212   : > { %v2283_v49 = vmul.f32 %v5104_v59, %v2282_v11  ;;  %v2285_v14 = vmul.f32 %v5110_v37, %v2282_v11  ;;  %v2288_v35 = vstv %s5568_s22  ;;  %v2294_v55 = vstv %s5572_s4  ;;  %s5666_s0 = sld [smem:[#allocation11 + $0x8]] }
 0x213   : > { %v2256_v57 = vadd.f32 %v2255_v16, %v2250_v38  ;;  %v2258_v6 = vadd.f32 %v2257_v12, %v2252_v41  ;;  %v2289_v2 = vmul.f32 %v5131_v7, %v2288_v35  ;;  %v2291_v39 = vmul.f32 %v5137_v53, %v2288_v35  ;;  %s5670_s22 = sld [smem:[#allocation9 + $0x9]] }
 0x214   : > { %v2284_v42 = vadd.f32 %v2283_v49, %v2279_v1  ;;  %v2286_v43 = vadd.f32 %v2285_v14, %v2280_v5  ;;  %v2295_v8 = vmul.f32 %v5156_v40, %v2294_v55  ;;  %v2297_v52 = vmul.f32 %v5163_v18, %v2294_v55  ;;  %s5676_s4 = sld [smem:[#allocation9 + $0x89]] }
 0x215   : > { %v2262_v20 = vadd.f32 %v2261_v47, %v2256_v57  ;;  %v2264_v54 = vadd.f32 %v2263_v36, %v2258_v6  ;;  %v2300_v19 = vstv %s5578_s25  ;;  %v2306_v50 = vstv %s5582_s28  ;;  %s5678_s25 = sld [smem:[#allocation9 + $0x109]] }
 0x216   : > { %v2290_v56 = vadd.f32 %v2289_v2, %v2284_v42  ;;  %v2292_v10 = vadd.f32 %v2291_v39, %v2286_v43  ;;  %v2301_v16 = vmul.f32 %v5172_v32, %v2300_v19  ;;  %v2303_v12 = vmul.f32 %v5178_v51, %v2300_v19  ;;  %s5684_s28 = sld [smem:[#allocation9 + $0x189]] }
 0x217   : > { %v2268_v48 = vadd.f32 %v2267_v9, %v2262_v20  ;;  %v2270_v29 = vadd.f32 %v2269_v27, %v2264_v54  ;;  %v2307_v61 = vmul.f32 %v5197_v25, %v2306_v50  ;;  %v2309_v47 = vmul.f32 %v5204_v34, %v2306_v50 }
 0x218   : > { %v2296_v36 = vadd.f32 %v2295_v8, %v2290_v56  ;;  %v2298_v13 = vadd.f32 %v2297_v52, %v2292_v10  ;;  %v2312_v11 = vstv %s5589_s2  ;;  %v2318_v38 = vstv %s5594_s30  ;;  %s5690_s2 = sld [smem:[#allocation9 + $0x209]] }
 0x219   : > { %v2273_v41 = vadd.f32 %v2272_v30, %v2268_v48  ;;  %v2274_v1 = vadd.f32 %v2272_v30, %v2270_v29  ;;  %v2313_v5 = vmul.f32 %v5218_v46, %v2312_v11  ;;  %v2315_v9 = vmul.f32 %v5225_v3, %v2312_v11  ;;  %s5696_s30 = sld [smem:[#allocation9 + $0x289]] }
 0x21a   : > { %v2302_v27 = vadd.f32 %v2301_v16, %v2296_v36  ;;  %v2304_v49 = vadd.f32 %v2303_v12, %v2298_v13  ;;  %v2319_v14 = vmul.f32 %v5235_v26, %v2318_v38  ;;  %v2321_v35 = vmul.f32 %v5242_v44, %v2318_v38 }
 0x21b   : > { %v5640_v55 = vpop.eup %3553  ;;  %3557 = vtanh.f32 %v2273_v41  ;;  %v2324_v57 = vstv %s5600_s1  ;;  %v2330_v6 = vstv %s5604_s27  ;;  %v2336_v2 = vstv %s5610_s26  ;;  %s5706_s1 = sld [smem:[#allocation9 + $0x309]] }
 0x21c   : > { %v5647_v30 = vpop.eup %3555  ;;  %3559 = vtanh.f32 %v2274_v1  ;;  %v2308_v39 = vadd.f32 %v2307_v61, %v2302_v27  ;;  %v2310_v42 = vadd.f32 %v2309_v47, %v2304_v49  ;;  %v2325_v43 = vmul.f32 %v5255_v21, %v2324_v57  ;;  %s5710_s27 = sld [smem:[#allocation9 + $0x389]] }
 0x21d   : > { %v2327_v8 = vmul.f32 %v5262_v17, %v2324_v57  ;;  %v2331_v52 = vmul.f32 %v5276_v23, %v2330_v6  ;;  %v2333_v20 = vmul.f32 %v5282_v62, %v2330_v6  ;;  %v2342_v54 = vstv %s5614_s21  ;;  %s5716_s26 = sld [smem:[#allocation9 + $0x409]] }
 0x21e   : > { %v2314_v19 = vadd.f32 %v2313_v5, %v2308_v39  ;;  %v2316_v50 = vadd.f32 %v2315_v9, %v2310_v42  ;;  %v2343_v56 = vmul.f32 %v5084_v58, %v2342_v54  ;;  %v2344_v10 = vmul.f32 %v5097_v0, %v2342_v54  ;;  %s5720_s21 = sld [smem:[#allocation9 + $0x489]] }
 0x21f   : > { %v2346_v16 = vstv %s5618_s14  ;;  %v2352_v12 = vstv %s5622_s3  ;;  %v2358_v48 = vstv %s5626_s15  ;;  %v2364_v29 = vstv %s5630_s23  ;;  %s5726_s14 = sld [smem:[#allocation11 + $0x9]] }
 0x220   : > { %v2320_v61 = vadd.f32 %v2319_v14, %v2314_v19  ;;  %v2322_v47 = vadd.f32 %v2321_v35, %v2316_v50  ;;  %v2347_v36 = vmul.f32 %v5104_v59, %v2346_v16  ;;  %v2349_v13 = vmul.f32 %v5110_v37, %v2346_v16  ;;  %s5730_s3 = sld [smem:[#allocation12]] }
 0x221   : > { %v2353_v11 = vmul.f32 %v5131_v7, %v2352_v12  ;;  %v2355_v38 = vmul.f32 %v5137_v53, %v2352_v12  ;;  %v2359_v41 = vmul.f32 %v5156_v40, %v2358_v48  ;;  %v2361_v1 = vmul.f32 %v5163_v18, %v2358_v48  ;;  %s5734_s15 = sld [smem:[#allocation12 + $0x80]] }
 0x222   : > { %v2326_v5 = vadd.f32 %v2325_v43, %v2320_v61  ;;  %v2328_v9 = vadd.f32 %v2327_v8, %v2322_v47  ;;  %v2348_v27 = vadd.f32 %v2347_v36, %v2343_v56  ;;  %v2350_v49 = vadd.f32 %v2349_v13, %v2344_v10  ;;  %s5738_s23 = sld [smem:[#allocation12 + $0x100]] }
 0x223   : > { %v2365_v14 = vmul.f32 %v5172_v32, %v2364_v29  ;;  %v2367_v35 = vmul.f32 %v5178_v51, %v2364_v29  ;;  %v2370_v57 = vstv %s5638_s29  ;;  %v2376_v6 = vstv %s5645_s24  ;;  %s5744_s29 = sld [smem:[#allocation12 + $0x180]] }
 0x224   : > { %v2332_v39 = vadd.f32 %v2331_v52, %v2326_v5  ;;  %v2334_v42 = vadd.f32 %v2333_v20, %v2328_v9  ;;  %v2354_v43 = vadd.f32 %v2353_v11, %v2348_v27  ;;  %v2356_v8 = vadd.f32 %v2355_v38, %v2350_v49  ;;  %s5748_s24 = sld [smem:[#allocation12 + $0x200]] }
 0x225   : > { %v2371_v54 = vmul.f32 %v5197_v25, %v2370_v57  ;;  %v2373_v19 = vmul.f32 %v5204_v34, %v2370_v57  ;;  %v2377_v50 = vmul.f32 %v5218_v46, %v2376_v6  ;;  %v2379_v56 = vmul.f32 %v5225_v3, %v2376_v6 }
 0x226   : > { %v2337_v10 = vadd.f32 %v2336_v2, %v2332_v39  ;;  %v2338_v16 = vadd.f32 %v2336_v2, %v2334_v42  ;;  %v2360_v12 = vadd.f32 %v2359_v41, %v2354_v43  ;;  %v2362_v48 = vadd.f32 %v2361_v1, %v2356_v8 }
 0x227   : > { %v2382_v29 = vstv %s5650_s20  ;;  %v2388_v52 = vstv %s5656_s17  ;;  %v2394_v61 = vstv %s5660_s19  ;;  %v2400_v20 = vstv %s5666_s0  ;;  %s5760_s20 = sld [smem:[#allocation12 + $0x280]] }
 0x228   : > { %v5698_v47 = vpop.eup %3557  ;;  %3561 = vtanh.f32 %v2337_v10  ;;  %v2366_v36 = vadd.f32 %v2365_v14, %v2360_v12  ;;  %v2368_v13 = vadd.f32 %v2367_v35, %v2362_v48  ;;  %v2383_v2 = vmul.f32 %v5235_v26, %v2382_v29  ;;  %s5767_s17 = sld [smem:[#allocation12 + $0x300]] }
 0x229   : > { %v5701_v11 = vpop.eup %3559  ;;  %3563 = vtanh.f32 %v2338_v16  ;;  %v2385_v38 = vmul.f32 %v5242_v44, %v2382_v29  ;;  %v2389_v41 = vmul.f32 %v5255_v21, %v2388_v52  ;;  %v2391_v1 = vmul.f32 %v5262_v17, %v2388_v52  ;;  %s5770_s19 = sld [smem:[#allocation12 + $0x380]] }
 0x22a   : > { %v2372_v5 = vadd.f32 %v2371_v54, %v2366_v36  ;;  %v2374_v9 = vadd.f32 %v2373_v19, %v2368_v13  ;;  %v2395_v27 = vmul.f32 %v5276_v23, %v2394_v61  ;;  %v2397_v49 = vmul.f32 %v5282_v62, %v2394_v61  ;;  %s5776_s0 = sld [smem:[#allocation12 + $0x400]] }
 0x22b   : > { %v2406_v14 = vstv %s5670_s22  ;;  %v2410_v35 = vstv %s5676_s4  ;;  %v2416_v57 = vstv %s5678_s25  ;;  %v2422_v6 = vstv %s5684_s28  ;;  %s5780_s22 = sld [smem:[#allocation12 + $0x480]] }
 0x22c   : > { %v2378_v39 = vadd.f32 %v2377_v50, %v2372_v5  ;;  %v2380_v42 = vadd.f32 %v2379_v56, %v2374_v9  ;;  %v2407_v43 = vmul.f32 %v5084_v58, %v2406_v14  ;;  %v2408_v8 = vmul.f32 %v5097_v0, %v2406_v14  ;;  %s5786_s4 = sld [smem:[#allocation12 + $0x1]] }
 0x22d   : > { %v2411_v54 = vmul.f32 %v5104_v59, %v2410_v35  ;;  %v2413_v19 = vmul.f32 %v5110_v37, %v2410_v35  ;;  %v2417_v10 = vmul.f32 %v5131_v7, %v2416_v57  ;;  %v2419_v16 = vmul.f32 %v5137_v53, %v2416_v57  ;;  %s5790_s25 = sld [smem:[#allocation12 + $0x81]] }
 0x22e   : > { %v2384_v50 = vadd.f32 %v2383_v2, %v2378_v39  ;;  %v2386_v56 = vadd.f32 %v2385_v38, %v2380_v42  ;;  %v2423_v12 = vmul.f32 %v5156_v40, %v2422_v6  ;;  %v2425_v58 = vmul.f32 %v5163_v18, %v2422_v6  ;;  %s5794_s28 = sld [smem:[#allocation12 + $0x101]] }
 0x22f   : > { %v2412_v0 = vadd.f32 %v2411_v54, %v2407_v43  ;;  %v2414_v48 = vadd.f32 %v2413_v19, %v2408_v8  ;;  %v2428_v59 = vstv %s5690_s2  ;;  %v2434_v37 = vstv %s5696_s30  ;;  %s5798_s2 = sld [smem:[#allocation12 + $0x181]] }
 0x230   : > { %v2390_v7 = vadd.f32 %v2389_v41, %v2384_v50  ;;  %v2392_v53 = vadd.f32 %v2391_v1, %v2386_v56  ;;  %v2429_v29 = vmul.f32 %v5172_v32, %v2428_v59  ;;  %v2431_v52 = vmul.f32 %v5178_v51, %v2428_v59  ;;  %s5802_s30 = sld [smem:[#allocation12 + $0x201]] }
 0x231   : > { %v2418_v40 = vadd.f32 %v2417_v10, %v2412_v0  ;;  %v2420_v18 = vadd.f32 %v2419_v16, %v2414_v48  ;;  %v2435_v61 = vmul.f32 %v5197_v25, %v2434_v37  ;;  %v2437_v36 = vmul.f32 %v5204_v34, %v2434_v37 }
 0x232   : > { %v2396_v13 = vadd.f32 %v2395_v27, %v2390_v7  ;;  %v2398_v2 = vadd.f32 %v2397_v49, %v2392_v53  ;;  %v2440_v38 = vstv %s5706_s1  ;;  %v2446_v41 = vstv %s5710_s27  ;;  %s5805_s1 = sld [smem:[#allocation12 + $0x281]] }
 0x233   : > { %v2424_v32 = vadd.f32 %v2423_v12, %v2418_v40  ;;  %v2426_v51 = vadd.f32 %v2425_v58, %v2420_v18  ;;  %v2441_v1 = vmul.f32 %v5218_v46, %v2440_v38  ;;  %v2443_v5 = vmul.f32 %v5225_v3, %v2440_v38  ;;  %s5811_s27 = sld [smem:[#allocation14]] }
 0x234   : > { %v2401_v25 = vadd.f32 %v2400_v20, %v2396_v13  ;;  %v2402_v34 = vadd.f32 %v2400_v20, %v2398_v2  ;;  %v2447_v9 = vmul.f32 %v5235_v26, %v2446_v41  ;;  %v2449_v27 = vmul.f32 %v5242_v44, %v2446_v41 }
 0x235   : > { %v5756_v49 = vpop.eup %3561  ;;  %v2430_v14 = vadd.f32 %v2429_v29, %v2424_v32  ;;  %v2432_v35 = vadd.f32 %v2431_v52, %v2426_v51  ;;  %v2452_v57 = vstv %s5716_s26  ;;  %v2458_v46 = vstv %s5720_s21  ;;  %s5815_s26 = sld [smem:[#allocation12 + $0x301]] }
 0x236   : > { %v5762_v3 = vpop.eup %3563  ;;  %3565 = vtanh.f32 %v2401_v25  ;;  %v2453_v20 = vmul.f32 %v5255_v21, %v2452_v57  ;;  %v2455_v26 = vmul.f32 %v5262_v17, %v2452_v57  ;;  %v2459_v44 = vmul.f32 %v5276_v23, %v2458_v46  ;;  %s5822_s21 = sld [smem:[#allocation12 + $0x381]] }
 0x237   : > { %3567 = vtanh.f32 %v2402_v34  ;;  %v2436_v6 = vadd.f32 %v2435_v61, %v2430_v14  ;;  %v2438_v39 = vadd.f32 %v2437_v36, %v2432_v35  ;;  %v2461_v42 = vmul.f32 %v5282_v62, %v2458_v46 }
 0x238   : > { %v2464_v43 = vstv %s5726_s14  ;;  %v2470_v8 = vstv %s5730_s3  ;;  %v2474_v54 = vstv %s5734_s15  ;;  %v2480_v19 = vstv %s5738_s23  ;;  %s5827_s14 = sld [smem:[#allocation12 + $0x401]] }
 0x239   : > { %v2442_v21 = vadd.f32 %v2441_v1, %v2436_v6  ;;  %v2444_v17 = vadd.f32 %v2443_v5, %v2438_v39  ;;  %v2471_v23 = vmul.f32 %v5364_v31, %v2470_v8  ;;  %v2472_v10 = vmul.f32 %v5370_v28, %v2470_v8  ;;  %s5833_s3 = sld [smem:[#allocation12 + $0x481]] }
 0x23a   : > { %v2475_v62 = vmul.f32 %v5400_v24, %v2474_v54  ;;  %v2477_v16 = vmul.f32 %v5406_v45, %v2474_v54  ;;  %v2481_v50 = vmul.f32 %v5470_v4, %v2480_v19  ;;  %v2483_v56 = vmul.f32 %v5478_v60, %v2480_v19  ;;  %s5837_s15 = sld [smem:[#allocation12 + $0x2]] }
 0x23b   : > { %v2448_v12 = vadd.f32 %v2447_v9, %v2442_v21  ;;  %v2450_v58 = vadd.f32 %v2449_v27, %v2444_v17  ;;  %v2486_v0 = vstv %s5744_s29  ;;  %v2492_v48 = vstv %s5748_s24  ;;  %s5843_s23 = sld [smem:[#allocation12 + $0x82]] }
 0x23c   : > { %v2476_v59 = vadd.f32 %v2475_v62, %v2471_v23  ;;  %v2478_v37 = vadd.f32 %v2477_v16, %v2472_v10  ;;  %v2487_v7 = vmul.f32 %v5522_v15, %v2486_v0  ;;  %v2489_v53 = vmul.f32 %v5526_v33, %v2486_v0  ;;  %s5845_s29 = sld [smem:[#allocation12 + $0x102]] }
 0x23d   : > { %v2454_v29 = vadd.f32 %v2453_v20, %v2448_v12  ;;  %v2456_v52 = vadd.f32 %v2455_v26, %v2450_v58  ;;  %v2493_v40 = vmul.f32 %v5584_v63, %v2492_v48  ;;  %v2495_v18 = vmul.f32 %v5591_v22, %v2492_v48  ;;  %s5851_s24 = sld [smem:[#allocation14 + $0x1]] }
 0x23e   : > { %v2482_v61 = vadd.f32 %v2481_v50, %v2476_v59  ;;  %v2484_v36 = vadd.f32 %v2483_v56, %v2478_v37  ;;  %v2498_v13 = vstv %s5760_s20  ;;  %v2504_v2 = vstv %s5767_s17  ;;  %s5863_s20 = sld [smem:[#allocation12 + $0x182]] }
 0x23f   : > { %v2460_v38 = vadd.f32 %v2459_v44, %v2454_v29  ;;  %v2462_v41 = vadd.f32 %v2461_v42, %v2456_v52  ;;  %v2499_v32 = vmul.f32 %v5640_v55, %v2498_v13  ;;  %v2501_v5 = vmul.f32 %v5647_v30, %v2498_v13  ;;  %s5871_s17 = sld [smem:[#allocation12 + $0x202]] }
 0x240   : > { %v2488_v51 = vadd.f32 %v2487_v7, %v2482_v61  ;;  %v2490_v1 = vadd.f32 %v2489_v53, %v2484_v36  ;;  %v2505_v25 = vmul.f32 %v5698_v47, %v2504_v2  ;;  %v2510_v27 = vstv %s5770_s19  ;;  %s5879_s19 = sld [smem:[#allocation12 + $0x282]] }
 0x241   : > { %v2465_v34 = vadd.f32 %v2464_v43, %v2460_v38  ;;  %v2466_v9 = vadd.f32 %v2464_v43, %v2462_v41  ;;  %v2516_v14 = vstv %s5776_s0  ;;  %v2507_v46 = vmul.f32 %v5701_v11, %v2504_v2  ;;  %s5887_s0 = sld [smem:[#allocation12 + $0x302]] }
 0x242   : > { %v2494_v35 = vadd.f32 %v2493_v40, %v2488_v51  ;;  %v2496_v57 = vadd.f32 %v2495_v18, %v2490_v1  ;;  %v2511_v20 = vmul.f32 %v5756_v49, %v2510_v27  ;;  %v2513_v44 = vmul.f32 %v5762_v3, %v2510_v27 }
 0x243   : > { %v5817_v26 = vpop.eup %3565  ;;  %3569 = vtanh.f32 %v2465_v34  ;;  %v2522_v6 = vstv %s5780_s22  ;;  %v2532_v39 = vstv %s5786_s4  ;;  %v2536_v23 = vstv %s5790_s25  ;;  %s5895_s4 = sld [smem:[#allocation12 + $0x382]] }
 0x244   : > { %v5824_v42 = vpop.eup %3567  ;;  %3571 = vtanh.f32 %v2466_v9  ;;  %v2500_v43 = vadd.f32 %v2499_v32, %v2494_v35  ;;  %v2502_v8 = vadd.f32 %v2501_v5, %v2496_v57  ;;  %v2517_v54 = vmul.f32 %v5817_v26, %v2516_v14  ;;  %s5900_s22 = sld [smem:[#allocation12 + $0x402]] }
 0x245   : > { %v2519_v19 = vmul.f32 %v5824_v42, %v2516_v14  ;;  %v2533_v21 = vmul.f32 %v5364_v31, %v2532_v39  ;;  %v2534_v17 = vmul.f32 %v5370_v28, %v2532_v39  ;;  %v2537_v16 = vmul.f32 %v5400_v24, %v2536_v23  ;;  %s5903_s25 = sld [smem:[#allocation12 + $0x482]] }
 0x246   : > { %v2506_v10 = vadd.f32 %v2505_v25, %v2500_v43  ;;  %v2508_v62 = vadd.f32 %v2507_v46, %v2502_v8  ;;  %v2539_v50 = vmul.f32 %v5406_v45, %v2536_v23  ;;  %v2542_v56 = vstv %s5794_s28  ;;  %s3296_s28 = sld [smem:[#allocation14 + $0x2]] }
 0x247   : > { %v2548_v12 = vstv %s5798_s2  ;;  %v2554_v58 = vstv %s5802_s30  ;;  %v2560_v0 = vstv %s5805_s1  ;;  %v2538_v37 = vadd.f32 %v2537_v16, %v2533_v21  ;;  %s3306_s2 = sshll.u32 (%p5994_p12), %s3801_s12, 4 }
 0x248   : > { %v2512_v48 = vadd.f32 %v2511_v20, %v2506_v10  ;;  %v2514_v59 = vadd.f32 %v2513_v44, %v2508_v62  ;;  %v2540_v7 = vadd.f32 %v2539_v50, %v2534_v17  ;;  %v2543_v53 = vmul.f32 %v5470_v4, %v2542_v56 }
 0x249   : > { %v2545_v29 = vmul.f32 %v5478_v60, %v2542_v56  ;;  %v2549_v52 = vmul.f32 %v5522_v15, %v2548_v12  ;;  %v2551_v40 = vmul.f32 %v5526_v33, %v2548_v12  ;;  %v2528_v36 = vstv %s5811_s27  ;;  %s2685_s27 = scalar_lea.vmem (%p5994_p12), %s5963_s9, %s3306_s2 }
 0x24a   : > { %v2518_v18 = vadd.f32 %v2517_v54, %v2512_v48  ;;  %v2520_v61 = vadd.f32 %v2519_v19, %v2514_v59  ;;  %v2555_v13 = vmul.f32 %v5584_v63, %v2554_v58  ;;  %v2544_v2 = vadd.f32 %v2543_v53, %v2538_v37 }
 0x24b   : > { %v2546_v38 = vadd.f32 %v2545_v29, %v2540_v7  ;;  %v2557_v41 = vmul.f32 %v5591_v22, %v2554_v58  ;;  %v2561_v32 = vmul.f32 %v5640_v55, %v2560_v0  ;;  %v2563_v51 = vmul.f32 %v5647_v30, %v2560_v0 }
 0x24c   : > { %v2566_v1 = vstv %s5815_s26  ;;  %v2572_v5 = vstv %s5822_s21  ;;  %v2578_v25 = vstv %s5827_s14  ;;  %v2550_v34 = vadd.f32 %v2549_v52, %v2544_v2 }
 0x24d   : > { %v2552_v9 = vadd.f32 %v2551_v40, %v2546_v38  ;;  %v2567_v27 = vmul.f32 %v5698_v47, %v2566_v1  ;;  %v2584_v14 = vstv %s5833_s3  ;;  %v2569_v35 = vmul.f32 %v5701_v11, %v2566_v1 }
 0x24e   : > { %v2573_v57 = vmul.f32 %v5756_v49, %v2572_v5  ;;  %v2575_v46 = vmul.f32 %v5762_v3, %v2572_v5  ;;  %v2579_v20 = vmul.f32 %v5817_v26, %v2578_v25  ;;  %v2556_v44 = vadd.f32 %v2555_v13, %v2550_v34 }
 0x24f   : > { %v2558_v39 = vadd.f32 %v2557_v41, %v2552_v9  ;;  %v2581_v43 = vmul.f32 %v5824_v42, %v2578_v25  ;;  %v2594_v8 = vstv %s5837_s15  ;;  %v2598_v17 = vstv %s5843_s23 }
 0x250   : > { %v5873_v54 = vpop.eup %3569  ;;  %v2595_v19 = vmul.f32 %v5364_v31, %v2594_v8  ;;  %v2596_v21 = vmul.f32 %v5370_v28, %v2594_v8  ;;  %v2604_v23 = vstv %s5845_s29  ;;  %v2562_v16 = vadd.f32 %v2561_v32, %v2556_v44 }
 0x251   : > { %v5881_v10 = vpop.eup %3571  ;;  %v2523_v62 = vmul.f32 %v5873_v54, %v2522_v6  ;;  %v2564_v50 = vadd.f32 %v2563_v51, %v2558_v39  ;;  %v2590_v56 = vstv %s5851_s24  ;;  %v2585_v31 = vmul.f32 %v5873_v54, %v2584_v14 }
 0x252   : > { %v2525_v12 = vmul.f32 %v5881_v10, %v2522_v6  ;;  %v2599_v28 = vmul.f32 %v5400_v24, %v2598_v17  ;;  %v2601_v58 = vmul.f32 %v5406_v45, %v2598_v17  ;;  %v2568_v48 = vadd.f32 %v2567_v27, %v2562_v16 }
 0x253   : > { %v2524_v0 = vadd.f32 %v2523_v62, %v2518_v18  ;;  %v2570_v59 = vadd.f32 %v2569_v35, %v2564_v50  ;;  %v2605_v37 = vmul.f32 %v5470_v4, %v2604_v23  ;;  %v2587_v7 = vmul.f32 %v5881_v10, %v2584_v14 }
 0x254   : > { %v2600_v53 = vadd.f32 %v2599_v28, %v2595_v19  ;;  %v2602_v6 = vadd.f32 %v2601_v58, %v2596_v21  ;;  %v2607_v29 = vmul.f32 %v5478_v60, %v2604_v23  ;;  %v2526_v24 = vadd.f32 %v2525_v12, %v2520_v61 }
 0x255   : > { %v2574_v45 = vadd.f32 %v2573_v57, %v2568_v48  ;;  %v2576_v52 = vadd.f32 %v2575_v46, %v2570_v59  ;;  %v2610_v40 = vstv %s5863_s20  ;;  %v2529_v18 = vadd.f32 %v2528_v36, %v2524_v0 }
 0x256   : > { %v2606_v13 = vadd.f32 %v2605_v37, %v2600_v53  ;;  %v2608_v4 = vadd.f32 %v2607_v29, %v2602_v6  ;;  %v2611_v2 = vmul.f32 %v5522_v15, %v2610_v40  ;;  %v2613_v41 = vmul.f32 %v5526_v33, %v2610_v40  ;;  %v2728_v40 = vld [vmem:[%s4994_s11 + $0x10] sm:$0xff] (%p5994_p12) }
 0x257   : > { %v2580_v38 = vadd.f32 %v2579_v20, %v2574_v45  ;;  %v2582_v60 = vadd.f32 %v2581_v43, %v2576_v52  ;;  %v2616_v61 = vstv %s5871_s17  ;;  %v2622_v5 = vstv %s5879_s19  ;;  %v2724_v45 = vld [vmem:[%s4994_s11] sm:$0xff] (%p5994_p12)  ;;  %2729 = vst [vmem:[%s2685_s27 + $0x20] sm:$0xff] (%p5994_p12), %v2728_v40 }
 0x258   : > { %v2612_v32 = vadd.f32 %v2611_v2, %v2606_v13  ;;  %v2617_v51 = vmul.f32 %v5584_v63, %v2616_v61  ;;  %v2619_v1 = vmul.f32 %v5591_v22, %v2616_v61  ;;  %v2614_v9 = vadd.f32 %v2613_v41, %v2608_v4  ;;  %v2732_v13 = vld [vmem:[%s4994_s11 + $0x20] sm:$0xff] (%p5994_p12)  ;;  %2725 = vst [vmem:[%s2685_s27] sm:$0xff] (%p5994_p12), %v2724_v45 }
 0x259   : > { %v2586_v25 = vadd.f32 %v2585_v31, %v2580_v38  ;;  %v2588_v34 = vadd.f32 %v2587_v7, %v2582_v60  ;;  %v2623_v27 = vmul.f32 %v5640_v55, %v2622_v5  ;;  %v2625_v14 = vmul.f32 %v5647_v30, %v2622_v5  ;;  %2733 = vst [vmem:[%s2685_s27 + $0x40] sm:$0xff] (%p5994_p12), %v2732_v13 }
 0x25a   : > { %v2618_v15 = vadd.f32 %v2617_v51, %v2612_v32  ;;  %v2628_v35 = vstv %s5887_s0  ;;  %v2634_v57 = vstv %s5895_s4  ;;  %v2530_v33 = vadd.f32 %v2528_v36, %v2526_v24 }
 0x25b   : > { %v2591_v46 = vadd.f32 %v2590_v56, %v2586_v25  ;;  %v2620_v20 = vadd.f32 %v2619_v1, %v2614_v9  ;;  %v2629_v63 = vmul.f32 %v5698_v47, %v2628_v35  ;;  %v2592_v22 = vadd.f32 %v2590_v56, %v2588_v34 }
 0x25c   : > { %v2624_v44 = vadd.f32 %v2623_v27, %v2618_v15  ;;  %v2631_v39 = vmul.f32 %v5701_v11, %v2628_v35  ;;  %v2635_v55 = vmul.f32 %v5756_v49, %v2634_v57  ;;  %v2637_v8 = vmul.f32 %v5762_v3, %v2634_v57 }
 0x25d   : > { %v2626_v43 = vadd.f32 %v2625_v14, %v2620_v20  ;;  %v2640_v19 = vstv %s5900_s22  ;;  %v2646_v30 = vstv %s5903_s25  ;;  %v2655_v47 = vadd.f32 %v2530_v33, %v2529_v18 }
 0x25e   : > { %v2630_v21 = vadd.f32 %v2629_v63, %v2624_v44  ;;  %v2641_v17 = vmul.f32 %v5817_v26, %v2640_v19  ;;  %v2643_v23 = vmul.f32 %v5824_v42, %v2640_v19  ;;  %v2657_v62 = vmul.f32 1.442695, %v2591_v46 }
 0x25f   : > { %v2632_v36 = vadd.f32 %v2631_v39, %v2626_v43  ;;  %v2647_v50 = vmul.f32 %v5873_v54, %v2646_v30  ;;  %v2659_v11 = vmul.f32 1.442695, %v2592_v22  ;;  %v2649_v49 = vmul.f32 %v5881_v10, %v2646_v30 }
 0x260   : > { %v2636_v16 = vadd.f32 %v2635_v55, %v2630_v21  ;;  %v2656_v12 = vmul.f32 0.5, %v2655_v47  ;;  %3573 = vpow2.f32 %v2657_v62  ;;  %v2652_v26 = vstv %s3296_s28 }
 0x261   : > { %v2638_v56 = vadd.f32 %v2637_v8, %v2632_v36  ;;  %3575 = vpow2.f32 %v2659_v11 }
 0x262   : > { %v2642_v3 = vadd.f32 %v2641_v17, %v2636_v16  ;;  %3298 = vst [vmem:[%s4994_s11 + $0x18] sm:$0xff] %v2656_v12 }
 0x263   : > { %v2644_v31 = vadd.f32 %v2643_v23, %v2638_v56 }
 0x264   : > { %v2648_v28 = vadd.f32 %v2647_v50, %v2642_v3 }
 0x265   : > { %v2650_v58 = vadd.f32 %v2649_v49, %v2644_v31 }
 0x266   : > { %v2653_v42 = vadd.f32 %v2652_v26, %v2648_v28 }
 0x267   : > { %v2654_v0 = vadd.f32 %v2652_v26, %v2650_v58 }
 0x268   : > { %v2663_v48 = vmul.f32 1.442695, %v2653_v42 }
 0x269   : > { %v2665_v59 = vmul.f32 1.442695, %v2654_v0  ;;  %v2730_v18 = vld [vmem:[%s4994_s11 + $0x18] sm:$0xff] (%p5994_p12) }
 0x26a   : > { %3577 = vpow2.f32 %v2663_v48  ;;  %2731 = vst [vmem:[%s2685_s27 + $0x28] sm:$0xff] (%p5994_p12), %v2730_v18 }
 0x26b   : > { %3579 = vpow2.f32 %v2665_v59 }
 0x26d   : > { %v3574_v54 = vpop.eup %3573 }
 0x26e   : > { %v3576_v37 = vpop.eup %3575 }
 0x26f   : > { %v2661_v10 = vadd.f32 %v3576_v37, %v3574_v54 }
 0x271   : > { %v2662_v7 = vmul.f32 0.5, %v2661_v10 }
 0x273   : > { %3297 = vst [vmem:[%s4994_s11 + $0x8] sm:$0xff] %v2662_v7 }
 0x277   : > { %v3578_v53 = vpop.eup %3577 }
 0x278   : > { %v3580_v6 = vpop.eup %3579 }
 0x279   : > { %v2667_v29 = vadd.f32 %v3580_v6, %v3578_v53  ;;  %2682 = sbr.rel (!%p5994_p12) target bundleno = 646 (0x286), region = 164 }
 0x27a   : > { %v2726_v52 = vld [vmem:[%s4994_s11 + $0x8] sm:$0xff] (%p5994_p12) }
 0x27b   : > { %v2668_v24 = vmul.f32 0.5, %v2667_v29  ;;  %2727 = vst [vmem:[%s2685_s27 + $0x8] sm:$0xff] (%p5994_p12), %v2726_v52 }
 0x27d   : > { %3299 = vst [vmem:[%s4994_s11 + $0x28] sm:$0xff] %v2668_v24 }
 0x284   : > { %v2734_v4 = vld [vmem:[%s4994_s11 + $0x28] sm:$0xff] }
 0x285   : > { %2735 = vst [vmem:[%s2685_s27 + $0x48] sm:$0xff] %v2734_v4 }
 0x286 PF: > { %p20_p0 = scmp.ge.s32.totalorder %s3804_s13, 4   ;;  %s5995_s30 = smov %s3720_s10 }
 0x287   : > { %s5996_s10 = smov %s3814_s16  ;;  %s5997_s11 = smov %s3804_s13 }
 0x288   :  { %22 = sbr.rel (!%p20_p0) target bundleno = 11 (0xb), region = 253 }
 0x28d   :  { %2751 = vsyncpa [#allocation5], 1 }
 0x28e   :  { %2753 = vsyncpa [#allocation5 + $0x1], 1 }
 0x28f   :  { %2754 = vsyncpa [#allocation7], 1 }
 0x290   :  { %2755 = vsyncpa [#allocation10], 1 }
 0x291   :  { %2756 = vsyncpa [#allocation13], 1 }

</bundles_post_ra>
